<compile_context>
chip_gen: v6e
topology: v6e:2x2x1
jax: 0.10.0
libtpu: 0.0.40
codegen_flags: <defaults>
</compile_context>

<pallas_src>
import numpy as np
import jax
import jax.numpy as jnp
from jax.experimental import pallas as pl
from jax.experimental.pallas import tpu as pltpu


# --------------------------- weight folding (tiny, wrapper-side) --------------------------- #

def _fold_child():
    # F[a, s, k]: per axis, "2x nearest-neighbour subdivide then 3-tap SAME conv" collapses to
    # a 3-tap SAME conv on the parent grid, one folded kernel per child offset a.
    F = np.zeros((2, 3, 3), np.float32)
    for a in range(2):
        for k in range(3):
            s = (a + k - 1) // 2 + 1
            F[a, s, k] = 1.0
    return jnp.asarray(F)


def _fold_folded():
    # G[a_out, s, a_in, k]: per axis, a 3-tap SAME conv on the 2x-upsampled grid expressed on
    # the child-folded parent grid (channels carry the 2 children per axis).
    G = np.zeros((2, 3, 2, 3), np.float32)
    for a in range(2):
        for k in range(3):
            u = a + k - 1
            G[a, u // 2 + 1, u % 2, k] = 1.0
    return jnp.asarray(G)


def fold_conv_weight_subdivide(w):
    """(3,3,3,Cin,Cout) -> (3,3,3,Cin,8*Cout): subdivide-then-conv as a parent-grid conv."""
    F = _fold_child()
    Cin, Cout = w.shape[3], w.shape[4]
    wf = jnp.einsum('apk,bql,crm,klmio->pqriabco', F, F, F, w)
    return wf.reshape(3, 3, 3, Cin, 8 * Cout)


def fold_conv_weight_folded(w):
    """(3,3,3,Ci,Co) -> (3,3,3,8*Ci,8*Co): upsampled-grid conv on the child-folded layout."""
    G = _fold_folded()
    Ci, Co = w.shape[3], w.shape[4]
    wf = jnp.einsum('apik,bqjl,grvm,klmxo->pqrijvxabgo', G, G, G, w)
    return wf.reshape(3, 3, 3, 8 * Ci, 8 * Co)


# ------------------------------ GroupNorm statistics kernel ------------------------------ #

def gn_scale_bias_pallas(xpad, gamma, beta, gmat, mask2d, count, eps=1e-5):
    """Per-(sample, channel) affine (scale, bias) implementing GroupNorm + affine.

    xpad  : (N, D, H+2, W+2, Cf) with zero H/W halo (halo does not perturb the statistics)
    gamma, beta : (Cf,)
    gmat  : (Cf, Cf) group-averaging matrix (1/group_size on same-group entries)
    mask2d: (H+2, W+2) float32, 1 in the interior, 0 on the halo
    count : number of true voxels per channel (D*H*W)
    """
    N, D, Hp, Wp, Cf = xpad.shape
    R = D * Hp * Wp
    inv_count = 1.0 / float(count)

    def kernel(x_ref, gm_ref, g_ref, b_ref, m_ref, scale_ref, bias_ref):
        x5 = x_ref[...].astype(jnp.float32)                      # (1, D, Hp, Wp, Cf)
        gm = gm_ref[...]
        sum_c = jnp.sum(x5.reshape(R, Cf), axis=0, keepdims=True)            # (1, Cf)
        mu_g = jnp.dot(sum_c, gm, preferred_element_type=jnp.float32) * inv_count
        m5 = m_ref[...][None, None, :, :, None]                  # (1, 1, Hp, Wp, 1)
        diff = (x5 - mu_g) * m5                                  # two-pass, halo masked out
        sq_c = jnp.sum((diff * diff).reshape(R, Cf), axis=0, keepdims=True)
        var_g = jnp.dot(sq_c, gm, preferred_element_type=jnp.float32) * inv_count
        inv = jax.lax.rsqrt(var_g + eps)
        scale = g_ref[...] * inv                                 # (1, Cf)
        scale_ref[...] = scale.reshape(1, 1, Cf)
        bias_ref[...] = (b_ref[...] - mu_g * scale).reshape(1, 1, Cf)

    return pl.pallas_call(
        kernel,
        out_shape=(jax.ShapeDtypeStruct((N, 1, Cf), jnp.float32),
                   jax.ShapeDtypeStruct((N, 1, Cf), jnp.float32)),
        grid=(N,),
        in_specs=[
            pl.BlockSpec((1, D, Hp, Wp, Cf), lambda n: (n, 0, 0, 0, 0)),
            pl.BlockSpec((Cf, Cf), lambda n: (0, 0)),
            pl.BlockSpec((1, Cf), lambda n: (0, 0)),
            pl.BlockSpec((1, Cf), lambda n: (0, 0)),
            pl.BlockSpec((Hp, Wp), lambda n: (0, 0)),
        ],
        out_specs=(pl.BlockSpec((1, 1, Cf), lambda n: (n, 0, 0)),
                   pl.BlockSpec((1, 1, Cf), lambda n: (n, 0, 0))),
        compiler_params=pltpu.CompilerParams(dimension_semantics=("parallel",)),
    )(xpad, gmat, gamma.reshape(1, Cf), beta.reshape(1, Cf), mask2d)


# ----------------- fused GroupNorm-apply + SiLU + (subdivided) 3x3x3 conv ----------------- #

def fused_gn_silu_conv3_pallas(xpad, scale, bias, mask2d, weff, beff,
                               skip=None, pad_output=False):
    """Fused: per-channel affine (GroupNorm) + SiLU on the parent-grid input, then the 3x3x3
    conv of the 2x-subdivided volume expressed as a folded (child-interleaved channel) conv on
    the parent grid.  Optionally fuses the 1x1x1 skip conv + residual add into the epilogue.

    xpad  : (N, D, H+2, W+2, Cin)  zero-padded in H/W (depth halo handled via index maps)
    scale, bias : (N, 1, Cin)      GroupNorm affine (applied BEFORE the conv)
    mask2d: (H+2, W+2) float32     1 in the interior, 0 on the H/W halo
    weff  : (3, 3, 3, Cin, Co)     folded conv weight (bf16 or f32)
    beff  : (1, Co) float32
    skip  : None or (xskip_pad (N,D,H+2,W+2,Cs), wskip (Cs,Co), bskip (1,Co))
    returns (N, D, H+2, W+2, Co) with zero halo if pad_output else (N, D, H, W, Co)
    """
    N, D, Hp, Wp, Cin = xpad.shape
    H, W = Hp - 2, Wp - 2
    Co = weff.shape[-1]
    HW = H * W
    has_skip = skip is not None

    def kernel(*refs):
        if has_skip:
            (x0_ref, x1_ref, x2_ref, sc_ref, bi_ref, m_ref, w_ref, b_ref,
             xs_ref, ws_ref, bs_ref, o_ref) = refs
        else:
            (x0_ref, x1_ref, x2_ref, sc_ref, bi_ref, m_ref, w_ref, b_ref,
             o_ref) = refs
        d = pl.program_id(1)
        nd = pl.num_programs(1)
        sc = sc_ref[...].reshape(1, 1, Cin)
        bi = bi_ref[...].reshape(1, 1, Cin)
        m2 = m_ref[...][:, :, None]                              # (Hp, Wp, 1)

        acc = jnp.zeros((HW, Co), jnp.float32)
        taps = (x0_ref, x1_ref, x2_ref)
        for t in range(3):
            xin = taps[t][...].astype(jnp.float32).reshape(Hp, Wp, Cin)
            y = xin * sc + bi                                    # GroupNorm affine (f32)
            y = y * jax.nn.sigmoid(y)                            # SiLU (f32 on VPU/EUP)
            if t == 0:
                gate = m2 * (d >= 1).astype(jnp.float32)         # depth halo -> exact zero
            elif t == 2:
                gate = m2 * (d <= nd - 2).astype(jnp.float32)
            else:
                gate = m2
            y = (y * gate).astype(w_ref.dtype)                   # bf16 MXU operand
            for kh in range(3):
                for kw in range(3):
                    patch = y[kh:kh + H, kw:kw + W, :].reshape(HW, Cin)
                    acc = acc + jnp.dot(patch, w_ref[t, kh, kw],
                                        preferred_element_type=jnp.float32)
        acc = acc + b_ref[...]

        if has_skip:
            # 1x1x1 skip conv on the raw (pre-subdivided) x + residual add, fused epilogue.
            xs = xs_ref[...].astype(jnp.float32).reshape(Hp, Wp, -1)
            xsc = xs[1:H + 1, 1:W + 1, :].reshape(HW, xs.shape[-1]).astype(ws_ref.dtype)
            acc = acc + jnp.dot(xsc, ws_ref[...],
                                preferred_element_type=jnp.float32) + bs_ref[...]

        if pad_output:
            o_ref[...] = jnp.zeros(o_ref.shape, o_ref.dtype)     # keep zero H/W halo
            o_ref[:, :, pl.ds(1, H), pl.ds(1, W), :] = (
                acc.reshape(1, 1, H, W, Co).astype(o_ref.dtype))
        else:
            o_ref[...] = acc.reshape(1, 1, H, W, Co).astype(o_ref.dtype)

    def tap_spec(t):
        return pl.BlockSpec(
            (1, 1, Hp, Wp, Cin),
            lambda n, dd, t=t: (n, jnp.clip(dd - 1 + t, 0, D - 1), 0, 0, 0))

    in_specs = [
        tap_spec(0), tap_spec(1), tap_spec(2),
        pl.BlockSpec((1, 1, Cin), lambda n, dd: (n, 0, 0)),
        pl.BlockSpec((1, 1, Cin), lambda n, dd: (n, 0, 0)),
        pl.BlockSpec((Hp, Wp), lambda n, dd: (0, 0)),
        pl.BlockSpec((3, 3, 3, Cin, Co), lambda n, dd: (0, 0, 0, 0, 0)),
        pl.BlockSpec((1, Co), lambda n, dd: (0, 0)),
    ]
    args = [xpad, xpad, xpad, scale, bias, mask2d, weff, beff]
    if has_skip:
        xs_pad, wsk, bsk = skip
        Cs = xs_pad.shape[-1]
        in_specs += [
            pl.BlockSpec((1, 1, Hp, Wp, Cs), lambda n, dd: (n, dd, 0, 0, 0)),
            pl.BlockSpec((Cs, Co), lambda n, dd: (0, 0)),
            pl.BlockSpec((1, Co), lambda n, dd: (0, 0)),
        ]
        args += [xs_pad, wsk, bsk]

    if pad_output:
        out_shape = jax.ShapeDtypeStruct((N, D, Hp, Wp, Co), xpad.dtype)
        out_spec = pl.BlockSpec((1, 1, Hp, Wp, Co), lambda n, dd: (n, dd, 0, 0, 0))
    else:
        out_shape = jax.ShapeDtypeStruct((N, D, H, W, Co), xpad.dtype)
        out_spec = pl.BlockSpec((1, 1, H, W, Co), lambda n, dd: (n, dd, 0, 0, 0))

    return pl.pallas_call(
        kernel,
        out_shape=out_shape,
        grid=(N, D),
        in_specs=in_specs,
        out_specs=out_spec,
        compiler_params=pltpu.CompilerParams(
            dimension_semantics=("parallel", "parallel")),
    )(*args)


# ------------------------------------- block forward ------------------------------------- #

def sparse_subdivide_block_forward(x, p, num_groups, eps=1e-5, mm_dtype=jnp.bfloat16):
    N, D, H, W, C = x.shape
    Cout = p["w1"].shape[-1]
    cg1 = C // num_groups
    cg2 = Cout // num_groups
    Hp, Wp = H + 2, W + 2
    f32 = jnp.float32

    # fold conv weights into the child-interleaved ("folded") parent-grid representation
    w1f = fold_conv_weight_subdivide(p["w1"]).astype(mm_dtype)        # (3,3,3,C,8*Cout)
    b1f = jnp.tile(p["b1"], 8).reshape(1, 8 * Cout).astype(f32)
    w2f = fold_conv_weight_folded(p["w2"]).astype(mm_dtype)           # (3,3,3,8*Cout,8*Cout)
    b2f = jnp.tile(p["b2"], 8).reshape(1, 8 * Cout).astype(f32)
    wskf = jnp.tile(p["wskip"].reshape(C, Cout), (1, 8)).astype(mm_dtype)   # (C, 8*Cout)
    bskf = jnp.tile(p["bskip"], 8).reshape(1, 8 * Cout).astype(f32)

    # GroupNorm group-averaging matrices (gmat trick) + folded affine params
    gid1 = np.arange(C) // cg1
    gmat1 = jnp.asarray((gid1[:, None] == gid1[None, :]).astype(np.float32) / cg1)
    gid2 = (np.arange(8 * Cout) % Cout) // cg2
    gmat2 = jnp.asarray((gid2[:, None] == gid2[None, :]).astype(np.float32) / (8 * cg2))
    gamma2f = jnp.tile(p["gamma2"], 8).astype(f32)
    beta2f = jnp.tile(p["beta2"], 8).astype(f32)

    # interior mask: H/W halo must be exactly zero AFTER GroupNorm+SiLU
    mask_np = np.zeros((Hp, Wp), np.float32)
    mask_np[1:H + 1, 1:W + 1] = 1.0
    mask2d = jnp.asarray(mask_np)

    # zero-pad the (small, parent-sized) input H/W halo; depth halo handled in-kernel
    xp = jnp.pad(x, ((0, 0), (0, 0), (1, 1), (1, 1), (0, 0)))

    # GN1 statistics -> per-(sample, channel) affine
    s1, t1 = gn_scale_bias_pallas(xp, p["gamma1"], p["beta1"], gmat1, mask2d,
                                  count=D * H * W, eps=eps)
    # fused GN1+SiLU -> subdivide -> conv3x3x3 (folded); keep zero H/W halo for the next conv
    h1p = fused_gn_silu_conv3_pallas(xp, s1, t1, mask2d, w1f, b1f, pad_output=True)

    # GN2 statistics on the folded tensor (8*Cout channels, lane-dense)
    s2, t2 = gn_scale_bias_pallas(h1p, gamma2f, beta2f, gmat2, mask2d,
                                  count=D * H * W, eps=eps)
    # fused GN2+SiLU -> conv3x3x3 (folded) + fused 1x1x1 skip conv + residual add
    outf = fused_gn_silu_conv3_pallas(h1p, s2, t2, mask2d, w2f, b2f,
                                      skip=(xp, wskf, bskf), pad_output=False)

    # depth-to-space: unfold the 8 children back into the 2x-subdivided dense volume (wrapper)
    out = outf.reshape(N, D, H, W, 2, 2, 2, Cout)
    out = out.transpose(0, 1, 4, 2, 5, 3, 6, 7).reshape(N, 2 * D, 2 * H, 2 * W, Cout)
    return out


# ----------------------------------- pure-JAX reference ----------------------------------- #

def subdivide(x):
    x = jnp.repeat(x, 2, axis=1)
    x = jnp.repeat(x, 2, axis=2)
    x = jnp.repeat(x, 2, axis=3)
    return x


def _ref_gn_silu(x, gamma, beta, G, eps=1e-5):
    N, D, H, W, C = x.shape
    xr = x.reshape(N, D * H * W, G, C // G).astype(jnp.float32)
    mean = xr.mean(axis=(1, 3), keepdims=True)
    var = ((xr - mean) ** 2).mean(axis=(1, 3), keepdims=True)
    xn = ((xr - mean) / jnp.sqrt(var + eps)).reshape(N, D, H, W, C)
    y = xn * gamma + beta
    return y * jax.nn.sigmoid(y)


def _ref_conv3d(x, w, b):
    out = jax.lax.conv_general_dilated(
        x, w, window_strides=(1, 1, 1), padding="SAME",
        dimension_numbers=("NDHWC", "DHWIO", "NDHWC"))
    return out + b


def _ref_forward(x, p, G):
    h = _ref_gn_silu(x, p["gamma1"], p["beta1"], G)
    h = subdivide(h)
    xs = subdivide(x)
    h = _ref_conv3d(h, p["w1"], p["b1"])
    h = _ref_gn_silu(h, p["gamma2"], p["beta2"], G)
    h = _ref_conv3d(h, p["w2"], p["b2"])
    return h + _ref_conv3d(xs, p["wskip"], p["bskip"])


# ------------------------------------------ main ------------------------------------------ #

if __name__ == "__main__":
    # channels=8, resolution=8, out_channels=16, num_groups=4  (8*Cout = 128 folded channels)
    N, C, Cout, R, G = 2, 8, 16, 8, 4

    key = jax.random.PRNGKey(0)
    ks = jax.random.split(key, 12)
    x = jax.random.normal(ks[0], (N, R, R, R, C), jnp.float32)

    params = {
        "gamma1": 1.0 + 0.1 * jax.random.normal(ks[1], (C,), jnp.float32),
        "beta1": 0.1 * jax.random.normal(ks[2], (C,), jnp.float32),
        "w1": 0.1 * jax.random.normal(ks[3], (3, 3, 3, C, Cout), jnp.float32),
        "b1": 0.05 * jax.random.normal(ks[4], (Cout,), jnp.float32),
        "gamma2": 1.0 + 0.1 * jax.random.normal(ks[5], (Cout,), jnp.float32),
        "beta2": 0.1 * jax.random.normal(ks[6], (Cout,), jnp.float32),
        # second out_layers conv is wrapped in ZeroModule -> zero-initialized params
        "w2": jnp.zeros((3, 3, 3, Cout, Cout), jnp.float32),
        "b2": jnp.zeros((Cout,), jnp.float32),
        # out_channels != channels -> 1x1x1 skip conv
        "wskip": 0.1 * jax.random.normal(ks[7], (1, 1, 1, C, Cout), jnp.float32),
        "bskip": 0.05 * jax.random.normal(ks[8], (Cout,), jnp.float32),
    }

    # (1) spec-faithful params (ZeroModule-zeroed second conv), f32 MXU operands: tight check.
    out = jax.block_until_ready(
        sparse_subdivide_block_forward(x, params, G, mm_dtype=jnp.float32))
    ref = _ref_forward(x, params, G)
    np.testing.assert_allclose(out, ref, rtol=2e-3, atol=2e-3)

    # (2) non-zero second conv (exercises the folded conv2 path with real weights), f32.
    params_nz = dict(params)
    params_nz["w2"] = 0.1 * jax.random.normal(ks[9], (3, 3, 3, Cout, Cout), jnp.float32)
    params_nz["b2"] = 0.05 * jax.random.normal(ks[10], (Cout,), jnp.float32)
    out_nz = jax.block_until_ready(
        sparse_subdivide_block_forward(x, params_nz, G, mm_dtype=jnp.float32))
    ref_nz = _ref_forward(x, params_nz, G)
    np.testing.assert_allclose(out_nz, ref_nz, rtol=2e-3, atol=2e-3)

    # (3) production path: bf16 MXU operands, f32 accumulation (looser tolerance).
    out_bf = jax.block_until_ready(
        sparse_subdivide_block_forward(x, params_nz, G, mm_dtype=jnp.bfloat16))
    np.testing.assert_allclose(out_bf, ref_nz, rtol=3e-2, atol=3e-2)

    print("KERNEL_OK")
</pallas_src>

<mosaic_0001>
module attributes {stable_mosaic.version = 11 : i64} {
  func.func @kernel(%arg0: i32, %arg1: memref<1x8x10x10x8xf32, #tpu.memory_space<vmem>>, %arg2: memref<8x8xf32, #tpu.memory_space<vmem>>, %arg3: memref<1x8xf32, #tpu.memory_space<vmem>>, %arg4: memref<1x8xf32, #tpu.memory_space<vmem>>, %arg5: memref<10x10xf32, #tpu.memory_space<vmem>>, %arg6: memref<1x1x8xf32, #tpu.memory_space<vmem>>, %arg7: memref<1x1x8xf32, #tpu.memory_space<vmem>>) attributes {dimension_semantics = [#tpu.dimension_semantics<parallel>], iteration_bounds = array<i64: 2>, scalar_prefetch = 0 : i64, scratch_operands = 0 : i64, tpu.core_type = #tpu.core_type<tc>, window_params = [{transform_indices = @transform_0, window_bounds = array<i64: 1, 8, 10, 10, 8>}, {pipeline_mode = #tpu.pipeline_mode<synchronous>, transform_indices = @transform_1, window_bounds = array<i64: 8, 8>}, {pipeline_mode = #tpu.pipeline_mode<synchronous>, transform_indices = @transform_2, window_bounds = array<i64: 1, 8>}, {pipeline_mode = #tpu.pipeline_mode<synchronous>, transform_indices = @transform_3, window_bounds = array<i64: 1, 8>}, {pipeline_mode = #tpu.pipeline_mode<synchronous>, transform_indices = @transform_4, window_bounds = array<i64: 10, 10>}, {transform_indices = @transform_5, window_bounds = array<i64: 1, 1, 8>}, {transform_indices = @transform_6, window_bounds = array<i64: 1, 1, 8>}]} {
    %c0 = arith.constant 0 : index
    %c0_0 = arith.constant 0 : index
    %c0_1 = arith.constant 0 : index
    %c0_2 = arith.constant 0 : index
    %c0_3 = arith.constant 0 : index
    %0 = vector.load %arg1[%c0, %c0_0, %c0_1, %c0_2, %c0_3] : memref<1x8x10x10x8xf32, #tpu.memory_space<vmem>>, vector<1x8x10x10x8xf32>
    %c0_4 = arith.constant 0 : index
    %c0_5 = arith.constant 0 : index
    %1 = vector.load %arg2[%c0_4, %c0_5] : memref<8x8xf32, #tpu.memory_space<vmem>>, vector<8x8xf32>
    %2 = vector.shape_cast %0 : vector<1x8x10x10x8xf32> to vector<800x8xf32>
    %cst = arith.constant dense<0.000000e+00> : vector<8xf32>
    %3 = vector.multi_reduction <add>, %2, %cst [0] : vector<800x8xf32> to vector<8xf32>
    %4 = vector.shape_cast %3 : vector<8xf32> to vector<1x8xf32>
    %cst_6 = arith.constant dense<0.000000e+00> : vector<1x8xf32>
    %5 = tpu.matmul %4, %1, %cst_6 {dimension_numbers = #tpu.dot_dimension_numbers<[1], [0], [0], [1], [0, 0, 1, 1], [], []>} : vector<1x8xf32>, vector<8x8xf32>, vector<1x8xf32> -> vector<1x8xf32>
    %cst_7 = arith.constant 0.001953125 : f32
    %6 = vector.broadcast %cst_7 : f32 to vector<1x8xf32>
    %7 = arith.mulf %5, %6 : vector<1x8xf32>
    %c0_8 = arith.constant 0 : index
    %c0_9 = arith.constant 0 : index
    %8 = vector.load %arg5[%c0_8, %c0_9] : memref<10x10xf32, #tpu.memory_space<vmem>>, vector<10x10xf32>
    %9 = vector.shape_cast %8 : vector<10x10xf32> to vector<1x1x10x10x1xf32>
    %10 = vector.shape_cast %7 : vector<1x8xf32> to vector<1x1x1x1x8xf32>
    %11 = vector.broadcast %10 : vector<1x1x1x1x8xf32> to vector<1x8x10x10x8xf32>
    %12 = arith.subf %0, %11 : vector<1x8x10x10x8xf32>
    %13 = vector.broadcast %9 : vector<1x1x10x10x1xf32> to vector<1x8x10x10x8xf32>
    %14 = arith.mulf %12, %13 : vector<1x8x10x10x8xf32>
    %15 = arith.mulf %14, %14 : vector<1x8x10x10x8xf32>
    %16 = vector.shape_cast %15 : vector<1x8x10x10x8xf32> to vector<800x8xf32>
    %cst_10 = arith.constant dense<0.000000e+00> : vector<8xf32>
    %17 = vector.multi_reduction <add>, %16, %cst_10 [0] : vector<800x8xf32> to vector<8xf32>
    %18 = vector.shape_cast %17 : vector<8xf32> to vector<1x8xf32>
    %cst_11 = arith.constant dense<0.000000e+00> : vector<1x8xf32>
    %19 = tpu.matmul %18, %1, %cst_11 {dimension_numbers = #tpu.dot_dimension_numbers<[1], [0], [0], [1], [0, 0, 1, 1], [], []>} : vector<1x8xf32>, vector<8x8xf32>, vector<1x8xf32> -> vector<1x8xf32>
    %cst_12 = arith.constant 0.001953125 : f32
    %20 = vector.broadcast %cst_12 : f32 to vector<1x8xf32>
    %21 = arith.mulf %19, %20 : vector<1x8xf32>
    %cst_13 = arith.constant 9.99999974E-6 : f32
    %22 = vector.broadcast %cst_13 : f32 to vector<1x8xf32>
    %23 = arith.addf %21, %22 : vector<1x8xf32>
    %24 = math.rsqrt %23 : vector<1x8xf32>
    %c0_14 = arith.constant 0 : index
    %c0_15 = arith.constant 0 : index
    %25 = vector.load %arg3[%c0_14, %c0_15] : memref<1x8xf32, #tpu.memory_space<vmem>>, vector<1x8xf32>
    %26 = arith.mulf %25, %24 : vector<1x8xf32>
    %27 = vector.shape_cast %26 : vector<1x8xf32> to vector<1x1x8xf32>
    %c0_16 = arith.constant 0 : index
    %c0_17 = arith.constant 0 : index
    %c0_18 = arith.constant 0 : index
    %28 = vector.load %arg6[%c0_16, %c0_17, %c0_18] : memref<1x1x8xf32, #tpu.memory_space<vmem>>, vector<1x1x8xf32>
    tpu.vector_store %arg6[%c0_16, %c0_17, %c0_18], %27 {strides = array<i32>} : memref<1x1x8xf32, #tpu.memory_space<vmem>>, vector<1x1x8xf32>,
    %c0_19 = arith.constant 0 : index
    %c0_20 = arith.constant 0 : index
    %29 = vector.load %arg4[%c0_19, %c0_20] : memref<1x8xf32, #tpu.memory_space<vmem>>, vector<1x8xf32>
    %30 = arith.mulf %7, %26 : vector<1x8xf32>
    %31 = arith.subf %29, %30 : vector<1x8xf32>
    %32 = vector.shape_cast %31 : vector<1x8xf32> to vector<1x1x8xf32>
    %c0_21 = arith.constant 0 : index
    %c0_22 = arith.constant 0 : index
    %c0_23 = arith.constant 0 : index
    %33 = vector.load %arg7[%c0_21, %c0_22, %c0_23] : memref<1x1x8xf32, #tpu.memory_space<vmem>>, vector<1x1x8xf32>
    tpu.vector_store %arg7[%c0_21, %c0_22, %c0_23], %32 {strides = array<i32>} : memref<1x1x8xf32, #tpu.memory_space<vmem>>, vector<1x1x8xf32>,
    return
  }
  func.func @transform_0(%arg0: i32) -> (i32, i32, i32, i32, i32) {
    %c0_i32 = arith.constant 0 : i32
    %c0_i32_0 = arith.constant 0 : i32
    %c0_i32_1 = arith.constant 0 : i32
    %c0_i32_2 = arith.constant 0 : i32
    %c0_i32_3 = arith.constant 0 : i32
    return %arg0, %c0_i32, %c0_i32_0, %c0_i32_1, %c0_i32_2 : i32, i32, i32, i32, i32
  }
  func.func @transform_1(%arg0: i32) -> (i32, i32) {
    %c0_i32 = arith.constant 0 : i32
    %c0_i32_0 = arith.constant 0 : i32
    %c0_i32_1 = arith.constant 0 : i32
    return %c0_i32, %c0_i32_0 : i32, i32
  }
  func.func @transform_2(%arg0: i32) -> (i32, i32) {
    %c0_i32 = arith.constant 0 : i32
    %c0_i32_0 = arith.constant 0 : i32
    %c0_i32_1 = arith.constant 0 : i32
    return %c0_i32, %c0_i32_0 : i32, i32
  }
  func.func @transform_3(%arg0: i32) -> (i32, i32) {
    %c0_i32 = arith.constant 0 : i32
    %c0_i32_0 = arith.constant 0 : i32
    %c0_i32_1 = arith.constant 0 : i32
    return %c0_i32, %c0_i32_0 : i32, i32
  }
  func.func @transform_4(%arg0: i32) -> (i32, i32) {
    %c0_i32 = arith.constant 0 : i32
    %c0_i32_0 = arith.constant 0 : i32
    %c0_i32_1 = arith.constant 0 : i32
    return %c0_i32, %c0_i32_0 : i32, i32
  }
  func.func @transform_5(%arg0: i32) -> (i32, i32, i32) {
    %c0_i32 = arith.constant 0 : i32
    %c0_i32_0 = arith.constant 0 : i32
    %c0_i32_1 = arith.constant 0 : i32
    return %arg0, %c0_i32, %c0_i32_0 : i32, i32, i32
  }
  func.func @transform_6(%arg0: i32) -> (i32, i32, i32) {
    %c0_i32 = arith.constant 0 : i32
    %c0_i32_0 = arith.constant 0 : i32
    %c0_i32_1 = arith.constant 0 : i32
    return %arg0, %c0_i32, %c0_i32_0 : i32, i32, i32
  }
}

</mosaic_0001>

<bundles_post_ra>
// kernel: tpu_custom_call.1
= control target key start
LH: loop header
LB: loop body
LE: loop exit
PB: predicated region body
PF: predicated region fallthrough
CT: control target
= control target key end

     0   :  { %12 = vsyncpa [#allocation3], 0  ;;  %s16266_s0 = inlined_call_operand.vmem [shape: f32[2,8,10,10,8], index: 0, kind: input, shape index: {}]   ;;  %s16267_s1 = inlined_call_operand.vmem [shape: f32[8,8], index: 1, kind: input, shape index: {}]   ;;  %s16268_s2 = inlined_call_operand.vmem [shape: f32[1,8], index: 2, kind: input, shape index: {}]   ;;  %s16269_s3 = inlined_call_operand.vmem [shape: f32[1,8], index: 3, kind: input, shape index: {}]   ;;  %s16270_s4 = inlined_call_operand.vmem [shape: f32[10,10], index: 4, kind: input, shape index: {}]   ;;  %s16271_s5 = inlined_call_operand.hbm [shape: f32[2,1,8], index: 5, kind: output, shape index: {0}]   ;;  %s16272_s6 = inlined_call_operand.hbm [shape: f32[2,1,8], index: 6, kind: output, shape index: {1}]  }
   0x1   :  { %14 = vsyncpa [#allocation3 + $0x1], 0 }
   0x2   :  { %15 = vsyncpa [#allocation5], 0 }
   0x3   :  { %17 = vsyncpa [#allocation5 + $0x1], 0  ;;  %s9975_s21 = smov 0   ;;  %s9977_s22 = smov 0  }
   0x4   :  { %s9979_s23 = smov 0   ;;  %s9981_s24 = smov 0  }
   0x5 LB: > { %s9996_s25 = sadd.s32 4294967295, %s9933_s24   ;;  %s9458_s26 = sadd.s32 4294967294, %s9933_s24   ;;  %s9933_s24 = sphi %s9981_s24, %s18442_s24   ;;  %s9929_s23 = sphi %s9979_s23, %s18441_s23   ;;  %s9925_s22 = sphi %s9977_s22, %s18440_s22   ;;  %s9921_s21 = sphi %s9975_s21, %s18439_s21  }
   0x6   : > { %s10000_s27 = sadd.s32 1, %s9933_s24   ;;  %s140_s28 = sadd.s32 1, %s9929_s23 }
   0x7   : > { %s137_s29 = ssub.s32 %s9933_s24, %s10000_s27  ;;  %p150_p0 = scmp.ne.s32.totalorder %s9929_s23, %s9925_s22 }
   0x8   : > { %p138_p1 = scmp.eq.s32.totalorder %s137_s29, 0  ;;  %p151_p2 = scmp.eq.s32.totalorder %s9996_s25, 1 }
   0x9   : > { %p156_p3 = scmp.ne.s32.totalorder %s9925_s22, %s9921_s21  ;;  %p157_p4 = scmp.eq.s32.totalorder %s9458_s26, 1 }
   0xa   : > { %s10011_s30 = scalar_select %p138_p1, %s9929_s23, %s140_s28  }
   0xb   : > { %p10013_p5 = por %p151_p2, %p150_p0  ;;  %p10017_p6 = por %p157_p4, %p156_p3 }
   0xc   : > { %p9461_p7 = scmp.ge.s32.totalorder %s9933_s24, 1  ;;  %p221_p8 = scmp.lt.s32.totalorder %s9933_s24, 3 }
   0xe   : > { %p222_p9 = pnand %p9461_p7, %p221_p8 }
  0x10   : > { %225 = sbr.rel (%p222_p9) target bundleno = 1319 (0x527), region = 40 }
  0x15   : > { %v419_v0 = vld [vmem:[%s16267_s1] sm:$0xff]  ;;  %v9935_v1 = vmov 0.0   ;;  %vm9936_vm0 = vmmov 0   ;;  %p254_p10 = scmp.lt.s32.totalorder %s9996_s25, 1  ;;  %v9937_v2 = vmov 1983009808   ;;  %v584_v4 = vlaneseq }
  0x16   : > { %9473 = vmatprep.subr.mxu0 %v9935_v1  ;;  %9475 = vmatprep.mubr.msk.f32.mxu0 %vm9936_vm0, %v9935_v1  ;;  %v582_v3 = vunpack.c.l.s4 %v9937_v2  ;;  %vm4300_vm1 = vcmask 64512   ;;  %s16180_s20 = sand.u32 1, %s9925_s22   ;;  %s9465_s29 = sshll.u32 %s9996_s25, 4  ;;  %vm9339_vm2 = vcmask 57344  }
  0x17   : > { %9474 = vmatpush3.msra.mxu0 %v419_v0  ;;  %9478 = vmatprep.subr.mxu1 %v9935_v1  ;;  %s255_s11 = scalar_select %p254_p10, %s9996_s25, 1  ;;  %v10033_v6 = vshrl.u32 %v584_v4, 7 }
  0x18   : > { %9479 = vmatpush3.msra.mxu1 %v419_v0  ;;  %9480 = vmatprep.mubr.msk.f32.mxu1 %vm9936_vm0, %v9935_v1  ;;  %v583_v5 = vunpack.c.0.s8 %v582_v3  ;;  %s247_s9 = scalar_lea.vmem [#allocation2], %s16180_s20  ;;  %s16192_s13 = scalar_lea.hbm %s16271_s5, %s9465_s29 }
  0x19   : > { %s9483_s12 = smul.u32 1280, %s255_s11  ;;  %16822 = vst [vmem:[#allocation8_spill] sm:$0xff] %v10033_v6  ;;  %s9362_s10 = sshll.u32 %s247_s9, 4  ;;  %s16194_s10 = int_to_ptr.vmem [resolvable:$true] %s9362_s10 }
  0x1a   : > { %v10039_v10 = vsub.s32 %v583_v5, %v10033_v6  ;;  %s16819_s16 = scalar_lea.vmem [#allocation4], %s16180_s20  ;;  %s9346_s18 = scalar_lea.sflag [#allocation3], %s16180_s20 }
  0x1b   : > { %s10031_s15 = scalar_lea.vmem %s16266_s0, %s9483_s12  ;;  %s16202_s17 = sshll.u32 %s16819_s16, 4  ;;  %s9376_s17 = int_to_ptr.vmem [resolvable:$true] %s16202_s17 }
  0x1c   : > { %v259_v7 = vld [vmem:[%s10031_s15] sm:$0xff]  ;;  %v261_v8 = vld [vmem:[%s10031_s15 + $0x10] sm:$0xff]  ;;  %16823 = vst [vmem:[#allocation9_spill] sm:$0xff] %v10039_v10  ;;  %s9843_s19 = scalar_lea.vmem %s16194_s10, 16  ;;  %s9938_s26 = smov [#allocation2]  }
  0x1d   : > { %v263_v9 = vld [vmem:[%s10031_s15 + $0x20] sm:$0xff]  ;;  %v265_v11 = vld [vmem:[%s10031_s15 + $0x30] sm:$0xff]  ;;  %v580_v12 = vcombine.high %v259_v7, %v259_v7  ;;  %v604_v13 = vcombine.high %v261_v8, %v261_v8  ;;  %v10043_v14 = vld.sshfl [vmem:[%s10031_s15 + $0x8] sm:$0x3 pattern:$0x76325410]  ;;  %v10050_v18 = vrot.slane %v259_v7, %v10039_v10  ;;  %v10053_v19 = vrot.slane %v261_v8, %v10039_v10  ;;  %p9844_p11 = scmp.ne.s32.totalorder %s16194_s10, %s9843_s19 }
  0x1e   : > { %v628_v15 = vcombine.high %v263_v9, %v263_v9  ;;  %v10046_v16 = vld.sshfl [vmem:[%s10031_s15 + $0x18] sm:$0x3 pattern:$0x76325410]  ;;  %v267_v17 = vld [vmem:[%s10031_s15 + $0x40] sm:$0xff]  ;;  %v269_v21 = vld [vmem:[%s10031_s15 + $0x50] sm:$0xff]  ;;  %v10060_v22 = vrot.slane %v263_v9, %v10039_v10  ;;  %v652_v23 = vcombine.high %v265_v11, %v265_v11  ;;  %v10074_v29 = vrot.slane %v265_v11, %v10039_v10 }
  0x1f   : > { %v10056_v20 = vld.sshfl [vmem:[%s10031_s15 + $0x28] sm:$0x3 pattern:$0x76325410]  ;;  %v271_v24 = vld [vmem:[%s10031_s15 + $0x60] sm:$0xff]  ;;  %v10064_v25 = vrot.slane %v580_v12, %v10039_v10  ;;  %v10067_v26 = vrot.slane %v604_v13, %v10039_v10  ;;  %v273_v27 = vld [vmem:[%s10031_s15 + $0x70] sm:$0xff]  ;;  %v676_v30 = vcombine.high %v267_v17, %v267_v17  ;;  %v700_v34 = vcombine.high %v269_v21, %v269_v21  ;;  %p9845_p12 = pnand %p9844_p11, %p10013_p5 }
  0x20   : > { %v10071_v28 = vrot.slane %v628_v15, %v10039_v10  ;;  %v10077_v31 = vld.sshfl [vmem:[%s10031_s15 + $0x38] sm:$0x3 pattern:$0x76325410]  ;;  %v275_v36 = vld [vmem:[%s10031_s15 + $0x80] sm:$0xff]  ;;  %v10090_v38 = vrot.slane %v652_v23, %v10039_v10  ;;  %v10093_v39 = vrot.slane %v267_v17, %v10039_v10  ;;  %v724_v40 = vcombine.high %v271_v24, %v271_v24  ;;  %v277_v46 = vld [vmem:[%s10031_s15 + $0x90] sm:$0xff] }
  0x21   : > { %v10084_v35 = vld.sshfl [vmem:[%s10031_s15 + $0x48] sm:$0x3 pattern:$0x76325410]  ;;  %v10100_v43 = vrot.slane %v269_v21, %v10039_v10  ;;  %v748_v44 = vcombine.high %v273_v27, %v273_v27  ;;  %v10111_v49 = vrot.slane %v676_v30, %v10039_v10  ;;  %v279_v51 = vld [vmem:[%s10031_s15 + $0xa0] sm:$0xff]  ;;  %v10118_v52 = vrot.slane %v700_v34, %v10039_v10  ;;  %v281_v60 = vld [vmem:[%s10031_s15 + $0xb0] sm:$0xff]  ;;  %p9846_p13 = pneg %p9845_p12 }
  0x22   : > { %v10103_v45 = vld.sshfl [vmem:[%s10031_s15 + $0x58] sm:$0x3 pattern:$0x76325410]  ;;  %v10121_v53 = vrot.slane %v271_v24, %v10039_v10  ;;  %v772_v54 = vcombine.high %v275_v36, %v275_v36  ;;  %v10128_v57 = vrot.slane %v724_v40, %v10039_v10  ;;  %v10131_v58 = vrot.slane %v273_v27, %v10039_v10  ;;  %v283_v4 = vld [vmem:[%s10031_s15 + $0xc0] sm:$0xff]  ;;  %v285_v12 = vld [vmem:[%s10031_s15 + $0xd0] sm:$0xff] }
  0x23   : > { %v10114_v50 = vld.sshfl [vmem:[%s10031_s15 + $0x68] sm:$0x3 pattern:$0x76325410]  ;;  %v10140_v62 = vrot.slane %v748_v44, %v10039_v10  ;;  %v796_v63 = vcombine.high %v277_v46, %v277_v46  ;;  %v10148_v2 = vrot.slane %v275_v36, %v10039_v10  ;;  %v820_v3 = vcombine.high %v279_v51, %v279_v51  ;;  %v287_v23 = vld [vmem:[%s10031_s15 + $0xe0] sm:$0xff]  ;;  %v289_v34 = vld [vmem:[%s10031_s15 + $0xf0] sm:$0xff] }
  0x24   : > { %v10134_v59 = vld.sshfl [vmem:[%s10031_s15 + $0x78] sm:$0x3 pattern:$0x76325410]  ;;  %v10156_v8 = vrot.slane %v772_v54, %v10039_v10  ;;  %v10159_v9 = vrot.slane %v277_v46, %v10039_v10  ;;  %v844_v17 = vcombine.high %v281_v60, %v281_v60  ;;  %v10179_v30 = vrot.slane %v279_v51, %v10039_v10  ;;  %v297_v37 = vld [vmem:[%s10031_s15 + $0x130] sm:$0xff]  ;;  %v299_v41 = vld [vmem:[%s10031_s15 + $0x140] sm:$0xff] }
  0x25   : > { %v10143_v0 = vld.sshfl [vmem:[%s10031_s15 + $0x88] sm:$0x3 pattern:$0x76325410]  ;;  %v10176_v27 = vrot.slane %v796_v63, %v10039_v10  ;;  %v10185_v40 = vrot.slane %v820_v3, %v10039_v10  ;;  %v10188_v44 = vrot.slane %v281_v60, %v10039_v10  ;;  %v868_v46 = vcombine.high %v283_v4, %v283_v4  ;;  %v291_v3 = vld [vmem:[%s10031_s15 + $0x100] sm:$0xff]  ;;  %s9847_s28 = sshll.u32 %s9938_s26, 4  ;;  %s9848_s28 = int_to_ptr.vmem [resolvable:$false] %s9847_s28 }
  0x26   : > { %v10162_v11 = vld.sshfl [vmem:[%s10031_s15 + $0x98] sm:$0x3 pattern:$0x76325410]  ;;  %v892_v24 = vcombine.high %v285_v12, %v285_v12  ;;  %v10202_v15 = vrot.slane %v844_v17, %v10039_v10  ;;  %v10205_v60 = vrot.slane %v283_v4, %v10039_v10  ;;  %v916_v13 = vcombine.high %v287_v23, %v287_v23  ;;  %v293_v17 = vld [vmem:[%s10031_s15 + $0x110] sm:$0xff]  ;;  %s9849_s11 = scalar_lea.vmem %s9848_s28, 32  ;;  %p9850_p0 = scmp.lt.s32.totalorder %s16194_s10, %s9848_s28 }
  0x27   : > { %v10170_v21 = vld.sshfl [vmem:[%s10031_s15 + $0xa8] sm:$0x3 pattern:$0x76325410]  ;;  %v10212_v51 = vrot.slane %v285_v12, %v10039_v10  ;;  %v940_v5 = vcombine.high %v289_v34, %v289_v34  ;;  %v10223_v7 = vrot.slane %v868_v46, %v10039_v10  ;;  %v295_v12 = vld [vmem:[%s10031_s15 + $0x120] sm:$0xff]  ;;  %v10233_v55 = vrot.slane %v287_v23, %v10039_v10  ;;  %p9851_p1 = scmp.lt.s32.totalorder %s9849_s11, %s9843_s19 }
  0x28   : > { %v10191_v54 = vld.sshfl [vmem:[%s10031_s15 + $0xb8] sm:$0x3 pattern:$0x76325410]  ;;  %v10230_v56 = vrot.slane %v892_v24, %v10039_v10  ;;  %v964_v48 = vcombine.high %v291_v3, %v291_v3  ;;  %v10240_v46 = vrot.slane %v916_v13, %v10039_v10  ;;  %v10243_v47 = vrot.slane %v289_v34, %v10039_v10 }
  0x29   : > { %v10198_v36 = vld.sshfl [vmem:[%s10031_s15 + $0xc8] sm:$0x3 pattern:$0x76325410]  ;;  %16826 = vst [vmem:[#allocation12_spill] sm:$0xff] %v10233_v55  ;;  %v10252_v42 = vrot.slane %v940_v5, %v10039_v10  ;;  %v988_v4 = vcombine.high %v293_v17, %v293_v17  ;;  %v10260_v34 = vrot.slane %v291_v3, %v10039_v10  ;;  %v1012_v33 = vcombine.high %v295_v12, %v295_v12  ;;  %v301_v3 = vld [vmem:[%s10031_s15 + $0x150] sm:$0xff]  ;;  %p9852_p2 = por %p9851_p1, %p9850_p0 }
  0x2a   : > { %v10215_v61 = vld.sshfl [vmem:[%s10031_s15 + $0xd8] sm:$0x3 pattern:$0x76325410]  ;;  %16827 = vst [vmem:[#allocation13_spill] sm:$0xff] %v10240_v46  ;;  %16828 = vst [vmem:[#allocation14_spill] sm:$0xff] %v10243_v47  ;;  %v10268_v32 = vrot.slane %v964_v48, %v10039_v10  ;;  %v10271_v6 = vrot.slane %v293_v17, %v10039_v10  ;;  %v1036_v23 = vcombine.high %v297_v37, %v297_v37 }
  0x2b   : > { %16824 = vst [vmem:[#allocation10_spill] sm:$0xff] %v10215_v61  ;;  %v10226_v63 = vld.sshfl [vmem:[%s10031_s15 + $0xe8] sm:$0x3 pattern:$0x76325410]  ;;  %16830 = vst [vmem:[#allocation16_spill] sm:$0xff] %v10252_v42  ;;  %v1060_v47 = vcombine.high %v299_v41, %v299_v41  ;;  %v1084_v42 = vcombine.high %v301_v3, %v301_v3  ;;  %p9853_p3 = pnand %p9852_p2, %p9846_p13 }
  0x2c   : > { %16825 = vst [vmem:[#allocation11_spill] sm:$0xff] %v10226_v63  ;;  %v10246_v24 = vld.sshfl [vmem:[%s10031_s15 + $0xf8] sm:$0x3 pattern:$0x76325410]  ;;  %16832 = vst [vmem:[#allocation18_spill] sm:$0xff] %v10260_v34  ;;  %v10288_v63 = vrot.slane %v988_v4, %v10039_v10  ;;  %v10314_v34 = vrot.slane %v1036_v23, %v10039_v10 }
  0x2d   : > { %16829 = vst [vmem:[#allocation15_spill] sm:$0xff] %v10246_v24  ;;  %v10255_v1 = vld.sshfl [vmem:[%s10031_s15 + $0x108] sm:$0x3 pattern:$0x76325410]  ;;  %16833 = vst [vmem:[#allocation19_spill] sm:$0xff] %v10268_v32  ;;  %v10297_v24 = vrot.slane %v1012_v33, %v10039_v10 }
  0x2e   : > { %16831 = vst [vmem:[#allocation17_spill] sm:$0xff] %v10255_v1  ;;  %16834 = vst [vmem:[#allocation20_spill] sm:$0xff] %v10271_v6  ;;  %v10274_v13 = vld.sshfl [vmem:[%s10031_s15 + $0x118] sm:$0x3 pattern:$0x76325410] }
  0x2f   : > { %16835 = vst [vmem:[#allocation21_spill] sm:$0xff] %v10274_v13  ;;  %v10282_v5 = vld.sshfl [vmem:[%s10031_s15 + $0x128] sm:$0x3 pattern:$0x76325410]  ;;  %v303_v48 = vld [vmem:[%s10031_s15 + $0x160] sm:$0xff]  ;;  %v10291_v13 = vrot.slane %v295_v12, %v10039_v10  ;;  %v10324_v12 = vrot.slane %v301_v3, %v10039_v10 }
  0x30   : > { %16836 = vst [vmem:[#allocation22_spill] sm:$0xff] %v10282_v5  ;;  %16837 = vst [vmem:[#allocation23_spill] sm:$0xff] %v10288_v63  ;;  %v305_v55 = vld [vmem:[%s10031_s15 + $0x170] sm:$0xff]  ;;  %v10300_v5 = vrot.slane %v297_v37, %v10039_v10  ;;  %v307_v33 = vld [vmem:[%s10031_s15 + $0x180] sm:$0xff]  ;;  %v10317_v37 = vrot.slane %v299_v41, %v10039_v10  ;;  %v1108_v46 = vcombine.high %v303_v48, %v303_v48 }
  0x31   : > { %16838 = vst [vmem:[#allocation24_spill] sm:$0xff] %v10291_v13  ;;  %16839 = vst [vmem:[#allocation25_spill] sm:$0xff] %v10297_v24  ;;  %v10303_v17 = vld.sshfl [vmem:[%s10031_s15 + $0x138] sm:$0x3 pattern:$0x76325410]  ;;  %v1132_v6 = vcombine.high %v305_v55, %v305_v55  ;;  %v10342_v13 = vrot.slane %v1084_v42, %v10039_v10  ;;  %v1156_v63 = vcombine.high %v307_v33, %v307_v33 }
  0x32   : > { %16840 = vst [vmem:[#allocation26_spill] sm:$0xff] %v10300_v5  ;;  %16841 = vst [vmem:[#allocation27_spill] sm:$0xff] %v10303_v17  ;;  %v10310_v1 = vld.sshfl [vmem:[%s10031_s15 + $0x148] sm:$0x3 pattern:$0x76325410]  ;;  %v10335_v17 = vrot.slane %v1060_v47, %v10039_v10  ;;  %v10352_v47 = vrot.slane %v1108_v46, %v10039_v10 }
  0x33   : > { %16842 = vst [vmem:[#allocation28_spill] sm:$0xff] %v10310_v1  ;;  %16843 = vst [vmem:[#allocation29_spill] sm:$0xff] %v10314_v34  ;;  %v10327_v1 = vld.sshfl [vmem:[%s10031_s15 + $0x158] sm:$0x3 pattern:$0x76325410]  ;;  %v10364_v24 = vrot.slane %v1132_v6, %v10039_v10 }
  0x34   : > { %16844 = vst [vmem:[#allocation30_spill] sm:$0xff] %v10317_v37  ;;  %16845 = vst [vmem:[#allocation31_spill] sm:$0xff] %v10324_v12  ;;  %v309_v23 = vld [vmem:[%s10031_s15 + $0x190] sm:$0xff]  ;;  %v311_v3 = vld [vmem:[%s10031_s15 + $0x1a0] sm:$0xff]  ;;  %v10380_v12 = vrot.slane %v1156_v63, %v10039_v10 }
  0x35   : > { %16846 = vst [vmem:[#allocation32_spill] sm:$0xff] %v10327_v1  ;;  %16847 = vst [vmem:[#allocation33_spill] sm:$0xff] %v10335_v17  ;;  %v10338_v4 = vld.sshfl [vmem:[%s10031_s15 + $0x168] sm:$0x3 pattern:$0x76325410]  ;;  %v10345_v1 = vrot.slane %v303_v48, %v10039_v10  ;;  %v1180_v41 = vcombine.high %v309_v23, %v309_v23  ;;  %v1204_v37 = vcombine.high %v311_v3, %v311_v3 }
  0x36   : > { %16848 = vst [vmem:[#allocation34_spill] sm:$0xff] %v10338_v4  ;;  %16849 = vst [vmem:[#allocation35_spill] sm:$0xff] %v10342_v13  ;;  %v10355_v4 = vrot.slane %v305_v55, %v10039_v10  ;;  %v10358_v42 = vld.sshfl [vmem:[%s10031_s15 + $0x178] sm:$0x3 pattern:$0x76325410]  ;;  %v10372_v55 = vrot.slane %v307_v33, %v10039_v10 }
  0x37   : > { %16850 = vst [vmem:[#allocation36_spill] sm:$0xff] %v10345_v1  ;;  %16851 = vst [vmem:[#allocation37_spill] sm:$0xff] %v10352_v47  ;;  %v313_v5 = vld [vmem:[%s10031_s15 + $0x1b0] sm:$0xff]  ;;  %v319_v63 = vld [vmem:[%s10031_s15 + $0x1e0] sm:$0xff]  ;;  %v10400_v1 = vrot.slane %v1180_v41, %v10039_v10  ;;  %v10409_v34 = vrot.slane %v1204_v37, %v10039_v10 }
  0x38   : > { %16852 = vst [vmem:[#allocation38_spill] sm:$0xff] %v10355_v4  ;;  %16853 = vst [vmem:[#allocation39_spill] sm:$0xff] %v10358_v42  ;;  %v10367_v32 = vld.sshfl [vmem:[%s10031_s15 + $0x188] sm:$0x3 pattern:$0x76325410]  ;;  %v1228_v48 = vcombine.high %v313_v5, %v313_v5  ;;  %v1300_v47 = vcombine.high %v319_v63, %v319_v63 }
  0x39   : > { %16854 = vst [vmem:[#allocation40_spill] sm:$0xff] %v10364_v24  ;;  %16855 = vst [vmem:[#allocation41_spill] sm:$0xff] %v10367_v32  ;;  %v315_v42 = vld [vmem:[%s10031_s15 + $0x1c0] sm:$0xff]  ;;  %v10383_v32 = vrot.slane %v309_v23, %v10039_v10  ;;  %v317_v33 = vld [vmem:[%s10031_s15 + $0x1d0] sm:$0xff] }
  0x3a   : > { %16856 = vst [vmem:[#allocation42_spill] sm:$0xff] %v10372_v55  ;;  %16857 = vst [vmem:[#allocation43_spill] sm:$0xff] %v10380_v12  ;;  %v10386_v46 = vld.sshfl [vmem:[%s10031_s15 + $0x198] sm:$0x3 pattern:$0x76325410]  ;;  %v1252_v4 = vcombine.high %v315_v42, %v315_v42  ;;  %v1276_v24 = vcombine.high %v317_v33, %v317_v33  ;;  %v10426_v55 = vrot.slane %v1228_v48, %v10039_v10 }
  0x3b   : > { %16858 = vst [vmem:[#allocation44_spill] sm:$0xff] %v10383_v32  ;;  %16859 = vst [vmem:[#allocation45_spill] sm:$0xff] %v10386_v46  ;;  %v10394_v6 = vld.sshfl [vmem:[%s10031_s15 + $0x1a8] sm:$0x3 pattern:$0x76325410]  ;;  %v10403_v46 = vrot.slane %v311_v3, %v10039_v10  ;;  %v10436_v3 = vrot.slane %v317_v33, %v10039_v10 }
  0x3c   : > { %16860 = vst [vmem:[#allocation46_spill] sm:$0xff] %v10394_v6  ;;  %16861 = vst [vmem:[#allocation47_spill] sm:$0xff] %v10400_v1  ;;  %v321_v13 = vld [vmem:[%s10031_s15 + $0x1f0] sm:$0xff]  ;;  %v10412_v6 = vrot.slane %v313_v5, %v10039_v10  ;;  %v323_v37 = vld [vmem:[%s10031_s15 + $0x200] sm:$0xff]  ;;  %v10429_v5 = vrot.slane %v315_v42, %v10039_v10 }
  0x3d   : > { %16862 = vst [vmem:[#allocation48_spill] sm:$0xff] %v10403_v46  ;;  %16863 = vst [vmem:[#allocation49_spill] sm:$0xff] %v10409_v34  ;;  %v10415_v23 = vld.sshfl [vmem:[%s10031_s15 + $0x1b8] sm:$0x3 pattern:$0x76325410]  ;;  %v1324_v32 = vcombine.high %v321_v13, %v321_v13  ;;  %v10454_v46 = vrot.slane %v1276_v24, %v10039_v10  ;;  %v1348_v1 = vcombine.high %v323_v37, %v323_v37 }
  0x3e   : > { %16864 = vst [vmem:[#allocation50_spill] sm:$0xff] %v10412_v6  ;;  %16865 = vst [vmem:[#allocation51_spill] sm:$0xff] %v10415_v23  ;;  %v10422_v17 = vld.sshfl [vmem:[%s10031_s15 + $0x1c8] sm:$0x3 pattern:$0x76325410]  ;;  %v10447_v23 = vrot.slane %v1252_v4, %v10039_v10  ;;  %v10464_v4 = vrot.slane %v1300_v47, %v10039_v10 }
  0x3f   : > { %16866 = vst [vmem:[#allocation52_spill] sm:$0xff] %v10422_v17  ;;  %16867 = vst [vmem:[#allocation53_spill] sm:$0xff] %v10426_v55  ;;  %v10439_v17 = vld.sshfl [vmem:[%s10031_s15 + $0x1d8] sm:$0x3 pattern:$0x76325410]  ;;  %v10476_v34 = vrot.slane %v1324_v32, %v10039_v10 }
  0x40   : > { %16868 = vst [vmem:[#allocation54_spill] sm:$0xff] %v10429_v5  ;;  %16869 = vst [vmem:[#allocation55_spill] sm:$0xff] %v10436_v3  ;;  %v325_v48 = vld [vmem:[%s10031_s15 + $0x210] sm:$0xff]  ;;  %v327_v33 = vld [vmem:[%s10031_s15 + $0x220] sm:$0xff]  ;;  %v10492_v3 = vrot.slane %v1348_v1, %v10039_v10 }
  0x41   : > { %16870 = vst [vmem:[#allocation56_spill] sm:$0xff] %v10439_v17  ;;  %16871 = vst [vmem:[#allocation57_spill] sm:$0xff] %v10447_v23  ;;  %v10450_v41 = vld.sshfl [vmem:[%s10031_s15 + $0x1e8] sm:$0x3 pattern:$0x76325410]  ;;  %v10457_v17 = vrot.slane %v319_v63, %v10039_v10  ;;  %v1372_v42 = vcombine.high %v325_v48, %v325_v48  ;;  %v1396_v5 = vcombine.high %v327_v33, %v327_v33 }
  0x42   : > { %16872 = vst [vmem:[#allocation58_spill] sm:$0xff] %v10450_v41  ;;  %16873 = vst [vmem:[#allocation59_spill] sm:$0xff] %v10454_v46  ;;  %v10467_v41 = vrot.slane %v321_v13, %v10039_v10  ;;  %v10470_v24 = vld.sshfl [vmem:[%s10031_s15 + $0x1f8] sm:$0x3 pattern:$0x76325410]  ;;  %v10484_v13 = vrot.slane %v323_v37, %v10039_v10 }
  0x43   : > { %16874 = vst [vmem:[#allocation60_spill] sm:$0xff] %v10457_v17  ;;  %16875 = vst [vmem:[#allocation61_spill] sm:$0xff] %v10464_v4  ;;  %v329_v6 = vld [vmem:[%s10031_s15 + $0x230] sm:$0xff]  ;;  %v335_v1 = vld [vmem:[%s10031_s15 + $0x260] sm:$0xff]  ;;  %v10512_v17 = vrot.slane %v1372_v42, %v10039_v10  ;;  %v10521_v55 = vrot.slane %v1396_v5, %v10039_v10 }
  0x44   : > { %16876 = vst [vmem:[#allocation62_spill] sm:$0xff] %v10467_v41  ;;  %16877 = vst [vmem:[#allocation63_spill] sm:$0xff] %v10470_v24  ;;  %v10479_v12 = vld.sshfl [vmem:[%s10031_s15 + $0x208] sm:$0x3 pattern:$0x76325410]  ;;  %v1420_v63 = vcombine.high %v329_v6, %v329_v6  ;;  %v1492_v4 = vcombine.high %v335_v1, %v335_v1 }
  0x45   : > { %16878 = vst [vmem:[#allocation64_spill] sm:$0xff] %v10476_v34  ;;  %16879 = vst [vmem:[#allocation65_spill] sm:$0xff] %v10479_v12  ;;  %v331_v24 = vld [vmem:[%s10031_s15 + $0x240] sm:$0xff]  ;;  %v10495_v12 = vrot.slane %v325_v48, %v10039_v10  ;;  %v333_v37 = vld [vmem:[%s10031_s15 + $0x250] sm:$0xff] }
  0x46   : > { %16880 = vst [vmem:[#allocation66_spill] sm:$0xff] %v10484_v13  ;;  %16881 = vst [vmem:[#allocation67_spill] sm:$0xff] %v10492_v3  ;;  %v10498_v47 = vld.sshfl [vmem:[%s10031_s15 + $0x218] sm:$0x3 pattern:$0x76325410]  ;;  %v1444_v41 = vcombine.high %v331_v24, %v331_v24  ;;  %v1468_v34 = vcombine.high %v333_v37, %v333_v37  ;;  %v10538_v13 = vrot.slane %v1420_v63, %v10039_v10 }
  0x47   : > { %16882 = vst [vmem:[#allocation68_spill] sm:$0xff] %v10495_v12  ;;  %16883 = vst [vmem:[#allocation69_spill] sm:$0xff] %v10498_v47  ;;  %v10506_v32 = vld.sshfl [vmem:[%s10031_s15 + $0x228] sm:$0x3 pattern:$0x76325410]  ;;  %v10515_v47 = vrot.slane %v327_v33, %v10039_v10  ;;  %v10548_v33 = vrot.slane %v333_v37, %v10039_v10 }
  0x48   : > { %16884 = vst [vmem:[#allocation70_spill] sm:$0xff] %v10506_v32  ;;  %16885 = vst [vmem:[#allocation71_spill] sm:$0xff] %v10512_v17  ;;  %v337_v46 = vld [vmem:[%s10031_s15 + $0x270] sm:$0xff]  ;;  %v10524_v32 = vrot.slane %v329_v6, %v10039_v10  ;;  %v339_v5 = vld [vmem:[%s10031_s15 + $0x280] sm:$0xff]  ;;  %v10541_v6 = vrot.slane %v331_v24, %v10039_v10 }
  0x49   : > { %16886 = vst [vmem:[#allocation72_spill] sm:$0xff] %v10515_v47  ;;  %16887 = vst [vmem:[#allocation73_spill] sm:$0xff] %v10521_v55  ;;  %v10527_v48 = vld.sshfl [vmem:[%s10031_s15 + $0x238] sm:$0x3 pattern:$0x76325410]  ;;  %v1516_v12 = vcombine.high %v337_v46, %v337_v46  ;;  %v10566_v47 = vrot.slane %v1468_v34, %v10039_v10  ;;  %v1540_v17 = vcombine.high %v339_v5, %v339_v5 }
  0x4a   : > { %16888 = vst [vmem:[#allocation74_spill] sm:$0xff] %v10524_v32  ;;  %16889 = vst [vmem:[#allocation75_spill] sm:$0xff] %v10527_v48  ;;  %v10534_v23 = vld.sshfl [vmem:[%s10031_s15 + $0x248] sm:$0x3 pattern:$0x76325410]  ;;  %v10559_v48 = vrot.slane %v1444_v41, %v10039_v10  ;;  %v10576_v41 = vrot.slane %v1492_v4, %v10039_v10 }
  0x4b   : > { %16890 = vst [vmem:[#allocation76_spill] sm:$0xff] %v10534_v23  ;;  %16891 = vst [vmem:[#allocation77_spill] sm:$0xff] %v10538_v13  ;;  %v10551_v23 = vld.sshfl [vmem:[%s10031_s15 + $0x258] sm:$0x3 pattern:$0x76325410]  ;;  %v10588_v55 = vrot.slane %v1516_v12, %v10039_v10 }
  0x4c   : > { %16892 = vst [vmem:[#allocation78_spill] sm:$0xff] %v10541_v6  ;;  %16893 = vst [vmem:[#allocation79_spill] sm:$0xff] %v10548_v33  ;;  %v341_v63 = vld [vmem:[%s10031_s15 + $0x290] sm:$0xff]  ;;  %v343_v37 = vld [vmem:[%s10031_s15 + $0x2a0] sm:$0xff]  ;;  %v10604_v33 = vrot.slane %v1540_v17, %v10039_v10 }
  0x4d   : > { %16894 = vst [vmem:[#allocation80_spill] sm:$0xff] %v10551_v23  ;;  %16895 = vst [vmem:[#allocation81_spill] sm:$0xff] %v10559_v48  ;;  %v10562_v42 = vld.sshfl [vmem:[%s10031_s15 + $0x268] sm:$0x3 pattern:$0x76325410]  ;;  %v10569_v23 = vrot.slane %v335_v1, %v10039_v10  ;;  %v1564_v24 = vcombine.high %v341_v63, %v341_v63  ;;  %v1588_v6 = vcombine.high %v343_v37, %v343_v37 }
  0x4e   : > { %16896 = vst [vmem:[#allocation82_spill] sm:$0xff] %v10562_v42  ;;  %16897 = vst [vmem:[#allocation83_spill] sm:$0xff] %v10566_v47  ;;  %v10579_v42 = vrot.slane %v337_v46, %v10039_v10  ;;  %v10582_v34 = vld.sshfl [vmem:[%s10031_s15 + $0x278] sm:$0x3 pattern:$0x76325410]  ;;  %v10596_v46 = vrot.slane %v339_v5, %v10039_v10 }
  0x4f   : > { %16898 = vst [vmem:[#allocation84_spill] sm:$0xff] %v10569_v23  ;;  %16899 = vst [vmem:[#allocation85_spill] sm:$0xff] %v10576_v41  ;;  %v345_v32 = vld [vmem:[%s10031_s15 + $0x2b0] sm:$0xff]  ;;  %v351_v17 = vld [vmem:[%s10031_s15 + $0x2e0] sm:$0xff]  ;;  %v10624_v23 = vrot.slane %v1564_v24, %v10039_v10  ;;  %v10633_v13 = vrot.slane %v1588_v6, %v10039_v10 }
  0x50   : > { %16900 = vst [vmem:[#allocation86_spill] sm:$0xff] %v10579_v42  ;;  %16901 = vst [vmem:[#allocation87_spill] sm:$0xff] %v10582_v34  ;;  %v10591_v3 = vld.sshfl [vmem:[%s10031_s15 + $0x288] sm:$0x3 pattern:$0x76325410]  ;;  %v1612_v1 = vcombine.high %v345_v32, %v345_v32  ;;  %v1684_v41 = vcombine.high %v351_v17, %v351_v17 }
  0x51   : > { %16902 = vst [vmem:[#allocation88_spill] sm:$0xff] %v10588_v55  ;;  %16903 = vst [vmem:[#allocation89_spill] sm:$0xff] %v10591_v3  ;;  %v347_v34 = vld [vmem:[%s10031_s15 + $0x2c0] sm:$0xff]  ;;  %v10607_v3 = vrot.slane %v341_v63, %v10039_v10  ;;  %v349_v5 = vld [vmem:[%s10031_s15 + $0x2d0] sm:$0xff] }
  0x52   : > { %16904 = vst [vmem:[#allocation90_spill] sm:$0xff] %v10596_v46  ;;  %16905 = vst [vmem:[#allocation91_spill] sm:$0xff] %v10604_v33  ;;  %v10610_v4 = vld.sshfl [vmem:[%s10031_s15 + $0x298] sm:$0x3 pattern:$0x76325410]  ;;  %v1636_v42 = vcombine.high %v347_v34, %v347_v34  ;;  %v1660_v55 = vcombine.high %v349_v5, %v349_v5  ;;  %v10650_v46 = vrot.slane %v1612_v1, %v10039_v10 }
  0x53   : > { %16906 = vst [vmem:[#allocation92_spill] sm:$0xff] %v10607_v3  ;;  %16907 = vst [vmem:[#allocation93_spill] sm:$0xff] %v10610_v4  ;;  %v10618_v12 = vld.sshfl [vmem:[%s10031_s15 + $0x2a8] sm:$0x3 pattern:$0x76325410]  ;;  %v10627_v4 = vrot.slane %v343_v37, %v10039_v10  ;;  %v10660_v37 = vrot.slane %v349_v5, %v10039_v10 }
  0x54   : > { %16908 = vst [vmem:[#allocation94_spill] sm:$0xff] %v10618_v12  ;;  %16909 = vst [vmem:[#allocation95_spill] sm:$0xff] %v10624_v23  ;;  %v353_v47 = vld [vmem:[%s10031_s15 + $0x2f0] sm:$0xff]  ;;  %v10636_v12 = vrot.slane %v345_v32, %v10039_v10  ;;  %v355_v6 = vld [vmem:[%s10031_s15 + $0x300] sm:$0xff]  ;;  %v10653_v32 = vrot.slane %v347_v34, %v10039_v10 }
  0x55   : > { %16910 = vst [vmem:[#allocation96_spill] sm:$0xff] %v10627_v4  ;;  %16911 = vst [vmem:[#allocation97_spill] sm:$0xff] %v10633_v13  ;;  %v10639_v63 = vld.sshfl [vmem:[%s10031_s15 + $0x2b8] sm:$0x3 pattern:$0x76325410]  ;;  %v1708_v3 = vcombine.high %v353_v47, %v353_v47  ;;  %v10678_v4 = vrot.slane %v1660_v55, %v10039_v10  ;;  %v1732_v23 = vcombine.high %v355_v6, %v355_v6 }
  0x56   : > { %16912 = vst [vmem:[#allocation98_spill] sm:$0xff] %v10636_v12  ;;  %16913 = vst [vmem:[#allocation99_spill] sm:$0xff] %v10639_v63  ;;  %v10646_v48 = vld.sshfl [vmem:[%s10031_s15 + $0x2c8] sm:$0x3 pattern:$0x76325410]  ;;  %v10671_v63 = vrot.slane %v1636_v42, %v10039_v10  ;;  %v10688_v42 = vrot.slane %v1684_v41, %v10039_v10 }
  0x57   : > { %16914 = vst [vmem:[#allocation100_spill] sm:$0xff] %v10646_v48  ;;  %16915 = vst [vmem:[#allocation101_spill] sm:$0xff] %v10650_v46  ;;  %v10663_v48 = vld.sshfl [vmem:[%s10031_s15 + $0x2d8] sm:$0x3 pattern:$0x76325410]  ;;  %v10700_v13 = vrot.slane %v1708_v3, %v10039_v10 }
  0x58   : > { %16916 = vst [vmem:[#allocation102_spill] sm:$0xff] %v10653_v32  ;;  %16917 = vst [vmem:[#allocation103_spill] sm:$0xff] %v10660_v37  ;;  %v357_v1 = vld [vmem:[%s10031_s15 + $0x310] sm:$0xff]  ;;  %v359_v5 = vld [vmem:[%s10031_s15 + $0x320] sm:$0xff]  ;;  %v10716_v37 = vrot.slane %v1732_v23, %v10039_v10 }
  0x59   : > { %16918 = vst [vmem:[#allocation104_spill] sm:$0xff] %v10663_v48  ;;  %16919 = vst [vmem:[#allocation105_spill] sm:$0xff] %v10671_v63  ;;  %v10674_v24 = vld.sshfl [vmem:[%s10031_s15 + $0x2e8] sm:$0x3 pattern:$0x76325410]  ;;  %v10681_v48 = vrot.slane %v351_v17, %v10039_v10  ;;  %v1756_v34 = vcombine.high %v357_v1, %v357_v1  ;;  %v1780_v32 = vcombine.high %v359_v5, %v359_v5 }
  0x5a   : > { %16920 = vst [vmem:[#allocation106_spill] sm:$0xff] %v10674_v24  ;;  %16921 = vst [vmem:[#allocation107_spill] sm:$0xff] %v10678_v4  ;;  %v10691_v24 = vrot.slane %v353_v47, %v10039_v10  ;;  %v10694_v55 = vld.sshfl [vmem:[%s10031_s15 + $0x2f8] sm:$0x3 pattern:$0x76325410]  ;;  %v10708_v47 = vrot.slane %v355_v6, %v10039_v10 }
  0x5b   : > { %16922 = vst [vmem:[#allocation108_spill] sm:$0xff] %v10681_v48  ;;  %16923 = vst [vmem:[#allocation109_spill] sm:$0xff] %v10688_v42  ;;  %v361_v12 = vld [vmem:[%s10031_s15 + $0x330] sm:$0xff]  ;;  %v367_v23 = vld [vmem:[%s10031_s15 + $0x360] sm:$0xff]  ;;  %v10736_v48 = vrot.slane %v1756_v34, %v10039_v10  ;;  %v10745_v46 = vrot.slane %v1780_v32, %v10039_v10 }
  0x5c   : > { %16924 = vst [vmem:[#allocation110_spill] sm:$0xff] %v10691_v24  ;;  %16925 = vst [vmem:[#allocation111_spill] sm:$0xff] %v10694_v55  ;;  %v10703_v33 = vld.sshfl [vmem:[%s10031_s15 + $0x308] sm:$0x3 pattern:$0x76325410]  ;;  %v1804_v17 = vcombine.high %v361_v12, %v361_v12  ;;  %v1876_v42 = vcombine.high %v367_v23, %v367_v23 }
  0x5d   : > { %16926 = vst [vmem:[#allocation112_spill] sm:$0xff] %v10700_v13  ;;  %16927 = vst [vmem:[#allocation113_spill] sm:$0xff] %v10703_v33  ;;  %v363_v55 = vld [vmem:[%s10031_s15 + $0x340] sm:$0xff]  ;;  %v10719_v33 = vrot.slane %v357_v1, %v10039_v10  ;;  %v365_v6 = vld [vmem:[%s10031_s15 + $0x350] sm:$0xff] }
  0x5e   : > { %16928 = vst [vmem:[#allocation114_spill] sm:$0xff] %v10708_v47  ;;  %16929 = vst [vmem:[#allocation115_spill] sm:$0xff] %v10716_v37  ;;  %v10722_v41 = vld.sshfl [vmem:[%s10031_s15 + $0x318] sm:$0x3 pattern:$0x76325410]  ;;  %v1828_v24 = vcombine.high %v363_v55, %v363_v55  ;;  %v1852_v13 = vcombine.high %v365_v6, %v365_v6  ;;  %v10762_v47 = vrot.slane %v1804_v17, %v10039_v10 }
  0x5f   : > { %16930 = vst [vmem:[#allocation116_spill] sm:$0xff] %v10719_v33  ;;  %16931 = vst [vmem:[#allocation117_spill] sm:$0xff] %v10722_v41  ;;  %v10730_v3 = vld.sshfl [vmem:[%s10031_s15 + $0x328] sm:$0x3 pattern:$0x76325410]  ;;  %v10739_v41 = vrot.slane %v359_v5, %v10039_v10  ;;  %v10772_v5 = vrot.slane %v365_v6, %v10039_v10 }
  0x60   : > { %16932 = vst [vmem:[#allocation118_spill] sm:$0xff] %v10730_v3  ;;  %16933 = vst [vmem:[#allocation119_spill] sm:$0xff] %v10736_v48  ;;  %v369_v4 = vld [vmem:[%s10031_s15 + $0x370] sm:$0xff]  ;;  %v10748_v3 = vrot.slane %v361_v12, %v10039_v10  ;;  %v371_v32 = vld [vmem:[%s10031_s15 + $0x380] sm:$0xff]  ;;  %v10765_v12 = vrot.slane %v363_v55, %v10039_v10 }
  0x61   : > { %16934 = vst [vmem:[#allocation120_spill] sm:$0xff] %v10739_v41  ;;  %16935 = vst [vmem:[#allocation121_spill] sm:$0xff] %v10745_v46  ;;  %v10751_v1 = vld.sshfl [vmem:[%s10031_s15 + $0x338] sm:$0x3 pattern:$0x76325410]  ;;  %v1900_v33 = vcombine.high %v369_v4, %v369_v4  ;;  %v10790_v41 = vrot.slane %v1852_v13, %v10039_v10  ;;  %v1924_v48 = vcombine.high %v371_v32, %v371_v32 }
  0x62   : > { %16936 = vst [vmem:[#allocation122_spill] sm:$0xff] %v10748_v3  ;;  %16937 = vst [vmem:[#allocation123_spill] sm:$0xff] %v10751_v1  ;;  %v10758_v63 = vld.sshfl [vmem:[%s10031_s15 + $0x348] sm:$0x3 pattern:$0x76325410]  ;;  %v10783_v1 = vrot.slane %v1828_v24, %v10039_v10  ;;  %v10800_v24 = vrot.slane %v1876_v42, %v10039_v10  ;;  %v10820_v42 = vrot.slane %v371_v32, %v10039_v10 }
  0x63   : > { %16938 = vst [vmem:[#allocation124_spill] sm:$0xff] %v10758_v63  ;;  %16939 = vst [vmem:[#allocation125_spill] sm:$0xff] %v10762_v47  ;;  %v10775_v63 = vld.sshfl [vmem:[%s10031_s15 + $0x358] sm:$0x3 pattern:$0x76325410]  ;;  %v10812_v46 = vrot.slane %v1900_v33, %v10039_v10 }
  0x64   : > { %16940 = vst [vmem:[#allocation126_spill] sm:$0xff] %v10765_v12  ;;  %16941 = vst [vmem:[#allocation127_spill] sm:$0xff] %v10772_v5  ;;  %v373_v17 = vld [vmem:[%s10031_s15 + $0x390] sm:$0xff]  ;;  %v375_v6 = vld [vmem:[%s10031_s15 + $0x3a0] sm:$0xff]  ;;  %v10828_v5 = vrot.slane %v1924_v48, %v10039_v10 }
  0x65   : > { %16942 = vst [vmem:[#allocation128_spill] sm:$0xff] %v10775_v63  ;;  %16943 = vst [vmem:[#allocation129_spill] sm:$0xff] %v10783_v1  ;;  %v10786_v34 = vld.sshfl [vmem:[%s10031_s15 + $0x368] sm:$0x3 pattern:$0x76325410]  ;;  %v10793_v63 = vrot.slane %v367_v23, %v10039_v10  ;;  %v1948_v55 = vcombine.high %v373_v17, %v373_v17 }
  0x66   : > { %16944 = vst [vmem:[#allocation130_spill] sm:$0xff] %v10786_v34  ;;  %16945 = vst [vmem:[#allocation131_spill] sm:$0xff] %v10790_v41  ;;  %v10803_v34 = vrot.slane %v369_v4, %v10039_v10  ;;  %v10806_v13 = vld.sshfl [vmem:[%s10031_s15 + $0x378] sm:$0x3 pattern:$0x76325410] }
  0x67   : > { %16946 = vst [vmem:[#allocation132_spill] sm:$0xff] %v10793_v63  ;;  %16947 = vst [vmem:[#allocation133_spill] sm:$0xff] %v10800_v24  ;;  %v377_v3 = vld [vmem:[%s10031_s15 + $0x3b0] sm:$0xff]  ;;  %v379_v12 = vld [vmem:[%s10031_s15 + $0x3c0] sm:$0xff] }
  0x68   : > { %16948 = vst [vmem:[#allocation134_spill] sm:$0xff] %v10803_v34  ;;  %16949 = vst [vmem:[#allocation135_spill] sm:$0xff] %v10806_v13  ;;  %v10815_v37 = vld.sshfl [vmem:[%s10031_s15 + $0x388] sm:$0x3 pattern:$0x76325410]  ;;  %v1972_v13 = vcombine.high %v375_v6, %v375_v6  ;;  %v1996_v23 = vcombine.high %v377_v3, %v377_v3  ;;  %v10863_v34 = vrot.slane %v377_v3, %v10039_v10 }
  0x69   : > { %16950 = vst [vmem:[#allocation136_spill] sm:$0xff] %v10812_v46  ;;  %16951 = vst [vmem:[#allocation137_spill] sm:$0xff] %v10815_v37  ;;  %v10831_v37 = vrot.slane %v373_v17, %v10039_v10  ;;  %v10834_v47 = vld.sshfl [vmem:[%s10031_s15 + $0x398] sm:$0x3 pattern:$0x76325410]  ;;  %v10849_v17 = vrot.slane %v1948_v55, %v10039_v10  ;;  %v2020_v48 = vcombine.high %v379_v12, %v379_v12 }
  0x6a   : > { %16952 = vst [vmem:[#allocation138_spill] sm:$0xff] %v10820_v42  ;;  %16953 = vst [vmem:[#allocation139_spill] sm:$0xff] %v10828_v5  ;;  %v381_v4 = vld [vmem:[%s10031_s15 + $0x3d0] sm:$0xff]  ;;  %v383_v33 = vld [vmem:[%s10031_s15 + $0x3e0] sm:$0xff]  ;;  %v10873_v1 = vrot.slane %v1996_v23, %v10039_v10  ;;  %v10881_v5 = vrot.slane %v379_v12, %v10039_v10 }
  0x6b   : > { %16954 = vst [vmem:[#allocation140_spill] sm:$0xff] %v10831_v37  ;;  %16955 = vst [vmem:[#allocation141_spill] sm:$0xff] %v10834_v47  ;;  %v10842_v41 = vld.sshfl [vmem:[%s10031_s15 + $0x3a8] sm:$0x3 pattern:$0x76325410]  ;;  %v10852_v47 = vrot.slane %v375_v6, %v10039_v10  ;;  %v2068_v42 = vcombine.high %v383_v33, %v383_v33  ;;  %v10892_v61 = vrot.slane %v2020_v48, %v10039_v10 }
  0x6c   : > { %16956 = vst [vmem:[#allocation142_spill] sm:$0xff] %v10842_v41  ;;  %v385_v63 = vld [vmem:[%s10031_s15 + $0x3f0] sm:$0xff]  ;;  %v10855_v32 = vld.sshfl [vmem:[%s10031_s15 + $0x3b8] sm:$0x3 pattern:$0x76325410]  ;;  %v10860_v41 = vrot.slane %v1972_v13, %v10039_v10  ;;  %v10895_v55 = vrot.slane %v381_v4, %v10039_v10 }
  0x6d   : > { %16957 = vst [vmem:[#allocation143_spill] sm:$0xff] %v10855_v32  ;;  %16959 = vst [vmem:[#allocation145_spill] sm:$0xff] %v10863_v34  ;;  %v2044_v32 = vcombine.high %v381_v4, %v381_v4  ;;  %v10870_v46 = vld.sshfl [vmem:[%s10031_s15 + $0x3c8] sm:$0x3 pattern:$0x76325410]  ;;  %v2092_v13 = vcombine.high %v385_v63, %v385_v63  ;;  %v10907_v23 = vrot.slane %v385_v63, %v10039_v10 }
  0x6e   : > { %16958 = vst [vmem:[#allocation144_spill] sm:$0xff] %v10860_v41  ;;  %16960 = vst [vmem:[#allocation146_spill] sm:$0xff] %v10870_v46  ;;  %v387_v24 = vld [vmem:[%s10031_s15 + $0x400] sm:$0xff]  ;;  %v389_v46 = vld [vmem:[%s10031_s15 + $0x410] sm:$0xff]  ;;  %v10915_v4 = vrot.slane %v2068_v42, %v10039_v10 }
  0x6f   : > { %16961 = vst [vmem:[#allocation147_spill] sm:$0xff] %v10873_v1  ;;  %v10884_v6 = vld.sshfl [vmem:[%s10031_s15 + $0x3d8] sm:$0x3 pattern:$0x76325410]  ;;  %16963 = vst [vmem:[#allocation149_spill] sm:$0xff] %v10895_v55  ;;  %v10901_v3 = vrot.slane %v2044_v32, %v10039_v10  ;;  %v2116_v32 = vcombine.high %v387_v24, %v387_v24  ;;  %v10926_v63 = vrot.slane %v387_v24, %v10039_v10 }
  0x70   : > { %16962 = vst [vmem:[#allocation148_spill] sm:$0xff] %v10884_v6  ;;  %v10898_v12 = vld.sshfl [vmem:[%s10031_s15 + $0x3e8] sm:$0x3 pattern:$0x76325410]  ;;  %v10904_v6 = vrot.slane %v383_v33, %v10039_v10  ;;  %16966 = vst [vmem:[#allocation152_spill] sm:$0xff] %v10907_v23  ;;  %v10937_v1 = vrot.slane %v389_v46, %v10039_v10  ;;  %v16979_v33 = vcombine.high %v10064_v25, %v10064_v25 }
  0x71   : > { %16964 = vst [vmem:[#allocation150_spill] sm:$0xff] %v10898_v12  ;;  %16965 = vst [vmem:[#allocation151_spill] sm:$0xff] %v10901_v3  ;;  %v10910_v37 = vld.sshfl [vmem:[%s10031_s15 + $0x3f8] sm:$0x3 pattern:$0x76325410]  ;;  %v10918_v12 = vrot.slane %v2092_v13, %v10039_v10 }
  0x72   : > { %16967 = vst [vmem:[#allocation153_spill] sm:$0xff] %v10910_v37  ;;  %v10921_v34 = vld.sshfl [vmem:[%s10031_s15 + $0x408] sm:$0x3 pattern:$0x76325410]  ;;  %16969 = vst [vmem:[#allocation155_spill] sm:$0xff] %v10926_v63  ;;  %v2140_v37 = vcombine.high %v389_v46, %v389_v46  ;;  %v10951_v46 = vrot.slane %v2116_v32, %v10039_v10 }
  0x73   : > { %16968 = vst [vmem:[#allocation154_spill] sm:$0xff] %v10921_v34  ;;  %v10929_v41 = vld.sshfl [vmem:[%s10031_s15 + $0x418] sm:$0x3 pattern:$0x76325410]  ;;  %v391_v48 = vld [vmem:[%s10031_s15 + $0x420] sm:$0xff] }
  0x74   : > { %16970 = vst [vmem:[#allocation156_spill] sm:$0xff] %v10929_v41  ;;  %16971 = vst [vmem:[#allocation157_spill] sm:$0xff] %v10937_v1  ;;  %v393_v34 = vld [vmem:[%s10031_s15 + $0x430] sm:$0xff]  ;;  %v10959_v3 = vrot.slane %v2140_v37, %v10039_v10  ;;  %v2164_v24 = vcombine.high %v391_v48, %v391_v48  ;;  %v10964_v42 = vrot.slane %v391_v48, %v10039_v10 }
  0x75   : > { %16972 = vst [vmem:[#allocation158_spill] sm:$0xff] %v10951_v46  ;;  %v10954_v55 = vld.sshfl [vmem:[%s10031_s15 + $0x428] sm:$0x3 pattern:$0x76325410]  ;;  %v2188_v23 = vcombine.high %v393_v34, %v393_v34  ;;  %v10967_v13 = vrot.slane %v393_v34, %v10039_v10  ;;  %v2501_v41 = vcombine.low %v10064_v25, %v16979_v33  ;;  %v2517_v48 = vcombine.low %v10043_v14, %v10053_v19 }
  0x76   : > { %16973 = vst [vmem:[#allocation159_spill] sm:$0xff] %v10954_v55  ;;  %16974 = vst [vmem:[#allocation160_spill] sm:$0xff] %v10959_v3  ;;  %v10970_v32 = vld.sshfl [vmem:[%s10031_s15 + $0x438] sm:$0x3 pattern:$0x76325410]  ;;  %v16978_v55 = vcombine.high %v10050_v18, %v10050_v18  ;;  %v16980_v34 = vcombine.high %v10053_v19, %v10053_v19  ;;  %v16982_v25 = vcombine.high %v10060_v22, %v10060_v22 }
  0x77   : > { %16975 = vst [vmem:[#allocation161_spill] sm:$0xff] %v10964_v42  ;;  %16976 = vst [vmem:[#allocation162_spill] sm:$0xff] %v10967_v13  ;;  %v10999_v33 = vrot.slane %v2164_v24, %v10039_v10  ;;  %v395_v19 = vld [vmem:[%s10031_s15 + $0x440] sm:$0xff]  ;;  %v2525_v3 = vrot.slane %v2517_v48, %v10039_v10 }
  0x78   : > { %16977 = vst [vmem:[#allocation163_spill] sm:$0xff] %v10970_v32  ;;  %v2500_v37 = vcombine.low %v10050_v18, %v16978_v55  ;;  %v2518_v1 = vcombine.low %v16980_v34, %v10067_v26  ;;  %v16981_v18 = vcombine.high %v10067_v26, %v10067_v26  ;;  %v2535_v14 = vcombine.low %v10060_v22, %v16982_v25 }
  0x79   : > { %v16983_v34 = vcombine.high %v10071_v28, %v10071_v28  ;;  %v11010_v22 = vrot.slane %v2188_v23, %v10039_v10  ;;  %v2515_v32 = vrot.slane %v2501_v41, %v10039_v10  ;;  %v16985_v25 = vcombine.high %v10074_v29, %v10074_v29 }
  0x7a   : > { %v2534_v55 = vcombine.low %v16981_v18, %v10046_v16  ;;  %v2552_v16 = vcombine.low %v10056_v20, %v10074_v29  ;;  %v2508_v24 = vrot.slane %v2500_v37, %v10039_v10  ;;  %v397_v20 = vld [vmem:[%s10031_s15 + $0x450] sm:$0xff]  ;;  %v2549_v23 = vrot.slane %v2535_v14, %v10039_v10 }
  0x7b   : > { %v2551_v26 = vcombine.low %v10071_v28, %v16983_v34  ;;  %v2532_v28 = vrot.slane %v2518_v1, %v10039_v10  ;;  %v11020_v34 = vld.sshfl [vmem:[%s10031_s15 + $0x448] sm:$0x3 pattern:$0x76325410]  ;;  %v2568_v13 = vcombine.low %v16985_v25, %v10090_v38  ;;  %v16986_v41 = vcombine.high %v10090_v38, %v10090_v38 }
  0x7c   : > { %16984 = vst [vmem:[#allocation164_spill] sm:$0xff] %v11020_v34  ;;  %v2542_v18 = vrot.slane %v2534_v55, %v10039_v10  ;;  %v2566_v1 = vrot.slane %v2552_v16, %v10039_v10  ;;  %v16987_v34 = vcombine.high %v10093_v39, %v10093_v39  ;;  %v16988_v14 = vcombine.high %v10111_v49, %v10111_v49 }
  0x7d   : > { %v2569_v37 = vcombine.low %v16986_v41, %v10077_v31  ;;  %v2559_v48 = vrot.slane %v2551_v26, %v10039_v10  ;;  %v2212_v25 = vcombine.high %v395_v19, %v395_v19  ;;  %v11044_v42 = vrot.slane %v395_v19, %v10039_v10 }
  0x7e   : > { %v2585_v55 = vcombine.low %v10093_v39, %v16987_v34  ;;  %v2586_v29 = vcombine.low %v10111_v49, %v16988_v14  ;;  %v2602_v31 = vcombine.low %v10084_v35, %v10100_v43  ;;  %v16989_v38 = vcombine.high %v10100_v43, %v10100_v43 }
  0x7f   : > { %v2236_v16 = vcombine.high %v397_v20, %v397_v20  ;;  %v2516_v34 = vcombine.low %v2508_v24, %v2515_v32  ;;  %v11055_v41 = vrot.slane %v397_v20, %v10039_v10  ;;  %v2533_v49 = vcombine.low %v2525_v3, %v2532_v28 }
  0x80   : > { %v2603_v26 = vcombine.low %v16989_v38, %v10118_v52  ;;  %v2576_v19 = vrot.slane %v2568_v13, %v10039_v10  ;;  %v2583_v14 = vrot.slane %v2569_v37, %v10039_v10  ;;  %v2550_v46 = vcombine.low %v2542_v18, %v2549_v23  ;;  %v17140_v18 = vld [vmem:[#allocation87_spill] sm:$0xff] }
  0x81   : > { %v2567_v35 = vcombine.low %v2559_v48, %v2566_v1  ;;  %v2593_v63 = vrot.slane %v2585_v55, %v10039_v10  ;;  %v2600_v43 = vrot.slane %v2586_v29, %v10039_v10  ;;  %v2610_v38 = vrot.slane %v2602_v31, %v10039_v10 }
  0x82   : > { %v2617_v39 = vrot.slane %v2603_v26, %v10039_v10  ;;  %v16990_v32 = vcombine.high %v10118_v52, %v10118_v52  ;;  %v16991_v3 = vcombine.high %v10121_v53, %v10121_v53  ;;  %v16992_v28 = vcombine.high %v10128_v57, %v10128_v57 }
  0x83   : > { %v2637_v23 = vcombine.low %v10114_v50, %v10131_v58  ;;  %v4301_v37 = vsel %vm4300_vm1, %v2516_v34, 0.0  ;;  %v2584_v52 = vcombine.low %v2576_v19, %v2583_v14  ;;  %v16994_v48 = vcombine.high %v10140_v62, %v10140_v62 }
  0x84   : > { %v2619_v24 = vcombine.low %v16990_v32, %v10103_v45  ;;  %v2620_v13 = vcombine.low %v10121_v53, %v16991_v3  ;;  %v2636_v20 = vcombine.low %v10128_v57, %v16992_v28  ;;  %v16993_v45 = vcombine.high %v10131_v58, %v10131_v58 }
  0x85   : > { %v2654_v1 = vcombine.low %v16994_v48, %v10134_v59  ;;  %v4302_v55 = vsel %vm4300_vm1, %v2533_v49, 0.0  ;;  %v11090_v57 = vrot.slane %v2212_v25, %v10039_v10  ;;  %v2601_v50 = vcombine.low %v2593_v63, %v2600_v43  ;;  %v11103_v49 = vld.sshfl [vmem:[%s10031_s15 + $0x458] sm:$0x3 pattern:$0x76325410] }
  0x86   : > { %v2653_v53 = vcombine.low %v16993_v45, %v10140_v62  ;;  %v4303_v29 = vadd.f32 %v4302_v55, %v4301_v37  ;;  %v4304_v31 = vsel %vm4300_vm1, %v2550_v46, 0.0  ;;  %v2618_v26 = vcombine.low %v2610_v38, %v2617_v39 }
  0x87   : > { %v2627_v34 = vrot.slane %v2619_v24, %v10039_v10  ;;  %v2634_v58 = vrot.slane %v2620_v13, %v10039_v10  ;;  %v4306_v19 = vsel %vm4300_vm1, %v2567_v35, 0.0  ;;  %v2644_v14 = vrot.slane %v2636_v20, %v10039_v10 }
  0x88   : > { %v2651_v59 = vrot.slane %v2637_v23, %v10039_v10  ;;  %v16995_v62 = vcombine.high %v10148_v2, %v10148_v2  ;;  %v4305_v63 = vadd.f32 %v4304_v31, %v4303_v29  ;;  %v2661_v46 = vrot.slane %v2653_v53, %v10039_v10 }
  0x89   : > { %v2668_v39 = vrot.slane %v2654_v1, %v10039_v10  ;;  %v16996_v43 = vcombine.high %v10156_v8, %v10156_v8  ;;  %v4308_v38 = vsel %vm4300_vm1, %v2584_v52, 0.0  ;;  %v2687_v32 = vcombine.low %v10143_v0, %v10159_v9 }
  0x8a   : > { %v2670_v25 = vcombine.low %v10148_v2, %v16995_v62  ;;  %v16997_v2 = vcombine.high %v10159_v9, %v10159_v9  ;;  %v16998_v3 = vcombine.high %v10176_v27, %v10176_v27  ;;  %v4307_v28 = vadd.f32 %v4306_v19, %v4305_v63  ;;  %v11573_v19 = vld [vmem:[%s10031_s15 + $0x4b0] sm:$0xff] }
  0x8b   : > { %v2671_v35 = vcombine.low %v10156_v8, %v16996_v43  ;;  %v2635_v20 = vcombine.low %v2627_v34, %v2634_v58  ;;  %v16999_v23 = vcombine.high %v10179_v30, %v10179_v30  ;;  %v4310_v37 = vsel %vm4300_vm1, %v2601_v50, 0.0  ;;  %v11139_v50 = vld [vmem:[%s10031_s15 + $0x460] sm:$0xff] }
  0x8c   : > { %v2688_v24 = vcombine.low %v16997_v2, %v10176_v27  ;;  %v2704_v13 = vcombine.low %v16998_v3, %v10162_v11  ;;  %v11130_v9 = vrot.slane %v2236_v16, %v10039_v10  ;;  %v2652_v52 = vcombine.low %v2644_v14, %v2651_v59 }
  0x8d   : > { %v2705_v0 = vcombine.low %v10179_v30, %v16999_v23  ;;  %v4309_v45 = vadd.f32 %v4308_v38, %v4307_v28  ;;  %v2669_v27 = vcombine.low %v2661_v46, %v2668_v39  ;;  %v2678_v11 = vrot.slane %v2670_v25, %v10039_v10  ;;  %v401_v23 = vld [vmem:[%s10031_s15 + $0x470] sm:$0xff] }
  0x8e   : > { %v2685_v53 = vrot.slane %v2671_v35, %v10039_v10  ;;  %v4312_v48 = vsel %vm4300_vm1, %v2618_v26, 0.0  ;;  %v2695_v1 = vrot.slane %v2687_v32, %v10039_v10  ;;  %v2702_v55 = vrot.slane %v2688_v24, %v10039_v10 }
  0x8f   : > { %v2712_v30 = vrot.slane %v2704_v13, %v10039_v10  ;;  %v4311_v29 = vadd.f32 %v4310_v37, %v4309_v45  ;;  %v2719_v16 = vrot.slane %v2705_v0, %v10039_v10  ;;  %v17000_v31 = vcombine.high %v10185_v40, %v10185_v40 }
  0x90   : > { %v2722_v58 = vcombine.low %v10170_v21, %v10188_v44  ;;  %v4314_v26 = vsel %vm4300_vm1, %v2635_v20, 0.0  ;;  %v17001_v14 = vcombine.high %v10188_v44, %v10188_v44  ;;  %v17002_v62 = vcombine.high %v10202_v15, %v10202_v15  ;;  %v11182_v20 = vld.sshfl [vmem:[%s10031_s15 + $0x468] sm:$0x3 pattern:$0x76325410] }
  0x91   : > { %v2721_v34 = vcombine.low %v10185_v40, %v17000_v31  ;;  %v4313_v63 = vadd.f32 %v4312_v48, %v4311_v29  ;;  %v2686_v40 = vcombine.low %v2678_v11, %v2685_v53  ;;  %v17003_v21 = vcombine.high %v10205_v60, %v10205_v60  ;;  %v17006_v53 = vld [vmem:[#allocation10_spill] sm:$0xff] }
  0x92   : > { %v2738_v59 = vcombine.low %v17001_v14, %v10202_v15  ;;  %v2739_v25 = vcombine.low %v17002_v62, %v10191_v54  ;;  %v17004_v39 = vcombine.high %v10223_v7, %v10223_v7  ;;  %v4316_v43 = vsel %vm4300_vm1, %v2652_v52, 0.0 }
  0x93   : > { %v2755_v46 = vcombine.low %v10205_v60, %v17003_v21  ;;  %v2260_v15 = vcombine.high %v11139_v50, %v11139_v50  ;;  %v11172_v54 = vrot.slane %v11139_v50, %v10039_v10  ;;  %v2703_v35 = vcombine.low %v2695_v1, %v2702_v55  ;;  %v17008_v1 = vld [vmem:[#allocation12_spill] sm:$0xff] }
  0x94   : > { %v2756_v44 = vcombine.low %v10223_v7, %v17004_v39  ;;  %v4315_v38 = vadd.f32 %v4314_v26, %v4313_v63  ;;  %v2720_v32 = vcombine.low %v2712_v30, %v2719_v16  ;;  %v2729_v60 = vrot.slane %v2721_v34, %v10039_v10  ;;  %v17010_v16 = vld [vmem:[#allocation13_spill] sm:$0xff]  ;;  %v17012_v34 = vld [vmem:[#allocation14_spill] sm:$0xff] }
  0x95   : > { %v2736_v2 = vrot.slane %v2722_v58, %v10039_v10  ;;  %v4318_v24 = vsel %vm4300_vm1, %v2669_v27, 0.0  ;;  %v2746_v7 = vrot.slane %v2738_v59, %v10039_v10  ;;  %v2753_v3 = vrot.slane %v2739_v25, %v10039_v10  ;;  %v17013_v58 = vld [vmem:[#allocation11_spill] sm:$0xff] }
  0x96   : > { %v2772_v13 = vcombine.low %v10198_v36, %v10212_v51  ;;  %v4317_v28 = vadd.f32 %v4316_v43, %v4315_v38  ;;  %v2763_v0 = vrot.slane %v2755_v46, %v10039_v10  ;;  %v2770_v37 = vrot.slane %v2756_v44, %v10039_v10  ;;  %v17014_v44 = vld [vmem:[#allocation16_spill] sm:$0xff] }
  0x97   : > { %v17005_v52 = vcombine.high %v10212_v51, %v10212_v51  ;;  %v4320_v27 = vsel %vm4300_vm1, %v2686_v40, 0.0  ;;  %v17007_v36 = vcombine.high %v10230_v56, %v10230_v56  ;;  %v17009_v55 = vcombine.high %v17008_v1, %v17008_v1 }
  0x98   : > { %v4319_v29 = vadd.f32 %v4318_v24, %v4317_v28  ;;  %v2737_v50 = vcombine.low %v2729_v60, %v2736_v2  ;;  %v17011_v51 = vcombine.high %v17010_v16, %v17010_v16  ;;  %v2807_v26 = vcombine.low %v17013_v58, %v17012_v34  ;;  %v17016_v24 = vld [vmem:[#allocation15_spill] sm:$0xff]  ;;  %v17018_v28 = vld [vmem:[#allocation18_spill] sm:$0xff] }
  0x99   : > { %v2773_v45 = vcombine.low %v17005_v52, %v10230_v56  ;;  %v2789_v48 = vcombine.low %v17007_v36, %v17006_v53  ;;  %v2790_v30 = vcombine.low %v17008_v1, %v17009_v55  ;;  %v4322_v14 = vsel %vm4300_vm1, %v2703_v35, 0.0  ;;  %v17020_v52 = vld [vmem:[#allocation19_spill] sm:$0xff]  ;;  %v17023_v1 = vld [vmem:[#allocation17_spill] sm:$0xff] }
  0x9a   : > { %v2806_v31 = vcombine.low %v17010_v16, %v17011_v51  ;;  %v2284_v59 = vcombine.high %v401_v23, %v401_v23  ;;  %v2754_v56 = vcombine.low %v2746_v7, %v2753_v3  ;;  %v4321_v62 = vadd.f32 %v4320_v27, %v4319_v29 }
  0x9b   : > { %v2771_v25 = vcombine.low %v2763_v0, %v2770_v37  ;;  %v2780_v63 = vrot.slane %v2772_v13, %v10039_v10  ;;  %v2787_v40 = vrot.slane %v2773_v45, %v10039_v10  ;;  %v4324_v21 = vsel %vm4300_vm1, %v2720_v32, 0.0 }
  0x9c   : > { %v2797_v46 = vrot.slane %v2789_v48, %v10039_v10  ;;  %v2804_v39 = vrot.slane %v2790_v30, %v10039_v10  ;;  %v17015_v43 = vcombine.high %v17012_v34, %v17012_v34  ;;  %v4323_v35 = vadd.f32 %v4322_v14, %v4321_v62  ;;  %v17022_v48 = vld [vmem:[#allocation20_spill] sm:$0xff]  ;;  %v17024_v30 = vld [vmem:[#allocation23_spill] sm:$0xff] }
  0x9d   : > { %v2814_v60 = vrot.slane %v2806_v31, %v10039_v10  ;;  %v2821_v2 = vrot.slane %v2807_v26, %v10039_v10  ;;  %v17017_v7 = vcombine.high %v17014_v44, %v17014_v44  ;;  %v4326_v32 = vsel %vm4300_vm1, %v2737_v50, 0.0 }
  0x9e   : > { %v2823_v38 = vcombine.low %v17015_v43, %v17014_v44  ;;  %v11226_v13 = vrot.slane %v401_v23, %v10039_v10  ;;  %v17019_v0 = vcombine.high %v17018_v28, %v17018_v28  ;;  %v17021_v45 = vcombine.high %v17020_v52, %v17020_v52  ;;  %v11258_v43 = vld.sshfl [vmem:[%s10031_s15 + $0x478] sm:$0x3 pattern:$0x76325410] }
  0x9f   : > { %v2824_v3 = vcombine.low %v17017_v7, %v17016_v24  ;;  %v4325_v53 = vadd.f32 %v4324_v21, %v4323_v35  ;;  %v2788_v36 = vcombine.low %v2780_v63, %v2787_v40  ;;  %v2857_v55 = vcombine.low %v17023_v1, %v17022_v48 }
  0xa0   : > { %v2840_v37 = vcombine.low %v17018_v28, %v17019_v0  ;;  %v2841_v27 = vcombine.low %v17020_v52, %v17021_v45  ;;  %v17025_v23 = vcombine.high %v17022_v48, %v17022_v48  ;;  %v4328_v50 = vsel %vm4300_vm1, %v2754_v56, 0.0  ;;  %v17026_v56 = vld [vmem:[#allocation21_spill] sm:$0xff] }
  0xa1   : > { %v11246_v51 = vrot.slane %v2260_v15, %v10039_v10  ;;  %v2805_v31 = vcombine.low %v2797_v46, %v2804_v39  ;;  %v4327_v34 = vadd.f32 %v4326_v32, %v4325_v53  ;;  %v2822_v58 = vcombine.low %v2814_v60, %v2821_v2  ;;  %v17030_v2 = vld [vmem:[#allocation25_spill] sm:$0xff]  ;;  %v17033_v32 = vld [vmem:[#allocation22_spill] sm:$0xff] }
  0xa2   : > { %v2858_v29 = vcombine.low %v17025_v23, %v17024_v30  ;;  %v2831_v26 = vrot.slane %v2823_v38, %v10039_v10  ;;  %v2838_v14 = vrot.slane %v2824_v3, %v10039_v10  ;;  %v4330_v62 = vsel %vm4300_vm1, %v2771_v25, 0.0  ;;  %v17028_v38 = vld [vmem:[#allocation24_spill] sm:$0xff]  ;;  %v17032_v3 = vld [vmem:[#allocation26_spill] sm:$0xff]  ;;  %v17034_v0 = vld [vmem:[#allocation29_spill] sm:$0xff] }
  0xa3   : > { %v2848_v63 = vrot.slane %v2840_v37, %v10039_v10  ;;  %v2855_v40 = vrot.slane %v2841_v27, %v10039_v10  ;;  %v17027_v21 = vcombine.high %v17024_v30, %v17024_v30  ;;  %v4329_v15 = vadd.f32 %v4328_v50, %v4327_v34 }
  0xa4   : > { %v2865_v46 = vrot.slane %v2857_v55, %v10039_v10  ;;  %v2872_v39 = vrot.slane %v2858_v29, %v10039_v10  ;;  %v17029_v35 = vcombine.high %v17028_v38, %v17028_v38  ;;  %v4332_v60 = vsel %vm4300_vm1, %v2788_v36, 0.0  ;;  %v17036_v36 = vld [vmem:[#allocation27_spill] sm:$0xff] }
  0xa5   : > { %v2874_v44 = vcombine.low %v17027_v21, %v17026_v56  ;;  %v17031_v24 = vcombine.high %v17030_v2, %v17030_v2  ;;  %v2892_v28 = vcombine.low %v17033_v32, %v17032_v3  ;;  %v17035_v37 = vcombine.high %v17032_v3, %v17032_v3 }
  0xa6   : > { %v2875_v25 = vcombine.low %v17028_v38, %v17029_v35  ;;  %v4331_v45 = vadd.f32 %v4330_v62, %v4329_v15  ;;  %v2839_v53 = vcombine.low %v2831_v26, %v2838_v14  ;;  %v17037_v48 = vcombine.high %v17034_v0, %v17034_v0 }
  0xa7   : > { %v2891_v7 = vcombine.low %v17030_v2, %v17031_v24  ;;  %v2908_v52 = vcombine.low %v17035_v37, %v17034_v0  ;;  %v4334_v55 = vsel %vm4300_vm1, %v2805_v31, 0.0  ;;  %v11285_v30 = vrot.slane %v2284_v59, %v10039_v10  ;;  %v11294_v31 = vld [vmem:[%s10031_s15 + $0x480] sm:$0xff] }
  0xa8   : > { %v2909_v1 = vcombine.low %v17037_v48, %v17036_v36  ;;  %v2856_v23 = vcombine.low %v2848_v63, %v2855_v40  ;;  %v4333_v29 = vadd.f32 %v4332_v60, %v4331_v45  ;;  %v2873_v50 = vcombine.low %v2865_v46, %v2872_v39  ;;  %v17038_v63 = vld [vmem:[#allocation30_spill] sm:$0xff]  ;;  %v17040_v46 = vld [vmem:[#allocation33_spill] sm:$0xff]  ;;  %v17043_v60 = vld [vmem:[#allocation28_spill] sm:$0xff] }
  0xa9   : > { %v2882_v34 = vrot.slane %v2874_v44, %v10039_v10  ;;  %v2889_v62 = vrot.slane %v2875_v25, %v10039_v10  ;;  %v4336_v56 = vsel %vm4300_vm1, %v2822_v58, 0.0  ;;  %v2899_v26 = vrot.slane %v2891_v7, %v10039_v10  ;;  %v17042_v25 = vld [vmem:[#allocation31_spill] sm:$0xff]  ;;  %v17046_v0 = vld [vmem:[#allocation32_spill] sm:$0xff] }
  0xaa   : > { %v2906_v14 = vrot.slane %v2892_v28, %v10039_v10  ;;  %v2916_v21 = vrot.slane %v2908_v52, %v10039_v10  ;;  %v4335_v15 = vadd.f32 %v4334_v55, %v4333_v29  ;;  %v2923_v59 = vrot.slane %v2909_v1, %v10039_v10  ;;  %v17044_v24 = vld [vmem:[#allocation35_spill] sm:$0xff]  ;;  %v17048_v45 = vld [vmem:[#allocation36_spill] sm:$0xff] }
  0xab   : > { %v17039_v40 = vcombine.high %v17038_v63, %v17038_v63  ;;  %v17041_v39 = vcombine.high %v17040_v46, %v17040_v46  ;;  %v4338_v38 = vsel %vm4300_vm1, %v2839_v53, 0.0  ;;  %v2942_v2 = vcombine.low %v17043_v60, %v17042_v25  ;;  %v11339_v60 = vld.sshfl [vmem:[%s10031_s15 + $0x488] sm:$0x3 pattern:$0x76325410] }
  0xac   : > { %v17045_v7 = vcombine.high %v17042_v25, %v17042_v25  ;;  %v4337_v32 = vadd.f32 %v4336_v56, %v4335_v15  ;;  %v2890_v28 = vcombine.low %v2882_v34, %v2889_v62  ;;  %v17047_v37 = vcombine.high %v17044_v24, %v17044_v24  ;;  %17052 = vst [vmem:[#allocation10_spill] sm:$0xff] %v11339_v60 }
  0xad   : > { %v2925_v44 = vcombine.low %v17038_v63, %v17039_v40  ;;  %v2926_v58 = vcombine.low %v17040_v46, %v17041_v39  ;;  %v17049_v53 = vcombine.high %v17048_v45, %v17048_v45  ;;  %v4340_v48 = vsel %vm4300_vm1, %v2856_v23, 0.0  ;;  %v17050_v46 = vld [vmem:[#allocation37_spill] sm:$0xff] }
  0xae   : > { %v2943_v3 = vcombine.low %v17045_v7, %v17044_v24  ;;  %v2959_v52 = vcombine.low %v17047_v37, %v17046_v0  ;;  %v2308_v1 = vcombine.high %v11294_v31, %v11294_v31  ;;  %v11327_v55 = vrot.slane %v11294_v31, %v10039_v10 }
  0xaf   : > { %v2960_v36 = vcombine.low %v17048_v45, %v17049_v53  ;;  %v2907_v29 = vcombine.low %v2899_v26, %v2906_v14  ;;  %v4339_v34 = vadd.f32 %v4338_v38, %v4337_v32  ;;  %v2924_v62 = vcombine.low %v2916_v21, %v2923_v59  ;;  %v405_v26 = vld [vmem:[%s10031_s15 + $0x490] sm:$0xff] }
  0xb0   : > { %v2933_v56 = vrot.slane %v2925_v44, %v10039_v10  ;;  %v2940_v15 = vrot.slane %v2926_v58, %v10039_v10  ;;  %v4342_v63 = vsel %vm4300_vm1, %v2873_v50, 0.0  ;;  %v2950_v40 = vrot.slane %v2942_v2, %v10039_v10  ;;  %v17053_v59 = vld [vmem:[#allocation38_spill] sm:$0xff]  ;;  %v17055_v2 = vld [vmem:[#allocation40_spill] sm:$0xff] }
  0xb1   : > { %v2957_v23 = vrot.slane %v2943_v3, %v10039_v10  ;;  %v17051_v39 = vcombine.high %v17050_v46, %v17050_v46  ;;  %v4341_v31 = vadd.f32 %v4340_v48, %v4339_v34  ;;  %v2967_v14 = vrot.slane %v2959_v52, %v10039_v10  ;;  %v17054_v44 = vld [vmem:[#allocation34_spill] sm:$0xff]  ;;  %v17057_v3 = vld [vmem:[#allocation39_spill] sm:$0xff] }
  0xb2   : > { %v2974_v21 = vrot.slane %v2960_v36, %v10039_v10  ;;  %v2977_v50 = vcombine.low %v17054_v44, %v17053_v59  ;;  %v4344_v58 = vsel %vm4300_vm1, %v2890_v28, 0.0  ;;  %v17056_v24 = vcombine.high %v17053_v59, %v17053_v59  ;;  %v17059_v45 = vld [vmem:[#allocation42_spill] sm:$0xff]  ;;  %v17061_v36 = vld [vmem:[#allocation43_spill] sm:$0xff] }
  0xb3   : > { %v2976_v25 = vcombine.low %v17050_v46, %v17051_v39  ;;  %v17058_v32 = vcombine.high %v17055_v2, %v17055_v2  ;;  %v4343_v37 = vadd.f32 %v4342_v63, %v4341_v31  ;;  %v2941_v52 = vcombine.low %v2933_v56, %v2940_v15 }
  0xb4   : > { %v2993_v7 = vcombine.low %v17056_v24, %v17055_v2  ;;  %v17060_v53 = vcombine.high %v17059_v45, %v17059_v45  ;;  %v17062_v48 = vcombine.high %v17061_v36, %v17061_v36  ;;  %v4346_v46 = vsel %vm4300_vm1, %v2907_v29, 0.0 }
  0xb5   : > { %v2994_v0 = vcombine.low %v17058_v32, %v17057_v3  ;;  %v2332_v39 = vcombine.high %v405_v26, %v405_v26  ;;  %v2958_v59 = vcombine.low %v2950_v40, %v2957_v23  ;;  %v4345_v44 = vadd.f32 %v4344_v58, %v4343_v37  ;;  %v17063_v3 = vld [vmem:[#allocation44_spill] sm:$0xff]  ;;  %v17064_v32 = vld [vmem:[#allocation41_spill] sm:$0xff]  ;;  %v17065_v23 = vld [vmem:[#allocation47_spill] sm:$0xff] }
  0xb6   : > { %v3010_v28 = vcombine.low %v17059_v45, %v17060_v53  ;;  %v3011_v34 = vcombine.low %v17061_v36, %v17062_v48  ;;  %v2975_v24 = vcombine.low %v2967_v14, %v2974_v21  ;;  %v2984_v2 = vrot.slane %v2976_v25, %v10039_v10 }
  0xb7   : > { %v2991_v56 = vrot.slane %v2977_v50, %v10039_v10  ;;  %v4348_v15 = vsel %vm4300_vm1, %v2924_v62, 0.0  ;;  %v3001_v63 = vrot.slane %v2993_v7, %v10039_v10  ;;  %v3008_v31 = vrot.slane %v2994_v0, %v10039_v10  ;;  %v17068_v50 = vld [vmem:[#allocation45_spill] sm:$0xff]  ;;  %v17070_v0 = vld [vmem:[#allocation48_spill] sm:$0xff] }
  0xb8   : > { %v3027_v45 = vcombine.low %v17064_v32, %v17063_v3  ;;  %v4347_v53 = vadd.f32 %v4346_v46, %v4345_v44  ;;  %v3018_v29 = vrot.slane %v3010_v28, %v10039_v10  ;;  %v3025_v40 = vrot.slane %v3011_v34, %v10039_v10  ;;  %v17072_v34 = vld [vmem:[#allocation49_spill] sm:$0xff]  ;;  %v17075_v44 = vld [vmem:[#allocation46_spill] sm:$0xff] }
  0xb9   : > { %v17066_v25 = vcombine.high %v17063_v3, %v17063_v3  ;;  %v4350_v21 = vsel %vm4300_vm1, %v2941_v52, 0.0  ;;  %v11381_v62 = vrot.slane %v405_v26, %v10039_v10  ;;  %v17069_v58 = vcombine.high %v17065_v23, %v17065_v23  ;;  %v17074_v26 = vld [vmem:[#allocation50_spill] sm:$0xff] }
  0xba   : > { %v17071_v37 = vcombine.high %v17070_v0, %v17070_v0  ;;  %v4349_v36 = vadd.f32 %v4348_v15, %v4347_v53  ;;  %v2992_v48 = vcombine.low %v2984_v2, %v2991_v56  ;;  %v17073_v46 = vcombine.high %v17072_v34, %v17072_v34 }
  0xbb   : > { %v3028_v14 = vcombine.low %v17066_v25, %v17065_v23  ;;  %17067 = vst [vmem:[#allocation12_spill] sm:$0xff] %v11381_v62  ;;  %v3044_v7 = vcombine.low %v17069_v58, %v17068_v50  ;;  %v3062_v3 = vcombine.low %v17075_v44, %v17074_v26  ;;  %v4352_v32 = vsel %vm4300_vm1, %v2958_v59, 0.0  ;;  %v17076_v59 = vld [vmem:[#allocation53_spill] sm:$0xff] }
  0xbc   : > { %v3045_v28 = vcombine.low %v17070_v0, %v17071_v37  ;;  %v3061_v52 = vcombine.low %v17072_v34, %v17073_v46  ;;  %v11401_v25 = vrot.slane %v2308_v1, %v10039_v10  ;;  %v3009_v50 = vcombine.low %v3001_v63, %v3008_v31  ;;  %v11413_v44 = vld.sshfl [vmem:[%s10031_s15 + $0x498] sm:$0x3 pattern:$0x76325410] }
  0xbd   : > { %v4351_v15 = vadd.f32 %v4350_v21, %v4349_v36  ;;  %v3026_v2 = vcombine.low %v3018_v29, %v3025_v40  ;;  %v3035_v56 = vrot.slane %v3027_v45, %v10039_v10  ;;  %v3042_v53 = vrot.slane %v3028_v14, %v10039_v10  ;;  %17078 = vst [vmem:[#allocation13_spill] sm:$0xff] %v11413_v44  ;;  %v17079_v45 = vld [vmem:[#allocation51_spill] sm:$0xff]  ;;  %v17081_v14 = vld [vmem:[#allocation54_spill] sm:$0xff] }
  0xbe   : > { %v4354_v58 = vsel %vm4300_vm1, %v2975_v24, 0.0  ;;  %v3052_v0 = vrot.slane %v3044_v7, %v10039_v10  ;;  %v3059_v37 = vrot.slane %v3045_v28, %v10039_v10  ;;  %v17077_v34 = vcombine.high %v17074_v26, %v17074_v26  ;;  %v17083_v28 = vld [vmem:[#allocation57_spill] sm:$0xff] }
  0xbf   : > { %v4353_v1 = vadd.f32 %v4352_v32, %v4351_v15  ;;  %v3069_v63 = vrot.slane %v3061_v52, %v10039_v10  ;;  %v3076_v31 = vrot.slane %v3062_v3, %v10039_v10  ;;  %v17080_v24 = vcombine.high %v17076_v59, %v17076_v59  ;;  %v17085_v52 = vld [vmem:[#allocation55_spill] sm:$0xff]  ;;  %v17086_v32 = vld [vmem:[#allocation52_spill] sm:$0xff] }
  0xc0   : > { %v3078_v46 = vcombine.low %v17077_v34, %v17076_v59  ;;  %v4356_v40 = vsel %vm4300_vm1, %v2992_v48, 0.0  ;;  %v17082_v21 = vcombine.high %v17081_v14, %v17081_v14  ;;  %v17084_v36 = vcombine.high %v17083_v28, %v17083_v28  ;;  %v17101_v59 = vld [vmem:[#allocation66_spill] sm:$0xff] }
  0xc1   : > { %v3079_v29 = vcombine.low %v17080_v24, %v17079_v45  ;;  %v3112_v3 = vcombine.low %v17086_v32, %v17085_v52  ;;  %v4355_v15 = vadd.f32 %v4354_v58, %v4353_v1  ;;  %v3043_v34 = vcombine.low %v3035_v56, %v3042_v53  ;;  %v17087_v45 = vld [vmem:[#allocation59_spill] sm:$0xff] }
  0xc2   : > { %v3095_v7 = vcombine.low %v17081_v14, %v17082_v21  ;;  %v3096_v26 = vcombine.low %v17083_v28, %v17084_v36  ;;  %v17088_v48 = vcombine.high %v17085_v52, %v17085_v52  ;;  %v4358_v14 = vsel %vm4300_vm1, %v3009_v50, 0.0 }
  0xc3   : > { %v11440_v21 = vrot.slane %v2332_v39, %v10039_v10  ;;  %v3060_v23 = vcombine.low %v3052_v0, %v3059_v37  ;;  %v4357_v28 = vadd.f32 %v4356_v40, %v4355_v15  ;;  %v3077_v36 = vcombine.low %v3069_v63, %v3076_v31  ;;  %v17089_v39 = vld [vmem:[#allocation56_spill] sm:$0xff] }
  0xc4   : > { %v3113_v24 = vcombine.low %v17088_v48, %v17087_v45  ;;  %v3086_v32 = vrot.slane %v3078_v46, %v10039_v10  ;;  %v3093_v58 = vrot.slane %v3079_v29, %v10039_v10  ;;  %v4360_v1 = vsel %vm4300_vm1, %v3026_v2, 0.0  ;;  %v17091_v46 = vld [vmem:[#allocation60_spill] sm:$0xff]  ;;  %v17093_v29 = vld [vmem:[#allocation61_spill] sm:$0xff] }
  0xc5   : > { %v3103_v56 = vrot.slane %v3095_v7, %v10039_v10  ;;  %v3110_v53 = vrot.slane %v3096_v26, %v10039_v10  ;;  %v3120_v52 = vrot.slane %v3112_v3, %v10039_v10  ;;  %v4359_v48 = vadd.f32 %v4358_v14, %v4357_v28  ;;  %v17095_v26 = vld [vmem:[#allocation62_spill] sm:$0xff] }
  0xc6   : > { %v3127_v50 = vrot.slane %v3113_v24, %v10039_v10  ;;  %v17090_v0 = vcombine.high %v17087_v45, %v17087_v45  ;;  %v17092_v63 = vcombine.high %v17091_v46, %v17091_v46  ;;  %v4362_v31 = vsel %vm4300_vm1, %v3043_v34, 0.0  ;;  %v17096_v3 = vld [vmem:[#allocation58_spill] sm:$0xff]  ;;  %v17097_v24 = vld [vmem:[#allocation64_spill] sm:$0xff] }
  0xc7   : > { %v17094_v40 = vcombine.high %v17093_v29, %v17093_v29  ;;  %v3147_v15 = vcombine.low %v17096_v3, %v17095_v26  ;;  %v17098_v45 = vcombine.high %v17095_v26, %v17095_v26  ;;  %v4361_v28 = vadd.f32 %v4360_v1, %v4359_v48  ;;  %v17103_v26 = vld [vmem:[#allocation67_spill] sm:$0xff] }
  0xc8   : > { %v3129_v37 = vcombine.low %v17090_v0, %v17089_v39  ;;  %v3130_v2 = vcombine.low %v17091_v46, %v17092_v63  ;;  %v3094_v0 = vcombine.low %v3086_v32, %v3093_v58  ;;  %v17099_v46 = vld [vmem:[#allocation63_spill] sm:$0xff]  ;;  %v17100_v34 = vcombine.high %v17097_v24, %v17097_v24  ;;  %v17116_v39 = vld [vmem:[#allocation70_spill] sm:$0xff] }
  0xc9   : > { %v3146_v7 = vcombine.low %v17093_v29, %v17094_v40  ;;  %v3163_v14 = vcombine.low %v17098_v45, %v17097_v24  ;;  %v4364_v29 = vsel %vm4300_vm1, %v3060_v23, 0.0  ;;  %v3111_v40 = vcombine.low %v3103_v56, %v3110_v53  ;;  %v11484_v32 = vld [vmem:[%s10031_s15 + $0x4a0] sm:$0xff] }
  0xca   : > { %v3164_v63 = vcombine.low %v17100_v34, %v17099_v46  ;;  %v17102_v3 = vcombine.high %v17101_v59, %v17101_v59  ;;  %v17104_v1 = vcombine.high %v17103_v26, %v17103_v26  ;;  %v4363_v45 = vadd.f32 %v4362_v31, %v4361_v28  ;;  %v17106_v31 = vld [vmem:[#allocation65_spill] sm:$0xff] }
  0xcb   : > { %v3128_v58 = vcombine.low %v3120_v52, %v3127_v50  ;;  %v3137_v24 = vrot.slane %v3129_v37, %v10039_v10  ;;  %v3144_v46 = vrot.slane %v3130_v2, %v10039_v10  ;;  %v4366_v23 = vsel %vm4300_vm1, %v3077_v36, 0.0 }
  0xcc   : > { %v3180_v35 = vcombine.low %v17101_v59, %v17102_v3  ;;  %v3181_v48 = vcombine.low %v17103_v26, %v17104_v1  ;;  %v3154_v56 = vrot.slane %v3146_v7, %v10039_v10  ;;  %v3161_v53 = vrot.slane %v3147_v15, %v10039_v10  ;;  %v17105_v26 = vld [vmem:[#allocation68_spill] sm:$0xff]  ;;  %v17107_v1 = vld [vmem:[#allocation71_spill] sm:$0xff] }
  0xcd   : > { %v3171_v59 = vrot.slane %v3163_v14, %v10039_v10  ;;  %v4365_v34 = vadd.f32 %v4364_v29, %v4363_v45  ;;  %v3178_v3 = vrot.slane %v3164_v63, %v10039_v10  ;;  %v3197_v28 = vcombine.low %v17106_v31, %v17105_v26  ;;  %v17109_v63 = vld [vmem:[#allocation69_spill] sm:$0xff]  ;;  %v17111_v31 = vld [vmem:[#allocation72_spill] sm:$0xff] }
  0xce   : > { %v17108_v52 = vcombine.high %v17105_v26, %v17105_v26  ;;  %v4368_v37 = vsel %vm4300_vm1, %v3094_v0, 0.0  ;;  %v3188_v2 = vrot.slane %v3180_v35, %v10039_v10  ;;  %v3195_v7 = vrot.slane %v3181_v48, %v10039_v10 }
  0xcf   : > { %v4367_v15 = vadd.f32 %v4366_v23, %v4365_v34  ;;  %v3145_v14 = vcombine.low %v3137_v24, %v3144_v46  ;;  %v17110_v29 = vcombine.high %v17107_v1, %v17107_v1  ;;  %v17112_v26 = vcombine.high %v17111_v31, %v17111_v31 }
  0xd0   : > { %v3198_v50 = vcombine.low %v17108_v52, %v17107_v1  ;;  %v4370_v0 = vsel %vm4300_vm1, %v3111_v40, 0.0  ;;  %v11517_v35 = vrot.slane %v11484_v32, %v10039_v10  ;;  %v3162_v48 = vcombine.low %v3154_v56, %v3161_v53 }
  0xd1   : > { %v3214_v45 = vcombine.low %v17110_v29, %v17109_v63  ;;  %v3215_v52 = vcombine.low %v17111_v31, %v17112_v26  ;;  %v4369_v24 = vadd.f32 %v4368_v37, %v4367_v15  ;;  %v3179_v46 = vcombine.low %v3171_v59, %v3178_v3  ;;  %v17113_v29 = vld [vmem:[#allocation73_spill] sm:$0xff]  ;;  %v17115_v26 = vld [vmem:[#allocation74_spill] sm:$0xff] }
  0xd2   : > { %v3205_v23 = vrot.slane %v3197_v28, %v10039_v10  ;;  %v3212_v34 = vrot.slane %v3198_v50, %v10039_v10  ;;  %v4372_v1 = vsel %vm4300_vm1, %v3128_v58, 0.0  ;;  %v3196_v63 = vcombine.low %v3188_v2, %v3195_v7  ;;  %v17117_v59 = vld [vmem:[#allocation77_spill] sm:$0xff]  ;;  %v17119_v50 = vld [vmem:[#allocation75_spill] sm:$0xff]  ;;  %v17121_v7 = vld [vmem:[#allocation78_spill] sm:$0xff] }
  0xd3   : > { %v17114_v40 = vcombine.high %v17113_v29, %v17113_v29  ;;  %v3232_v38 = vcombine.low %v17116_v39, %v17115_v26  ;;  %v4371_v27 = vadd.f32 %v4370_v0, %v4369_v24  ;;  %v3222_v56 = vrot.slane %v3214_v45, %v10039_v10  ;;  %v17123_v45 = vld [vmem:[#allocation81_spill] sm:$0xff] }
  0xd4   : > { %v3229_v53 = vrot.slane %v3215_v52, %v10039_v10  ;;  %v17118_v3 = vcombine.high %v17115_v26, %v17115_v26  ;;  %v4374_v58 = vsel %vm4300_vm1, %v3145_v14, 0.0  ;;  %v17120_v37 = vcombine.high %v17117_v59, %v17117_v59  ;;  %v17126_v14 = vld [vmem:[#allocation76_spill] sm:$0xff] }
  0xd5   : > { %v3231_v31 = vcombine.low %v17113_v29, %v17114_v40  ;;  %v17122_v39 = vcombine.high %v17121_v7, %v17121_v7  ;;  %v17124_v52 = vcombine.high %v17123_v45, %v17123_v45  ;;  %v4373_v24 = vadd.f32 %v4372_v1, %v4371_v27  ;;  %v17125_v40 = vld [vmem:[#allocation79_spill] sm:$0xff]  ;;  %v17131_v27 = vld [vmem:[#allocation84_spill] sm:$0xff] }
  0xd6   : > { %v3248_v28 = vcombine.low %v17118_v3, %v17117_v59  ;;  %v3249_v2 = vcombine.low %v17120_v37, %v17119_v50  ;;  %v3213_v29 = vcombine.low %v3205_v23, %v3212_v34  ;;  %v3282_v26 = vcombine.low %v17126_v14, %v17125_v40  ;;  %v17127_v3 = vld [vmem:[#allocation83_spill] sm:$0xff] }
  0xd7   : > { %v3265_v15 = vcombine.low %v17121_v7, %v17122_v39  ;;  %v3266_v0 = vcombine.low %v17123_v45, %v17124_v52  ;;  %v17128_v59 = vcombine.high %v17125_v40, %v17125_v40  ;;  %v4376_v37 = vsel %vm4300_vm1, %v3162_v48, 0.0  ;;  %v17129_v39 = vld [vmem:[#allocation80_spill] sm:$0xff] }
  0xd8   : > { %v3239_v7 = vrot.slane %v3231_v31, %v10039_v10  ;;  %v17130_v16 = vcombine.high %v17127_v3, %v17127_v3  ;;  %v17132_v23 = vcombine.high %v17131_v27, %v17131_v27  ;;  %v4375_v1 = vadd.f32 %v4374_v58, %v4373_v24  ;;  %v17136_v24 = vld [vmem:[#allocation86_spill] sm:$0xff] }
  0xd9   : > { %v3283_v50 = vcombine.low %v17128_v59, %v17127_v3  ;;  %v3230_v52 = vcombine.low %v3222_v56, %v3229_v53  ;;  %v3246_v40 = vrot.slane %v3232_v38, %v10039_v10  ;;  %v3256_v14 = vrot.slane %v3248_v28, %v10039_v10  ;;  %v11567_v59 = vld.sshfl [vmem:[%s10031_s15 + $0x4a8] sm:$0x3 pattern:$0x76325410]  ;;  %v17134_v38 = vld [vmem:[#allocation85_spill] sm:$0xff] }
  0xda   : > { %v3299_v45 = vcombine.low %v17130_v16, %v17129_v39  ;;  %v3300_v34 = vcombine.low %v17131_v27, %v17132_v23  ;;  %v4378_v48 = vsel %vm4300_vm1, %v3179_v46, 0.0  ;;  %17133 = vst [vmem:[#allocation14_spill] sm:$0xff] %v11567_v59  ;;  %v3263_v31 = vrot.slane %v3249_v2, %v10039_v10 }
  0xdb   : > { %v3273_v3 = vrot.slane %v3265_v15, %v10039_v10  ;;  %v3280_v16 = vrot.slane %v3266_v0, %v10039_v10  ;;  %v4377_v39 = vadd.f32 %v4376_v37, %v4375_v1  ;;  %v3290_v58 = vrot.slane %v3282_v26, %v10039_v10  ;;  %v17137_v0 = vld [vmem:[#allocation82_spill] sm:$0xff]  ;;  %v17138_v1 = vld [vmem:[#allocation88_spill] sm:$0xff] }
  0xdc   : > { %v3297_v56 = vrot.slane %v3283_v50, %v10039_v10  ;;  %v17135_v53 = vcombine.high %v17134_v38, %v17134_v38  ;;  %v4380_v28 = vsel %vm4300_vm1, %v3196_v63, 0.0  ;;  %v3307_v2 = vrot.slane %v3299_v45, %v10039_v10 }
  0xdd   : > { %v3314_v15 = vrot.slane %v3300_v34, %v10039_v10  ;;  %v3317_v37 = vcombine.low %v17137_v0, %v17136_v24  ;;  %v4379_v27 = vadd.f32 %v4378_v48, %v4377_v39  ;;  %v3247_v23 = vcombine.low %v3239_v7, %v3246_v40 }
  0xde   : > { %v3316_v46 = vcombine.low %v17134_v38, %v17135_v53  ;;  %v17139_v26 = vcombine.high %v17136_v24, %v17136_v24  ;;  %v4382_v11 = vsel %vm4300_vm1, %v3213_v29, 0.0  ;;  %v3264_v63 = vcombine.low %v3256_v14, %v3263_v31  ;;  %v17142_v29 = vld [vmem:[#allocation90_spill] sm:$0xff] }
  0xdf   : > { %v3281_v53 = vcombine.low %v3273_v3, %v3280_v16  ;;  %v4381_v45 = vadd.f32 %v4380_v28, %v4379_v27  ;;  %v3298_v8 = vcombine.low %v3290_v58, %v3297_v56  ;;  %v17141_v7 = vcombine.high %v17138_v1, %v17138_v1  ;;  %v17144_v16 = vld [vmem:[#allocation91_spill] sm:$0xff] }
  0xe0   : > { %v3333_v50 = vcombine.low %v17139_v26, %v17138_v1  ;;  %v3324_v34 = vrot.slane %v3316_v46, %v10039_v10  ;;  %v4384_v48 = vsel %vm4300_vm1, %v3230_v52, 0.0  ;;  %v3315_v39 = vcombine.low %v3307_v2, %v3314_v15  ;;  %v17146_v46 = vld [vmem:[#allocation92_spill] sm:$0xff] }
  0xe1   : > { %v3334_v40 = vcombine.low %v17141_v7, %v17140_v18  ;;  %v3331_v24 = vrot.slane %v3317_v37, %v10039_v10  ;;  %v17143_v0 = vcombine.high %v17142_v29, %v17142_v29  ;;  %v4383_v31 = vadd.f32 %v4382_v11, %v4381_v45  ;;  %v17147_v18 = vld [vmem:[#allocation89_spill] sm:$0xff]  ;;  %v11615_v15 = vld [vmem:[%s16270_s4] sm:$0xff] }
  0xe2   : > { %v3341_v3 = vrot.slane %v3333_v50, %v10039_v10  ;;  %v17145_v58 = vcombine.high %v17144_v16, %v17144_v16  ;;  %v3367_v28 = vcombine.low %v17147_v18, %v17146_v46  ;;  %v4386_v52 = vsel %vm4300_vm1, %v3247_v23, 0.0  ;;  %v17148_v37 = vld [vmem:[#allocation8_spill] sm:$0xff]  ;;  %v17149_v50 = vld [vmem:[#allocation95_spill] sm:$0xff]  ;;  %v17151_v7 = vld [vmem:[#allocation93_spill] sm:$0xff] }
  0xe3   : > { %v3350_v14 = vcombine.low %v17142_v29, %v17143_v0  ;;  %v4385_v2 = vadd.f32 %v4384_v48, %v4383_v31  ;;  %v11618_v11 = vsub.s32 0, %v17148_v37  ;;  %v4606_v27 = vsub.s32 2, %v17148_v37 }
  0xe4   : > { %v3351_v56 = vcombine.low %v17144_v16, %v17145_v58  ;;  %v16473_v1 = vsub.s32 1, %v17148_v37  ;;  %v3348_v26 = vrot.slane %v3334_v40, %v10039_v10  ;;  %v17150_v45 = vcombine.high %v17146_v46, %v17146_v46  ;;  %v17153_v16 = vld [vmem:[#allocation96_spill] sm:$0xff] }
  0xe5   : > { %v17152_v48 = vcombine.high %v17149_v50, %v17149_v50  ;;  %v4388_v0 = vsel %vm4300_vm1, %v3264_v63, 0.0  ;;  %v3332_v31 = vcombine.low %v3324_v34, %v3331_v24  ;;  %v17154_v58 = vcombine.high %v17153_v16, %v17153_v16 }
  0xe6   : > { %v3368_v23 = vcombine.low %v17150_v45, %v17149_v50  ;;  %v4387_v38 = vadd.f32 %v4386_v52, %v4385_v2  ;;  %v4585_v40 = vrot.slane %v11615_v15, %v11618_v11  ;;  %v3358_v46 = vrot.slane %v3350_v14, %v10039_v10 }
  0xe7   : > { %v3384_v29 = vcombine.low %v17152_v48, %v17151_v7  ;;  %v3385_v18 = vcombine.low %v17153_v16, %v17154_v58  ;;  %v3365_v45 = vrot.slane %v3351_v56, %v10039_v10  ;;  %v3375_v36 = vrot.slane %v3367_v28, %v10039_v10  ;;  %v17155_v56 = vld [vmem:[#allocation97_spill] sm:$0xff]  ;;  %v17158_v48 = vld [vmem:[#allocation94_spill] sm:$0xff] }
  0xe8   : > { %v4390_v50 = vsel %vm4300_vm1, %v3281_v53, 0.0  ;;  %v4389_v7 = vadd.f32 %v4388_v0, %v4387_v38  ;;  %4591 = vbcast.lane.b32.xlu1 %v4585_v40, 264  ;;  %4587 = vbcast.lane.b32.xlu0 %v4585_v40, 256  ;;  %v4607_v63 = vrot.slane %v11615_v15, %v4606_v27  ;;  %v4596_v34 = vrot.slane %v11615_v15, %v16473_v1  ;;  %v17157_v27 = vld [vmem:[#allocation98_spill] sm:$0xff]  ;;  %v17159_v16 = vld [vmem:[#allocation101_spill] sm:$0xff] }
  0xe9   : > { %v4617_v24 = vsub.s32 3, %v17148_v37  ;;  %v3382_v52 = vrot.slane %v3368_v23, %v10039_v10  ;;  %v3392_v14 = vrot.slane %v3384_v29, %v10039_v10  ;;  %v17156_v28 = vcombine.high %v17155_v56, %v17155_v56  ;;  %v17161_v29 = vld [vmem:[#allocation99_spill] sm:$0xff] }
  0xea   : > { %v4392_v38 = vsel %vm4300_vm1, %v3298_v8, 0.0  ;;  %v3399_v2 = vrot.slane %v3385_v18, %v10039_v10  ;;  %v3402_v0 = vcombine.low %v17158_v48, %v17157_v27  ;;  %v17160_v58 = vcombine.high %v17157_v27, %v17157_v27  ;;  %v17165_v48 = vld [vmem:[#allocation105_spill] sm:$0xff] }
  0xeb   : > { %v3401_v53 = vcombine.low %v17155_v56, %v17156_v28  ;;  %v4391_v23 = vadd.f32 %v4390_v50, %v4389_v7  ;;  %v3349_v1 = vcombine.low %v3341_v3, %v3348_v26  ;;  %v17162_v59 = vcombine.high %v17159_v16, %v17159_v16  ;;  %v17163_v56 = vld [vmem:[#allocation102_spill] sm:$0xff] }
  0xec   : > { %v3418_v40 = vcombine.low %v17160_v58, %v17159_v16  ;;  %v17164_v8 = vcombine.high %v17163_v56, %v17163_v56  ;;  %v4394_v28 = vsel %vm4300_vm1, %v3315_v39, 0.0  ;;  %v17166_v60 = vcombine.high %v17165_v48, %v17165_v48  ;;  %4609 = vbcast.lane.b32.xlu1 %v4607_v63, 256  ;;  %4598 = vbcast.lane.b32.xlu0 %v4596_v34, 256 }
  0xed   : > { %v3419_v44 = vcombine.low %v17162_v59, %v17161_v29  ;;  %v4393_v58 = vadd.f32 %v4392_v38, %v4391_v23  ;;  %v4618_v3 = vrot.slane %v11615_v15, %v4617_v24  ;;  %v4628_v26 = vsub.s32 4, %v17148_v37  ;;  %v17167_v23 = vld [vmem:[#allocation103_spill] sm:$0xff]  ;;  %v17168_v24 = vld [vmem:[#allocation100_spill] sm:$0xff] }
  0xee   : > { %v3435_v18 = vcombine.low %v17163_v56, %v17164_v8  ;;  %v3436_v27 = vcombine.low %v17165_v48, %v17166_v60  ;;  %v3366_v59 = vcombine.low %v3358_v46, %v3365_v45  ;;  %v3383_v50 = vcombine.low %v3375_v36, %v3382_v52 }
  0xef   : > { %v3409_v7 = vrot.slane %v3401_v53, %v10039_v10  ;;  %v4396_v16 = vsel %vm4300_vm1, %v3332_v31, 0.0  ;;  %v3400_v29 = vcombine.low %v3392_v14, %v3399_v2  ;;  %v3416_v39 = vrot.slane %v3402_v0, %v10039_v10  ;;  %v17169_v14 = vld [vmem:[#allocation107_spill] sm:$0xff]  ;;  %v17171_v2 = vld [vmem:[#allocation104_spill] sm:$0xff] }
  0xf0   : > { %v3426_v56 = vrot.slane %v3418_v40, %v10039_v10  ;;  %v4395_v8 = vadd.f32 %v4394_v28, %v4393_v58  ;;  %v3433_v60 = vrot.slane %v3419_v44, %v10039_v10  ;;  %v3443_v38 = vrot.slane %v3435_v18, %v10039_v10  ;;  %4620 = vbcast.lane.b32.xlu1 %v4618_v3, 256 }
  0xf1   : > { %v3452_v48 = vcombine.low %v17168_v24, %v17167_v23  ;;  %v4398_v46 = vsel %vm4300_vm1, %v3349_v1, 0.0  ;;  %v3450_v36 = vrot.slane %v3436_v27, %v10039_v10  ;;  %4602 = vbcast.lane.b32.xlu0 %v4596_v34, 264  ;;  %v4629_v31 = vrot.slane %v11615_v15, %v4628_v26  ;;  %v17173_v1 = vld [vmem:[#allocation108_spill] sm:$0xff]  ;;  %v17175_v26 = vld [vmem:[#allocation109_spill] sm:$0xff] }
  0xf2   : > { %v4397_v45 = vadd.f32 %v4396_v16, %v4395_v8  ;;  %v4639_v52 = vsub.s32 5, %v17148_v37  ;;  %v17170_v44 = vcombine.high %v17167_v23, %v17167_v23  ;;  %v17172_v0 = vcombine.high %v17169_v14, %v17169_v14 }
  0xf3   : > { %v17174_v18 = vcombine.high %v17173_v1, %v17173_v1  ;;  %v4400_v34 = vsel %vm4300_vm1, %v3366_v59, 0.0  ;;  %v11703_v27 = vrot.slane %v11573_v19, %v10039_v10  ;;  %v3417_v58 = vcombine.low %v3409_v7, %v3416_v39 }
  0xf4   : > { %v3453_v53 = vcombine.low %v17170_v44, %v17169_v14  ;;  %v3469_v40 = vcombine.low %v17172_v0, %v17171_v2  ;;  %v17176_v16 = vcombine.high %v17175_v26, %v17175_v26  ;;  %v4399_v23 = vadd.f32 %v4398_v46, %v4397_v45  ;;  %v17177_v44 = vld [vmem:[#allocation110_spill] sm:$0xff]  ;;  %4631 = vbcast.lane.b32.xlu1 %v4629_v31, 256  ;;  %v17179_v45 = vld [vmem:[#allocation112_spill] sm:$0xff] }
  0xf5   : > { %v3470_v28 = vcombine.low %v17173_v1, %v17174_v18  ;;  %v3434_v24 = vcombine.low %v3426_v56, %v3433_v60  ;;  %v3460_v14 = vrot.slane %v3452_v48, %v10039_v10  ;;  %v17178_v2 = vld [vmem:[#allocation106_spill] sm:$0xff]  ;;  %v4402_v1 = vsel %vm4300_vm1, %v3383_v50, 0.0  ;;  %4613 = vbcast.lane.b32.xlu0 %v4607_v63, 264  ;;  %v17181_v63 = vld [vmem:[#allocation111_spill] sm:$0xff] }
  0xf6   : > { %v3486_v8 = vcombine.low %v17175_v26, %v17176_v16  ;;  %v3487_v0 = vcombine.low %v17178_v2, %v17177_v44  ;;  %v3451_v59 = vcombine.low %v3443_v38, %v3450_v36  ;;  %v4401_v18 = vadd.f32 %v4400_v34, %v4399_v23  ;;  %v17185_v26 = vld [vmem:[#allocation115_spill] sm:$0xff] }
  0xf7   : > { %v4640_v7 = vrot.slane %v11615_v15, %v4639_v52  ;;  %v4650_v39 = vsub.s32 6, %v17148_v37  ;;  %v3467_v62 = vrot.slane %v3453_v53, %v10039_v10  ;;  %v3477_v46 = vrot.slane %v3469_v40, %v10039_v10  ;;  %v17183_v40 = vld [vmem:[#allocation114_spill] sm:$0xff] }
  0xf8   : > { %v3484_v56 = vrot.slane %v3470_v28, %v10039_v10  ;;  %v4404_v60 = vsel %vm4300_vm1, %v3400_v29, 0.0  ;;  %v3494_v48 = vrot.slane %v3486_v8, %v10039_v10  ;;  %v17180_v50 = vcombine.high %v17177_v44, %v17177_v44 }
  0xf9   : > { %v17182_v36 = vcombine.high %v17179_v45, %v17179_v45  ;;  %v4403_v34 = vadd.f32 %v4402_v1, %v4401_v18  ;;  %v3501_v53 = vrot.slane %v3487_v0, %v10039_v10  ;;  %v17184_v28 = vcombine.high %v17183_v40, %v17183_v40  ;;  %4642 = vbcast.lane.b32.xlu1 %v4640_v7, 256 }
  0xfa   : > { %v3503_v38 = vcombine.low %v17180_v50, %v17179_v45  ;;  %v17186_v16 = vcombine.high %v17185_v26, %v17185_v26  ;;  %v4406_v23 = vsel %vm4300_vm1, %v3417_v58, 0.0  ;;  %4624 = vbcast.lane.b32.xlu0 %v4618_v3, 264  ;;  %v4651_v0 = vrot.slane %v11615_v15, %v4650_v39  ;;  %v17187_v45 = vld [vmem:[#allocation116_spill] sm:$0xff]  ;;  %v17188_v50 = vld [vmem:[#allocation113_spill] sm:$0xff] }
  0xfb   : > { %v3504_v52 = vcombine.low %v17182_v36, %v17181_v63  ;;  %v3520_v29 = vcombine.low %v17183_v40, %v17184_v28  ;;  %v4405_v2 = vadd.f32 %v4404_v60, %v4403_v34  ;;  %v4661_v1 = vsub.s32 7, %v17148_v37  ;;  %v17189_v36 = vld [vmem:[#allocation119_spill] sm:$0xff] }
  0xfc   : > { %v3521_v8 = vcombine.low %v17185_v26, %v17186_v16  ;;  %v3468_v18 = vcombine.low %v3460_v14, %v3467_v62  ;;  %v3537_v63 = vcombine.low %v17188_v50, %v17187_v45  ;;  %v17190_v40 = vcombine.high %v17187_v45, %v17187_v45  ;;  %v17191_v50 = vld [vmem:[#allocation117_spill] sm:$0xff] }
  0xfd   : > { %v4408_v58 = vsel %vm4300_vm1, %v3434_v24, 0.0  ;;  %v3485_v26 = vcombine.low %v3477_v46, %v3484_v56  ;;  %v3511_v60 = vrot.slane %v3503_v38, %v10039_v10  ;;  %v3518_v3 = vrot.slane %v3504_v52, %v10039_v10  ;;  %4653 = vbcast.lane.b32.xlu1 %v4651_v0, 256 }
  0xfe   : > { %v3538_v28 = vcombine.low %v17190_v40, %v17189_v36  ;;  %v4407_v34 = vadd.f32 %v4406_v23, %v4405_v2  ;;  %v3502_v39 = vcombine.low %v3494_v48, %v3501_v53  ;;  %v3528_v16 = vrot.slane %v3520_v29, %v10039_v10  ;;  %4635 = vbcast.lane.b32.xlu0 %v4629_v31, 264  ;;  %v17193_v48 = vld [vmem:[#allocation120_spill] sm:$0xff] }
  0xff   : > { %v3535_v62 = vrot.slane %v3521_v8, %v10039_v10  ;;  %v4410_v14 = vsel %vm4300_vm1, %v3451_v59, 0.0  ;;  %v17192_v45 = vcombine.high %v17189_v36, %v17189_v36  ;;  %v4662_v24 = vrot.slane %v11615_v15, %v4661_v1  ;;  %v4581_v53 = vld [vmem:[%s16270_s4 + $0x8] sm:$0x3]  ;;  %v17196_v8 = vld [vmem:[#allocation121_spill] sm:$0xff]  ;;  %v17199_v36 = vld [vmem:[#allocation118_spill] sm:$0xff] }
 0x100   : > { %v4409_v44 = vadd.f32 %v4408_v58, %v4407_v34  ;;  %v3545_v46 = vrot.slane %v3537_v63, %v10039_v10  ;;  %v3552_v56 = vrot.slane %v3538_v28, %v10039_v10  ;;  %v17194_v38 = vcombine.high %v17193_v48, %v17193_v48  ;;  %v17198_v63 = vld [vmem:[#allocation122_spill] sm:$0xff]  ;;  %v17200_v28 = vld [vmem:[#allocation125_spill] sm:$0xff] }
 0x101   : > { %v3554_v40 = vcombine.low %v17192_v45, %v17191_v50  ;;  %v4412_v59 = vsel %vm4300_vm1, %v3468_v18, 0.0  ;;  %v17195_v31 = vcombine.high %v11484_v32, %v11484_v32  ;;  %v3519_v29 = vcombine.low %v3511_v60, %v3518_v3  ;;  %v17202_v50 = vld [vmem:[#allocation123_spill] sm:$0xff]  ;;  %4664 = vbcast.lane.b32.xlu1 %v4662_v24, 256 }
 0x102   : > { %v3555_v52 = vcombine.low %v17193_v48, %v17194_v38  ;;  %v17197_v23 = vcombine.high %v17196_v8, %v17196_v8  ;;  %v4411_v1 = vadd.f32 %v4410_v14, %v4409_v44  ;;  %v3572_v18 = vcombine.low %v17199_v36, %v17198_v63  ;;  %4646 = vbcast.lane.b32.xlu0 %v4640_v7, 264 }
 0x103   : > { %v11773_v15 = vrot.slane %v17195_v31, %v10039_v10  ;;  %v17201_v58 = vcombine.high %v17198_v63, %v17198_v63  ;;  %v17203_v32 = vcombine.high %v17200_v28, %v17200_v28  ;;  %v4414_v60 = vsel %vm4300_vm1, %v3485_v26, 0.0  ;;  %v17204_v63 = vld [vmem:[#allocation126_spill] sm:$0xff] }
 0x104   : > { %v3571_v2 = vcombine.low %v17196_v8, %v17197_v23  ;;  %v3536_v3 = vcombine.low %v3528_v16, %v3535_v62  ;;  %v4413_v48 = vadd.f32 %v4412_v59, %v4411_v1  ;;  %v4673_v44 = vrot.slane %v4581_v53, %v11618_v11  ;;  %v17206_v16 = vld [vmem:[#allocation129_spill] sm:$0xff]  ;;  %v17209_v1 = vld [vmem:[#allocation124_spill] sm:$0xff] }
 0x105   : > { %v3588_v34 = vcombine.low %v17201_v58, %v17200_v28  ;;  %v3589_v45 = vcombine.low %v17203_v32, %v17202_v50  ;;  %v3553_v14 = vcombine.low %v3545_v46, %v3552_v56  ;;  %v3562_v38 = vrot.slane %v3554_v40, %v10039_v10 }
 0x106   : > { %v3569_v31 = vrot.slane %v3555_v52, %v10039_v10  ;;  %v4416_v8 = vsel %vm4300_vm1, %v3502_v39, 0.0  ;;  %v3579_v23 = vrot.slane %v3571_v2, %v10039_v10  ;;  %v17205_v36 = vcombine.high %v17204_v63, %v17204_v63  ;;  %v11808_v52 = vld [vmem:[%s10031_s15 + $0x4b8] sm:$0x3]  ;;  %v17208_v2 = vld [vmem:[#allocation127_spill] sm:$0xff]  ;;  %4675 = vbcast.lane.b32.xlu1 %v4673_v44, 256  ;;  %4657 = vbcast.lane.b32.xlu0 %v4651_v0, 264 }
 0x107   : > { %v17207_v62 = vcombine.high %v17206_v16, %v17206_v16  ;;  %v4415_v59 = vadd.f32 %v4414_v60, %v4413_v48  ;;  %v3586_v46 = vrot.slane %v3572_v18, %v10039_v10  ;;  %v3596_v40 = vrot.slane %v3588_v34, %v10039_v10  ;;  %v17211_v34 = vld [vmem:[#allocation131_spill] sm:$0xff] }
 0x108   : > { %v3605_v26 = vcombine.low %v17204_v63, %v17205_v36  ;;  %v3603_v56 = vrot.slane %v3589_v45, %v10039_v10  ;;  %v4418_v39 = vsel %vm4300_vm1, %v3519_v29, 0.0  ;;  %v3622_v28 = vcombine.low %v17209_v1, %v17208_v2  ;;  %v17213_v36 = vld [vmem:[#allocation128_spill] sm:$0xff] }
 0x109   : > { %v3606_v7 = vcombine.low %v17206_v16, %v17207_v62  ;;  %v4417_v58 = vadd.f32 %v4416_v8, %v4415_v59  ;;  %v17210_v50 = vsub.s32 1, %v17148_v37  ;;  %v2371_v18 = vcombine.high %v11517_v35, %v11517_v35  ;;  %v17215_v16 = vld [vmem:[#allocation132_spill] sm:$0xff] }
 0x10a   : > { %v3570_v60 = vcombine.low %v3562_v38, %v3569_v31  ;;  %v17212_v45 = vcombine.high %v17208_v2, %v17208_v2  ;;  %v4420_v48 = vsel %vm4300_vm1, %v3536_v3, 0.0  ;;  %v3613_v63 = vrot.slane %v3605_v26, %v10039_v10  ;;  %4668 = vbcast.lane.b32.xlu0 %v4662_v24, 264 }
 0x10b   : > { %v4684_v32 = vrot.slane %v4581_v53, %v17210_v50  ;;  %v3620_v8 = vrot.slane %v3606_v7, %v10039_v10  ;;  %v17214_v37 = vcombine.high %v17211_v34, %v17211_v34  ;;  %v4419_v53 = vadd.f32 %v4418_v39, %v4417_v58  ;;  %v17217_v39 = vld [vmem:[#allocation133_spill] sm:$0xff]  ;;  %v17220_v50 = vld [vmem:[#allocation130_spill] sm:$0xff] }
 0x10c   : > { %v3623_v29 = vcombine.low %v17212_v45, %v17211_v34  ;;  %v2403_v38 = vrot.slane %v11808_v52, %v10039_v10  ;;  %v3587_v31 = vcombine.low %v3579_v23, %v3586_v46  ;;  %v17216_v62 = vcombine.high %v17215_v16, %v17215_v16  ;;  %v17219_v46 = vld [vmem:[#allocation134_spill] sm:$0xff] }
 0x10d   : > { %v3639_v0 = vcombine.low %v17214_v37, %v17213_v36  ;;  %v4422_v3 = vsel %vm4300_vm1, %v3553_v14, 0.0  ;;  %v3604_v26 = vcombine.low %v3596_v40, %v3603_v56  ;;  %v3630_v7 = vrot.slane %v3622_v28, %v10039_v10  ;;  %4686 = vbcast.lane.b32.xlu1 %v4684_v32, 256 }
 0x10e   : > { %v3640_v59 = vcombine.low %v17215_v16, %v17216_v62  ;;  %v4421_v2 = vadd.f32 %v4420_v48, %v4419_v53  ;;  %v3637_v1 = vrot.slane %v3623_v29, %v10039_v10  ;;  %v17218_v58 = vcombine.high %v17217_v39, %v17217_v39  ;;  %v17222_v48 = vld [vmem:[#allocation136_spill] sm:$0xff]  ;;  %v17224_v53 = vld [vmem:[#allocation135_spill] sm:$0xff]  ;;  %v17226_v62 = vld [vmem:[#allocation138_spill] sm:$0xff]  ;;  %4679 = vbcast.lane.b32.xlu0 %v4673_v44, 264 }
 0x10f   : > { %v3657_v34 = vcombine.low %v17220_v50, %v17219_v46  ;;  %v4424_v45 = vsel %vm4300_vm1, %v3570_v60, 0.0  ;;  %v17221_v14 = vcombine.high %v11573_v19, %v11573_v19  ;;  %v3621_v56 = vcombine.low %v3613_v63, %v3620_v8  ;;  %v11872_v50 = vld [vmem:[%s10031_s15 + $0x4c0] sm:$0xff] }
 0x110   : > { %v3656_v23 = vcombine.low %v17217_v39, %v17218_v58  ;;  %v3647_v24 = vrot.slane %v3639_v0, %v10039_v10  ;;  %v4423_v28 = vadd.f32 %v4422_v3, %v4421_v2  ;;  %v3654_v29 = vrot.slane %v3640_v59, %v10039_v10  ;;  %v17228_v0 = vld [vmem:[#allocation139_spill] sm:$0xff] }
 0x111   : > { %v11847_v40 = vrot.slane %v17221_v14, %v10039_v10  ;;  %v17223_v36 = vcombine.high %v17219_v46, %v17219_v46  ;;  %v17225_v60 = vcombine.high %v17222_v48, %v17222_v48  ;;  %v4426_v19 = vsel %vm4300_vm1, %v3587_v31, 0.0  ;;  %4690 = vbcast.lane.b32.xlu1 %v4684_v32, 264 }
 0x112   : > { %v17227_v63 = vcombine.high %v17226_v62, %v17226_v62  ;;  %v17229_v59 = vcombine.high %v17228_v0, %v17228_v0  ;;  %v4425_v2 = vadd.f32 %v4424_v45, %v4423_v28  ;;  %v3638_v39 = vcombine.low %v3630_v7, %v3637_v1 }
 0x113   : > { %v3673_v37 = vcombine.low %v17223_v36, %v17222_v48  ;;  %v3674_v16 = vcombine.low %v17225_v60, %v17224_v53  ;;  %v3664_v58 = vrot.slane %v3656_v23, %v10039_v10  ;;  %v3671_v46 = vrot.slane %v3657_v34, %v10039_v10  ;;  %v17230_v48 = vld [vmem:[#allocation140_spill] sm:$0xff]  ;;  %v17231_v36 = vld [vmem:[#allocation137_spill] sm:$0xff] }
 0x114   : > { %v3690_v8 = vcombine.low %v17226_v62, %v17227_v63  ;;  %v3691_v3 = vcombine.low %v17228_v0, %v17229_v59  ;;  %v4428_v31 = vsel %vm4300_vm1, %v3604_v26, 0.0  ;;  %v2395_v14 = vcombine.high %v11703_v27, %v11703_v27  ;;  %v17233_v60 = vld [vmem:[#allocation141_spill] sm:$0xff]  ;;  %v17236_v59 = vld [vmem:[#allocation144_spill] sm:$0xff] }
 0x115   : > { %v3707_v53 = vcombine.low %v17231_v36, %v17230_v48  ;;  %v17232_v32 = vcombine.high %v17230_v48, %v17230_v48  ;;  %v4427_v7 = vadd.f32 %v4426_v19, %v4425_v2  ;;  %v3655_v1 = vcombine.low %v3647_v24, %v3654_v29  ;;  %v17239_v48 = vld [vmem:[#allocation142_spill] sm:$0xff] }
 0x116   : > { %v3681_v23 = vrot.slane %v3673_v37, %v10039_v10  ;;  %v3688_v26 = vrot.slane %v3674_v16, %v10039_v10  ;;  %v4430_v34 = vsel %vm4300_vm1, %v3621_v56, 0.0  ;;  %v3698_v45 = vrot.slane %v3690_v8, %v10039_v10 }
 0x117   : > { %v3708_v44 = vcombine.low %v17232_v32, %v10849_v17  ;;  %v3705_v28 = vrot.slane %v3691_v3, %v10039_v10  ;;  %v17234_v62 = vcombine.high %v10849_v17, %v10849_v17  ;;  %v4429_v0 = vadd.f32 %v4428_v31, %v4427_v7  ;;  %v11905_v31 = vld [vmem:[%s10031_s15 + $0x4c8] sm:$0x3] }
 0x118   : > { %v2404_v24 = vcombine.high %v11872_v50, %v11872_v50  ;;  %v3672_v29 = vcombine.low %v3664_v58, %v3671_v46  ;;  %v17235_v37 = vcombine.high %v10852_v47, %v10852_v47  ;;  %v4432_v16 = vsel %vm4300_vm1, %v3638_v39, 0.0 }
 0x119   : > { %v3724_v63 = vcombine.low %v17234_v62, %v17233_v60  ;;  %v3715_v19 = vrot.slane %v3707_v53, %v10039_v10  ;;  %v3722_v8 = vrot.slane %v3708_v44, %v10039_v10  ;;  %v17237_v17 = vcombine.high %v17236_v59, %v17236_v59  ;;  %v17240_v62 = vld [vmem:[#allocation147_spill] sm:$0xff] }
 0x11a   : > { %v3725_v56 = vcombine.low %v10852_v47, %v17235_v37  ;;  %v4431_v2 = vadd.f32 %v4430_v34, %v4429_v0  ;;  %v11909_v58 = vrot.slane %v11872_v50, %v10039_v10  ;;  %v3689_v46 = vcombine.low %v3681_v23, %v3688_v26  ;;  %v17238_v47 = vld [vmem:[#allocation145_spill] sm:$0xff]  ;;  %v17242_v0 = vld [vmem:[#allocation143_spill] sm:$0xff] }
 0x11b   : > { %v3741_v3 = vcombine.low %v17236_v59, %v17237_v17  ;;  %v3742_v39 = vcombine.low %v17239_v48, %v17238_v47  ;;  %v4434_v36 = vsel %vm4300_vm1, %v3655_v1, 0.0  ;;  %v2372_v53 = vcombine.high %v11773_v15, %v11773_v15  ;;  %v11918_v34 = vld [vmem:[%s10031_s15 + $0x4d0] sm:$0xff] }
 0x11c   : > { %v3706_v32 = vcombine.low %v3698_v45, %v3705_v28  ;;  %v3732_v44 = vrot.slane %v3724_v63, %v10039_v10  ;;  %v4433_v7 = vadd.f32 %v4432_v16, %v4431_v2  ;;  %v3739_v60 = vrot.slane %v3725_v56, %v10039_v10 }
 0x11d   : > { %v17241_v23 = vcombine.high %v17238_v47, %v17238_v47  ;;  %v17243_v1 = vcombine.high %v17240_v62, %v17240_v62  ;;  %v4436_v59 = vsel %vm4300_vm1, %v3672_v29, 0.0  ;;  %v3723_v28 = vcombine.low %v3715_v19, %v3722_v8  ;;  %v17246_v8 = vld [vmem:[#allocation149_spill] sm:$0xff] }
 0x11e   : > { %v3749_v63 = vrot.slane %v3741_v3, %v10039_v10  ;;  %v4435_v16 = vadd.f32 %v4434_v36, %v4433_v7  ;;  %v3756_v56 = vrot.slane %v3742_v39, %v10039_v10  ;;  %v17244_v17 = vcombine.high %v10881_v5, %v10881_v5  ;;  %v17247_v3 = vld [vmem:[#allocation146_spill] sm:$0xff]  ;;  %v17248_v7 = vld [vmem:[#allocation151_spill] sm:$0xff] }
 0x11f   : > { %v3758_v26 = vcombine.low %v17241_v23, %v17240_v62  ;;  %v3759_v37 = vcombine.low %v17243_v1, %v17242_v0  ;;  %v17245_v47 = vcombine.high %v10892_v61, %v10892_v61  ;;  %v4438_v29 = vsel %vm4300_vm1, %v3689_v46, 0.0 }
 0x120   : > { %v3775_v2 = vcombine.low %v10881_v5, %v17244_v17  ;;  %v2428_v19 = vcombine.high %v11918_v34, %v11918_v34  ;;  %v3792_v36 = vcombine.low %v17247_v3, %v17246_v8  ;;  %v17249_v39 = vcombine.high %v17246_v8, %v17246_v8  ;;  %v17250_v17 = vld [vmem:[#allocation148_spill] sm:$0xff] }
 0x121   : > { %v3776_v48 = vcombine.low %v10892_v61, %v17245_v47  ;;  %v4437_v23 = vadd.f32 %v4436_v59, %v4435_v16  ;;  %v3740_v5 = vcombine.low %v3732_v44, %v3739_v60  ;;  %v3766_v0 = vrot.slane %v3758_v26, %v10039_v10 }
 0x122   : > { %v3793_v62 = vcombine.low %v17249_v39, %v17248_v7  ;;  %v3773_v1 = vrot.slane %v3759_v37, %v10039_v10  ;;  %v4440_v61 = vsel %vm4300_vm1, %v3706_v32, 0.0  ;;  %v11956_v46 = vrot.slane %v11918_v34, %v10039_v10 }
 0x123   : > { %v17251_v47 = vcombine.high %v17248_v7, %v17248_v7  ;;  %v17252_v8 = vcombine.high %v10904_v6, %v10904_v6  ;;  %v4439_v60 = vadd.f32 %v4438_v29, %v4437_v23  ;;  %v3757_v26 = vcombine.low %v3749_v63, %v3756_v56  ;;  %v17254_v56 = vld [vmem:[#allocation152_spill] sm:$0xff] }
 0x124   : > { %v3783_v37 = vrot.slane %v3775_v2, %v10039_v10  ;;  %v3790_v32 = vrot.slane %v3776_v48, %v10039_v10  ;;  %v4442_v59 = vsel %vm4300_vm1, %v3723_v28, 0.0  ;;  %v3800_v16 = vrot.slane %v3792_v36, %v10039_v10  ;;  %v17255_v2 = vld [vmem:[#allocation150_spill] sm:$0xff] }
 0x125   : > { %v3809_v3 = vcombine.low %v17251_v47, %v17250_v17  ;;  %v3810_v44 = vcombine.low %v10904_v6, %v17252_v8  ;;  %v3807_v39 = vrot.slane %v3793_v62, %v10039_v10  ;;  %v17253_v7 = vcombine.high %v10915_v4, %v10915_v4 }
 0x126   : > { %v4441_v47 = vadd.f32 %v4440_v61, %v4439_v60  ;;  %v2396_v6 = vcombine.high %v11847_v40, %v11847_v40  ;;  %v3774_v63 = vcombine.low %v3766_v0, %v3773_v1  ;;  %v3827_v29 = vcombine.low %v17255_v2, %v17254_v56  ;;  %v11987_v61 = vld.sshfl [vmem:[%s10031_s15 + $0x4d8] sm:$0x3 pattern:$0x76325410]  ;;  %v17257_v1 = vld [vmem:[#allocation153_spill] sm:$0xff]  ;;  %v17259_v2 = vld [vmem:[#allocation155_spill] sm:$0xff] }
 0x127   : > { %v3826_v17 = vcombine.low %v10915_v4, %v17253_v7  ;;  %v4444_v48 = vsel %vm4300_vm1, %v3740_v5, 0.0  ;;  %v3817_v28 = vrot.slane %v3809_v3, %v10039_v10  ;;  %v3824_v36 = vrot.slane %v3810_v44, %v10039_v10 }
 0x128   : > { %v17256_v62 = vcombine.high %v17254_v56, %v17254_v56  ;;  %v4443_v4 = vadd.f32 %v4442_v59, %v4441_v47  ;;  %v11990_v8 = vrot.slane %v2404_v24, %v10039_v10  ;;  %v3791_v0 = vcombine.low %v3783_v37, %v3790_v32  ;;  %v17261_v32 = vld [vmem:[#allocation158_spill] sm:$0xff] }
 0x129   : > { %v17258_v5 = vcombine.high %v10918_v12, %v10918_v12  ;;  %v4446_v3 = vsel %vm4300_vm1, %v3757_v26, 0.0  ;;  %v2419_v44 = vcombine.high %v11909_v58, %v11909_v58  ;;  %v3808_v7 = vcombine.low %v3800_v16, %v3807_v39 }
 0x12a   : > { %v3843_v23 = vcombine.low %v17256_v62, %v10918_v12  ;;  %v3834_v56 = vrot.slane %v3826_v17, %v10039_v10  ;;  %v4445_v59 = vadd.f32 %v4444_v48, %v4443_v4  ;;  %v3841_v47 = vrot.slane %v3827_v29, %v10039_v10  ;;  %v17263_v29 = vld [vmem:[#allocation157_spill] sm:$0xff]  ;;  %v17264_v48 = vld [vmem:[#allocation154_spill] sm:$0xff] }
 0x12b   : > { %v3844_v60 = vcombine.low %v17258_v5, %v17257_v1  ;;  %v17260_v24 = vcombine.high %v17259_v2, %v17259_v2  ;;  %v17262_v12 = vcombine.high %v17261_v32, %v17261_v32  ;;  %v4448_v26 = vsel %vm4300_vm1, %v3774_v63, 0.0  ;;  %v17265_v5 = vld [vmem:[#allocation160_spill] sm:$0xff] }
 0x12c   : > { %v3825_v1 = vcombine.low %v3817_v28, %v3824_v36  ;;  %v3851_v16 = vrot.slane %v3843_v23, %v10039_v10  ;;  %v4447_v39 = vadd.f32 %v4446_v3, %v4445_v59  ;;  %v3877_v4 = vcombine.low %v17264_v48, %v17263_v29  ;;  %v17267_v63 = vld [vmem:[#allocation156_spill] sm:$0xff]  ;;  %v17269_v23 = vld [vmem:[#allocation161_spill] sm:$0xff] }
 0x12d   : > { %v3860_v37 = vcombine.low %v17259_v2, %v17260_v24  ;;  %v3861_v62 = vcombine.low %v17261_v32, %v17262_v12  ;;  %v3858_v17 = vrot.slane %v3844_v60, %v10039_v10  ;;  %v17266_v2 = vcombine.high %v17263_v29, %v17263_v29 }
 0x12e   : > { %v4450_v45 = vsel %vm4300_vm1, %v3791_v0, 0.0  ;;  %v12020_v32 = vrot.slane %v2428_v19, %v10039_v10  ;;  %v17268_v28 = vcombine.high %v17265_v5, %v17265_v5  ;;  %v17270_v60 = vcombine.high %v17269_v23, %v17269_v23  ;;  %v12034_v19 = vld [vmem:[%s10031_s15 + $0x4e0] sm:$0xff] }
 0x12f   : > { %v3878_v24 = vcombine.low %v17266_v2, %v17265_v5  ;;  %v4449_v59 = vadd.f32 %v4448_v26, %v4447_v39  ;;  %v3842_v12 = vcombine.low %v3834_v56, %v3841_v47  ;;  %v3868_v29 = vrot.slane %v3860_v37, %v10039_v10 }
 0x130   : > { %v3894_v36 = vcombine.low %v17268_v28, %v17267_v63  ;;  %v3895_v3 = vcombine.low %v17269_v23, %v17270_v60  ;;  %v3875_v48 = vrot.slane %v3861_v62, %v10039_v10  ;;  %v4452_v0 = vsel %vm4300_vm1, %v3808_v7, 0.0  ;;  %v17272_v28 = vld [vmem:[#allocation162_spill] sm:$0xff]  ;;  %v17273_v23 = vld [vmem:[#allocation159_spill] sm:$0xff] }
 0x131   : > { %v17271_v5 = vcombine.high %v10999_v33, %v10999_v33  ;;  %v3912_v26 = vcombine.low %v17273_v23, %v17272_v28  ;;  %v4451_v56 = vadd.f32 %v4450_v45, %v4449_v59  ;;  %v3859_v47 = vcombine.low %v3851_v16, %v3858_v17  ;;  %v17275_v17 = vld [vmem:[#allocation163_spill] sm:$0xff]  ;;  %v12067_v23 = vld.sshfl [vmem:[%s10031_s15 + $0x4e8] sm:$0x3 pattern:$0x76325410] }
 0x132   : > { %v3885_v37 = vrot.slane %v3877_v4, %v10039_v10  ;;  %v3892_v7 = vrot.slane %v3878_v24, %v10039_v10  ;;  %v4454_v62 = vsel %vm4300_vm1, %v3825_v1, 0.0  ;;  %v3902_v39 = vrot.slane %v3894_v36, %v10039_v10 }
 0x133   : > { %v3911_v63 = vcombine.low %v10999_v33, %v17271_v5  ;;  %v3909_v60 = vrot.slane %v3895_v3, %v10039_v10  ;;  %v17274_v33 = vcombine.high %v17272_v28, %v17272_v28  ;;  %v4453_v2 = vadd.f32 %v4452_v0, %v4451_v56 }
 0x134   : > { %v2452_v45 = vcombine.high %v12034_v19, %v12034_v19  ;;  %v3876_v16 = vcombine.low %v3868_v29, %v3875_v48  ;;  %v17276_v4 = vcombine.high %v11010_v22, %v11010_v22  ;;  %v4456_v24 = vsel %vm4300_vm1, %v3842_v12, 0.0 }
 0x135   : > { %v3928_v5 = vcombine.low %v17274_v33, %v11010_v22  ;;  %v3919_v36 = vrot.slane %v3911_v63, %v10039_v10  ;;  %v3926_v3 = vrot.slane %v3912_v26, %v10039_v10  ;;  %v17277_v59 = vcombine.high %v11044_v42, %v11044_v42 }
 0x136   : > { %v3929_v1 = vcombine.low %v17276_v4, %v17275_v17  ;;  %v4455_v28 = vadd.f32 %v4454_v62, %v4453_v2  ;;  %v12071_v29 = vrot.slane %v12034_v19, %v10039_v10  ;;  %v3893_v22 = vcombine.low %v3885_v37, %v3892_v7  ;;  %v12082_v62 = vld [vmem:[%s10031_s15 + $0x4f0] sm:$0xff]  ;;  %v17279_v37 = vld [vmem:[#allocation164_spill] sm:$0xff] }
 0x137   : > { %v3945_v0 = vcombine.low %v11044_v42, %v17277_v59  ;;  %v17278_v12 = vcombine.high %v11090_v57, %v11090_v57  ;;  %v4458_v63 = vsel %vm4300_vm1, %v3859_v47, 0.0  ;;  %v2420_v26 = vcombine.high %v11990_v8, %v11990_v8 }
 0x138   : > { %v3910_v56 = vcombine.low %v3902_v39, %v3909_v60  ;;  %v3936_v42 = vrot.slane %v3928_v5, %v10039_v10  ;;  %v4457_v2 = vadd.f32 %v4456_v24, %v4455_v28  ;;  %v3943_v33 = vrot.slane %v3929_v1, %v10039_v10 }
 0x139   : > { %v3946_v48 = vcombine.low %v11090_v57, %v17278_v12  ;;  %v3962_v7 = vcombine.low %v17279_v37, %v11055_v41  ;;  %v17280_v57 = vcombine.high %v11055_v41, %v11055_v41  ;;  %v4460_v47 = vsel %vm4300_vm1, %v3876_v16, 0.0 }
 0x13a   : > { %v3927_v4 = vcombine.low %v3919_v36, %v3926_v3  ;;  %v3953_v39 = vrot.slane %v3945_v0, %v10039_v10  ;;  %v4459_v60 = vadd.f32 %v4458_v63, %v4457_v2  ;;  %v17281_v1 = vcombine.high %v11130_v9, %v11130_v9 }
 0x13b   : > { %v3963_v17 = vcombine.low %v17280_v57, %v11130_v9  ;;  %v3960_v5 = vrot.slane %v3946_v48, %v10039_v10  ;;  %v17282_v59 = vcombine.high %v11172_v54, %v11172_v54  ;;  %v4462_v41 = vsel %vm4300_vm1, %v3893_v22, 0.0 }
 0x13c   : > { %v3979_v24 = vcombine.low %v17281_v1, %v11103_v49  ;;  %v2476_v16 = vcombine.high %v12082_v62, %v12082_v62  ;;  %v17283_v36 = vcombine.high %v11246_v51, %v11246_v51  ;;  %v3997_v0 = vcombine.low %v11182_v20, %v11226_v13 }
 0x13d   : > { %v3980_v28 = vcombine.low %v11172_v54, %v17282_v59  ;;  %v4461_v9 = vadd.f32 %v4460_v47, %v4459_v60  ;;  %v3944_v49 = vcombine.low %v3936_v42, %v3943_v33  ;;  %v3970_v12 = vrot.slane %v3962_v7, %v10039_v10  ;;  %v17288_v59 = vld [vmem:[#allocation12_spill] sm:$0xff] }
 0x13e   : > { %v3996_v3 = vcombine.low %v11246_v51, %v17283_v36  ;;  %v3977_v48 = vrot.slane %v3963_v17, %v10039_v10  ;;  %v4464_v54 = vsel %vm4300_vm1, %v3910_v56, 0.0  ;;  %v12116_v22 = vrot.slane %v12082_v62, %v10039_v10  ;;  %v12147_v36 = vld [vmem:[%s10031_s15 + $0x4f8] sm:$0x3] }
 0x13f   : > { %v17284_v63 = vcombine.high %v11226_v13, %v11226_v13  ;;  %v17285_v20 = vcombine.high %v11285_v30, %v11285_v30  ;;  %v4463_v2 = vadd.f32 %v4462_v41, %v4461_v9  ;;  %v3961_v33 = vcombine.low %v3953_v39, %v3960_v5  ;;  %17290 = vst [vmem:[#allocation11_spill] sm:$0xff] %v12147_v36 }
 0x140   : > { %v3987_v37 = vrot.slane %v3979_v24, %v10039_v10  ;;  %v3994_v56 = vrot.slane %v3980_v28, %v10039_v10  ;;  %v4466_v7 = vsel %vm4300_vm1, %v3927_v4, 0.0  ;;  %v4004_v57 = vrot.slane %v3996_v3, %v10039_v10  ;;  %v17289_v28 = vld [vmem:[#allocation10_spill] sm:$0xff] }
 0x141   : > { %v4013_v51 = vcombine.low %v17284_v63, %v11285_v30  ;;  %v4014_v42 = vcombine.low %v17285_v20, %v11258_v43  ;;  %v4011_v17 = vrot.slane %v3997_v0, %v10039_v10  ;;  %v17286_v13 = vcombine.high %v11327_v55, %v11327_v55  ;;  %v17292_v20 = vld [vmem:[#allocation13_spill] sm:$0xff] }
 0x142   : > { %v4465_v30 = vadd.f32 %v4464_v54, %v4463_v2  ;;  %v2444_v43 = vcombine.high %v12020_v32, %v12020_v32  ;;  %v3978_v39 = vcombine.low %v3970_v12, %v3977_v48  ;;  %v17287_v60 = vcombine.high %v11401_v25, %v11401_v25 }
 0x143   : > { %v4030_v47 = vcombine.low %v11327_v55, %v17286_v13  ;;  %v4468_v4 = vsel %vm4300_vm1, %v3944_v49, 0.0  ;;  %v4021_v1 = vrot.slane %v4013_v51, %v10039_v10  ;;  %v4028_v24 = vrot.slane %v4014_v42, %v10039_v10  ;;  %v17294_v13 = vld [vmem:[#allocation14_spill] sm:$0xff] }
 0x144   : > { %v4031_v5 = vcombine.low %v11401_v25, %v17287_v60  ;;  %v4047_v41 = vcombine.low %v17289_v28, %v17288_v59  ;;  %v4467_v55 = vadd.f32 %v4466_v7, %v4465_v30  ;;  %v2466_v3 = vrot.slane %v2452_v45, %v10039_v10 }
 0x145   : > { %v3995_v0 = vcombine.low %v3987_v37, %v3994_v56  ;;  %v17291_v9 = vcombine.high %v17288_v59, %v17288_v59  ;;  %v4470_v49 = vsel %vm4300_vm1, %v3961_v33, 0.0  ;;  %v2467_v12 = vcombine.high %v12071_v29, %v12071_v29 }
 0x146   : > { %v4012_v48 = vcombine.low %v4004_v57, %v4011_v17  ;;  %v4038_v54 = vrot.slane %v4030_v47, %v10039_v10  ;;  %v4469_v63 = vadd.f32 %v4468_v4, %v4467_v55  ;;  %v4045_v51 = vrot.slane %v4031_v5, %v10039_v10 }
 0x147   : > { %v4048_v25 = vcombine.low %v17291_v9, %v11440_v21  ;;  %v17293_v45 = vcombine.high %v11440_v21, %v11440_v21  ;;  %v4065_v2 = vcombine.low %v11517_v35, %v2371_v18  ;;  %v4472_v33 = vsel %vm4300_vm1, %v3978_v39, 0.0 }
 0x148   : > { %v2499_v37 = vrot.slane %v12147_v36, %v10039_v10  ;;  %v4029_v56 = vcombine.low %v4021_v1, %v4028_v24  ;;  %v4055_v7 = vrot.slane %v4047_v41, %v10039_v10  ;;  %v4471_v57 = vadd.f32 %v4470_v49, %v4469_v63  ;;  %v12504_v36 = vld [vmem:[%s10031_s15 + $0x1e0] sm:$0xff] }
 0x149   : > { %v4064_v42 = vcombine.low %v17293_v45, %v17292_v20  ;;  %v4062_v17 = vrot.slane %v4048_v25, %v10039_v10  ;;  %v4081_v21 = vcombine.low %v11773_v15, %v2372_v53  ;;  %v4082_v47 = vcombine.low %v17294_v13, %v11703_v27  ;;  %17323 = vst [vmem:[#allocation42_spill] sm:$0xff] %v12504_v36  ;;  %v12526_v36 = vld [vmem:[%s10031_s15 + $0x200] sm:$0xff] }
 0x14a   : > { %v4474_v35 = vsel %vm4300_vm1, %v3995_v0, 0.0  ;;  %v2490_v18 = vrot.slane %v2476_v16, %v10039_v10  ;;  %v4098_v30 = vcombine.low %v2395_v14, %v11847_v40  ;;  %v4099_v39 = vcombine.low %v2396_v6, %v2403_v38  ;;  %17327 = vst [vmem:[#allocation47_spill] sm:$0xff] %v12526_v36  ;;  %v12551_v36 = vld [vmem:[%s10031_s15 + $0x228] sm:$0x3] }
 0x14b   : > { %v4473_v15 = vadd.f32 %v4472_v33, %v4471_v57  ;;  %v4046_v53 = vcombine.low %v4038_v54, %v4045_v51  ;;  %v4072_v60 = vrot.slane %v4064_v42, %v10039_v10  ;;  %v4079_v5 = vrot.slane %v4065_v2, %v10039_v10  ;;  %17332 = vst [vmem:[#allocation46_spill] sm:$0xff] %v12551_v36 }
 0x14c   : > { %v4476_v16 = vsel %vm4300_vm1, %v4012_v48, 0.0  ;;  %v2491_v4 = vcombine.high %v12116_v22, %v12116_v22  ;;  %v4115_v27 = vcombine.low %v11909_v58, %v2419_v44  ;;  %v4116_v38 = vcombine.low %v11990_v8, %v2420_v26 }
 0x14d   : > { %v4475_v40 = vadd.f32 %v4474_v35, %v4473_v15  ;;  %v4063_v14 = vcombine.low %v4055_v7, %v4062_v17  ;;  %v4089_v6 = vrot.slane %v4081_v21, %v10039_v10  ;;  %v4096_v1 = vrot.slane %v4082_v47, %v10039_v10 }
 0x14e   : > { %v4478_v24 = vsel %vm4300_vm1, %v4029_v56, 0.0  ;;  %v4106_v59 = vrot.slane %v4098_v30, %v10039_v10  ;;  %v4113_v28 = vrot.slane %v4099_v39, %v10039_v10  ;;  %v17295_v58 = vrot.slane %v11905_v31, %v10039_v10 }
 0x14f   : > { %v4477_v41 = vadd.f32 %v4476_v16, %v4475_v40  ;;  %v2468_v55 = vcombine.high %v2466_v3, %v2466_v3  ;;  %v4080_v8 = vcombine.low %v4072_v60, %v4079_v5  ;;  %v17296_v26 = vcombine.high %v11956_v46, %v11956_v46 }
 0x150   : > { %v4132_v44 = vcombine.low %v17295_v58, %v11956_v46  ;;  %v4480_v9 = vsel %vm4300_vm1, %v4046_v53, 0.0  ;;  %v4123_v25 = vrot.slane %v4115_v27, %v10039_v10  ;;  %v4130_v49 = vrot.slane %v4116_v38, %v10039_v10 }
 0x151   : > { %v4133_v0 = vcombine.low %v17296_v26, %v12020_v32  ;;  %v4149_v48 = vcombine.low %v2444_v43, %v11987_v61  ;;  %v4479_v54 = vadd.f32 %v4478_v24, %v4477_v41  ;;  %v2492_v63 = vcombine.high %v2490_v18, %v2490_v18 }
 0x152   : > { %v4097_v51 = vcombine.low %v4089_v6, %v4096_v1  ;;  %v4150_v20 = vcombine.low %v12071_v29, %v2467_v12  ;;  %v4482_v45 = vsel %vm4300_vm1, %v4063_v14, 0.0  ;;  %v4114_v42 = vcombine.low %v4106_v59, %v4113_v28 }
 0x153   : > { %v4140_v2 = vrot.slane %v4132_v44, %v10039_v10  ;;  %v4481_v46 = vadd.f32 %v4480_v9, %v4479_v54  ;;  %v4147_v32 = vrot.slane %v4133_v0, %v10039_v10  ;;  %v4166_v33 = vcombine.low %v2466_v3, %v2468_v55  ;;  %v12256_v54 = vld [vmem:[%s10031_s15] sm:$0xff] }
 0x154   : > { %v4167_v56 = vcombine.low %v12067_v23, %v12116_v22  ;;  %v4484_v7 = vsel %vm4300_vm1, %v4080_v8, 0.0  ;;  %v4131_v61 = vcombine.low %v4123_v25, %v4130_v49  ;;  %v4157_v43 = vrot.slane %v4149_v48, %v10039_v10 }
 0x155   : > { %v4483_v57 = vadd.f32 %v4482_v45, %v4481_v46  ;;  %v4164_v29 = vrot.slane %v4150_v20, %v10039_v10  ;;  %v4183_v12 = vcombine.low %v2491_v4, %v2490_v18  ;;  %v4184_v17 = vcombine.low %v2492_v63, %v2499_v37  ;;  %v12263_v20 = vld [vmem:[%s10031_s15 + $0x8] sm:$0x3]  ;;  %v12474_v63 = vld [vmem:[%s10031_s15 + $0x190] sm:$0xff] }
 0x156   : > { %v4486_v21 = vsel %vm4300_vm1, %v4097_v51, 0.0  ;;  %v4148_v47 = vcombine.low %v4140_v2, %v4147_v32  ;;  %v4174_v35 = vrot.slane %v4166_v33, %v10039_v10  ;;  %v4181_v3 = vrot.slane %v4167_v56, %v10039_v10  ;;  %v12273_v2 = vld [vmem:[%s10031_s15 + $0x18] sm:$0x3]  ;;  %v12278_v32 = vld [vmem:[%s10031_s15 + $0x20] sm:$0xff]  ;;  %v12283_v56 = vld [vmem:[%s10031_s15 + $0x28] sm:$0x3] }
 0x157   : > { %v4485_v13 = vadd.f32 %v4484_v7, %v4483_v57  ;;  %v4488_v23 = vsel %vm4300_vm1, %v4114_v42, 0.0  ;;  %v4165_v30 = vcombine.low %v4157_v43, %v4164_v29  ;;  %v4191_v39 = vrot.slane %v4183_v12, %v10039_v10  ;;  %v12268_v42 = vld [vmem:[%s10031_s15 + $0x10] sm:$0xff]  ;;  %v12293_v57 = vld [vmem:[%s10031_s15 + $0x38] sm:$0x3]  ;;  %v12298_v12 = vld [vmem:[%s10031_s15 + $0x40] sm:$0xff]  ;;  %17317 = vst [vmem:[#allocation36_spill] sm:$0xff] %v12474_v63 }
 0x158   : > { %v4198_v15 = vrot.slane %v4184_v17, %v10039_v10  ;;  %v4490_v53 = vsel %vm4300_vm1, %v4131_v61, 0.0  ;;  %v4182_v37 = vcombine.low %v4174_v35, %v4181_v3  ;;  %v4492_v60 = vsel %vm4300_vm1, %v4148_v47, 0.0  ;;  %v12288_v61 = vld [vmem:[%s10031_s15 + $0x30] sm:$0xff]  ;;  %v12313_v3 = vld [vmem:[%s10031_s15 + $0x58] sm:$0x3]  ;;  %v12422_v35 = vld [vmem:[%s10031_s15 + $0x140] sm:$0xff] }
 0x159   : > { %v4487_v22 = vadd.f32 %v4486_v21, %v4485_v13  ;;  %v4494_v4 = vsel %vm4300_vm1, %v4165_v30, 0.0  ;;  %v12303_v21 = vld [vmem:[%s10031_s15 + $0x48] sm:$0x3]  ;;  %v12308_v47 = vld [vmem:[%s10031_s15 + $0x50] sm:$0xff]  ;;  %17307 = vst [vmem:[#allocation26_spill] sm:$0xff] %v12422_v35  ;;  %v12442_v43 = vld [vmem:[%s10031_s15 + $0x160] sm:$0xff] }
 0x15a   : > { %v4199_v16 = vcombine.low %v4191_v39, %v4198_v15  ;;  %v4496_v38 = vsel %vm4300_vm1, %v4182_v37, 0.0  ;;  %v12241_v26 = vpop.permute.xlu1 %4591  ;;  %v12260_v51 = vpop.permute.xlu0 %4587  ;;  %v12323_v39 = vld [vmem:[%s10031_s15 + $0x68] sm:$0x3]  ;;  %v12333_v37 = vld [vmem:[%s10031_s15 + $0x80] sm:$0xff]  ;;  %v12412_v30 = vld [vmem:[%s10031_s15 + $0x110] sm:$0xff]  ;;  %17311 = vst [vmem:[#allocation30_spill] sm:$0xff] %v12442_v43 }
 0x15b   : > { %v4489_v18 = vadd.f32 %v4488_v23, %v4487_v22  ;;  %v12318_v22 = vld [vmem:[%s10031_s15 + $0x60] sm:$0xff]  ;;  %v12407_v15 = vld [vmem:[%s10031_s15 + $0x108] sm:$0x3]  ;;  %17305 = vst [vmem:[#allocation24_spill] sm:$0xff] %v12412_v30  ;;  %v12432_v17 = vld [vmem:[%s10031_s15 + $0x150] sm:$0xff] }
 0x15c   : > { %v4498_v14 = vsel %vm4300_vm1, %v4199_v16, 0.0  ;;  %v12397_v16 = vld [vmem:[%s10031_s15 + $0xf8] sm:$0x3]  ;;  %17304 = vst [vmem:[#allocation21_spill] sm:$0xff] %v12407_v15  ;;  %v12417_v23 = vld [vmem:[%s10031_s15 + $0x120] sm:$0xff]  ;;  %17309 = vst [vmem:[#allocation29_spill] sm:$0xff] %v12432_v17 }
 0x15d   : > { %v4491_v5 = vadd.f32 %v4490_v53, %v4489_v18  ;;  %v12328_v53 = vld [vmem:[%s10031_s15 + $0x70] sm:$0xff]  ;;  %17302 = vst [vmem:[#allocation17_spill] sm:$0xff] %v12397_v16  ;;  %17306 = vst [vmem:[#allocation25_spill] sm:$0xff] %v12417_v23  ;;  %v12427_v13 = vld [vmem:[%s10031_s15 + $0x148] sm:$0x3] }
 0x15e   : > { %v12243_v0 = vpop.permute.xlu1 %4609  ;;  %17308 = vst [vmem:[#allocation22_spill] sm:$0xff] %v12427_v13  ;;  %v12437_v29 = vld [vmem:[%s10031_s15 + $0x158] sm:$0x3]  ;;  %v12462_v18 = vld [vmem:[%s10031_s15 + $0x180] sm:$0xff]  ;;  %v12469_v45 = vld [vmem:[%s10031_s15 + $0x188] sm:$0x3] }
 0x15f   : > { %v4493_v27 = vadd.f32 %v4492_v60, %v4491_v5  ;;  %v12338_v5 = vld [vmem:[%s10031_s15 + $0xa0] sm:$0xff]  ;;  %17310 = vst [vmem:[#allocation27_spill] sm:$0xff] %v12437_v29  ;;  %17315 = vst [vmem:[#allocation35_spill] sm:$0xff] %v12462_v18  ;;  %v12489_v33 = vld [vmem:[%s10031_s15 + $0x1a8] sm:$0x3] }
 0x160   : > { %v12402_v60 = vld [vmem:[%s10031_s15 + $0x100] sm:$0xff]  ;;  %17316 = vst [vmem:[#allocation32_spill] sm:$0xff] %v12469_v45  ;;  %17320 = vst [vmem:[#allocation34_spill] sm:$0xff] %v12489_v33  ;;  %v12494_v46 = vld [vmem:[%s10031_s15 + $0x1b0] sm:$0xff] }
 0x161   : > { %v4495_v40 = vadd.f32 %v4494_v4, %v4493_v27  ;;  %v12345_v27 = vld [vmem:[%s10031_s15 + $0xa8] sm:$0x3]  ;;  %17303 = vst [vmem:[#allocation23_spill] sm:$0xff] %v12402_v60  ;;  %v12484_v10 = vld [vmem:[%s10031_s15 + $0x1a0] sm:$0xff]  ;;  %17321 = vst [vmem:[#allocation40_spill] sm:$0xff] %v12494_v46 }
 0x162   : > { %v12247_v25 = vpop.permute.xlu1 %4620  ;;  %17319 = vst [vmem:[#allocation38_spill] sm:$0xff] %v12484_v10  ;;  %v12511_v33 = vld [vmem:[%s10031_s15 + $0x1e8] sm:$0x3]  ;;  %v12516_v46 = vld [vmem:[%s10031_s15 + $0x1f0] sm:$0xff]  ;;  %v12581_v10 = vld [vmem:[%s10031_s15 + $0x260] sm:$0xff] }
 0x163   : > { %v4497_v6 = vadd.f32 %v4496_v38, %v4495_v40  ;;  %v12350_v40 = vld [vmem:[%s10031_s15 + $0xb0] sm:$0xff]  ;;  %17324 = vst [vmem:[#allocation43_spill] sm:$0xff] %v12511_v33  ;;  %17325 = vst [vmem:[#allocation44_spill] sm:$0xff] %v12516_v46  ;;  %v12541_v46 = vld [vmem:[%s10031_s15 + $0x218] sm:$0x3] }
 0x164   : > { %v12392_v38 = vld [vmem:[%s10031_s15 + $0xf0] sm:$0xff]  ;;  %17330 = vst [vmem:[#allocation49_spill] sm:$0xff] %v12541_v46  ;;  %v12566_v46 = vld [vmem:[%s10031_s15 + $0x240] sm:$0xff]  ;;  %v12571_v63 = vld [vmem:[%s10031_s15 + $0x248] sm:$0x3] }
 0x165   : > { %v4499_v1 = vadd.f32 %v4498_v14, %v4497_v6  ;;  %v12355_v6 = vld [vmem:[%s10031_s15 + $0xb8] sm:$0x3]  ;;  %v12387_v14 = vld [vmem:[%s10031_s15 + $0xe8] sm:$0x3]  ;;  %17301 = vst [vmem:[#allocation20_spill] sm:$0xff] %v12392_v38  ;;  %v12536_v33 = vld [vmem:[%s10031_s15 + $0x210] sm:$0xff] }
 0x166   : > { %v12253_v48 = vpop.permute.xlu1 %4631  ;;  %17300 = vst [vmem:[#allocation19_spill] sm:$0xff] %v12387_v14  ;;  %17329 = vst [vmem:[#allocation48_spill] sm:$0xff] %v12536_v33  ;;  %v12561_v33 = vld [vmem:[%s10031_s15 + $0x238] sm:$0x3]  ;;  %v12586_v18 = vld [vmem:[%s10031_s15 + $0x280] sm:$0xff] }
 0x167   : > { %v4500_v24 = vrot.slane %v4499_v1, 4  ;;  %17334 = vst [vmem:[#allocation51_spill] sm:$0xff] %v12561_v33  ;;  %17335 = vst [vmem:[#allocation54_spill] sm:$0xff] %v12566_v46  ;;  %v12618_v33 = vld [vmem:[%s10031_s15 + $0x2b0] sm:$0xff]  ;;  %v12623_v46 = vld [vmem:[%s10031_s15 + $0x2b8] sm:$0x3] }
 0x168   : > { %17336 = vst [vmem:[#allocation57_spill] sm:$0xff] %v12571_v63  ;;  %17338 = vst [vmem:[#allocation52_spill] sm:$0xff] %v12581_v10  ;;  %v12593_v63 = vld [vmem:[%s10031_s15 + $0x288] sm:$0x3]  ;;  %v12603_v10 = vld [vmem:[%s10031_s15 + $0x298] sm:$0x3] }
 0x169   : > { %v4501_v59 = vadd.f32 %v4500_v24, %v4499_v1  ;;  %v12360_v24 = vld [vmem:[%s10031_s15 + $0xc0] sm:$0xff]  ;;  %v12457_v1 = vld [vmem:[%s10031_s15 + $0x178] sm:$0x3]  ;;  %17339 = vst [vmem:[#allocation59_spill] sm:$0xff] %v12586_v18  ;;  %17340 = vst [vmem:[#allocation56_spill] sm:$0xff] %v12593_v63 }
 0x16a   : > { %17314 = vst [vmem:[#allocation28_spill] sm:$0xff] %v12457_v1  ;;  %v12531_v1 = vld [vmem:[%s10031_s15 + $0x208] sm:$0x3]  ;;  %17342 = vst [vmem:[#allocation61_spill] sm:$0xff] %v12603_v10  ;;  %v12608_v18 = vld [vmem:[%s10031_s15 + $0x2a0] sm:$0xff] }
 0x16b   : > { %v4502_v28 = vrot.slane %v4501_v59, 2  ;;  %v12342_v4 = vpop.permute.xlu1 %4642  ;;  %17328 = vst [vmem:[#allocation45_spill] sm:$0xff] %v12531_v1  ;;  %v12556_v1 = vld [vmem:[%s10031_s15 + $0x230] sm:$0xff]  ;;  %17343 = vst [vmem:[#allocation62_spill] sm:$0xff] %v12608_v18  ;;  %v12705_v18 = vld [vmem:[%s10031_s15 + $0x358] sm:$0x3] }
 0x16c   : > { %17333 = vst [vmem:[#allocation53_spill] sm:$0xff] %v12556_v1  ;;  %v12613_v1 = vld [vmem:[%s10031_s15 + $0x2a8] sm:$0x3]  ;;  %17345 = vst [vmem:[#allocation64_spill] sm:$0xff] %v12618_v33  ;;  %v12640_v33 = vld [vmem:[%s10031_s15 + $0x2d0] sm:$0xff] }
 0x16d   : > { %v4503_v58 = vadd.f32 %v4502_v28, %v4501_v59  ;;  %v12365_v28 = vld [vmem:[%s10031_s15 + $0xc8] sm:$0x3]  ;;  %v12380_v59 = vld [vmem:[%s10031_s15 + $0xe0] sm:$0xff]  ;;  %17344 = vst [vmem:[#allocation58_spill] sm:$0xff] %v12613_v1  ;;  %17346 = vst [vmem:[#allocation63_spill] sm:$0xff] %v12623_v46 }
 0x16e   : > { %17299 = vst [vmem:[#allocation18_spill] sm:$0xff] %v12380_v59  ;;  %v12635_v1 = vld [vmem:[%s10031_s15 + $0x2c8] sm:$0x3]  ;;  %17349 = vst [vmem:[#allocation68_spill] sm:$0xff] %v12640_v33  ;;  %v12645_v46 = vld [vmem:[%s10031_s15 + $0x2d8] sm:$0x3] }
 0x16f   : > { %v4504_v44 = vrot.slane %v4503_v58, 1  ;;  %v12466_v7 = vpop.permute.xlu1 %4653  ;;  %17348 = vst [vmem:[#allocation67_spill] sm:$0xff] %v12635_v1  ;;  %17350 = vst [vmem:[#allocation65_spill] sm:$0xff] %v12645_v46  ;;  %v12660_v1 = vld [vmem:[%s10031_s15 + $0x2f0] sm:$0xff]  ;;  %v12665_v33 = vld [vmem:[%s10031_s15 + $0x300] sm:$0xff] }
 0x170   : > { %17353 = vst [vmem:[#allocation72_spill] sm:$0xff] %v12660_v1  ;;  %17354 = vst [vmem:[#allocation73_spill] sm:$0xff] %v12665_v33  ;;  %v12670_v46 = vld [vmem:[%s10031_s15 + $0x320] sm:$0xff]  ;;  %v12685_v1 = vld [vmem:[%s10031_s15 + $0x338] sm:$0x3] }
 0x171   : > { %v4505_v41 = vadd.f32 %v4504_v44, %v4503_v58  ;;  %v12370_v44 = vld [vmem:[%s10031_s15 + $0xd0] sm:$0xff]  ;;  %v12384_v58 = vpop.permute.xlu0 %4598  ;;  %17355 = vst [vmem:[#allocation74_spill] sm:$0xff] %v12670_v46  ;;  %17358 = vst [vmem:[#allocation75_spill] sm:$0xff] %v12685_v1  ;;  %v12690_v33 = vld [vmem:[%s10031_s15 + $0x340] sm:$0xff] }
 0x172   : > { %17359 = vst [vmem:[#allocation78_spill] sm:$0xff] %v12690_v33  ;;  %v12700_v10 = vld [vmem:[%s10031_s15 + $0x350] sm:$0xff]  ;;  %17362 = vst [vmem:[#allocation76_spill] sm:$0xff] %v12705_v18  ;;  %v12727_v18 = vld [vmem:[%s10031_s15 + $0x378] sm:$0x3] }
 0x173   : > { %9476 = vmatmul.mubr.msk.f32.vlgmr.msra.gmra.mxu0 %vm4300_vm1, %v4505_v41  ;;  %v12447_v41 = vld [vmem:[%s10031_s15 + $0x168] sm:$0x3]  ;;  %v12590_v36 = vpop.permute.xlu1 %4664  ;;  %17361 = vst [vmem:[#allocation79_spill] sm:$0xff] %v12700_v10  ;;  %v12722_v10 = vld [vmem:[%s10031_s15 + $0x370] sm:$0xff]  ;;  %17366 = vst [vmem:[#allocation85_spill] sm:$0xff] %v12727_v18 }
 0x174   : > { %17312 = vst [vmem:[#allocation33_spill] sm:$0xff] %v12447_v41  ;;  %v12655_v41 = vld [vmem:[%s10031_s15 + $0x2e8] sm:$0x3]  ;;  %17365 = vst [vmem:[#allocation84_spill] sm:$0xff] %v12722_v10  ;;  %v12742_v1 = vld [vmem:[%s10031_s15 + $0x390] sm:$0xff] }
 0x175   : > { %v12508_v45 = vpop.permute.xlu0 %4602  ;;  %17352 = vst [vmem:[#allocation69_spill] sm:$0xff] %v12655_v41  ;;  %v12680_v41 = vld [vmem:[%s10031_s15 + $0x330] sm:$0xff]  ;;  %17369 = vst [vmem:[#allocation88_spill] sm:$0xff] %v12742_v1  ;;  %v12747_v33 = vld [vmem:[%s10031_s15 + $0x3a0] sm:$0xff] }
 0x176   : > { %17357 = vst [vmem:[#allocation77_spill] sm:$0xff] %v12680_v41  ;;  %v12737_v41 = vld [vmem:[%s10031_s15 + $0x388] sm:$0x3]  ;;  %17370 = vst [vmem:[#allocation87_spill] sm:$0xff] %v12747_v33  ;;  %v12752_v46 = vld [vmem:[%s10031_s15 + $0x3c0] sm:$0xff] }
 0x177   : > { %17368 = vst [vmem:[#allocation82_spill] sm:$0xff] %v12737_v41  ;;  %17371 = vst [vmem:[#allocation90_spill] sm:$0xff] %v12752_v46  ;;  %v12759_v41 = vld [vmem:[%s10031_s15 + $0x3c8] sm:$0x3]  ;;  %v12764_v1 = vld [vmem:[%s10031_s15 + $0x3d0] sm:$0xff] }
 0x178   : > { %17372 = vst [vmem:[#allocation91_spill] sm:$0xff] %v12759_v41  ;;  %17373 = vst [vmem:[#allocation92_spill] sm:$0xff] %v12764_v1  ;;  %v12769_v33 = vld [vmem:[%s10031_s15 + $0x3d8] sm:$0x3]  ;;  %v12774_v46 = vld [vmem:[%s10031_s15 + $0x3e0] sm:$0xff] }
 0x179   : > { %v12632_v63 = vpop.permute.xlu0 %4613  ;;  %17374 = vst [vmem:[#allocation89_spill] sm:$0xff] %v12769_v33  ;;  %17375 = vst [vmem:[#allocation8_spill] sm:$0xff] %v12774_v46  ;;  %v12779_v29 = vld [vmem:[%s10031_s15 + $0x3e8] sm:$0x3]  ;;  %v12784_v41 = vld [vmem:[%s10031_s15 + $0x3f0] sm:$0xff] }
 0x17a   : > { %17376 = vst [vmem:[#allocation95_spill] sm:$0xff] %v12779_v29  ;;  %17377 = vst [vmem:[#allocation93_spill] sm:$0xff] %v12784_v41  ;;  %v12789_v1 = vld [vmem:[%s10031_s15 + $0x3f8] sm:$0x3]  ;;  %v9717_v33 = vld [vmem:[%s10031_s15 + $0x90] sm:$0xff] }
 0x17b   : > { %17378 = vst [vmem:[#allocation96_spill] sm:$0xff] %v12789_v1  ;;  %v9718_v46 = vld [vmem:[%s10031_s15 + $0x130] sm:$0xff]  ;;  %v12815_v30 = vld [vmem:[%s10031_s15 + $0x408] sm:$0x3]  ;;  %v12852_v14 = vld [vmem:[%s10031_s15 + $0x460] sm:$0xff] }
 0x17c   : > { %v9719_v10 = vld [vmem:[%s10031_s15 + $0x1d0] sm:$0xff]  ;;  %17380 = vst [vmem:[#allocation98_spill] sm:$0xff] %v12815_v30  ;;  %v12835_v16 = vld [vmem:[%s10031_s15 + $0x428] sm:$0x3] }
 0x17d   : > { %v9720_v13 = vld [vmem:[%s10031_s15 + $0x270] sm:$0xff]  ;;  %17384 = vst [vmem:[#allocation102_spill] sm:$0xff] %v12835_v16 }
 0x17e   : > { %v9721_v41 = vld [vmem:[%s10031_s15 + $0x310] sm:$0xff] }
 0x17f   : > { %v9723_v1 = vld [vmem:[%s10031_s15 + $0x3b0] sm:$0xff] }
 0x180   : > { %v9724_v23 = vld [vmem:[%s10031_s15 + $0x450] sm:$0xff] }
 0x181   : > { %v12820_v15 = vld [vmem:[%s10031_s15 + $0x410] sm:$0xff] }
 0x182   : > { %17381 = vst [vmem:[#allocation94_spill] sm:$0xff] %v12820_v15  ;;  %v12840_v30 = vld [vmem:[%s10031_s15 + $0x430] sm:$0xff] }
 0x183   : > { %17385 = vst [vmem:[#allocation105_spill] sm:$0xff] %v12840_v30 }
 0x233   : > { %v4575_v55 = vpop.f32.mrf.mxu0 }
 0x234   : > { %v12245_v9 = vmul.f32 0.001953125, %v4575_v55  ;;  %v12375_v55 = vld [vmem:[%s10031_s15 + $0xd8] sm:$0x3] }
 0x235   : > { %v9477_v8 = vpop.f32.mrf.mxu0 }
 0x236   : > { %17297 = vst [vmem:[#allocation16_spill] sm:$0xff] %v12245_v9  ;;  %v12251_v49 = vrot.slane %v12245_v9, %v11618_v11  ;;  %v12452_v8 = vld [vmem:[%s10031_s15 + $0x170] sm:$0xff]  ;;  %v12479_v9 = vld [vmem:[%s10031_s15 + $0x198] sm:$0x3]  ;;  %v12499_v11 = vld [vmem:[%s10031_s15 + $0x1c0] sm:$0xff] }
 0x237   : > { %17313 = vst [vmem:[#allocation31_spill] sm:$0xff] %v12452_v8  ;;  %17318 = vst [vmem:[#allocation37_spill] sm:$0xff] %v12479_v9  ;;  %v12576_v9 = vld [vmem:[%s10031_s15 + $0x250] sm:$0xff]  ;;  %v12710_v8 = vld [vmem:[%s10031_s15 + $0x360] sm:$0xff] }
 0x238   : > { %17298 = vst [vmem:[#allocation15_spill] sm:$0xff] %v12251_v49  ;;  %17322 = vst [vmem:[#allocation39_spill] sm:$0xff] %v12499_v11  ;;  %v12521_v11 = vld [vmem:[%s10031_s15 + $0x1f8] sm:$0x3]  ;;  %v4714_v43 = vsub.f32 %v9717_v33, %v12251_v49  ;;  %v4734_v17 = vsub.f32 %v9718_v46, %v12251_v49  ;;  %v4754_v29 = vsub.f32 %v9719_v10, %v12251_v49  ;;  %v12872_v33 = vld [vmem:[%s10031_s15 + $0x480] sm:$0xff] }
 0x239   : > { %17326 = vst [vmem:[#allocation41_spill] sm:$0xff] %v12521_v11  ;;  %v12546_v11 = vld [vmem:[%s10031_s15 + $0x220] sm:$0xff]  ;;  %17337 = vst [vmem:[#allocation55_spill] sm:$0xff] %v12576_v9  ;;  %v12598_v9 = vld [vmem:[%s10031_s15 + $0x290] sm:$0xff]  ;;  %v4774_v18 = vsub.f32 %v9720_v13, %v12251_v49  ;;  %v4794_v35 = vsub.f32 %v9721_v41, %v12251_v49  ;;  %v4814_v46 = vsub.f32 %v9723_v1, %v12251_v49 }
 0x23a   : > { %17331 = vst [vmem:[#allocation50_spill] sm:$0xff] %v12546_v11  ;;  %17341 = vst [vmem:[#allocation60_spill] sm:$0xff] %v12598_v9  ;;  %v12628_v11 = vld [vmem:[%s10031_s15 + $0x2c0] sm:$0xff]  ;;  %v12695_v9 = vld [vmem:[%s10031_s15 + $0x348] sm:$0x3]  ;;  %v4834_v10 = vsub.f32 %v9724_v23, %v12251_v49  ;;  %v4854_v13 = vsub.f32 %v12082_v62, %v12251_v49 }
 0x23b   : > { %17347 = vst [vmem:[#allocation66_spill] sm:$0xff] %v12628_v11  ;;  %v12650_v11 = vld [vmem:[%s10031_s15 + $0x2e0] sm:$0xff]  ;;  %17360 = vst [vmem:[#allocation81_spill] sm:$0xff] %v12695_v9  ;;  %v12717_v9 = vld [vmem:[%s10031_s15 + $0x368] sm:$0x3] }
 0x23c   : > { %17351 = vst [vmem:[#allocation71_spill] sm:$0xff] %v12650_v11  ;;  %v12675_v11 = vld [vmem:[%s10031_s15 + $0x328] sm:$0x3]  ;;  %17363 = vst [vmem:[#allocation83_spill] sm:$0xff] %v12710_v8  ;;  %v12732_v8 = vld [vmem:[%s10031_s15 + $0x380] sm:$0xff] }
 0x23d   : > { %17356 = vst [vmem:[#allocation70_spill] sm:$0xff] %v12675_v11  ;;  %v12714_v11 = vpop.permute.xlu1 %4675  ;;  %17364 = vst [vmem:[#allocation80_spill] sm:$0xff] %v12717_v9  ;;  %v12756_v9 = vpop.permute.xlu0 %4624  ;;  %v12830_v23 = vld [vmem:[%s10031_s15 + $0x420] sm:$0xff] }
 0x23e   : > { %17367 = vst [vmem:[#allocation86_spill] sm:$0xff] %v12732_v8  ;;  %v12804_v8 = vld [vmem:[%s10031_s15 + $0x400] sm:$0xff]  ;;  %17383 = vst [vmem:[#allocation99_spill] sm:$0xff] %v12830_v23 }
 0x23f   : > { %17379 = vst [vmem:[#allocation97_spill] sm:$0xff] %v12804_v8  ;;  %v12825_v8 = vld [vmem:[%s10031_s15 + $0x418] sm:$0x3]  ;;  %v12845_v1 = vld [vmem:[%s10031_s15 + $0x440] sm:$0xff]  ;;  %17390 = vst [vmem:[#allocation108_spill] sm:$0xff] %v12872_v33 }
 0x240   : > { %17382 = vst [vmem:[#allocation101_spill] sm:$0xff] %v12825_v8  ;;  %17386 = vst [vmem:[#allocation103_spill] sm:$0xff] %v12845_v1  ;;  %v12857_v1 = vld [vmem:[%s10031_s15 + $0x468] sm:$0x3] }
 0x241   : > { %v4687_v60 = vpop.permute.xlu1 %4686  ;;  %v12849_v23 = vpop.permute.xlu0 %4635  ;;  %17387 = vst [vmem:[#allocation100_spill] sm:$0xff] %v12857_v1 }
 0x242   : > { %v4874_v62 = vmul.f32 %v4714_v43, %v4687_v60  ;;  %v4894_v15 = vmul.f32 %v4734_v17, %v4687_v60  ;;  %v4914_v38 = vmul.f32 %v4754_v29, %v4687_v60  ;;  %v4934_v41 = vmul.f32 %v4774_v18, %v4687_v60  ;;  %v12862_v17 = vld [vmem:[%s10031_s15 + $0x470] sm:$0xff]  ;;  %v12887_v43 = vld [vmem:[%s10031_s15 + $0x498] sm:$0x3] }
 0x243   : > { %v4954_v16 = vmul.f32 %v4794_v35, %v4687_v60  ;;  %v4974_v30 = vmul.f32 %v4814_v46, %v4687_v60  ;;  %v4994_v59 = vmul.f32 %v4834_v10, %v4687_v60  ;;  %v5014_v8 = vmul.f32 %v4854_v13, %v4687_v60  ;;  %17388 = vst [vmem:[#allocation107_spill] sm:$0xff] %v12862_v17  ;;  %v12867_v35 = vld [vmem:[%s10031_s15 + $0x478] sm:$0x3]  ;;  %v12877_v46 = vld [vmem:[%s10031_s15 + $0x488] sm:$0x3]  ;;  %v12882_v13 = vld [vmem:[%s10031_s15 + $0x490] sm:$0xff] }
 0x244   : > { %17389 = vst [vmem:[#allocation104_spill] sm:$0xff] %v12867_v35  ;;  %17391 = vst [vmem:[#allocation109_spill] sm:$0xff] %v12877_v46  ;;  %v12891_v35 = vmul.f32 %v4874_v62, %v4874_v62  ;;  %v12893_v60 = vmul.f32 %v4894_v15, %v4894_v15  ;;  %v12895_v33 = vmul.f32 %v4914_v38, %v4914_v38  ;;  %v12902_v46 = vld [vmem:[%s10031_s15 + $0x4a0] sm:$0xff]  ;;  %v12915_v15 = vld [vmem:[%s10031_s15 + $0x4a8] sm:$0x3] }
 0x245   : > { %17392 = vst [vmem:[#allocation110_spill] sm:$0xff] %v12882_v13  ;;  %v12897_v17 = vmul.f32 %v4934_v41, %v4934_v41  ;;  %v12899_v10 = vmul.f32 %v4954_v16, %v4954_v16  ;;  %v12906_v13 = vmul.f32 %v4974_v30, %v4974_v30  ;;  %v12908_v1 = vmul.f32 %v4994_v59, %v4994_v59  ;;  %v12912_v62 = vpop.permute.xlu0 %4646  ;;  %v12920_v16 = vld [vmem:[%s10031_s15 + $0x4b0] sm:$0xff] }
 0x246   : > { %17393 = vst [vmem:[#allocation106_spill] sm:$0xff] %v12891_v35  ;;  %17394 = vst [vmem:[#allocation112_spill] sm:$0xff] %v12893_v60  ;;  %v12910_v18 = vmul.f32 %v5014_v8, %v5014_v8  ;;  %v17402_v41 = vsub.f32 %v12256_v54, %v12251_v49  ;;  %v17403_v59 = vsub.f32 %v12263_v20, %v12251_v49 }
 0x247   : > { %17395 = vst [vmem:[#allocation111_spill] sm:$0xff] %v12895_v33  ;;  %17396 = vst [vmem:[#allocation114_spill] sm:$0xff] %v12897_v17  ;;  %v17404_v29 = vsub.f32 %v12268_v42, %v12251_v49  ;;  %v17406_v54 = vsub.f32 %v12278_v32, %v12251_v49  ;;  %v17407_v20 = vsub.f32 %v12283_v56, %v12251_v49 }
 0x248   : > { %17397 = vst [vmem:[#allocation115_spill] sm:$0xff] %v12899_v10  ;;  %17398 = vst [vmem:[#allocation116_spill] sm:$0xff] %v12906_v13  ;;  %v12954_v30 = vmul.f32 %v17402_v41, %v12260_v51  ;;  %v12960_v8 = vmul.f32 %v17403_v59, %v12241_v26  ;;  %v17408_v42 = vsub.f32 %v12288_v61, %v12251_v49 }
 0x249   : > { %17399 = vst [vmem:[#allocation113_spill] sm:$0xff] %v12908_v1  ;;  %17400 = vst [vmem:[#allocation119_spill] sm:$0xff] %v12910_v18  ;;  %v12966_v38 = vmul.f32 %v17404_v29, %v12384_v58  ;;  %v12978_v41 = vmul.f32 %v17406_v54, %v12243_v0  ;;  %v12984_v59 = vmul.f32 %v17407_v20, %v12632_v63  ;;  %v13004_v56 = vpop.permute.xlu0 %4657 }
 0x24a   : > { %17401 = vst [vmem:[#allocation117_spill] sm:$0xff] %v12915_v15  ;;  %v17405_v15 = vsub.f32 %v12273_v2, %v12251_v49  ;;  %v12990_v29 = vmul.f32 %v17408_v42, %v12247_v25  ;;  %v17409_v2 = vsub.f32 %v12293_v57, %v12251_v49  ;;  %v17410_v32 = vsub.f32 %v12298_v12, %v12251_v49 }
 0x24b   : > { %v17411_v61 = vsub.f32 %v12303_v21, %v12251_v49  ;;  %v17413_v57 = vsub.f32 %v12308_v47, %v12251_v49  ;;  %v17415_v12 = vsub.f32 %v12313_v3, %v12251_v49  ;;  %v17419_v21 = vsub.f32 %v12323_v39, %v12251_v49 }
 0x24c   : > { %v12972_v60 = vmul.f32 %v17405_v15, %v12508_v45  ;;  %v12996_v15 = vmul.f32 %v17409_v2, %v12756_v9  ;;  %v13002_v54 = vmul.f32 %v17410_v32, %v12253_v48  ;;  %v17417_v32 = vsub.f32 %v12318_v22, %v12251_v49 }
 0x24d   : > { %v13010_v20 = vmul.f32 %v17411_v61, %v12849_v23  ;;  %v13016_v42 = vmul.f32 %v17413_v57, %v12342_v4  ;;  %v13022_v2 = vmul.f32 %v17415_v12, %v12912_v62  ;;  %v13034_v61 = vmul.f32 %v17419_v21, %v13004_v56 }
 0x24e   : > { %v13028_v33 = vmul.f32 %v17417_v32, %v12466_v7  ;;  %v17421_v47 = vsub.f32 %v12328_v53, %v12251_v49  ;;  %v17422_v3 = vsub.f32 %v12333_v37, %v12251_v49  ;;  %v17424_v22 = vsub.f32 %v12338_v5, %v12251_v49 }
 0x24f   : > { %17412 = vst [vmem:[#allocation120_spill] sm:$0xff] %v13010_v20  ;;  %17414 = vst [vmem:[#allocation121_spill] sm:$0xff] %v13016_v42  ;;  %v17426_v39 = vsub.f32 %v12345_v27, %v12251_v49  ;;  %v17428_v53 = vsub.f32 %v12350_v40, %v12251_v49  ;;  %v17430_v37 = vsub.f32 %v12355_v6, %v12251_v49  ;;  %v17566_v42 = vld [vmem:[#allocation61_spill] sm:$0xff] }
 0x250   : > { %17416 = vst [vmem:[#allocation122_spill] sm:$0xff] %v13022_v2  ;;  %17418 = vst [vmem:[#allocation118_spill] sm:$0xff] %v13028_v33  ;;  %v13040_v57 = vmul.f32 %v17421_v47, %v12590_v36  ;;  %v13046_v12 = vmul.f32 %v17422_v3, %v12714_v11  ;;  %v13052_v32 = vmul.f32 %v17424_v22, %v12260_v51 }
 0x251   : > { %17420 = vst [vmem:[#allocation125_spill] sm:$0xff] %v13034_v61  ;;  %v13058_v21 = vmul.f32 %v17426_v39, %v12241_v26  ;;  %v13064_v47 = vmul.f32 %v17428_v53, %v12384_v58  ;;  %v13070_v3 = vmul.f32 %v17430_v37, %v12508_v45  ;;  %v17432_v5 = vsub.f32 %v12360_v24, %v12251_v49  ;;  %v17440_v24 = vld [vmem:[#allocation18_spill] sm:$0xff] }
 0x252   : > { %17423 = vst [vmem:[#allocation123_spill] sm:$0xff] %v13046_v12  ;;  %17425 = vst [vmem:[#allocation126_spill] sm:$0xff] %v13052_v32  ;;  %v17434_v27 = vsub.f32 %v12365_v28, %v12251_v49  ;;  %v17436_v40 = vsub.f32 %v12370_v44, %v12251_v49  ;;  %v17438_v6 = vsub.f32 %v12375_v55, %v12251_v49  ;;  %v17443_v28 = vld [vmem:[#allocation19_spill] sm:$0xff]  ;;  %v17446_v44 = vld [vmem:[#allocation20_spill] sm:$0xff] }
 0x253   : > { %17427 = vst [vmem:[#allocation129_spill] sm:$0xff] %v13058_v21  ;;  %17429 = vst [vmem:[#allocation127_spill] sm:$0xff] %v13064_v47  ;;  %v13076_v22 = vmul.f32 %v17432_v5, %v12243_v0  ;;  %v17441_v5 = vsub.f32 %v17440_v24, %v12251_v49  ;;  %v17449_v55 = vld [vmem:[#allocation17_spill] sm:$0xff]  ;;  %v17452_v24 = vld [vmem:[#allocation23_spill] sm:$0xff] }
 0x254   : > { %17431 = vst [vmem:[#allocation124_spill] sm:$0xff] %v13070_v3  ;;  %v13082_v39 = vmul.f32 %v17434_v27, %v12632_v63  ;;  %v13088_v53 = vmul.f32 %v17436_v40, %v12247_v25  ;;  %v13094_v37 = vmul.f32 %v17438_v6, %v12756_v9  ;;  %v17444_v27 = vsub.f32 %v17443_v28, %v12251_v49  ;;  %v17455_v28 = vld [vmem:[#allocation21_spill] sm:$0xff] }
 0x255   : > { %17433 = vst [vmem:[#allocation131_spill] sm:$0xff] %v13076_v22  ;;  %v13100_v35 = vmul.f32 %v17441_v5, %v12253_v48  ;;  %v17447_v40 = vsub.f32 %v17446_v44, %v12251_v49  ;;  %v17450_v6 = vsub.f32 %v17449_v55, %v12251_v49  ;;  %v17453_v5 = vsub.f32 %v17452_v24, %v12251_v49  ;;  %v17458_v44 = vld [vmem:[#allocation24_spill] sm:$0xff]  ;;  %v17460_v55 = vld [vmem:[#allocation25_spill] sm:$0xff]  ;;  %v17462_v24 = vld [vmem:[#allocation26_spill] sm:$0xff] }
 0x256   : > { %17435 = vst [vmem:[#allocation128_spill] sm:$0xff] %v13082_v39  ;;  %17437 = vst [vmem:[#allocation132_spill] sm:$0xff] %v13088_v53  ;;  %v13106_v39 = vmul.f32 %v17444_v27, %v12849_v23  ;;  %v17456_v27 = vsub.f32 %v17455_v28, %v12251_v49  ;;  %v17465_v28 = vld [vmem:[#allocation22_spill] sm:$0xff] }
 0x257   : > { %17439 = vst [vmem:[#allocation133_spill] sm:$0xff] %v13094_v37  ;;  %17442 = vst [vmem:[#allocation134_spill] sm:$0xff] %v13100_v35  ;;  %v13112_v53 = vmul.f32 %v17447_v40, %v12342_v4  ;;  %v13118_v37 = vmul.f32 %v17450_v6, %v12912_v62  ;;  %v13124_v35 = vmul.f32 %v17453_v5, %v12466_v7 }
 0x258   : > { %17445 = vst [vmem:[#allocation130_spill] sm:$0xff] %v13106_v39  ;;  %v13130_v39 = vmul.f32 %v17456_v27, %v13004_v56  ;;  %v17459_v40 = vsub.f32 %v17458_v44, %v12251_v49  ;;  %v17461_v6 = vsub.f32 %v17460_v55, %v12251_v49  ;;  %v17463_v5 = vsub.f32 %v17462_v24, %v12251_v49  ;;  %v17468_v44 = vld [vmem:[#allocation29_spill] sm:$0xff]  ;;  %v17471_v55 = vld [vmem:[#allocation27_spill] sm:$0xff]  ;;  %v17474_v24 = vld [vmem:[#allocation30_spill] sm:$0xff] }
 0x259   : > { %17448 = vst [vmem:[#allocation136_spill] sm:$0xff] %v13112_v53  ;;  %17451 = vst [vmem:[#allocation135_spill] sm:$0xff] %v13118_v37  ;;  %v17466_v27 = vsub.f32 %v17465_v28, %v12251_v49  ;;  %v17477_v28 = vld [vmem:[#allocation33_spill] sm:$0xff] }
 0x25a   : > { %17454 = vst [vmem:[#allocation138_spill] sm:$0xff] %v13124_v35  ;;  %17457 = vst [vmem:[#allocation139_spill] sm:$0xff] %v13130_v39  ;;  %v13136_v53 = vmul.f32 %v17459_v40, %v12590_v36  ;;  %v13142_v37 = vmul.f32 %v17461_v6, %v12714_v11  ;;  %v13148_v35 = vmul.f32 %v17463_v5, %v12260_v51 }
 0x25b   : > { %v13154_v39 = vmul.f32 %v17466_v27, %v12241_v26  ;;  %v17469_v40 = vsub.f32 %v17468_v44, %v12251_v49  ;;  %v17472_v6 = vsub.f32 %v17471_v55, %v12251_v49  ;;  %v17475_v5 = vsub.f32 %v17474_v24, %v12251_v49  ;;  %v17480_v44 = vld [vmem:[#allocation31_spill] sm:$0xff]  ;;  %v17483_v55 = vld [vmem:[#allocation28_spill] sm:$0xff] }
 0x25c   : > { %17464 = vst [vmem:[#allocation140_spill] sm:$0xff] %v13148_v35  ;;  %v17478_v27 = vsub.f32 %v17477_v28, %v12251_v49  ;;  %v17486_v24 = vld [vmem:[#allocation35_spill] sm:$0xff]  ;;  %v17489_v28 = vld [vmem:[#allocation32_spill] sm:$0xff] }
 0x25d   : > { %17467 = vst [vmem:[#allocation137_spill] sm:$0xff] %v13154_v39  ;;  %v13160_v22 = vmul.f32 %v17469_v40, %v12384_v58  ;;  %v13166_v3 = vmul.f32 %v17472_v6, %v12508_v45  ;;  %v13172_v35 = vmul.f32 %v17475_v5, %v12243_v0  ;;  %v17481_v40 = vsub.f32 %v17480_v44, %v12251_v49 }
 0x25e   : > { %v13178_v39 = vmul.f32 %v17478_v27, %v12632_v63  ;;  %v17484_v6 = vsub.f32 %v17483_v55, %v12251_v49  ;;  %v17487_v5 = vsub.f32 %v17486_v24, %v12251_v49  ;;  %v17490_v27 = vsub.f32 %v17489_v28, %v12251_v49 }
 0x25f   : > { %17470 = vst [vmem:[#allocation141_spill] sm:$0xff] %v13160_v22  ;;  %17473 = vst [vmem:[#allocation144_spill] sm:$0xff] %v13166_v3  ;;  %v13184_v22 = vmul.f32 %v17481_v40, %v12247_v25  ;;  %v17492_v40 = vld [vmem:[#allocation36_spill] sm:$0xff] }
 0x260   : > { %17476 = vst [vmem:[#allocation145_spill] sm:$0xff] %v13172_v35  ;;  %17479 = vst [vmem:[#allocation142_spill] sm:$0xff] %v13178_v39  ;;  %v13190_v3 = vmul.f32 %v17484_v6, %v12756_v9  ;;  %v13196_v35 = vmul.f32 %v17487_v5, %v12253_v48  ;;  %v13202_v44 = vmul.f32 %v17490_v27, %v12849_v23  ;;  %v17495_v6 = vld [vmem:[#allocation37_spill] sm:$0xff]  ;;  %v17498_v5 = vld [vmem:[#allocation38_spill] sm:$0xff] }
 0x261   : > { %17482 = vst [vmem:[#allocation147_spill] sm:$0xff] %v13184_v22  ;;  %v17493_v22 = vsub.f32 %v17492_v40, %v12251_v49  ;;  %v17499_v28 = vsub.f32 %v17498_v5, %v12251_v49  ;;  %v17501_v27 = vld [vmem:[#allocation34_spill] sm:$0xff] }
 0x262   : > { %17485 = vst [vmem:[#allocation143_spill] sm:$0xff] %v13190_v3  ;;  %17488 = vst [vmem:[#allocation149_spill] sm:$0xff] %v13196_v35  ;;  %v17496_v3 = vsub.f32 %v17495_v6, %v12251_v49  ;;  %v17509_v5 = vld [vmem:[#allocation42_spill] sm:$0xff] }
 0x263   : > { %17491 = vst [vmem:[#allocation146_spill] sm:$0xff] %v13202_v44  ;;  %v13208_v55 = vmul.f32 %v17493_v22, %v12342_v4  ;;  %v13220_v35 = vmul.f32 %v17499_v28, %v12466_v7  ;;  %v17502_v44 = vsub.f32 %v17501_v27, %v12251_v49  ;;  %v17504_v22 = vld [vmem:[#allocation40_spill] sm:$0xff]  ;;  %v17510_v28 = vsub.f32 %v17509_v5, %v12251_v49 }
 0x264   : > { %v13214_v24 = vmul.f32 %v17496_v3, %v12912_v62  ;;  %v17506_v3 = vld [vmem:[#allocation39_spill] sm:$0xff] }
 0x265   : > { %17494 = vst [vmem:[#allocation151_spill] sm:$0xff] %v13208_v55  ;;  %17500 = vst [vmem:[#allocation152_spill] sm:$0xff] %v13220_v35  ;;  %v13226_v40 = vmul.f32 %v17502_v44, %v13004_v56  ;;  %v17505_v55 = vsub.f32 %v17504_v22, %v12251_v49  ;;  %v13244_v35 = vmul.f32 %v17510_v28, %v12260_v51  ;;  %v17512_v44 = vld [vmem:[#allocation43_spill] sm:$0xff] }
 0x266   : > { %17497 = vst [vmem:[#allocation148_spill] sm:$0xff] %v13214_v24  ;;  %v17507_v24 = vsub.f32 %v17506_v3, %v12251_v49  ;;  %v17513_v27 = vsub.f32 %v17512_v44, %v12251_v49  ;;  %v17521_v28 = vld [vmem:[#allocation47_spill] sm:$0xff] }
 0x267   : > { %17503 = vst [vmem:[#allocation150_spill] sm:$0xff] %v13226_v40  ;;  %v13232_v6 = vmul.f32 %v17505_v55, %v12590_v36  ;;  %17511 = vst [vmem:[#allocation155_spill] sm:$0xff] %v13244_v35  ;;  %v17515_v55 = vld [vmem:[#allocation44_spill] sm:$0xff]  ;;  %v17522_v35 = vsub.f32 %v17521_v28, %v12251_v49 }
 0x268   : > { %v13238_v39 = vmul.f32 %v17507_v24, %v12714_v11  ;;  %v13250_v40 = vmul.f32 %v17513_v27, %v12241_v26  ;;  %v17516_v22 = vsub.f32 %v17515_v55, %v12251_v49  ;;  %v17518_v24 = vld [vmem:[#allocation41_spill] sm:$0xff] }
 0x269   : > { %v17519_v3 = vsub.f32 %v17518_v24, %v12251_v49  ;;  %v13268_v44 = vmul.f32 %v17522_v35, %v12243_v0  ;;  %v17524_v27 = vld [vmem:[#allocation45_spill] sm:$0xff]  ;;  %v9744_v35 = vld [vmem:[%s10031_s15 + $0x318] sm:$0x3] }
 0x26a   : > { %17508 = vst [vmem:[#allocation153_spill] sm:$0xff] %v13238_v39  ;;  %17514 = vst [vmem:[#allocation158_spill] sm:$0xff] %v13250_v40  ;;  %v13256_v47 = vmul.f32 %v17516_v22, %v12384_v58  ;;  %v17525_v40 = vsub.f32 %v17524_v27, %v12251_v49  ;;  %v17527_v22 = vld [vmem:[#allocation48_spill] sm:$0xff]  ;;  %v17531_v39 = vld [vmem:[#allocation49_spill] sm:$0xff] }
 0x26b   : > { %v13262_v5 = vmul.f32 %v17519_v3, %v12508_v45  ;;  %17523 = vst [vmem:[#allocation160_spill] sm:$0xff] %v13268_v44  ;;  %v17528_v24 = vsub.f32 %v17527_v22, %v12251_v49  ;;  %v13282_v3 = vpop.permute.xlu1 %4690  ;;  %v4795_v44 = vsub.f32 %v9744_v35, %v12251_v49  ;;  %v17532_v27 = vsub.f32 %v17531_v39, %v12251_v49  ;;  %v17540_v35 = vld [vmem:[#allocation53_spill] sm:$0xff]  ;;  %v17543_v39 = vld [vmem:[#allocation51_spill] sm:$0xff] }
 0x26c   : > { %17517 = vst [vmem:[#allocation157_spill] sm:$0xff] %v13256_v47  ;;  %v13274_v55 = vmul.f32 %v17525_v40, %v12632_v63  ;;  %17530 = vst [vmem:[#allocation162_spill] sm:$0xff] %v13282_v3  ;;  %v17541_v32 = vsub.f32 %v17540_v35, %v12251_v49 }
 0x26d   : > { %17520 = vst [vmem:[#allocation154_spill] sm:$0xff] %v13262_v5  ;;  %v13280_v47 = vmul.f32 %v17528_v24, %v12247_v25  ;;  %v9743_v5 = vld [vmem:[%s10031_s15 + $0x278] sm:$0x3]  ;;  %v13292_v40 = vmul.f32 %v17532_v27, %v12756_v9  ;;  %v17544_v27 = vsub.f32 %v17543_v39, %v12251_v49  ;;  %v17552_v39 = vld [vmem:[#allocation55_spill] sm:$0xff] }
 0x26e   : > { %17526 = vst [vmem:[#allocation156_spill] sm:$0xff] %v13274_v55  ;;  %v4775_v28 = vsub.f32 %v9743_v5, %v12251_v49  ;;  %v17534_v55 = vld [vmem:[#allocation50_spill] sm:$0xff]  ;;  %v13310_v12 = vmul.f32 %v17541_v32, %v12342_v4  ;;  %v17549_v32 = vld [vmem:[#allocation57_spill] sm:$0xff] }
 0x26f   : > { %17529 = vst [vmem:[#allocation161_spill] sm:$0xff] %v13280_v47  ;;  %17533 = vst [vmem:[#allocation159_spill] sm:$0xff] %v13292_v40  ;;  %v17535_v22 = vsub.f32 %v17534_v55, %v12251_v49  ;;  %v17537_v47 = vld [vmem:[#allocation46_spill] sm:$0xff]  ;;  %v13316_v40 = vmul.f32 %v17544_v27, %v12912_v62  ;;  %v17553_v27 = vsub.f32 %v17552_v39, %v12251_v49  ;;  %v17560_v39 = vld [vmem:[#allocation56_spill] sm:$0xff] }
 0x270   : > { %v17538_v21 = vsub.f32 %v17537_v47, %v12251_v49  ;;  %17542 = vst [vmem:[#allocation12_spill] sm:$0xff] %v13310_v12  ;;  %v17546_v55 = vld [vmem:[#allocation54_spill] sm:$0xff]  ;;  %v17550_v12 = vsub.f32 %v17549_v32, %v12251_v49 }
 0x271   : > { %v13298_v24 = vmul.f32 %v17535_v22, %v12253_v48  ;;  %17545 = vst [vmem:[#allocation10_spill] sm:$0xff] %v13316_v40  ;;  %v17547_v22 = vsub.f32 %v17546_v55, %v12251_v49  ;;  %v13338_v40 = vmul.f32 %v17553_v27, %v12590_v36  ;;  %v17554_v55 = vld [vmem:[#allocation11_spill] sm:$0xff]  ;;  %v17561_v27 = vsub.f32 %v17560_v39, %v12251_v49 }
 0x272   : > { %v13304_v5 = vmul.f32 %v17538_v21, %v12849_v23  ;;  %v9745_v21 = vld [vmem:[%s10031_s15 + $0x3b8] sm:$0x3]  ;;  %v13332_v61 = vmul.f32 %v17550_v12, %v13004_v56  ;;  %v17557_v12 = vld [vmem:[#allocation59_spill] sm:$0xff] }
 0x273   : > { %17536 = vst [vmem:[#allocation163_spill] sm:$0xff] %v13298_v24  ;;  %v13322_v24 = vmul.f32 %v17547_v22, %v12466_v7  ;;  %v4815_v47 = vsub.f32 %v9745_v21, %v12251_v49  ;;  %v4855_v22 = vsub.f32 %v17554_v55, %v12251_v49  ;;  %v4935_v21 = vmul.f32 %v4775_v28, %v13282_v3  ;;  %v17563_v55 = vld [vmem:[#allocation60_spill] sm:$0xff] }
 0x274   : > { %17539 = vst [vmem:[#allocation164_spill] sm:$0xff] %v13304_v5  ;;  %v9746_v5 = vld [vmem:[%s10031_s15 + $0x458] sm:$0x3]  ;;  %17551 = vst [vmem:[#allocation14_spill] sm:$0xff] %v13332_v61  ;;  %v17558_v32 = vsub.f32 %v17557_v12, %v12251_v49  ;;  %v13359_v2 = vmul.f32 %v17561_v27, %v12241_v26  ;;  %v4955_v28 = vmul.f32 %v4795_v44, %v13282_v3 }
 0x275   : > { %17548 = vst [vmem:[#allocation13_spill] sm:$0xff] %v13322_v24  ;;  %v4835_v35 = vsub.f32 %v9746_v5, %v12251_v49  ;;  %v17555_v24 = vld [vmem:[#allocation52_spill] sm:$0xff]  ;;  %v17567_v12 = vsub.f32 %v17566_v42, %v12251_v49  ;;  %v17572_v44 = vld [vmem:[#allocation58_spill] sm:$0xff]  ;;  %v17578_v42 = vld [vmem:[#allocation63_spill] sm:$0xff] }
 0x276   : > { %v17556_v5 = vsub.f32 %v17555_v24, %v12251_v49  ;;  %v13353_v61 = vmul.f32 %v17558_v32, %v12260_v51  ;;  %17562 = vst [vmem:[#allocation19_spill] sm:$0xff] %v13359_v2  ;;  %v17564_v24 = vsub.f32 %v17563_v55, %v12251_v49  ;;  %v17573_v2 = vsub.f32 %v17572_v44, %v12251_v49  ;;  %v17575_v55 = vld [vmem:[#allocation64_spill] sm:$0xff]  ;;  %v17581_v44 = vld [vmem:[#allocation66_spill] sm:$0xff] }
 0x277   : > { %v13372_v32 = vmul.f32 %v17567_v12, %v12508_v45  ;;  %v17579_v12 = vsub.f32 %v17578_v42, %v12251_v49 }
 0x278   : > { %v13347_v33 = vmul.f32 %v17556_v5, %v12714_v11  ;;  %17559 = vst [vmem:[#allocation18_spill] sm:$0xff] %v13353_v61  ;;  %v13366_v5 = vmul.f32 %v17564_v24, %v12384_v58  ;;  %v17569_v61 = vld [vmem:[#allocation62_spill] sm:$0xff]  ;;  %v13384_v20 = vmul.f32 %v17573_v2, %v12632_v63  ;;  %v17576_v24 = vsub.f32 %v17575_v55, %v12251_v49 }
 0x279   : > { %17568 = vst [vmem:[#allocation17_spill] sm:$0xff] %v13372_v32  ;;  %v17570_v39 = vsub.f32 %v17569_v61, %v12251_v49  ;;  %v13396_v32 = vmul.f32 %v17579_v12, %v12756_v9  ;;  %v4975_v61 = vmul.f32 %v4815_v47, %v13282_v3  ;;  %v17582_v2 = vsub.f32 %v17581_v44, %v12251_v49  ;;  %v17587_v12 = vld [vmem:[#allocation67_spill] sm:$0xff] }
 0x27a   : > { %17565 = vst [vmem:[#allocation20_spill] sm:$0xff] %v13366_v5  ;;  %17574 = vst [vmem:[#allocation21_spill] sm:$0xff] %v13384_v20  ;;  %v13390_v5 = vmul.f32 %v17576_v24, %v12247_v25  ;;  %v5015_v55 = vmul.f32 %v4855_v22, %v13282_v3  ;;  %v5095_v24 = vmul.f32 %v4935_v21, %v4935_v21 }
 0x27b   : > { %v13378_v27 = vmul.f32 %v17570_v39, %v12243_v0  ;;  %17580 = vst [vmem:[#allocation25_spill] sm:$0xff] %v13396_v32  ;;  %v4995_v39 = vmul.f32 %v4835_v35, %v13282_v3  ;;  %v13404_v20 = vmul.f32 %v17582_v2, %v12253_v48  ;;  %v17588_v47 = vsub.f32 %v17587_v12, %v12251_v49  ;;  %v17590_v32 = vld [vmem:[#allocation68_spill] sm:$0xff] }
 0x27c   : > { %17577 = vst [vmem:[#allocation24_spill] sm:$0xff] %v13390_v5  ;;  %v17584_v5 = vld [vmem:[#allocation9_spill] sm:$0xff]  ;;  %v17591_v44 = vsub.f32 %v17590_v32, %v12251_v49  ;;  %v5115_v22 = vmul.f32 %v4955_v28, %v4955_v28  ;;  %v17593_v21 = vcombine.high %v12899_v10, %v12899_v10  ;;  %v5135_v10 = vmul.f32 %v4975_v61, %v4975_v61 }
 0x27d   : > { %17571 = vst [vmem:[#allocation23_spill] sm:$0xff] %v13378_v27  ;;  %17583 = vst [vmem:[#allocation26_spill] sm:$0xff] %v13404_v20  ;;  %v17585_v27 = vcombine.high %v12897_v17, %v12897_v17  ;;  %v13417_v35 = vmul.f32 %v17588_v47, %v12849_v23  ;;  %v17598_v47 = vld [vmem:[#allocation71_spill] sm:$0xff]  ;;  %v17608_v61 = vcombine.high %v12910_v18, %v12910_v18  ;;  %v17615_v18 = vld [vmem:[#allocation74_spill] sm:$0xff] }
 0x27e   : > { %v13423_v2 = vmul.f32 %v17591_v44, %v12342_v4  ;;  %v13429_v3 = vrot.slane %v17593_v21, %v17584_v5  ;;  %v17601_v44 = vcombine.high %v12906_v13, %v12906_v13  ;;  %v5175_v13 = vmul.f32 %v5015_v55, %v5015_v55 }
 0x27f   : > { %v13411_v42 = vrot.slane %v17585_v27, %v17584_v5  ;;  %17589 = vst [vmem:[#allocation29_spill] sm:$0xff] %v13417_v35  ;;  %v17595_v27 = vld [vmem:[#allocation65_spill] sm:$0xff]  ;;  %v17599_v35 = vsub.f32 %v17598_v47, %v12251_v49 }
 0x280   : > { %17592 = vst [vmem:[#allocation27_spill] sm:$0xff] %v13423_v2  ;;  %17594 = vst [vmem:[#allocation30_spill] sm:$0xff] %v13429_v3  ;;  %v17596_v17 = vsub.f32 %v17595_v27, %v12251_v49  ;;  %v13449_v21 = vrot.slane %v17601_v44, %v17584_v5  ;;  %v5155_v2 = vmul.f32 %v4995_v39, %v4995_v39  ;;  %v17605_v47 = vld [vmem:[#allocation69_spill] sm:$0xff] }
 0x281   : > { %17586 = vst [vmem:[#allocation22_spill] sm:$0xff] %v13411_v42  ;;  %v13441_v32 = vmul.f32 %v17599_v35, %v12466_v7  ;;  %v6288_v28 = vcombine.high %v13411_v42, %v13411_v42  ;;  %v17603_v27 = vcombine.high %v12908_v1, %v12908_v1  ;;  %v17606_v42 = vsub.f32 %v17605_v47, %v12251_v49 }
 0x282   : > { %v13435_v12 = vmul.f32 %v17596_v17, %v12912_v62  ;;  %17602 = vst [vmem:[#allocation28_spill] sm:$0xff] %v13449_v21  ;;  %v6528_v17 = vcombine.high %v13429_v3, %v13429_v3  ;;  %v6295_v44 = vrot.slane %v5095_v24, %v17584_v5  ;;  %v13470_v39 = vrot.slane %v17608_v61, %v17584_v5  ;;  %v17610_v3 = vld [vmem:[#allocation72_spill] sm:$0xff]  ;;  %v17612_v24 = vld [vmem:[#allocation73_spill] sm:$0xff] }
 0x283   : > { %17600 = vst [vmem:[#allocation31_spill] sm:$0xff] %v13441_v32  ;;  %v13457_v35 = vrot.slane %v17603_v27, %v17584_v5  ;;  %v13463_v32 = vmul.f32 %v17606_v42, %v13004_v56  ;;  %v17611_v27 = vsub.f32 %v17610_v3, %v12251_v49  ;;  %v6768_v42 = vcombine.high %v13449_v21, %v13449_v21  ;;  %v17619_v21 = vld [vmem:[#allocation70_spill] sm:$0xff] }
 0x284   : > { %17597 = vst [vmem:[#allocation33_spill] sm:$0xff] %v13435_v12  ;;  %17609 = vst [vmem:[#allocation36_spill] sm:$0xff] %v13470_v39  ;;  %v6535_v12 = vrot.slane %v5115_v22, %v17584_v5  ;;  %v17613_v47 = vsub.f32 %v17612_v24, %v12251_v49  ;;  %v17616_v3 = vsub.f32 %v17615_v18, %v12251_v49  ;;  %v17622_v18 = vld [vmem:[#allocation77_spill] sm:$0xff] }
 0x285   : > { %17604 = vst [vmem:[#allocation35_spill] sm:$0xff] %v13457_v35  ;;  %17607 = vst [vmem:[#allocation32_spill] sm:$0xff] %v13463_v32  ;;  %v13476_v1 = vmul.f32 %v17611_v27, %v12590_v36  ;;  %v7008_v55 = vcombine.high %v13457_v35, %v13457_v35  ;;  %v7248_v22 = vcombine.high %v13470_v39, %v13470_v39 }
 0x286   : > { %v13487_v61 = vmul.f32 %v17613_v47, %v12714_v11  ;;  %v13493_v27 = vmul.f32 %v17616_v3, %v12260_v51  ;;  %v13497_v32 = vcombine.low %v6288_v28, %v6295_v44  ;;  %v17620_v35 = vsub.f32 %v17619_v21, %v12251_v49  ;;  %v17624_v28 = vld [vmem:[#allocation75_spill] sm:$0xff]  ;;  %v17626_v21 = vld [vmem:[#allocation78_spill] sm:$0xff] }
 0x287   : > { %v6775_v24 = vrot.slane %v5135_v10, %v17584_v5  ;;  %v7015_v47 = vrot.slane %v5155_v2, %v17584_v5  ;;  %v17623_v3 = vsub.f32 %v17622_v18, %v12251_v49  ;;  %v17625_v44 = vsub.f32 %v17624_v28, %v12251_v49 }
 0x288   : > { %17614 = vst [vmem:[#allocation37_spill] sm:$0xff] %v13487_v61  ;;  %17617 = vst [vmem:[#allocation38_spill] sm:$0xff] %v13493_v27  ;;  %v13503_v20 = vmul.f32 %v17620_v35, %v12241_v26  ;;  %v13507_v61 = vcombine.low %v6528_v17, %v6535_v12  ;;  %v17627_v10 = vsub.f32 %v17626_v21, %v12251_v49  ;;  %v17628_v12 = vld [vmem:[#allocation81_spill] sm:$0xff]  ;;  %v17635_v21 = vld [vmem:[#allocation76_spill] sm:$0xff] }
 0x289   : > { %17618 = vst [vmem:[#allocation34_spill] sm:$0xff] %v13497_v32  ;;  %v13513_v27 = vmul.f32 %v17623_v3, %v12384_v58  ;;  %v13519_v39 = vmul.f32 %v17625_v44, %v12508_v45  ;;  %v7255_v2 = vrot.slane %v5175_v13, %v17584_v5  ;;  %v17629_v17 = vsub.f32 %v17628_v12, %v12251_v49  ;;  %v17631_v3 = vld [vmem:[#allocation79_spill] sm:$0xff] }
 0x28a   : > { %17621 = vst [vmem:[#allocation40_spill] sm:$0xff] %v13507_v61  ;;  %v13525_v35 = vmul.f32 %v17627_v10, %v12243_v0  ;;  %v17632_v28 = vsub.f32 %v17631_v3, %v12251_v49  ;;  %v13540_v61 = vcombine.low %v6768_v42, %v6775_v24  ;;  %v13542_v32 = vcombine.low %v7008_v55, %v7015_v47  ;;  %v17637_v12 = vld [vmem:[#allocation83_spill] sm:$0xff]  ;;  %v17640_v3 = vld [vmem:[#allocation80_spill] sm:$0xff] }
 0x28b   : > { %v13532_v18 = vmul.f32 %v17629_v17, %v12632_v63  ;;  %v17636_v13 = vsub.f32 %v17635_v21, %v12251_v49  ;;  %v17638_v17 = vsub.f32 %v17637_v12, %v12251_v49  ;;  %v13562_v55 = vcombine.low %v7248_v22, %v7255_v2  ;;  %v17644_v24 = vld [vmem:[#allocation84_spill] sm:$0xff]  ;;  %v17653_v22 = vld [vmem:[#allocation82_spill] sm:$0xff] }
 0x28c   : > { %v13538_v44 = vmul.f32 %v17632_v28, %v12247_v25  ;;  %17633 = vst [vmem:[#allocation42_spill] sm:$0xff] %v13540_v61  ;;  %17634 = vst [vmem:[#allocation43_spill] sm:$0xff] %v13542_v32  ;;  %v17641_v28 = vsub.f32 %v17640_v3, %v12251_v49  ;;  %v17645_v47 = vsub.f32 %v17644_v24, %v12251_v49  ;;  %v17650_v32 = vld [vmem:[#allocation86_spill] sm:$0xff]  ;;  %v17656_v24 = vld [vmem:[#allocation88_spill] sm:$0xff] }
 0x28d   : > { %17630 = vst [vmem:[#allocation39_spill] sm:$0xff] %v13532_v18  ;;  %v13548_v10 = vmul.f32 %v17636_v13, %v12756_v9  ;;  %v13554_v18 = vmul.f32 %v17638_v17, %v12253_v48  ;;  %17643 = vst [vmem:[#allocation47_spill] sm:$0xff] %v13562_v55  ;;  %v17647_v13 = vld [vmem:[#allocation85_spill] sm:$0xff]  ;;  %v17651_v3 = vsub.f32 %v17650_v32, %v12251_v49  ;;  %v17660_v32 = vld [vmem:[#allocation90_spill] sm:$0xff] }
 0x28e   : > { %v13560_v42 = vmul.f32 %v17641_v28, %v12849_v23  ;;  %v13568_v21 = vmul.f32 %v17645_v47, %v12342_v4  ;;  %v17648_v12 = vsub.f32 %v17647_v13, %v12251_v49  ;;  %v17654_v2 = vsub.f32 %v17653_v22, %v12251_v49  ;;  %v17658_v13 = vld [vmem:[#allocation87_spill] sm:$0xff] }
 0x28f   : > { %17639 = vst [vmem:[#allocation44_spill] sm:$0xff] %v13554_v18  ;;  %v13580_v28 = vmul.f32 %v17651_v3, %v12466_v7  ;;  %v17657_v47 = vsub.f32 %v17656_v24, %v12251_v49  ;;  %v17661_v3 = vsub.f32 %v17660_v32, %v12251_v49  ;;  %v17663_v22 = vld [vmem:[#allocation91_spill] sm:$0xff]  ;;  %v17666_v24 = vld [vmem:[#allocation92_spill] sm:$0xff] }
 0x290   : > { %17642 = vst [vmem:[#allocation41_spill] sm:$0xff] %v13560_v42  ;;  %17646 = vst [vmem:[#allocation45_spill] sm:$0xff] %v13568_v21  ;;  %v13574_v17 = vmul.f32 %v17648_v12, %v12912_v62  ;;  %v13586_v55 = vmul.f32 %v17654_v2, %v13004_v56  ;;  %v17659_v12 = vsub.f32 %v17658_v13, %v12251_v49  ;;  %v17669_v13 = vld [vmem:[#allocation89_spill] sm:$0xff]  ;;  %v17672_v32 = vld [vmem:[#allocation8_spill] sm:$0xff] }
 0x291   : > { %17652 = vst [vmem:[#allocation49_spill] sm:$0xff] %v13580_v28  ;;  %v13592_v61 = vmul.f32 %v17657_v47, %v12590_v36  ;;  %v13604_v28 = vmul.f32 %v17661_v3, %v12260_v51  ;;  %v17664_v2 = vsub.f32 %v17663_v22, %v12251_v49  ;;  %v17667_v47 = vsub.f32 %v17666_v24, %v12251_v49  ;;  %v17675_v22 = vld [vmem:[#allocation95_spill] sm:$0xff]  ;;  %v17678_v24 = vld [vmem:[#allocation93_spill] sm:$0xff] }
 0x292   : > { %17649 = vst [vmem:[#allocation48_spill] sm:$0xff] %v13574_v17  ;;  %17655 = vst [vmem:[#allocation50_spill] sm:$0xff] %v13586_v55  ;;  %v13598_v17 = vmul.f32 %v17659_v12, %v12714_v11  ;;  %v17670_v12 = vsub.f32 %v17669_v13, %v12251_v49  ;;  %v17673_v3 = vsub.f32 %v17672_v32, %v12251_v49 }
 0x293   : > { %17662 = vst [vmem:[#allocation46_spill] sm:$0xff] %v13604_v28  ;;  %v13610_v55 = vmul.f32 %v17664_v2, %v12241_v26  ;;  %v13616_v21 = vmul.f32 %v17667_v47, %v12384_v58  ;;  %v17676_v2 = vsub.f32 %v17675_v22, %v12251_v49  ;;  %v17679_v47 = vsub.f32 %v17678_v24, %v12251_v49 }
 0x294   : > { %v13622_v42 = vmul.f32 %v17670_v12, %v12508_v45  ;;  %v13628_v28 = vmul.f32 %v17673_v3, %v12243_v0  ;;  %v17681_v12 = vld [vmem:[#allocation96_spill] sm:$0xff]  ;;  %v17684_v3 = vld [vmem:[#allocation97_spill] sm:$0xff] }
 0x295   : > { %17665 = vst [vmem:[#allocation53_spill] sm:$0xff] %v13610_v55  ;;  %17668 = vst [vmem:[#allocation51_spill] sm:$0xff] %v13616_v21  ;;  %v13634_v55 = vmul.f32 %v17676_v2, %v12632_v63  ;;  %v13640_v13 = vmul.f32 %v17679_v47, %v12247_v25  ;;  %v17687_v2 = vld [vmem:[#allocation98_spill] sm:$0xff] }
 0x296   : > { %17671 = vst [vmem:[#allocation54_spill] sm:$0xff] %v13622_v42  ;;  %17674 = vst [vmem:[#allocation57_spill] sm:$0xff] %v13628_v28  ;;  %v17682_v42 = vsub.f32 %v17681_v12, %v12251_v49  ;;  %v17685_v28 = vsub.f32 %v17684_v3, %v12251_v49  ;;  %v17690_v47 = vld [vmem:[#allocation94_spill] sm:$0xff] }
 0x297   : > { %17677 = vst [vmem:[#allocation55_spill] sm:$0xff] %v13634_v55  ;;  %17680 = vst [vmem:[#allocation11_spill] sm:$0xff] %v13640_v13  ;;  %v17688_v55 = vsub.f32 %v17687_v2, %v12251_v49  ;;  %v17691_v13 = vsub.f32 %v17690_v47, %v12251_v49 }
 0x298   : > { %v13646_v32 = vmul.f32 %v17682_v42, %v12756_v9  ;;  %v13652_v22 = vmul.f32 %v17685_v28, %v12253_v48  ;;  %v17693_v42 = vld [vmem:[#allocation101_spill] sm:$0xff]  ;;  %v17696_v28 = vld [vmem:[#allocation99_spill] sm:$0xff] }
 0x299   : > { %v13658_v24 = vmul.f32 %v17688_v55, %v12849_v23  ;;  %v13664_v21 = vmul.f32 %v17691_v13, %v12342_v4  ;;  %v17694_v12 = vsub.f32 %v17693_v42, %v12251_v49  ;;  %v17699_v55 = vld [vmem:[#allocation102_spill] sm:$0xff]  ;;  %v17702_v13 = vld [vmem:[#allocation105_spill] sm:$0xff] }
 0x29a   : > { %17683 = vst [vmem:[#allocation52_spill] sm:$0xff] %v13646_v32  ;;  %17686 = vst [vmem:[#allocation59_spill] sm:$0xff] %v13652_v22  ;;  %v17697_v22 = vsub.f32 %v17696_v28, %v12251_v49 }
 0x29b   : > { %17689 = vst [vmem:[#allocation56_spill] sm:$0xff] %v13658_v24  ;;  %17692 = vst [vmem:[#allocation60_spill] sm:$0xff] %v13664_v21  ;;  %v13670_v3 = vmul.f32 %v17694_v12, %v12912_v62  ;;  %v17700_v24 = vsub.f32 %v17699_v55, %v12251_v49  ;;  %v17703_v21 = vsub.f32 %v17702_v13, %v12251_v49  ;;  %v17704_v12 = vld [vmem:[#allocation103_spill] sm:$0xff] }
 0x29c   : > { %v13676_v2 = vmul.f32 %v17697_v22, %v12466_v7  ;;  %v17707_v22 = vsub.f32 %v12852_v14, %v12251_v49 }
 0x29d   : > { %17695 = vst [vmem:[#allocation61_spill] sm:$0xff] %v13670_v3  ;;  %v13682_v47 = vmul.f32 %v17700_v24, %v13004_v56  ;;  %v4990_v42 = vmul.f32 %v17703_v21, %v12590_v36  ;;  %v17705_v3 = vsub.f32 %v17704_v12, %v12251_v49  ;;  %v17709_v24 = vld [vmem:[#allocation100_spill] sm:$0xff]  ;;  %v17712_v21 = vld [vmem:[#allocation107_spill] sm:$0xff] }
 0x29e   : > { %17698 = vst [vmem:[#allocation62_spill] sm:$0xff] %v13676_v2  ;;  %v13698_v28 = vmul.f32 %v17707_v22, %v12260_v51  ;;  %v17710_v55 = vsub.f32 %v17709_v24, %v12251_v49  ;;  %v17715_v12 = vld [vmem:[#allocation104_spill] sm:$0xff] }
 0x29f   : > { %17701 = vst [vmem:[#allocation58_spill] sm:$0xff] %v13682_v47  ;;  %v13692_v32 = vmul.f32 %v17705_v3, %v12714_v11  ;;  %v17713_v47 = vsub.f32 %v17712_v21, %v12251_v49  ;;  %v17716_v14 = vsub.f32 %v17715_v12, %v12251_v49  ;;  %v17718_v51 = vld [vmem:[#allocation108_spill] sm:$0xff]  ;;  %v17721_v21 = vld [vmem:[#allocation109_spill] sm:$0xff]  ;;  %v17724_v12 = vld [vmem:[#allocation110_spill] sm:$0xff] }
 0x2a0   : > { %17708 = vst [vmem:[#allocation63_spill] sm:$0xff] %v13698_v28  ;;  %v13704_v13 = vmul.f32 %v17710_v55, %v12241_v26  ;;  %v17719_v22 = vsub.f32 %v17718_v51, %v12251_v49  ;;  %v9747_v26 = vld [vmem:[%s10031_s15 + $0x78] sm:$0x3] }
 0x2a1   : > { %17706 = vst [vmem:[#allocation64_spill] sm:$0xff] %v13692_v32  ;;  %v13710_v3 = vmul.f32 %v17713_v47, %v12384_v58  ;;  %v13716_v32 = vmul.f32 %v17716_v14, %v12508_v45  ;;  %v4711_v55 = vsub.f32 %v9747_v26, %v12251_v49  ;;  %v17722_v58 = vsub.f32 %v17721_v21, %v12251_v49 }
 0x2a2   : > { %17711 = vst [vmem:[#allocation66_spill] sm:$0xff] %v13704_v13  ;;  %v13722_v24 = vmul.f32 %v17719_v22, %v12243_v0  ;;  %v17725_v45 = vsub.f32 %v17724_v12, %v12251_v49  ;;  %v17727_v0 = vsub.f32 %v12887_v43, %v12251_v49  ;;  %v9748_v22 = vld [vmem:[%s10031_s15 + $0x118] sm:$0x3]  ;;  %v17731_v43 = vld [vmem:[#allocation117_spill] sm:$0xff] }
 0x2a3   : > { %17714 = vst [vmem:[#allocation9_spill] sm:$0xff] %v13710_v3  ;;  %17717 = vst [vmem:[#allocation67_spill] sm:$0xff] %v13716_v32  ;;  %v13730_v47 = vmul.f32 %v17722_v58, %v12632_v63  ;;  %v4731_v26 = vsub.f32 %v9748_v22, %v12251_v49  ;;  %v17729_v63 = vsub.f32 %v12902_v46, %v12251_v49  ;;  %v9749_v58 = vld [vmem:[%s10031_s15 + $0x1b8] sm:$0x3] }
 0x2a4   : > { %17720 = vst [vmem:[#allocation68_spill] sm:$0xff] %v13722_v24  ;;  %v13736_v14 = vmul.f32 %v17725_v45, %v12247_v25  ;;  %v13742_v51 = vmul.f32 %v17727_v0, %v12756_v9  ;;  %v4751_v25 = vsub.f32 %v9749_v58, %v12251_v49  ;;  %v9750_v12 = vld [vmem:[%s10031_s15 + $0x258] sm:$0x3]  ;;  %v17732_v0 = vsub.f32 %v17731_v43, %v12251_v49 }
 0x2a5   : > { %17723 = vst [vmem:[#allocation65_spill] sm:$0xff] %v13730_v47  ;;  %v13750_v21 = vmul.f32 %v17729_v63, %v12253_v48  ;;  %v4771_v45 = vsub.f32 %v9750_v12, %v12251_v49  ;;  %v9752_v47 = vld [vmem:[%s10031_s15 + $0x398] sm:$0x3]  ;;  %v5070_v43 = vmul.f32 %v13232_v6, %v13232_v6  ;;  %v13794_v6 = vmul.f32 %v13136_v53, %v13136_v53 }
 0x2a6   : > { %17726 = vst [vmem:[#allocation71_spill] sm:$0xff] %v13736_v14  ;;  %17728 = vst [vmem:[#allocation69_spill] sm:$0xff] %v13742_v51  ;;  %v9751_v14 = vld [vmem:[%s10031_s15 + $0x2f8] sm:$0x3]  ;;  %v13762_v22 = vmul.f32 %v17732_v0, %v12849_v23  ;;  %v4669_v51 = vpop.permute.xlu0 %4668  ;;  %v4811_v48 = vsub.f32 %v9752_v47, %v12251_v49  ;;  %v5030_v23 = vmul.f32 %v13040_v57, %v13040_v57 }
 0x2a7   : > { %17730 = vst [vmem:[#allocation72_spill] sm:$0xff] %v13750_v21  ;;  %v4791_v9 = vsub.f32 %v9751_v14, %v12251_v49  ;;  %v9753_v46 = vld [vmem:[%s10031_s15 + $0x438] sm:$0x3]  ;;  %v17734_v14 = vsub.f32 %v12920_v16, %v12251_v49  ;;  %v4871_v24 = vmul.f32 %v4711_v55, %v4669_v51  ;;  %v17736_v47 = vsub.f32 %v11808_v52, %v12251_v49 }
 0x2a8   : > { %17733 = vst [vmem:[#allocation73_spill] sm:$0xff] %v13762_v22  ;;  %v4831_v63 = vsub.f32 %v9753_v46, %v12251_v49  ;;  %v9754_v58 = vld [vmem:[%s10031_s15 + $0x4d8] sm:$0x3]  ;;  %v17738_v46 = vsub.f32 %v11918_v34, %v12251_v49  ;;  %v5110_v55 = vmul.f32 %v13476_v1, %v13476_v1  ;;  %v4931_v57 = vmul.f32 %v4771_v45, %v4669_v51 }
 0x2a9   : > { %v4851_v21 = vsub.f32 %v9754_v58, %v12251_v49  ;;  %v13774_v12 = vmul.f32 %v17734_v14, %v12342_v4  ;;  %v13784_v0 = vmul.f32 %v17736_v47, %v12912_v62  ;;  %v4891_v4 = vmul.f32 %v4731_v26, %v4669_v51  ;;  %17739 = vst [vmem:[#allocation77_spill] sm:$0xff] %v13794_v6 }
 0x2aa   : > { %v5010_v16 = vmul.f32 %v17738_v46, %v12590_v36  ;;  %v4911_v58 = vmul.f32 %v4751_v25, %v4669_v51  ;;  %v4951_v14 = vmul.f32 %v4791_v9, %v4669_v51  ;;  %v4991_v52 = vmul.f32 %v4831_v63, %v4669_v51 }
 0x2ab   : > { %17735 = vst [vmem:[#allocation74_spill] sm:$0xff] %v13774_v12  ;;  %17737 = vst [vmem:[#allocation70_spill] sm:$0xff] %v13784_v0  ;;  %v4971_v12 = vmul.f32 %v4811_v48, %v4669_v51  ;;  %v13796_v62 = vmul.f32 %v4851_v21, %v4669_v51  ;;  %v5150_v47 = vmul.f32 %v4990_v42, %v4990_v42 }
 0x2ac   : > { %v5031_v0 = vmul.f32 %v4871_v24, %v4871_v24  ;;  %v13800_v34 = vmul.f32 %v13338_v40, %v13338_v40  ;;  %v5504_v36 = vcombine.high %v5030_v23, %v5030_v23  ;;  %v5984_v26 = vcombine.high %v5070_v43, %v5070_v43 }
 0x2ad   : > { %v5051_v1 = vmul.f32 %v4891_v4, %v4891_v4  ;;  %v13804_v25 = vmul.f32 %v13142_v37, %v13142_v37  ;;  %v13808_v53 = vmul.f32 %v13592_v61, %v13592_v61  ;;  %v6464_v45 = vcombine.high %v5110_v55, %v5110_v55 }
 0x2ae   : > { %17740 = vst [vmem:[#allocation75_spill] sm:$0xff] %v13800_v34  ;;  %v5071_v51 = vmul.f32 %v4911_v58, %v4911_v58  ;;  %v5091_v21 = vmul.f32 %v4931_v57, %v4931_v57  ;;  %v13812_v42 = vmul.f32 %v13347_v33, %v13347_v33  ;;  %v5744_v40 = vcombine.high %v13794_v6, %v13794_v6 }
 0x2af   : > { %17741 = vst [vmem:[#allocation78_spill] sm:$0xff] %v13804_v25  ;;  %17742 = vst [vmem:[#allocation81_spill] sm:$0xff] %v13808_v53  ;;  %v5111_v24 = vmul.f32 %v4951_v14, %v4951_v14  ;;  %v5131_v9 = vmul.f32 %v4971_v12, %v4971_v12  ;;  %v13817_v48 = vrot.slane %v5030_v23, %v17584_v5 }
 0x2b0   : > { %17743 = vst [vmem:[#allocation79_spill] sm:$0xff] %v13812_v42  ;;  %v6944_v37 = vcombine.high %v5150_v47, %v5150_v47  ;;  %v13821_v61 = vmul.f32 %v13598_v17, %v13598_v17  ;;  %v5518_v63 = vrot.slane %v5504_v36, %v17584_v5  ;;  %v5998_v46 = vrot.slane %v5984_v26, %v17584_v5 }
 0x2b1   : > { %17744 = vst [vmem:[#allocation76_spill] sm:$0xff] %v13817_v48  ;;  %v6224_v33 = vcombine.high %v13800_v34, %v13800_v34  ;;  %v5151_v4 = vmul.f32 %v4991_v52, %v4991_v52  ;;  %v13827_v58 = vmul.f32 %v5010_v16, %v5010_v16  ;;  %v6478_v12 = vrot.slane %v6464_v45, %v17584_v5 }
 0x2b2   : > { %17745 = vst [vmem:[#allocation83_spill] sm:$0xff] %v13821_v61  ;;  %v6704_v23 = vcombine.high %v13808_v53, %v13808_v53  ;;  %v5527_v57 = vrot.slane %v5031_v0, %v17584_v5  ;;  %v13834_v17 = vrot.slane %v5744_v40, %v17584_v5  ;;  %v5775_v14 = vrot.slane %v13804_v25, %v17584_v5 }
 0x2b3   : > { %v13839_v36 = vrot.slane %v5070_v43, %v17584_v5  ;;  %v5519_v16 = vcombine.high %v13817_v48, %v13817_v48  ;;  %v5767_v52 = vrot.slane %v5051_v1, %v17584_v5  ;;  %v13845_v26 = vrot.slane %v5110_v55, %v17584_v5 }
 0x2b4   : > { %17746 = vst [vmem:[#allocation80_spill] sm:$0xff] %v13834_v17  ;;  %v6958_v45 = vrot.slane %v6944_v37, %v17584_v5  ;;  %v5520_v0 = vcombine.high %v5518_v63, %v5518_v63  ;;  %v6000_v53 = vcombine.high %v5998_v46, %v5998_v46  ;;  %v13849_v40 = vrot.slane %v6224_v33, %v17584_v5 }
 0x2b5   : > { %17747 = vst [vmem:[#allocation84_spill] sm:$0xff] %v13839_v36  ;;  %17748 = vst [vmem:[#allocation85_spill] sm:$0xff] %v13845_v26  ;;  %v6255_v34 = vrot.slane %v13812_v42, %v17584_v5  ;;  %v6007_v43 = vrot.slane %v5071_v51, %v17584_v5  ;;  %v6480_v25 = vcombine.high %v6478_v12, %v6478_v12 }
 0x2b6   : > { %17749 = vst [vmem:[#allocation86_spill] sm:$0xff] %v13849_v40  ;;  %v13855_v48 = vrot.slane %v6704_v23, %v17584_v5  ;;  %v13858_v1 = vrot.slane %v5150_v47, %v17584_v5  ;;  %v5760_v55 = vcombine.high %v13834_v17, %v13834_v17  ;;  %v5783_v37 = vcombine.high %v5775_v14, %v5775_v14 }
 0x2b7   : > { %v5999_v33 = vcombine.high %v13839_v36, %v13839_v36  ;;  %v6247_v6 = vrot.slane %v5091_v21, %v17584_v5  ;;  %v6479_v42 = vcombine.high %v13845_v26, %v13845_v26  ;;  %v6487_v51 = vrot.slane %v5111_v24, %v17584_v5 }
 0x2b8   : > { %17750 = vst [vmem:[#allocation82_spill] sm:$0xff] %v13855_v48  ;;  %17751 = vst [vmem:[#allocation88_spill] sm:$0xff] %v13858_v1  ;;  %v6735_v23 = vrot.slane %v13821_v61, %v17584_v5  ;;  %v6960_v22 = vcombine.high %v6958_v45, %v6958_v45  ;;  %v6240_v47 = vcombine.high %v13849_v40, %v13849_v40 }
 0x2b9   : > { %v6263_v32 = vcombine.high %v6255_v34, %v6255_v34  ;;  %v7410_v17 = vcombine.low %v5520_v0, %v5527_v57  ;;  %v7835_v3 = vcombine.low %v6000_v53, %v6007_v43  ;;  %v6720_v36 = vcombine.high %v13855_v48, %v13855_v48 }
 0x2ba   : > { %v6959_v21 = vcombine.high %v13858_v1, %v13858_v1  ;;  %v6967_v26 = vrot.slane %v5151_v4, %v17584_v5  ;;  %v8260_v13 = vcombine.low %v6480_v25, %v6487_v51  ;;  %v6727_v24 = vrot.slane %v5131_v9, %v17584_v5 }
 0x2bb   : > { %v7184_v61 = vcombine.high %v13827_v58, %v13827_v58  ;;  %v7409_v28 = vcombine.low %v5519_v16, %v5518_v63  ;;  %v7834_v2 = vcombine.low %v5999_v33, %v5998_v46  ;;  %v6743_v40 = vcombine.high %v6735_v23, %v6735_v23 }
 0x2bc   : > { %v7630_v18 = vcombine.low %v5760_v55, %v5767_v52  ;;  %v8259_v57 = vcombine.low %v6479_v42, %v6478_v12  ;;  %v8685_v53 = vcombine.low %v6960_v22, %v6967_v26  ;;  %v13882_v0 = vmul.f32 %v13796_v62, %v13796_v62  ;;  %v17813_v52 = vld [vmem:[#allocation149_spill] sm:$0xff] }
 0x2bd   : > { %v7424_v43 = vrot.slane %v7410_v17, %v17584_v5  ;;  %v7849_v4 = vrot.slane %v7835_v3, %v17584_v5  ;;  %v8055_v25 = vcombine.low %v6240_v47, %v6247_v6  ;;  %v7631_v51 = vcombine.low %v5775_v14, %v5783_v37 }
 0x2be   : > { %17752 = vst [vmem:[#allocation87_spill] sm:$0xff] %v13882_v0  ;;  %v8274_v9 = vrot.slane %v8260_v13, %v17584_v5  ;;  %v8480_v1 = vcombine.low %v6720_v36, %v6727_v24  ;;  %v8684_v48 = vcombine.low %v6959_v21, %v6958_v45  ;;  %v13888_v63 = vrot.slane %v7184_v61, %v17584_v5  ;;  %v17815_v0 = vld [vmem:[#allocation146_spill] sm:$0xff] }
 0x2bf   : > { %v7417_v42 = vrot.slane %v7409_v28, %v17584_v5  ;;  %v7842_v22 = vrot.slane %v7834_v2, %v17584_v5  ;;  %v8056_v46 = vcombine.low %v6255_v34, %v6263_v32  ;;  %v7638_v62 = vrot.slane %v7630_v18, %v17584_v5 }
 0x2c0   : > { %17753 = vst [vmem:[#allocation90_spill] sm:$0xff] %v13888_v63  ;;  %v8267_v12 = vrot.slane %v8259_v57, %v17584_v5  ;;  %v8481_v17 = vcombine.low %v6735_v23, %v6743_v40  ;;  %v8699_v3 = vrot.slane %v8685_v53, %v17584_v5  ;;  %v17754_v13 = vsub.f32 %v11872_v50, %v12251_v49  ;;  %v17817_v63 = vld [vmem:[#allocation151_spill] sm:$0xff] }
 0x2c1   : > { %v7425_v61 = vcombine.low %v7417_v42, %v7424_v43  ;;  %v7850_v14 = vcombine.low %v7842_v22, %v7849_v4  ;;  %v8063_v28 = vrot.slane %v8055_v25, %v17584_v5  ;;  %v7645_v2 = vrot.slane %v7631_v51, %v17584_v5  ;;  %v17773_v4 = vld [vmem:[#allocation118_spill] sm:$0xff]  ;;  %v17774_v25 = vld [vmem:[#allocation125_spill] sm:$0xff]  ;;  %v17776_v51 = vld [vmem:[#allocation123_spill] sm:$0xff] }
 0x2c2   : > { %v13899_v6 = vmul.f32 %v17754_v13, %v12466_v7  ;;  %v8275_v32 = vcombine.low %v8267_v12, %v8274_v9  ;;  %v8488_v18 = vrot.slane %v8480_v1, %v17584_v5  ;;  %v8692_v34 = vrot.slane %v8684_v48, %v17584_v5  ;;  %v17777_v42 = vld [vmem:[#allocation126_spill] sm:$0xff]  ;;  %v17781_v12 = vld [vmem:[#allocation127_spill] sm:$0xff] }
 0x2c3   : > { %v17755_v36 = vsub.f32 %v11905_v31, %v12251_v49  ;;  %v17756_v50 = vsub.f32 %v12034_v19, %v12251_v49  ;;  %v8070_v26 = vrot.slane %v8056_v46, %v17584_v5  ;;  %v13922_v45 = vcombine.low %v7638_v62, %v7645_v2  ;;  %v17779_v46 = vld [vmem:[#allocation129_spill] sm:$0xff]  ;;  %v17811_v48 = vld [vmem:[#allocation143_spill] sm:$0xff]  ;;  %v17833_v49 = vld [vmem:[#allocation154_spill] sm:$0xff] }
 0x2c4   : > { %v8495_v31 = vrot.slane %v8481_v17, %v17584_v5  ;;  %v13928_v1 = vsel %vm4300_vm1, %v7425_v61, 0.0  ;;  %v13931_v19 = vsel %vm4300_vm1, %v7850_v14, 0.0  ;;  %v13940_v37 = vsel %vm4300_vm1, %v8275_v32, 0.0  ;;  %v17784_v61 = vld [vmem:[#allocation131_spill] sm:$0xff]  ;;  %v17787_v32 = vld [vmem:[#allocation132_spill] sm:$0xff] }
 0x2c5   : > { %v13909_v16 = vmul.f32 %v17755_v36, %v13004_v56  ;;  %v13915_v7 = vmul.f32 %v17756_v50, %v12714_v11  ;;  %17757 = vst [vmem:[#allocation91_spill] sm:$0xff] %v13922_v45  ;;  %v8700_v56 = vcombine.low %v8692_v34, %v8699_v3  ;;  %v13925_v40 = vcombine.low %v8063_v28, %v8070_v26  ;;  %v17782_v3 = vld [vmem:[#allocation124_spill] sm:$0xff]  ;;  %v17788_v34 = vld [vmem:[#allocation133_spill] sm:$0xff]  ;;  %v17790_v50 = vld [vmem:[#allocation134_spill] sm:$0xff] }
 0x2c6   : > { %17759 = vst [vmem:[#allocation89_spill] sm:$0xff] %v13928_v1  ;;  %17760 = vst [vmem:[#allocation8_spill] sm:$0xff] %v13931_v19  ;;  %v13935_v11 = vmul.f32 %v12954_v30, %v12954_v30  ;;  %v13937_v55 = vcombine.low %v8488_v18, %v8495_v31  ;;  %v13944_v33 = vmul.f32 %v12960_v8, %v12960_v8  ;;  %v17785_v28 = vld [vmem:[#allocation128_spill] sm:$0xff]  ;;  %v17791_v31 = vld [vmem:[#allocation130_spill] sm:$0xff] }
 0x2c7   : > { %17758 = vst [vmem:[#allocation92_spill] sm:$0xff] %v13925_v40  ;;  %17762 = vst [vmem:[#allocation93_spill] sm:$0xff] %v13940_v37  ;;  %v13948_v23 = vmul.f32 %v12966_v38, %v12966_v38  ;;  %v13952_v47 = vmul.f32 %v12972_v60, %v12972_v60  ;;  %v13956_v30 = vmul.f32 %v12978_v41, %v12978_v41  ;;  %v13967_v24 = vsel %vm4300_vm1, %v8700_v56, 0.0  ;;  %v17768_v41 = vld [vmem:[#allocation120_spill] sm:$0xff]  ;;  %v17823_v37 = vld [vmem:[#allocation150_spill] sm:$0xff] }
 0x2c8   : > { %17761 = vst [vmem:[#allocation95_spill] sm:$0xff] %v13937_v55  ;;  %17763 = vst [vmem:[#allocation96_spill] sm:$0xff] %v13944_v33  ;;  %v13960_v21 = vmul.f32 %v12984_v59, %v12984_v59  ;;  %v13964_v8 = vmul.f32 %v12990_v29, %v12990_v29  ;;  %v13971_v38 = vmul.f32 %v12996_v15, %v12996_v15  ;;  %v17770_v59 = vld [vmem:[#allocation121_spill] sm:$0xff]  ;;  %v17771_v29 = vld [vmem:[#allocation122_spill] sm:$0xff] }
 0x2c9   : > { %17764 = vst [vmem:[#allocation97_spill] sm:$0xff] %v13952_v47  ;;  %17766 = vst [vmem:[#allocation94_spill] sm:$0xff] %v13967_v24  ;;  %v13975_v60 = vmul.f32 %v13002_v54, %v13002_v54  ;;  %v13979_v57 = vmul.f32 %v17768_v41, %v17768_v41  ;;  %v13983_v53 = vmul.f32 %v17770_v59, %v17770_v59  ;;  %v17793_v41 = vld [vmem:[#allocation136_spill] sm:$0xff]  ;;  %v17825_v40 = vld [vmem:[#allocation153_spill] sm:$0xff] }
 0x2ca   : > { %17765 = vst [vmem:[#allocation98_spill] sm:$0xff] %v13960_v21  ;;  %17767 = vst [vmem:[#allocation101_spill] sm:$0xff] %v13971_v38  ;;  %v13987_v43 = vmul.f32 %v17771_v29, %v17771_v29  ;;  %v13991_v15 = vmul.f32 %v17773_v4, %v17773_v4  ;;  %v13995_v54 = vmul.f32 %v17774_v25, %v17774_v25  ;;  %v17794_v29 = vld [vmem:[#allocation135_spill] sm:$0xff]  ;;  %v17796_v25 = vld [vmem:[#allocation138_spill] sm:$0xff] }
 0x2cb   : > { %17769 = vst [vmem:[#allocation99_spill] sm:$0xff] %v13979_v57  ;;  %v13999_v9 = vmul.f32 %v17776_v51, %v17776_v51  ;;  %v14003_v22 = vmul.f32 %v17777_v42, %v17777_v42  ;;  %v14007_v62 = vmul.f32 %v17779_v46, %v17779_v46  ;;  %v14011_v17 = vmul.f32 %v17781_v12, %v17781_v12  ;;  %v17797_v42 = vld [vmem:[#allocation139_spill] sm:$0xff]  ;;  %v17799_v12 = vld [vmem:[#allocation140_spill] sm:$0xff]  ;;  %v17829_v45 = vld [vmem:[#allocation158_spill] sm:$0xff] }
 0x2cc   : > { %17772 = vst [vmem:[#allocation102_spill] sm:$0xff] %v13987_v43  ;;  %17775 = vst [vmem:[#allocation105_spill] sm:$0xff] %v13995_v54  ;;  %v14015_v13 = vmul.f32 %v17782_v3, %v17782_v3  ;;  %v14019_v14 = vmul.f32 %v17784_v61, %v17784_v61  ;;  %v14023_v2 = vmul.f32 %v17785_v28, %v17785_v28  ;;  %v17800_v61 = vld [vmem:[#allocation137_spill] sm:$0xff]  ;;  %v17819_v24 = vld [vmem:[#allocation148_spill] sm:$0xff] }
 0x2cd   : > { %17778 = vst [vmem:[#allocation103_spill] sm:$0xff] %v14003_v22  ;;  %17780 = vst [vmem:[#allocation100_spill] sm:$0xff] %v14007_v62  ;;  %v14027_v18 = vmul.f32 %v17787_v32, %v17787_v32  ;;  %v14031_v36 = vmul.f32 %v17788_v34, %v17788_v34  ;;  %v14035_v26 = vmul.f32 %v17790_v50, %v17790_v50  ;;  %v17802_v32 = vld [vmem:[#allocation141_spill] sm:$0xff]  ;;  %v17803_v50 = vld [vmem:[#allocation144_spill] sm:$0xff] }
 0x2ce   : > { %17783 = vst [vmem:[#allocation107_spill] sm:$0xff] %v14015_v13  ;;  %17786 = vst [vmem:[#allocation104_spill] sm:$0xff] %v14023_v2  ;;  %v14039_v56 = vmul.f32 %v17791_v31, %v17791_v31  ;;  %v14043_v59 = vmul.f32 %v17793_v41, %v17793_v41  ;;  %v14047_v4 = vmul.f32 %v17794_v29, %v17794_v29  ;;  %v17805_v41 = vld [vmem:[#allocation145_spill] sm:$0xff]  ;;  %v17821_v55 = vld [vmem:[#allocation152_spill] sm:$0xff] }
 0x2cf   : > { %17789 = vst [vmem:[#allocation108_spill] sm:$0xff] %v14031_v36  ;;  %v14051_v51 = vmul.f32 %v17796_v25, %v17796_v25  ;;  %v14055_v46 = vmul.f32 %v17797_v42, %v17797_v42  ;;  %v14059_v3 = vmul.f32 %v17799_v12, %v17799_v12  ;;  %v14063_v28 = vmul.f32 %v17800_v61, %v17800_v61  ;;  %v17807_v25 = vld [vmem:[#allocation142_spill] sm:$0xff]  ;;  %v17809_v12 = vld [vmem:[#allocation147_spill] sm:$0xff]  ;;  %v17831_v1 = vld [vmem:[#allocation157_spill] sm:$0xff] }
 0x2d0   : > { %17792 = vst [vmem:[#allocation109_spill] sm:$0xff] %v14039_v56  ;;  %17795 = vst [vmem:[#allocation110_spill] sm:$0xff] %v14047_v4  ;;  %v14067_v34 = vmul.f32 %v17802_v32, %v17802_v32  ;;  %v14071_v31 = vmul.f32 %v17803_v50, %v17803_v50  ;;  %v14075_v29 = vmul.f32 %v17805_v41, %v17805_v41  ;;  %v17827_v19 = vld [vmem:[#allocation155_spill] sm:$0xff] }
 0x2d1   : > { %17798 = vst [vmem:[#allocation117_spill] sm:$0xff] %v14055_v46  ;;  %17801 = vst [vmem:[#allocation120_spill] sm:$0xff] %v14063_v28  ;;  %v14079_v42 = vmul.f32 %v17807_v25, %v17807_v25  ;;  %v14083_v61 = vmul.f32 %v17809_v12, %v17809_v12  ;;  %v14087_v32 = vmul.f32 %v17811_v48, %v17811_v48 }
 0x2d2   : > { %17804 = vst [vmem:[#allocation121_spill] sm:$0xff] %v14071_v31  ;;  %17806 = vst [vmem:[#allocation122_spill] sm:$0xff] %v14075_v29  ;;  %v14091_v50 = vmul.f32 %v17813_v52, %v17813_v52  ;;  %v14095_v41 = vmul.f32 %v17815_v0, %v17815_v0  ;;  %v14099_v25 = vmul.f32 %v17817_v63, %v17817_v63 }
 0x2d3   : > { %17808 = vst [vmem:[#allocation118_spill] sm:$0xff] %v14079_v42  ;;  %17810 = vst [vmem:[#allocation125_spill] sm:$0xff] %v14083_v61  ;;  %v14103_v12 = vmul.f32 %v17819_v24, %v17819_v24  ;;  %v14107_v48 = vmul.f32 %v17821_v55, %v17821_v55  ;;  %v14111_v52 = vmul.f32 %v17823_v37, %v17823_v37 }
 0x2d4   : > { %17812 = vst [vmem:[#allocation123_spill] sm:$0xff] %v14087_v32  ;;  %17814 = vst [vmem:[#allocation126_spill] sm:$0xff] %v14091_v50  ;;  %v14115_v0 = vmul.f32 %v17825_v40, %v17825_v40  ;;  %v14119_v63 = vmul.f32 %v17827_v19, %v17827_v19  ;;  %v14123_v24 = vmul.f32 %v17829_v45, %v17829_v45 }
 0x2d5   : > { %17816 = vst [vmem:[#allocation129_spill] sm:$0xff] %v14095_v41  ;;  %17818 = vst [vmem:[#allocation127_spill] sm:$0xff] %v14099_v25  ;;  %v14127_v55 = vmul.f32 %v17831_v1, %v17831_v1  ;;  %v14131_v37 = vmul.f32 %v17833_v49, %v17833_v49  ;;  %v14459_v33 = vrot.slane %v13964_v8, %v17584_v5 }
 0x2d6   : > { %17820 = vst [vmem:[#allocation124_spill] sm:$0xff] %v14103_v12  ;;  %17822 = vst [vmem:[#allocation131_spill] sm:$0xff] %v14107_v48  ;;  %v14467_v47 = vrot.slane %v13975_v60, %v17584_v5  ;;  %v14475_v21 = vrot.slane %v13983_v53, %v17584_v5  ;;  %v14483_v38 = vrot.slane %v13991_v15, %v17584_v5 }
 0x2d7   : > { %17824 = vst [vmem:[#allocation128_spill] sm:$0xff] %v14111_v52  ;;  %17826 = vst [vmem:[#allocation132_spill] sm:$0xff] %v14115_v0  ;;  %v17835_v52 = vld [vmem:[#allocation160_spill] sm:$0xff]  ;;  %v14491_v57 = vrot.slane %v13999_v9, %v17584_v5  ;;  %v14521_v62 = vrot.slane %v14027_v18, %v17584_v5  ;;  %v14529_v13 = vrot.slane %v14035_v26, %v17584_v5 }
 0x2d8   : > { %17828 = vst [vmem:[#allocation133_spill] sm:$0xff] %v14119_v63  ;;  %17830 = vst [vmem:[#allocation134_spill] sm:$0xff] %v14123_v24  ;;  %v14135_v40 = vmul.f32 %v17835_v52, %v17835_v52  ;;  %v17837_v0 = vld [vmem:[#allocation156_spill] sm:$0xff]  ;;  %v17839_v63 = vld [vmem:[#allocation161_spill] sm:$0xff]  ;;  %v14537_v2 = vrot.slane %v14043_v59, %v17584_v5  ;;  %v14545_v36 = vrot.slane %v14051_v51, %v17584_v5 }
 0x2d9   : > { %17832 = vst [vmem:[#allocation130_spill] sm:$0xff] %v14127_v55  ;;  %17834 = vst [vmem:[#allocation136_spill] sm:$0xff] %v14131_v37  ;;  %v14139_v19 = vmul.f32 %v17837_v0, %v17837_v0  ;;  %v14143_v45 = vmul.f32 %v17839_v63, %v17839_v63  ;;  %v17841_v24 = vld [vmem:[#allocation159_spill] sm:$0xff]  ;;  %v17845_v37 = vld [vmem:[#allocation164_spill] sm:$0xff]  ;;  %v14558_v54 = vrot.slane %v14059_v3, %v17584_v5 }
 0x2da   : > { %17836 = vst [vmem:[#allocation135_spill] sm:$0xff] %v14135_v40  ;;  %v14147_v1 = vmul.f32 %v17841_v24, %v17841_v24  ;;  %v17843_v55 = vld [vmem:[#allocation163_spill] sm:$0xff]  ;;  %v14155_v52 = vmul.f32 %v17845_v37, %v17845_v37  ;;  %v17847_v40 = vld [vmem:[#allocation12_spill] sm:$0xff]  ;;  %v14566_v43 = vrot.slane %v14067_v34, %v17584_v5  ;;  %v14582_v28 = vrot.slane %v14083_v61, %v17584_v5 }
 0x2db   : > { %17838 = vst [vmem:[#allocation138_spill] sm:$0xff] %v14139_v19  ;;  %17840 = vst [vmem:[#allocation139_spill] sm:$0xff] %v14143_v45  ;;  %v14151_v49 = vmul.f32 %v17843_v55, %v17843_v55  ;;  %v14159_v0 = vmul.f32 %v17847_v40, %v17847_v40  ;;  %v17849_v19 = vld [vmem:[#allocation10_spill] sm:$0xff]  ;;  %v17851_v45 = vld [vmem:[#allocation13_spill] sm:$0xff]  ;;  %v14590_v31 = vrot.slane %v14091_v50, %v17584_v5 }
 0x2dc   : > { %17842 = vst [vmem:[#allocation140_spill] sm:$0xff] %v14147_v1  ;;  %17846 = vst [vmem:[#allocation141_spill] sm:$0xff] %v14155_v52  ;;  %v14163_v63 = vmul.f32 %v17849_v19, %v17849_v19  ;;  %v14167_v24 = vmul.f32 %v17851_v45, %v17851_v45  ;;  %v17853_v1 = vld [vmem:[#allocation14_spill] sm:$0xff]  ;;  %v17857_v52 = vld [vmem:[#allocation19_spill] sm:$0xff]  ;;  %v14598_v42 = vrot.slane %v14099_v25, %v17584_v5 }
 0x2dd   : > { %17844 = vst [vmem:[#allocation137_spill] sm:$0xff] %v14151_v49  ;;  %17848 = vst [vmem:[#allocation144_spill] sm:$0xff] %v14159_v0  ;;  %v14171_v55 = vmul.f32 %v17853_v1, %v17853_v1  ;;  %v17855_v49 = vld [vmem:[#allocation18_spill] sm:$0xff]  ;;  %v14179_v40 = vmul.f32 %v17857_v52, %v17857_v52  ;;  %v17859_v0 = vld [vmem:[#allocation20_spill] sm:$0xff]  ;;  %v14606_v32 = vrot.slane %v14107_v48, %v17584_v5 }
 0x2de   : > { %17850 = vst [vmem:[#allocation145_spill] sm:$0xff] %v14163_v63  ;;  %17852 = vst [vmem:[#allocation142_spill] sm:$0xff] %v14167_v24  ;;  %v14175_v37 = vmul.f32 %v17855_v49, %v17855_v49  ;;  %v14183_v19 = vmul.f32 %v17859_v0, %v17859_v0  ;;  %v17861_v63 = vld [vmem:[#allocation17_spill] sm:$0xff]  ;;  %v17863_v24 = vld [vmem:[#allocation23_spill] sm:$0xff] }
 0x2df   : > { %17854 = vst [vmem:[#allocation147_spill] sm:$0xff] %v14171_v55  ;;  %17858 = vst [vmem:[#allocation149_spill] sm:$0xff] %v14179_v40  ;;  %v14187_v45 = vmul.f32 %v17861_v63, %v17861_v63  ;;  %v14191_v1 = vmul.f32 %v17863_v24, %v17863_v24  ;;  %v17865_v55 = vld [vmem:[#allocation21_spill] sm:$0xff]  ;;  %v17982_v41 = vld [vmem:[#allocation132_spill] sm:$0xff] }
 0x2e0   : > { %17856 = vst [vmem:[#allocation143_spill] sm:$0xff] %v14175_v37  ;;  %17860 = vst [vmem:[#allocation146_spill] sm:$0xff] %v14183_v19  ;;  %v14195_v49 = vmul.f32 %v17865_v55, %v17865_v55  ;;  %v17867_v37 = vld [vmem:[#allocation24_spill] sm:$0xff]  ;;  %v17869_v40 = vld [vmem:[#allocation25_spill] sm:$0xff] }
 0x2e1   : > { %17862 = vst [vmem:[#allocation151_spill] sm:$0xff] %v14187_v45  ;;  %17864 = vst [vmem:[#allocation148_spill] sm:$0xff] %v14191_v1  ;;  %v14199_v52 = vmul.f32 %v17867_v37, %v17867_v37  ;;  %v14203_v0 = vmul.f32 %v17869_v40, %v17869_v40  ;;  %v17871_v19 = vld [vmem:[#allocation26_spill] sm:$0xff]  ;;  %v17873_v45 = vld [vmem:[#allocation29_spill] sm:$0xff] }
 0x2e2   : > { %17866 = vst [vmem:[#allocation152_spill] sm:$0xff] %v14195_v49  ;;  %v14207_v63 = vmul.f32 %v17871_v19, %v17871_v19  ;;  %v14211_v24 = vmul.f32 %v17873_v45, %v17873_v45  ;;  %v17875_v1 = vld [vmem:[#allocation27_spill] sm:$0xff]  ;;  %v17877_v49 = vld [vmem:[#allocation33_spill] sm:$0xff]  ;;  %v17986_v48 = vld [vmem:[#allocation130_spill] sm:$0xff] }
 0x2e3   : > { %17868 = vst [vmem:[#allocation150_spill] sm:$0xff] %v14199_v52  ;;  %17870 = vst [vmem:[#allocation153_spill] sm:$0xff] %v14203_v0  ;;  %v14215_v55 = vmul.f32 %v17875_v1, %v17875_v1  ;;  %v14219_v37 = vmul.f32 %v17877_v49, %v17877_v49  ;;  %v17879_v52 = vld [vmem:[#allocation31_spill] sm:$0xff]  ;;  %v17881_v0 = vld [vmem:[#allocation32_spill] sm:$0xff]  ;;  %v14239_v49 = vmul.f32 %v13503_v20, %v13503_v20 }
 0x2e4   : > { %17872 = vst [vmem:[#allocation155_spill] sm:$0xff] %v14207_v63  ;;  %17874 = vst [vmem:[#allocation158_spill] sm:$0xff] %v14211_v24  ;;  %v14223_v40 = vmul.f32 %v17879_v52, %v17879_v52  ;;  %v14227_v19 = vmul.f32 %v17881_v0, %v17881_v0  ;;  %v17883_v63 = vld [vmem:[#allocation37_spill] sm:$0xff]  ;;  %v17885_v24 = vld [vmem:[#allocation38_spill] sm:$0xff]  ;;  %v14243_v52 = vmul.f32 %v13513_v27, %v13513_v27 }
 0x2e5   : > { %17876 = vst [vmem:[#allocation157_spill] sm:$0xff] %v14215_v55  ;;  %17878 = vst [vmem:[#allocation154_spill] sm:$0xff] %v14219_v37  ;;  %v14231_v45 = vmul.f32 %v17883_v63, %v17883_v63  ;;  %v14235_v1 = vmul.f32 %v17885_v24, %v17885_v24  ;;  %v14247_v0 = vmul.f32 %v13519_v39, %v13519_v39  ;;  %v17992_v12 = vld [vmem:[#allocation139_spill] sm:$0xff]  ;;  %v17995_v46 = vld [vmem:[#allocation137_spill] sm:$0xff]  ;;  %v14750_v37 = vpop.permute.xlu0 %4679 }
 0x2e6   : > { %17880 = vst [vmem:[#allocation160_spill] sm:$0xff] %v14223_v40  ;;  %17882 = vst [vmem:[#allocation156_spill] sm:$0xff] %v14227_v19  ;;  %v14251_v63 = vmul.f32 %v13525_v35, %v13525_v35  ;;  %v14259_v20 = vmul.f32 %v13538_v44, %v13538_v44  ;;  %v14263_v27 = vmul.f32 %v13548_v10, %v13548_v10  ;;  %v17998_v25 = vld [vmem:[#allocation144_spill] sm:$0xff] }
 0x2e7   : > { %17884 = vst [vmem:[#allocation161_spill] sm:$0xff] %v14231_v45  ;;  %17886 = vst [vmem:[#allocation159_spill] sm:$0xff] %v14235_v1  ;;  %v17891_v45 = vld [vmem:[#allocation39_spill] sm:$0xff]  ;;  %v14628_v4 = vrot.slane %v17986_v48, %v17584_v5  ;;  %v14644_v48 = vrot.slane %v17992_v12, %v17584_v5  ;;  %v14660_v12 = vrot.slane %v17998_v25, %v17584_v5 }
 0x2e8   : > { %17887 = vst [vmem:[#allocation163_spill] sm:$0xff] %v14239_v49  ;;  %17888 = vst [vmem:[#allocation164_spill] sm:$0xff] %v14243_v52  ;;  %v14255_v24 = vmul.f32 %v17891_v45, %v17891_v45  ;;  %v17895_v52 = vld [vmem:[#allocation44_spill] sm:$0xff] }
 0x2e9   : > { %17889 = vst [vmem:[#allocation12_spill] sm:$0xff] %v14247_v0  ;;  %17890 = vst [vmem:[#allocation10_spill] sm:$0xff] %v14251_v63  ;;  %v14267_v39 = vmul.f32 %v17895_v52, %v17895_v52  ;;  %v17897_v0 = vld [vmem:[#allocation41_spill] sm:$0xff] }
 0x2ea   : > { %17892 = vst [vmem:[#allocation13_spill] sm:$0xff] %v14255_v24  ;;  %17893 = vst [vmem:[#allocation14_spill] sm:$0xff] %v14259_v20  ;;  %v14271_v35 = vmul.f32 %v17897_v0, %v17897_v0  ;;  %v17899_v63 = vld [vmem:[#allocation45_spill] sm:$0xff]  ;;  %v17901_v24 = vld [vmem:[#allocation48_spill] sm:$0xff] }
 0x2eb   : > { %17894 = vst [vmem:[#allocation18_spill] sm:$0xff] %v14263_v27  ;;  %17896 = vst [vmem:[#allocation19_spill] sm:$0xff] %v14267_v39  ;;  %v14275_v45 = vmul.f32 %v17899_v63, %v17899_v63  ;;  %v14279_v44 = vmul.f32 %v17901_v24, %v17901_v24  ;;  %v17903_v20 = vld [vmem:[#allocation49_spill] sm:$0xff]  ;;  %v17905_v27 = vld [vmem:[#allocation50_spill] sm:$0xff] }
 0x2ec   : > { %17898 = vst [vmem:[#allocation20_spill] sm:$0xff] %v14271_v35  ;;  %v14283_v10 = vmul.f32 %v17903_v20, %v17903_v20  ;;  %v14287_v52 = vmul.f32 %v17905_v27, %v17905_v27  ;;  %v17907_v39 = vld [vmem:[#allocation46_spill] sm:$0xff]  ;;  %v17909_v35 = vld [vmem:[#allocation53_spill] sm:$0xff] }
 0x2ed   : > { %17900 = vst [vmem:[#allocation17_spill] sm:$0xff] %v14275_v45  ;;  %17902 = vst [vmem:[#allocation23_spill] sm:$0xff] %v14279_v44  ;;  %v14291_v0 = vmul.f32 %v17907_v39, %v17907_v39  ;;  %v14295_v63 = vmul.f32 %v17909_v35, %v17909_v35  ;;  %v17911_v45 = vld [vmem:[#allocation51_spill] sm:$0xff]  ;;  %v17913_v44 = vld [vmem:[#allocation54_spill] sm:$0xff] }
 0x2ee   : > { %17904 = vst [vmem:[#allocation21_spill] sm:$0xff] %v14283_v10  ;;  %17906 = vst [vmem:[#allocation24_spill] sm:$0xff] %v14287_v52  ;;  %v14299_v24 = vmul.f32 %v17911_v45, %v17911_v45  ;;  %v14303_v20 = vmul.f32 %v17913_v44, %v17913_v44  ;;  %v17915_v10 = vld [vmem:[#allocation57_spill] sm:$0xff]  ;;  %v17917_v52 = vld [vmem:[#allocation55_spill] sm:$0xff] }
 0x2ef   : > { %17908 = vst [vmem:[#allocation25_spill] sm:$0xff] %v14291_v0  ;;  %17910 = vst [vmem:[#allocation26_spill] sm:$0xff] %v14295_v63  ;;  %v14307_v27 = vmul.f32 %v17915_v10, %v17915_v10  ;;  %v14311_v39 = vmul.f32 %v17917_v52, %v17917_v52  ;;  %v17919_v0 = vld [vmem:[#allocation11_spill] sm:$0xff]  ;;  %v17921_v63 = vld [vmem:[#allocation52_spill] sm:$0xff] }
 0x2f0   : > { %17912 = vst [vmem:[#allocation29_spill] sm:$0xff] %v14299_v24  ;;  %17914 = vst [vmem:[#allocation27_spill] sm:$0xff] %v14303_v20  ;;  %v14315_v35 = vmul.f32 %v17919_v0, %v17919_v0  ;;  %v14319_v45 = vmul.f32 %v17921_v63, %v17921_v63  ;;  %v17923_v24 = vld [vmem:[#allocation59_spill] sm:$0xff]  ;;  %v17925_v20 = vld [vmem:[#allocation56_spill] sm:$0xff] }
 0x2f1   : > { %17916 = vst [vmem:[#allocation33_spill] sm:$0xff] %v14307_v27  ;;  %17918 = vst [vmem:[#allocation31_spill] sm:$0xff] %v14311_v39  ;;  %v14323_v44 = vmul.f32 %v17923_v24, %v17923_v24  ;;  %v14327_v10 = vmul.f32 %v17925_v20, %v17925_v20  ;;  %v17927_v27 = vld [vmem:[#allocation60_spill] sm:$0xff]  ;;  %v17929_v39 = vld [vmem:[#allocation61_spill] sm:$0xff] }
 0x2f2   : > { %17920 = vst [vmem:[#allocation32_spill] sm:$0xff] %v14315_v35  ;;  %17922 = vst [vmem:[#allocation37_spill] sm:$0xff] %v14319_v45  ;;  %v14331_v52 = vmul.f32 %v17927_v27, %v17927_v27  ;;  %v14335_v0 = vmul.f32 %v17929_v39, %v17929_v39  ;;  %v17931_v35 = vld [vmem:[#allocation62_spill] sm:$0xff] }
 0x2f3   : > { %17924 = vst [vmem:[#allocation38_spill] sm:$0xff] %v14323_v44  ;;  %17926 = vst [vmem:[#allocation39_spill] sm:$0xff] %v14327_v10  ;;  %v14339_v63 = vmul.f32 %v17931_v35, %v17931_v35  ;;  %v17933_v45 = vld [vmem:[#allocation58_spill] sm:$0xff]  ;;  %v17935_v44 = vld [vmem:[#allocation64_spill] sm:$0xff] }
 0x2f4   : > { %17928 = vst [vmem:[#allocation44_spill] sm:$0xff] %v14331_v52  ;;  %17930 = vst [vmem:[#allocation41_spill] sm:$0xff] %v14335_v0  ;;  %v14343_v24 = vmul.f32 %v17933_v45, %v17933_v45  ;;  %v14347_v20 = vmul.f32 %v17935_v44, %v17935_v44  ;;  %v17937_v10 = vld [vmem:[#allocation63_spill] sm:$0xff]  ;;  %v17939_v52 = vld [vmem:[#allocation66_spill] sm:$0xff] }
 0x2f5   : > { %17932 = vst [vmem:[#allocation45_spill] sm:$0xff] %v14339_v63  ;;  %v14351_v27 = vmul.f32 %v17937_v10, %v17937_v10  ;;  %v14355_v39 = vmul.f32 %v17939_v52, %v17939_v52  ;;  %v17941_v0 = vld [vmem:[#allocation9_spill] sm:$0xff]  ;;  %v17943_v63 = vld [vmem:[#allocation67_spill] sm:$0xff] }
 0x2f6   : > { %17934 = vst [vmem:[#allocation48_spill] sm:$0xff] %v14343_v24  ;;  %17936 = vst [vmem:[#allocation49_spill] sm:$0xff] %v14347_v20  ;;  %v14359_v35 = vmul.f32 %v17941_v0, %v17941_v0  ;;  %v14363_v45 = vmul.f32 %v17943_v63, %v17943_v63  ;;  %v17945_v24 = vld [vmem:[#allocation68_spill] sm:$0xff]  ;;  %v17947_v20 = vld [vmem:[#allocation65_spill] sm:$0xff] }
 0x2f7   : > { %17938 = vst [vmem:[#allocation50_spill] sm:$0xff] %v14351_v27  ;;  %17940 = vst [vmem:[#allocation46_spill] sm:$0xff] %v14355_v39  ;;  %v14367_v44 = vmul.f32 %v17945_v24, %v17945_v24  ;;  %v14371_v10 = vmul.f32 %v17947_v20, %v17947_v20  ;;  %v17949_v27 = vld [vmem:[#allocation71_spill] sm:$0xff]  ;;  %v17951_v39 = vld [vmem:[#allocation69_spill] sm:$0xff] }
 0x2f8   : > { %17942 = vst [vmem:[#allocation53_spill] sm:$0xff] %v14359_v35  ;;  %17944 = vst [vmem:[#allocation51_spill] sm:$0xff] %v14363_v45  ;;  %v14375_v52 = vmul.f32 %v17949_v27, %v17949_v27  ;;  %v14379_v0 = vmul.f32 %v17951_v39, %v17951_v39  ;;  %v17953_v35 = vld [vmem:[#allocation72_spill] sm:$0xff]  ;;  %v17955_v45 = vld [vmem:[#allocation73_spill] sm:$0xff]  ;;  %v14399_v39 = vmul.f32 %v13899_v6, %v13899_v6 }
 0x2f9   : > { %17946 = vst [vmem:[#allocation54_spill] sm:$0xff] %v14367_v44  ;;  %17948 = vst [vmem:[#allocation57_spill] sm:$0xff] %v14371_v10  ;;  %v14383_v63 = vmul.f32 %v17953_v35, %v17953_v35  ;;  %v14387_v24 = vmul.f32 %v17955_v45, %v17955_v45  ;;  %v17957_v44 = vld [vmem:[#allocation74_spill] sm:$0xff]  ;;  %v14403_v35 = vmul.f32 %v13909_v16, %v13909_v16  ;;  %v17969_v6 = vld [vmem:[#allocation79_spill] sm:$0xff] }
 0x2fa   : > { %17950 = vst [vmem:[#allocation55_spill] sm:$0xff] %v14375_v52  ;;  %17952 = vst [vmem:[#allocation11_spill] sm:$0xff] %v14379_v0  ;;  %v14391_v20 = vmul.f32 %v17957_v44, %v17957_v44  ;;  %v17959_v10 = vld [vmem:[#allocation70_spill] sm:$0xff]  ;;  %v14407_v45 = vmul.f32 %v13915_v7, %v13915_v7  ;;  %v17970_v16 = vld [vmem:[#allocation81_spill] sm:$0xff] }
 0x2fb   : > { %17954 = vst [vmem:[#allocation52_spill] sm:$0xff] %v14383_v63  ;;  %17956 = vst [vmem:[#allocation59_spill] sm:$0xff] %v14387_v24  ;;  %v14395_v27 = vmul.f32 %v17959_v10, %v17959_v10  ;;  %v17964_v24 = vld [vmem:[#allocation77_spill] sm:$0xff]  ;;  %v17972_v7 = vld [vmem:[#allocation83_spill] sm:$0xff] }
 0x2fc   : > { %17958 = vst [vmem:[#allocation56_spill] sm:$0xff] %v14391_v20  ;;  %17961 = vst [vmem:[#allocation61_spill] sm:$0xff] %v14399_v39  ;;  %v14411_v44 = vrot.slane %v17964_v24, %v17584_v5  ;;  %v17966_v20 = vld [vmem:[#allocation78_spill] sm:$0xff]  ;;  %v14429_v24 = vrot.slane %v13827_v58, %v17584_v5  ;;  %v18039_v19 = vld [vmem:[#allocation17_spill] sm:$0xff] }
 0x2fd   : > { %17960 = vst [vmem:[#allocation60_spill] sm:$0xff] %v14395_v27  ;;  %17962 = vst [vmem:[#allocation62_spill] sm:$0xff] %v14403_v35  ;;  %v5768_v10 = vcombine.high %v17966_v20, %v17966_v20  ;;  %v17967_v27 = vld [vmem:[#allocation75_spill] sm:$0xff]  ;;  %v14423_v35 = vrot.slane %v17970_v16, %v17584_v5  ;;  %v14497_v20 = vrot.slane %v14003_v22, %v17584_v5  ;;  %v18070_v61 = vld [vmem:[#allocation45_spill] sm:$0xff] }
 0x2fe   : > { %17963 = vst [vmem:[#allocation58_spill] sm:$0xff] %v14407_v45  ;;  %17965 = vst [vmem:[#allocation64_spill] sm:$0xff] %v14411_v44  ;;  %v14417_v63 = vrot.slane %v17967_v27, %v17584_v5  ;;  %v14435_v27 = vrot.slane %v13935_v11, %v17584_v5  ;;  %v14443_v45 = vrot.slane %v13948_v23, %v17584_v5 }
 0x2ff   : > { %17971 = vst [vmem:[#allocation66_spill] sm:$0xff] %v14423_v35  ;;  %17973 = vst [vmem:[#allocation9_spill] sm:$0xff] %v14429_v24  ;;  %v14451_v24 = vrot.slane %v13956_v30, %v17584_v5  ;;  %v14505_v16 = vrot.slane %v14011_v17, %v17584_v5  ;;  %v14513_v22 = vrot.slane %v14019_v14, %v17584_v5 }
 0x300   : > { %17968 = vst [vmem:[#allocation63_spill] sm:$0xff] %v14417_v63  ;;  %17974 = vst [vmem:[#allocation67_spill] sm:$0xff] %v14537_v2  ;;  %v14552_v56 = vrot.slane %v5768_v10, %v17584_v5  ;;  %v14574_v2 = vrot.slane %v14075_v29, %v17584_v5  ;;  %v14614_v44 = vrot.slane %v17982_v41, %v17584_v5  ;;  %v17989_v41 = vld [vmem:[#allocation135_spill] sm:$0xff]  ;;  %v18012_v63 = vld [vmem:[#allocation148_spill] sm:$0xff] }
 0x301   : > { %17975 = vst [vmem:[#allocation68_spill] sm:$0xff] %v14558_v54  ;;  %17977 = vst [vmem:[#allocation71_spill] sm:$0xff] %v14582_v28  ;;  %v18067_v28 = vld [vmem:[#allocation44_spill] sm:$0xff] }
 0x302   : > { %17976 = vst [vmem:[#allocation65_spill] sm:$0xff] %v14574_v2  ;;  %17978 = vst [vmem:[#allocation69_spill] sm:$0xff] %v14590_v31  ;;  %v18079_v2 = vld [vmem:[#allocation49_spill] sm:$0xff] }
 0x303   : > { %17979 = vst [vmem:[#allocation72_spill] sm:$0xff] %v14598_v42  ;;  %17980 = vst [vmem:[#allocation73_spill] sm:$0xff] %v14606_v32  ;;  %v17984_v42 = vld [vmem:[#allocation133_spill] sm:$0xff]  ;;  %v18009_v32 = vld [vmem:[#allocation146_spill] sm:$0xff] }
 0x304   : > { %17983 = vst [vmem:[#allocation74_spill] sm:$0xff] %v14614_v44  ;;  %v14620_v39 = vrot.slane %v17984_v42, %v17584_v5  ;;  %17987 = vst [vmem:[#allocation70_spill] sm:$0xff] %v14628_v4  ;;  %v14636_v42 = vrot.slane %v17989_v41, %v17584_v5  ;;  %v14652_v41 = vrot.slane %v17995_v46, %v17584_v5  ;;  %v18001_v4 = vld [vmem:[#allocation142_spill] sm:$0xff]  ;;  %v18006_v44 = vld [vmem:[#allocation143_spill] sm:$0xff] }
 0x305   : > { %17993 = vst [vmem:[#allocation78_spill] sm:$0xff] %v14644_v48  ;;  %17999 = vst [vmem:[#allocation79_spill] sm:$0xff] %v14660_v12  ;;  %v14668_v46 = vrot.slane %v18001_v4, %v17584_v5  ;;  %v14684_v10 = vrot.slane %v18006_v44, %v17584_v5  ;;  %v14692_v58 = vrot.slane %v18009_v32, %v17584_v5  ;;  %v18015_v44 = vld [vmem:[#allocation150_spill] sm:$0xff]  ;;  %v18018_v32 = vld [vmem:[#allocation155_spill] sm:$0xff] }
 0x306   : > { %17990 = vst [vmem:[#allocation77_spill] sm:$0xff] %v14636_v42  ;;  %17996 = vst [vmem:[#allocation75_spill] sm:$0xff] %v14652_v41  ;;  %v18004_v42 = vcombine.high %v17969_v6, %v17969_v6  ;;  %v14724_v4 = vrot.slane %v14215_v55, %v17584_v5  ;;  %v14732_v6 = vrot.slane %v14223_v40, %v17584_v5  ;;  %v18033_v40 = vld [vmem:[#allocation14_spill] sm:$0xff] }
 0x307   : > { %18002 = vst [vmem:[#allocation81_spill] sm:$0xff] %v14668_v46  ;;  %18007 = vst [vmem:[#allocation165_spill] sm:$0xff] %v14684_v10  ;;  %v14700_v10 = vrot.slane %v18012_v63, %v17584_v5  ;;  %v14716_v63 = vrot.slane %v18018_v32, %v17584_v5  ;;  %v18024_v32 = vld [vmem:[#allocation161_spill] sm:$0xff]  ;;  %v14748_v48 = vrot.slane %v14235_v1, %v17584_v5 }
 0x308   : > { %v14678_v12 = vrot.slane %v18004_v42, %v17584_v5  ;;  %18010 = vst [vmem:[#allocation166_spill] sm:$0xff] %v14692_v58  ;;  %v14708_v58 = vrot.slane %v18015_v44, %v17584_v5  ;;  %18021 = vst [vmem:[#allocation170_spill] sm:$0xff] %v14724_v4  ;;  %v14742_v4 = vrot.slane %v18024_v32, %v17584_v5  ;;  %v18030_v42 = vld [vmem:[#allocation10_spill] sm:$0xff]  ;;  %v18042_v1 = vld [vmem:[#allocation21_spill] sm:$0xff] }
 0x309   : > { %18013 = vst [vmem:[#allocation167_spill] sm:$0xff] %v14700_v10  ;;  %18019 = vst [vmem:[#allocation169_spill] sm:$0xff] %v14716_v63  ;;  %v9755_v10 = vld [vmem:[%s10031_s15 + $0x268] sm:$0x3]  ;;  %v18023_v63 = vld [vmem:[#allocation15_spill] sm:$0xff]  ;;  %v18045_v32 = vcombine.high %v17972_v7, %v17972_v7 }
 0x30a   : > { %18005 = vst [vmem:[#allocation83_spill] sm:$0xff] %v14678_v12  ;;  %18016 = vst [vmem:[#allocation168_spill] sm:$0xff] %v14708_v58  ;;  %v4773_v41 = vsub.f32 %v9755_v10, %v18023_v63  ;;  %v18027_v10 = vld [vmem:[#allocation164_spill] sm:$0xff] }
 0x30b   : > { %18022 = vst [vmem:[#allocation171_spill] sm:$0xff] %v14732_v6  ;;  %18025 = vst [vmem:[#allocation15_spill] sm:$0xff] %v14742_v4  ;;  %v14758_v55 = vrot.slane %v18027_v10, %v17584_v5  ;;  %v14766_v6 = vrot.slane %v18030_v42, %v17584_v5  ;;  %v18036_v10 = vld [vmem:[#allocation19_spill] sm:$0xff]  ;;  %v14811_v4 = vrot.slane %v18045_v32, %v17584_v5 }
 0x30c   : > { %18026 = vst [vmem:[#allocation172_spill] sm:$0xff] %v14748_v48  ;;  %v4933_v58 = vmul.f32 %v4773_v41, %v14750_v37  ;;  %v18047_v41 = vld [vmem:[#allocation25_spill] sm:$0xff] }
 0x30d   : > { %18028 = vst [vmem:[#allocation173_spill] sm:$0xff] %v14758_v55  ;;  %18031 = vst [vmem:[#allocation174_spill] sm:$0xff] %v14766_v6  ;;  %v14774_v55 = vrot.slane %v18033_v40, %v17584_v5  ;;  %v14783_v6 = vrot.slane %v18036_v10, %v17584_v5  ;;  %v9756_v10 = vld [vmem:[%s10031_s15 + $0x98] sm:$0x3]  ;;  %v18054_v40 = vld [vmem:[#allocation33_spill] sm:$0xff] }
 0x30e   : > { %v4715_v46 = vsub.f32 %v9756_v10, %v18023_v63  ;;  %18046 = vst [vmem:[#allocation179_spill] sm:$0xff] %v14811_v4  ;;  %v5093_v42 = vmul.f32 %v4933_v58, %v4933_v58  ;;  %v18057_v10 = vld [vmem:[#allocation162_spill] sm:$0xff] }
 0x30f   : > { %18034 = vst [vmem:[#allocation175_spill] sm:$0xff] %v14774_v55  ;;  %18037 = vst [vmem:[#allocation176_spill] sm:$0xff] %v14783_v6  ;;  %v14791_v55 = vrot.slane %v18039_v19, %v17584_v5  ;;  %v14799_v6 = vrot.slane %v18042_v1, %v17584_v5  ;;  %v18051_v1 = vld [vmem:[#allocation29_spill] sm:$0xff]  ;;  %v18060_v58 = vld [vmem:[#allocation106_spill] sm:$0xff] }
 0x310   : > { %v14827_v7 = vrot.slane %v18051_v1, %v17584_v5  ;;  %v4875_v44 = vmul.f32 %v4715_v46, %v18057_v10  ;;  %v18058_v1 = vld [vmem:[#allocation32_spill] sm:$0xff] }
 0x311   : > { %18040 = vst [vmem:[#allocation177_spill] sm:$0xff] %v14791_v55  ;;  %18043 = vst [vmem:[#allocation178_spill] sm:$0xff] %v14799_v6  ;;  %v14817_v6 = vrot.slane %v18047_v41, %v17584_v5  ;;  %v18050_v55 = vld [vmem:[#allocation114_spill] sm:$0xff]  ;;  %v14846_v4 = vrot.slane %v18058_v1, %v17584_v5  ;;  %v9759_v46 = vld [vmem:[%s10031_s15 + $0x308] sm:$0x3] }
 0x312   : > { %v6279_v35 = vrot.slane %v18050_v55, %v17584_v5  ;;  %18052 = vst [vmem:[#allocation114_spill] sm:$0xff] %v14827_v7  ;;  %v9757_v41 = vld [vmem:[%s10031_s15 + $0x1d8] sm:$0x3]  ;;  %v14837_v55 = vrot.slane %v18054_v40, %v17584_v5  ;;  %v18061_v40 = vcombine.high %v18060_v58, %v18060_v58  ;;  %v4793_v12 = vsub.f32 %v9759_v46, %v18023_v63 }
 0x313   : > { %18048 = vst [vmem:[#allocation180_spill] sm:$0xff] %v14817_v6  ;;  %v4755_v6 = vsub.f32 %v9757_v41, %v18023_v63  ;;  %18059 = vst [vmem:[#allocation162_spill] sm:$0xff] %v14846_v4  ;;  %v9758_v41 = vld [vmem:[%s10031_s15 + $0x138] sm:$0x3]  ;;  %v6271_v7 = vrot.slane %v5093_v42, %v17584_v5  ;;  %v14874_v46 = vrot.slane %v18067_v28, %v17584_v5 }
 0x314   : > { %18055 = vst [vmem:[#allocation181_spill] sm:$0xff] %v14837_v55  ;;  %v4735_v19 = vsub.f32 %v9758_v41, %v18023_v63  ;;  %v14854_v55 = vrot.slane %v18061_v40, %v17584_v5  ;;  %v6287_v25 = vcombine.high %v6279_v35, %v6279_v35  ;;  %v18064_v1 = vld [vmem:[#allocation38_spill] sm:$0xff]  ;;  %v5035_v4 = vmul.f32 %v4875_v44, %v4875_v44 }
 0x315   : > { %v14865_v41 = vrot.slane %v18064_v1, %v17584_v5  ;;  %v4915_v50 = vmul.f32 %v4755_v6, %v18057_v10  ;;  %18068 = vst [vmem:[#allocation183_spill] sm:$0xff] %v14874_v46  ;;  %v18071_v6 = vld [vmem:[#allocation111_spill] sm:$0xff]  ;;  %v18074_v46 = vld [vmem:[#allocation34_spill] sm:$0xff]  ;;  %v4953_v32 = vmul.f32 %v4793_v12, %v14750_v37  ;;  %v14892_v44 = vcombine.low %v6271_v7, %v6279_v35  ;;  %v18080_v35 = vld [vmem:[#allocation112_spill] sm:$0xff] }
 0x316   : > { %18062 = vst [vmem:[#allocation106_spill] sm:$0xff] %v14854_v55  ;;  %v5568_v40 = vcombine.high %v14854_v55, %v14854_v55  ;;  %v18072_v49 = vcombine.high %v18071_v6, %v18071_v6  ;;  %v8104_v28 = vrot.slane %v18074_v46, %v17584_v5  ;;  %v18076_v42 = vld [vmem:[#allocation22_spill] sm:$0xff]  ;;  %v5575_v29 = vrot.slane %v5035_v4, %v17584_v5 }
 0x317   : > { %18065 = vst [vmem:[#allocation182_spill] sm:$0xff] %v14865_v41  ;;  %v4895_v41 = vmul.f32 %v4735_v19, %v18057_v10  ;;  %18075 = vst [vmem:[#allocation34_spill] sm:$0xff] %v14892_v44  ;;  %v8089_v1 = vcombine.low %v6287_v25, %v18076_v42  ;;  %v14897_v19 = vrot.slane %v18070_v61, %v17584_v5  ;;  %v18084_v55 = vld [vmem:[#allocation50_spill] sm:$0xff]  ;;  %v18089_v44 = vld [vmem:[#allocation53_spill] sm:$0xff] }
 0x318   : > { %v14887_v31 = vrot.slane %v18072_v49, %v17584_v5  ;;  %v5075_v6 = vmul.f32 %v4915_v50, %v4915_v50  ;;  %v5591_v12 = vcombine.high %v14497_v20, %v14497_v20  ;;  %v18081_v25 = vcombine.high %v18080_v35, %v18080_v35 }
 0x319   : > { %18077 = vst [vmem:[#allocation22_spill] sm:$0xff] %v14897_v19  ;;  %v8097_v46 = vrot.slane %v8089_v1, %v17584_v5  ;;  %v14915_v42 = vrot.slane %v18079_v2, %v17584_v5  ;;  %v14921_v4 = vrot.slane %v18084_v55, %v17584_v5  ;;  %v5055_v10 = vmul.f32 %v4895_v41, %v4895_v41  ;;  %v18088_v55 = vld [vmem:[#allocation115_spill] sm:$0xff] }
 0x31a   : > { %18073 = vst [vmem:[#allocation184_spill] sm:$0xff] %v14887_v31  ;;  %v14910_v7 = vrot.slane %v18081_v25, %v17584_v5  ;;  %v6048_v49 = vcombine.high %v14887_v31, %v14887_v31  ;;  %v7460_v19 = vcombine.low %v5568_v40, %v5575_v29  ;;  %v5113_v25 = vmul.f32 %v4953_v32, %v4953_v32 }
 0x31b   : > { %18083 = vst [vmem:[#allocation185_spill] sm:$0xff] %v14915_v42  ;;  %18085 = vst [vmem:[#allocation186_spill] sm:$0xff] %v14921_v4  ;;  %v14925_v61 = vcombine.low %v8097_v46, %v8104_v28  ;;  %v6055_v42 = vrot.slane %v5075_v6, %v17584_v5  ;;  %v6071_v50 = vcombine.high %v14620_v39, %v14620_v39  ;;  %v18092_v6 = vld [vmem:[#allocation54_spill] sm:$0xff] }
 0x31c   : > { %18082 = vst [vmem:[#allocation112_spill] sm:$0xff] %v14910_v7  ;;  %v6519_v4 = vrot.slane %v18088_v55, %v17584_v5  ;;  %v14938_v29 = vrot.slane %v18089_v44, %v17584_v5  ;;  %v5808_v28 = vcombine.high %v14910_v7, %v14910_v7  ;;  %v7461_v32 = vcombine.low %v14497_v20, %v5591_v12  ;;  %v18100_v12 = vld [vmem:[#allocation56_spill] sm:$0xff] }
 0x31d   : > { %18086 = vst [vmem:[#allocation187_spill] sm:$0xff] %v14925_v61  ;;  %v14949_v55 = vrot.slane %v18092_v6, %v17584_v5  ;;  %v7885_v2 = vcombine.low %v6048_v49, %v6055_v42  ;;  %v5815_v31 = vrot.slane %v5055_v10, %v17584_v5  ;;  %v7468_v1 = vrot.slane %v7460_v19, %v17584_v5 }
 0x31e   : > { %18090 = vst [vmem:[#allocation115_spill] sm:$0xff] %v14938_v29  ;;  %v9760_v29 = vld [vmem:[%s10031_s15 + $0x3a8] sm:$0x3]  ;;  %v6511_v20 = vrot.slane %v5113_v25, %v17584_v5  ;;  %v7886_v41 = vcombine.low %v14620_v39, %v6071_v50  ;;  %v6527_v6 = vcombine.high %v6519_v4, %v6519_v4  ;;  %v14963_v49 = vrot.slane %v14375_v52, %v17584_v5  ;;  %v18104_v39 = vld [vmem:[#allocation61_spill] sm:$0xff] }
 0x31f   : > { %18093 = vst [vmem:[#allocation188_spill] sm:$0xff] %v14949_v55  ;;  %v4813_v44 = vsub.f32 %v9760_v29, %v18023_v63  ;;  %v7475_v10 = vrot.slane %v7461_v32, %v17584_v5  ;;  %v14968_v42 = vcombine.low %v5808_v28, %v5815_v31  ;;  %v18097_v25 = vld [vmem:[#allocation52_spill] sm:$0xff]  ;;  %v7893_v46 = vrot.slane %v7885_v2, %v17584_v5 }
 0x320   : > { %18095 = vst [vmem:[#allocation189_spill] sm:$0xff] %v14963_v49  ;;  %v14974_v40 = vrot.slane %v18097_v25, %v17584_v5  ;;  %v8293_v31 = vcombine.low %v6511_v20, %v6519_v4  ;;  %v14984_v28 = vrot.slane %v18100_v12, %v17584_v5  ;;  %v18103_v25 = vld [vmem:[#allocation30_spill] sm:$0xff]  ;;  %v18108_v2 = vcombine.high %v13935_v11, %v13935_v11  ;;  %v9761_v29 = vld [vmem:[%s10031_s15 + $0x448] sm:$0x3] }
 0x321   : > { %18096 = vst [vmem:[#allocation190_spill] sm:$0xff] %v14968_v42  ;;  %v7476_v19 = vcombine.low %v7468_v1, %v7475_v10  ;;  %v4973_v32 = vmul.f32 %v4813_v44, %v14750_v37  ;;  %v8294_v50 = vcombine.low %v6527_v6, %v18103_v25  ;;  %v14994_v1 = vrot.slane %v18104_v39, %v17584_v5  ;;  %v18107_v10 = vld [vmem:[#allocation42_spill] sm:$0xff]  ;;  %v18127_v52 = vld [vmem:[#allocation28_spill] sm:$0xff]  ;;  %v18146_v42 = vld [vmem:[#allocation119_spill] sm:$0xff] }
 0x322   : > { %18098 = vst [vmem:[#allocation191_spill] sm:$0xff] %v14974_v40  ;;  %18101 = vst [vmem:[#allocation192_spill] sm:$0xff] %v14984_v28  ;;  %v7900_v40 = vrot.slane %v7886_v41, %v17584_v5  ;;  %v8529_v41 = vrot.slane %v18107_v10, %v17584_v5  ;;  %v8301_v6 = vrot.slane %v8293_v31, %v17584_v5  ;;  %v9763_v28 = vld [vmem:[%s10031_s15 + $0x4e8] sm:$0x3] }
 0x323   : > { %18105 = vst [vmem:[#allocation30_spill] sm:$0xff] %v14994_v1  ;;  %v8308_v25 = vrot.slane %v8294_v50, %v17584_v5  ;;  %v15007_v0 = vsel %vm4300_vm1, %v7476_v19, 0.0  ;;  %v5350_v49 = vrot.slane %v18108_v2, %v17584_v5  ;;  %v5375_v50 = vcombine.high %v14443_v45, %v14443_v45  ;;  %v18110_v19 = vld [vmem:[#allocation116_spill] sm:$0xff] }
 0x324   : > { %v15000_v20 = vcombine.low %v7893_v46, %v7900_v40  ;;  %v5133_v40 = vmul.f32 %v4973_v32, %v4973_v32  ;;  %v18109_v46 = vcombine.high %v13948_v23, %v13948_v23  ;;  %v6759_v31 = vrot.slane %v18110_v19, %v17584_v5 }
 0x325   : > { %v15025_v4 = vcombine.low %v8301_v6, %v8308_v25  ;;  %v18112_v11 = vcombine.high %v13956_v30, %v13956_v30  ;;  %v5399_v2 = vcombine.high %v14451_v24, %v14451_v24  ;;  %v18113_v23 = vcombine.high %v13964_v8, %v13964_v8  ;;  %v18118_v30 = vld [vmem:[#allocation103_spill] sm:$0xff] }
 0x326   : > { %18106 = vst [vmem:[#allocation193_spill] sm:$0xff] %v15000_v20  ;;  %v15019_v10 = vrot.slane %v18109_v46, %v17584_v5  ;;  %v18114_v6 = vcombine.high %v13975_v60, %v13975_v60  ;;  %v4833_v60 = vsub.f32 %v9761_v29, %v18023_v63  ;;  %v6767_v1 = vcombine.high %v6759_v31, %v6759_v31 }
 0x327   : > { %18111 = vst [vmem:[#allocation42_spill] sm:$0xff] %v15025_v4  ;;  %v5398_v32 = vrot.slane %v18112_v11, %v17584_v5  ;;  %v15037_v46 = vrot.slane %v18113_v23, %v17584_v5  ;;  %v18115_v11 = vcombine.high %v13983_v53, %v13983_v53  ;;  %v18116_v23 = vcombine.high %v13991_v15, %v13991_v15 }
 0x328   : > { %v15045_v25 = vrot.slane %v18114_v6, %v17584_v5  ;;  %v18117_v6 = vcombine.high %v13999_v9, %v13999_v9  ;;  %v18119_v15 = vcombine.high %v18118_v30, %v18118_v30  ;;  %v18120_v9 = vcombine.high %v14011_v17, %v14011_v17 }
 0x329   : > { %v15053_v44 = vrot.slane %v18115_v11, %v17584_v5  ;;  %v15061_v19 = vrot.slane %v18116_v23, %v17584_v5  ;;  %v6751_v11 = vrot.slane %v5133_v40, %v17584_v5  ;;  %v18121_v30 = vcombine.high %v14019_v14, %v14019_v14  ;;  %v9762_v14 = vld [vmem:[%s10031_s15 + $0x88] sm:$0x3] }
 0x32a   : > { %v15069_v53 = vrot.slane %v18117_v6, %v17584_v5  ;;  %v15078_v23 = vrot.slane %v18119_v15, %v17584_v5  ;;  %v15086_v6 = vrot.slane %v18120_v9, %v17584_v5  ;;  %v18122_v29 = vcombine.high %v14027_v18, %v14027_v18 }
 0x32b   : > { %v15094_v8 = vrot.slane %v18121_v30, %v17584_v5  ;;  %v18123_v9 = vcombine.high %v14035_v26, %v14035_v26  ;;  %v4713_v30 = vsub.f32 %v9762_v14, %v18023_v63  ;;  %v18124_v18 = vcombine.high %v14043_v59, %v14043_v59  ;;  %v18126_v26 = vld [vmem:[#allocation67_spill] sm:$0xff] }
 0x32c   : > { %v15102_v39 = vrot.slane %v18122_v29, %v17584_v5  ;;  %v4853_v17 = vsub.f32 %v9763_v28, %v18023_v63  ;;  %v15124_v12 = vcombine.low %v6751_v11, %v6759_v31  ;;  %v4993_v55 = vmul.f32 %v4833_v60, %v14750_v37 }
 0x32d   : > { %v15110_v40 = vrot.slane %v18123_v9, %v17584_v5  ;;  %v15120_v29 = vrot.slane %v18124_v18, %v17584_v5  ;;  %v5352_v14 = vcombine.high %v5350_v49, %v5350_v49  ;;  %v8514_v4 = vcombine.low %v6767_v1, %v18127_v52 }
 0x32e   : > { %18125 = vst [vmem:[#allocation116_spill] sm:$0xff] %v15124_v12  ;;  %v18128_v15 = vcombine.high %v14051_v51, %v14051_v51  ;;  %v18129_v31 = vcombine.high %v14059_v3, %v14059_v3  ;;  %v4873_v1 = vmul.f32 %v4713_v30, %v14750_v37  ;;  %v5376_v51 = vcombine.high %v15019_v10, %v15019_v10  ;;  %v18137_v3 = vld [vmem:[#allocation99_spill] sm:$0xff] }
 0x32f   : > { %v8522_v11 = vrot.slane %v8514_v4, %v17584_v5  ;;  %v5400_v18 = vcombine.high %v5398_v32, %v5398_v32  ;;  %v5153_v52 = vmul.f32 %v4993_v55, %v4993_v55  ;;  %v7257_v9 = vcombine.low %v5350_v49, %v5352_v14  ;;  %v18133_v4 = vld [vmem:[#allocation96_spill] sm:$0xff]  ;;  %v18139_v49 = vld [vmem:[#allocation113_spill] sm:$0xff] }
 0x330   : > { %v15134_v59 = vrot.slane %v18128_v15, %v17584_v5  ;;  %v15144_v60 = vrot.slane %v18129_v31, %v17584_v5  ;;  %v18130_v15 = vcombine.high %v14067_v34, %v14067_v34  ;;  %v5013_v31 = vmul.f32 %v4853_v17, %v14750_v37  ;;  %v18135_v34 = vld [vmem:[#allocation98_spill] sm:$0xff]  ;;  %v18141_v14 = vld [vmem:[#allocation97_spill] sm:$0xff] }
 0x331   : > { %v7274_v30 = vcombine.low %v5375_v50, %v15019_v10  ;;  %v15162_v12 = vcombine.low %v8522_v11, %v8529_v41  ;;  %v18134_v48 = vrot.slane %v18133_v4, %v17584_v5  ;;  %v18138_v17 = vrot.slane %v18137_v3, %v17584_v5 }
 0x332   : > { %v15156_v28 = vrot.slane %v18130_v15, %v17584_v5  ;;  %v18136_v15 = vrot.slane %v18135_v34, %v17584_v5  ;;  %v6999_v41 = vrot.slane %v18139_v49, %v17584_v5  ;;  %v15180_v10 = vmul.f32 %v4873_v1, %v4873_v1 }
 0x333   : > { %18132 = vst [vmem:[#allocation67_spill] sm:$0xff] %v15162_v12  ;;  %v7273_v61 = vcombine.low %v18134_v48, %v14443_v45  ;;  %v15176_v55 = vcombine.low %v18138_v17, %v14475_v21  ;;  %v5424_v50 = vcombine.high %v15037_v46, %v15037_v46  ;;  %v18140_v48 = vcombine.high %v14435_v27, %v14435_v27 }
 0x334   : > { %18131 = vst [vmem:[#allocation103_spill] sm:$0xff] %v15156_v28  ;;  %v7308_v20 = vcombine.low %v18136_v15, %v14459_v33  ;;  %v18142_v11 = vrot.slane %v18141_v14, %v17584_v5  ;;  %v5173_v3 = vmul.f32 %v5013_v31, %v5013_v31  ;;  %v5448_v34 = vcombine.high %v15045_v25, %v15045_v25 }
 0x335   : > { %v7256_v45 = vcombine.low %v14435_v27, %v18140_v48  ;;  %v7291_v15 = vcombine.low %v14451_v24, %v5399_v2  ;;  %v7307_v1 = vcombine.low %v5398_v32, %v5400_v18  ;;  %v5472_v17 = vcombine.high %v15053_v44, %v15053_v44  ;;  %v18144_v18 = vld [vmem:[#allocation101_spill] sm:$0xff] }
 0x336   : > { %v7290_v4 = vcombine.low %v5376_v51, %v18142_v11  ;;  %v6991_v49 = vrot.slane %v5153_v52, %v17584_v5  ;;  %v7271_v12 = vrot.slane %v7257_v9, %v17584_v5  ;;  %v7288_v27 = vrot.slane %v7274_v30, %v17584_v5 }
 0x337   : > { %v5496_v48 = vcombine.high %v15061_v19, %v15061_v19  ;;  %v5544_v51 = vcombine.high %v15069_v53, %v15069_v53  ;;  %v7007_v31 = vcombine.high %v6999_v41, %v6999_v41  ;;  %v7281_v14 = vrot.slane %v7273_v61, %v17584_v5 }
 0x338   : > { %v7264_v24 = vrot.slane %v7256_v45, %v17584_v5  ;;  %v7298_v32 = vrot.slane %v7290_v4, %v17584_v5  ;;  %v18143_v2 = vcombine.high %v14459_v33, %v14459_v33  ;;  %v18145_v52 = vrot.slane %v18144_v18, %v17584_v5 }
 0x339   : > { %v7231_v11 = vrot.slane %v5173_v3, %v17584_v5  ;;  %v15216_v54 = vrot.slane %v18146_v42, %v17584_v5  ;;  %v7305_v61 = vrot.slane %v7291_v15, %v17584_v5  ;;  %v7315_v45 = vrot.slane %v7307_v1, %v17584_v5 }
 0x33a   : > { %v7324_v9 = vcombine.low %v18143_v2, %v15037_v46  ;;  %v7325_v30 = vcombine.low %v5424_v50, %v18145_v52  ;;  %v7272_v4 = vcombine.low %v7264_v24, %v7271_v12  ;;  %v7289_v7 = vcombine.low %v7281_v14, %v7288_v27  ;;  %v18148_v2 = vld [vmem:[#allocation35_spill] sm:$0xff]  ;;  %v18150_v27 = vld [vmem:[#allocation102_spill] sm:$0xff] }
 0x33b   : > { %v7342_v28 = vcombine.low %v15045_v25, %v5448_v34  ;;  %v8718_v33 = vcombine.low %v6991_v49, %v6999_v41  ;;  %v5559_v46 = vrot.slane %v18060_v58, %v17584_v5  ;;  %v7322_v50 = vrot.slane %v7308_v20, %v17584_v5 }
 0x33c   : > { %v18147_v3 = vcombine.high %v14467_v47, %v14467_v47  ;;  %v8719_v18 = vcombine.low %v7007_v31, %v18148_v2  ;;  %v7306_v15 = vcombine.low %v7298_v32, %v7305_v61  ;;  %v7332_v1 = vrot.slane %v7324_v9, %v17584_v5 }
 0x33d   : > { %v7339_v12 = vrot.slane %v7325_v30, %v17584_v5  ;;  %v18149_v25 = vcombine.high %v14475_v21, %v14475_v21  ;;  %v7323_v58 = vcombine.low %v7315_v45, %v7322_v50  ;;  %v8726_v20 = vrot.slane %v8718_v33, %v17584_v5  ;;  %v18153_v45 = vld [vmem:[#allocation122_spill] sm:$0xff]  ;;  %v18155_v33 = vld [vmem:[#allocation76_spill] sm:$0xff]  ;;  %v18156_v50 = vld [vmem:[#allocation105_spill] sm:$0xff] }
 0x33e   : > { %v7341_v42 = vcombine.low %v14467_v47, %v18147_v3  ;;  %v8733_v34 = vrot.slane %v8719_v18, %v17584_v5  ;;  %v15238_v49 = vcombine.low %v7231_v11, %v15216_v54  ;;  %v7356_v47 = vrot.slane %v7342_v28, %v17584_v5 }
 0x33f   : > { %v7359_v41 = vcombine.low %v18149_v25, %v15053_v44  ;;  %v18151_v31 = vrot.slane %v18150_v27, %v17584_v5  ;;  %v9056_v24 = vsel %vm4300_vm1, %v7272_v4, 0.0  ;;  %v9057_v32 = vsel %vm4300_vm1, %v7289_v7, 0.0 }
 0x340   : > { %v7349_v21 = vrot.slane %v7341_v42, %v17584_v5  ;;  %v18152_v44 = vcombine.high %v14483_v38, %v14483_v38  ;;  %v15251_v52 = vcombine.low %v8726_v20, %v8733_v34  ;;  %v9058_v30 = vadd.f32 %v9057_v32, %v9056_v24 }
 0x341   : > { %v7375_v14 = vcombine.low %v5472_v17, %v18151_v31  ;;  %v7340_v11 = vcombine.low %v7332_v1, %v7339_v12  ;;  %v7373_v28 = vrot.slane %v7359_v41, %v17584_v5  ;;  %v7392_v61 = vcombine.low %v15061_v19, %v5496_v48  ;;  %v18159_v31 = vld [vmem:[#allocation125_spill] sm:$0xff] }
 0x342   : > { %v7376_v9 = vcombine.low %v14483_v38, %v18152_v44  ;;  %v9059_v17 = vsel %vm4300_vm1, %v7306_v15, 0.0  ;;  %v18154_v7 = vcombine.high %v18153_v45, %v18153_v45  ;;  %v18157_v38 = vrot.slane %v18156_v50, %v17584_v5  ;;  %v18158_v15 = vld [vmem:[#allocation65_spill] sm:$0xff] }
 0x343   : > { %v5567_v42 = vcombine.high %v5559_v46, %v5559_v46  ;;  %v9060_v2 = vadd.f32 %v9059_v17, %v9058_v30  ;;  %v7357_v18 = vcombine.low %v7349_v21, %v7356_v47  ;;  %v7366_v1 = vrot.slane %v15176_v55, %v17584_v5 }
 0x344   : > { %v15260_v4 = vrot.slane %v18154_v7, %v17584_v5  ;;  %v7393_v3 = vcombine.low %v18157_v38, %v18155_v33  ;;  %v7383_v19 = vrot.slane %v7375_v14, %v17584_v5  ;;  %v9061_v48 = vsel %vm4300_vm1, %v7323_v58, 0.0 }
 0x345   : > { %v5879_v12 = vcombine.high %v18158_v15, %v18158_v15  ;;  %v5551_v25 = vrot.slane %v15180_v10, %v17584_v5  ;;  %v7390_v41 = vrot.slane %v7376_v9, %v17584_v5  ;;  %v9062_v20 = vadd.f32 %v9061_v48, %v9060_v2 }
 0x346   : > { %v7374_v34 = vcombine.low %v7366_v1, %v7373_v28  ;;  %v7400_v27 = vrot.slane %v7392_v61, %v17584_v5  ;;  %v7427_v47 = vcombine.low %v15069_v53, %v5544_v51  ;;  %v9063_v55 = vsel %vm4300_vm1, %v7340_v11, 0.0  ;;  %v18162_v51 = vld [vmem:[#allocation106_spill] sm:$0xff]  ;;  %v18163_v11 = vld [vmem:[#allocation71_spill] sm:$0xff] }
 0x347   : > { %v18160_v58 = vcombine.high %v18159_v31, %v18159_v31  ;;  %v5592_v24 = vcombine.high %v15078_v23, %v15078_v23  ;;  %v7407_v10 = vrot.slane %v7393_v3, %v17584_v5  ;;  %v9064_v32 = vadd.f32 %v9063_v55, %v9062_v20  ;;  %v18164_v61 = vld [vmem:[#allocation126_spill] sm:$0xff]  ;;  %v18170_v55 = vld [vmem:[#allocation131_spill] sm:$0xff] }
 0x348   : > { %v7391_v21 = vcombine.low %v7383_v19, %v7390_v41  ;;  %v18161_v44 = vcombine.high %v14491_v57, %v14491_v57  ;;  %v7444_v9 = vcombine.low %v5567_v42, %v18162_v51  ;;  %v9065_v30 = vsel %vm4300_vm1, %v7357_v18, 0.0  ;;  %v18166_v42 = vld [vmem:[#allocation69_spill] sm:$0xff]  ;;  %v18167_v18 = vld [vmem:[#allocation127_spill] sm:$0xff] }
 0x349   : > { %v15282_v14 = vrot.slane %v18160_v58, %v17584_v5  ;;  %v5903_v28 = vcombine.high %v18163_v11, %v18163_v11  ;;  %v18165_v17 = vcombine.high %v18164_v61, %v18164_v61  ;;  %v5616_v7 = vcombine.high %v15086_v6, %v15086_v6  ;;  %v18176_v61 = vld [vmem:[#allocation73_spill] sm:$0xff] }
 0x34a   : > { %v7426_v53 = vcombine.low %v14491_v57, %v18161_v44  ;;  %v9066_v33 = vadd.f32 %v9065_v30, %v9064_v32  ;;  %v7408_v50 = vcombine.low %v7400_v27, %v7407_v10  ;;  %v7441_v57 = vrot.slane %v7427_v47, %v17584_v5  ;;  %v18172_v10 = vld [vmem:[#allocation100_spill] sm:$0xff] }
 0x34b   : > { %v15299_v45 = vrot.slane %v18165_v17, %v17584_v5  ;;  %v7443_v38 = vcombine.low %v5551_v25, %v5559_v46  ;;  %v9067_v3 = vsel %vm4300_vm1, %v7374_v34, 0.0  ;;  %v5927_v2 = vcombine.high %v18166_v42, %v18166_v42  ;;  %v18169_v34 = vld [vmem:[#allocation72_spill] sm:$0xff] }
 0x34c   : > { %v18168_v1 = vcombine.high %v18167_v18, %v18167_v18  ;;  %v5640_v48 = vcombine.high %v15094_v8, %v15094_v8  ;;  %v9068_v41 = vadd.f32 %v9067_v3, %v9066_v33  ;;  %v7434_v20 = vrot.slane %v7426_v53, %v17584_v5  ;;  %v18177_v33 = vld [vmem:[#allocation132_spill] sm:$0xff] }
 0x34d   : > { %v7458_v27 = vrot.slane %v7444_v9, %v17584_v5  ;;  %v7477_v46 = vcombine.low %v15078_v23, %v5592_v24  ;;  %v9069_v25 = vsel %vm4300_vm1, %v7391_v21, 0.0  ;;  %v5951_v47 = vcombine.high %v18169_v34, %v18169_v34  ;;  %v18174_v24 = vld [vmem:[#allocation107_spill] sm:$0xff] }
 0x34e   : > { %v15311_v19 = vrot.slane %v18168_v1, %v17584_v5  ;;  %v18171_v31 = vcombine.high %v18170_v55, %v18170_v55  ;;  %v18173_v32 = vrot.slane %v18172_v10, %v17584_v5  ;;  %v9070_v53 = vadd.f32 %v9069_v25, %v9068_v41  ;;  %v9764_v25 = vld [vmem:[%s10031_s15 + $0x128] sm:$0x3]  ;;  %v18181_v10 = vld [vmem:[#allocation89_spill] sm:$0xff] }
 0x34f   : > { %v7442_v51 = vcombine.low %v7434_v20, %v7441_v57  ;;  %v7451_v23 = vrot.slane %v7443_v38, %v17584_v5  ;;  %v18175_v21 = vrot.slane %v18174_v24, %v17584_v5  ;;  %v9071_v30 = vsel %vm4300_vm1, %v7408_v50, 0.0 }
 0x350   : > { %v15325_v58 = vrot.slane %v18171_v31, %v17584_v5  ;;  %v7478_v44 = vcombine.low %v18173_v32, %v14505_v16  ;;  %v5975_v17 = vcombine.high %v18176_v61, %v18176_v61  ;;  %v18178_v3 = vcombine.high %v18177_v33, %v18177_v33 }
 0x351   : > { %v7495_v9 = vcombine.low %v5616_v7, %v18175_v21  ;;  %v18179_v57 = vcombine.high %v14505_v16, %v14505_v16  ;;  %v9072_v1 = vadd.f32 %v9071_v30, %v9070_v53  ;;  %v5664_v7 = vcombine.high %v15102_v39, %v15102_v39 }
 0x352   : > { %v15342_v18 = vrot.slane %v18178_v3, %v17584_v5  ;;  %v7459_v41 = vcombine.low %v7451_v23, %v7458_v27  ;;  %v7485_v50 = vrot.slane %v7477_v46, %v17584_v5  ;;  %v7512_v20 = vcombine.low %v15094_v8, %v5640_v48  ;;  %v18183_v23 = vld [vmem:[#allocation104_spill] sm:$0xff] }
 0x353   : > { %v7494_v38 = vcombine.low %v18179_v57, %v15086_v6  ;;  %v4733_v55 = vsub.f32 %v9764_v25, %v18023_v63  ;;  %v5688_v31 = vcombine.high %v15110_v40, %v15110_v40  ;;  %v18180_v16 = vcombine.high %v14521_v62, %v14521_v62  ;;  %v18185_v3 = vld [vmem:[#allocation108_spill] sm:$0xff] }
 0x354   : > { %v9074_v32 = vadd.f32 %v18181_v10, %v9072_v1  ;;  %v7492_v53 = vrot.slane %v7478_v44, %v17584_v5  ;;  %v7509_v27 = vrot.slane %v7495_v9, %v17584_v5  ;;  %v18182_v8 = vcombine.high %v14513_v22, %v14513_v22 }
 0x355   : > { %v7529_v6 = vcombine.low %v18180_v16, %v15102_v39  ;;  %v9075_v46 = vsel %vm4300_vm1, %v7442_v51, 0.0  ;;  %v18184_v24 = vrot.slane %v18183_v23, %v17584_v5  ;;  %v5712_v39 = vcombine.high %v15120_v29, %v15120_v29  ;;  %v18191_v23 = vld [vmem:[#allocation110_spill] sm:$0xff] }
 0x356   : > { %v7511_v48 = vcombine.low %v14513_v22, %v18182_v8  ;;  %v7502_v30 = vrot.slane %v7494_v38, %v17584_v5  ;;  %v9076_v44 = vadd.f32 %v9075_v46, %v9074_v32  ;;  %v7493_v33 = vcombine.low %v7485_v50, %v7492_v53  ;;  %v18188_v32 = vld [vmem:[#allocation74_spill] sm:$0xff] }
 0x357   : > { %v7528_v21 = vcombine.low %v18184_v24, %v14521_v62  ;;  %v7526_v9 = vrot.slane %v7512_v20, %v17584_v5  ;;  %v18186_v57 = vrot.slane %v18185_v3, %v17584_v5  ;;  %v9077_v51 = vsel %vm4300_vm1, %v7459_v41, 0.0 }
 0x358   : > { %v4893_v1 = vmul.f32 %v4733_v55, %v14750_v37  ;;  %v5736_v62 = vcombine.high %v15134_v59, %v15134_v59  ;;  %v7543_v25 = vrot.slane %v7529_v6, %v17584_v5  ;;  %v9078_v16 = vadd.f32 %v9077_v51, %v9076_v44  ;;  %v18189_v55 = vld [vmem:[#allocation109_spill] sm:$0xff]  ;;  %v18194_v51 = vld [vmem:[#allocation80_spill] sm:$0xff] }
 0x359   : > { %v7545_v22 = vcombine.low %v5664_v7, %v18186_v57  ;;  %v7510_v10 = vcombine.low %v7502_v30, %v7509_v27  ;;  %v7519_v38 = vrot.slane %v7511_v48, %v17584_v5  ;;  %v18187_v50 = vcombine.high %v14529_v13, %v14529_v13 }
 0x35a   : > { %v7562_v7 = vcombine.low %v15110_v40, %v5688_v31  ;;  %v6023_v41 = vcombine.high %v18188_v32, %v18188_v32  ;;  %v18190_v53 = vrot.slane %v18189_v55, %v17584_v5  ;;  %v7536_v6 = vrot.slane %v7528_v21, %v17584_v5 }
 0x35b   : > { %v7546_v20 = vcombine.low %v14529_v13, %v18187_v50  ;;  %v9080_v27 = vadd.f32 %v15007_v0, %v9078_v16  ;;  %v7527_v48 = vcombine.low %v7519_v38, %v7526_v9  ;;  %v7553_v46 = vrot.slane %v7545_v22, %v17584_v5 }
 0x35c   : > { %v7563_v8 = vcombine.low %v18190_v53, %v18126_v26  ;;  %v18192_v13 = vrot.slane %v18191_v23, %v17584_v5  ;;  %v9081_v40 = vsel %vm4300_vm1, %v7493_v33, 0.0  ;;  %v5053_v31 = vmul.f32 %v4893_v1, %v4893_v1 }
 0x35d   : > { %v7544_v30 = vcombine.low %v7536_v6, %v7543_v25  ;;  %v18193_v44 = vcombine.high %v18126_v26, %v18126_v26  ;;  %v9082_v57 = vadd.f32 %v9081_v40, %v9080_v27  ;;  %v7560_v21 = vrot.slane %v7546_v20, %v17584_v5 }
 0x35e   : > { %v7580_v24 = vcombine.low %v5712_v39, %v18192_v13  ;;  %v7570_v0 = vrot.slane %v7562_v7, %v17584_v5  ;;  %v7597_v9 = vcombine.low %v15134_v59, %v5736_v62  ;;  %v9083_v22 = vsel %vm4300_vm1, %v7510_v10, 0.0  ;;  %v18195_v39 = vld [vmem:[#allocation64_spill] sm:$0xff]  ;;  %v18198_v10 = vld [vmem:[#allocation117_spill] sm:$0xff] }
 0x35f   : > { %v7579_v3 = vcombine.low %v18193_v44, %v15120_v29  ;;  %v18196_v33 = vcombine.high %v18195_v39, %v18195_v39  ;;  %v5799_v25 = vrot.slane %v18080_v35, %v17584_v5  ;;  %v7577_v26 = vrot.slane %v7563_v8, %v17584_v5  ;;  %v18200_v35 = vld [vmem:[#allocation120_spill] sm:$0xff] }
 0x360   : > { %v9084_v29 = vadd.f32 %v9083_v22, %v9082_v57  ;;  %v7561_v16 = vcombine.low %v7553_v46, %v7560_v21  ;;  %v7594_v38 = vrot.slane %v7580_v24, %v17584_v5  ;;  %v18197_v50 = vcombine.high %v14545_v36, %v14545_v36  ;;  %v9765_v22 = vld [vmem:[%s10031_s15 + $0x1c8] sm:$0x3] }
 0x361   : > { %v7614_v1 = vcombine.low %v18196_v33, %v18194_v51  ;;  %v9085_v62 = vsel %vm4300_vm1, %v7527_v48, 0.0  ;;  %v18199_v20 = vrot.slane %v18198_v10, %v17584_v5  ;;  %v18201_v55 = vrot.slane %v18200_v35, %v17584_v5  ;;  %v18207_v35 = vld [vmem:[#allocation68_spill] sm:$0xff] }
 0x362   : > { %v7596_v59 = vcombine.low %v14545_v36, %v18197_v50  ;;  %v5791_v8 = vrot.slane %v5053_v31, %v17584_v5  ;;  %v9086_v6 = vadd.f32 %v9085_v62, %v9084_v29  ;;  %v7578_v27 = vcombine.low %v7570_v0, %v7577_v26  ;;  %v18203_v0 = vld [vmem:[#allocation118_spill] sm:$0xff] }
 0x363   : > { %v7613_v7 = vcombine.low %v18199_v20, %v18195_v39  ;;  %v15432_v53 = vcombine.low %v18201_v55, %v14566_v43  ;;  %v7587_v36 = vrot.slane %v7579_v3, %v17584_v5  ;;  %v7611_v48 = vrot.slane %v7597_v9, %v17584_v5 }
 0x364   : > { %v9087_v46 = vsel %vm4300_vm1, %v7544_v30, 0.0  ;;  %v5807_v23 = vcombine.high %v5799_v25, %v5799_v25  ;;  %v5832_v13 = vcombine.high %v15144_v60, %v15144_v60  ;;  %v7628_v24 = vrot.slane %v7614_v1, %v17584_v5 }
 0x365   : > { %v9088_v40 = vadd.f32 %v9087_v46, %v9086_v6  ;;  %v7595_v44 = vcombine.low %v7587_v36, %v7594_v38  ;;  %v7604_v57 = vrot.slane %v7596_v59, %v17584_v5  ;;  %v18202_v31 = vcombine.high %v14552_v56, %v14552_v56  ;;  %v18206_v59 = vld [vmem:[#allocation112_spill] sm:$0xff] }
 0x366   : > { %v9089_v3 = vsel %vm4300_vm1, %v7561_v16, 0.0  ;;  %v18204_v30 = vrot.slane %v18203_v0, %v17584_v5  ;;  %v4753_v51 = vsub.f32 %v9765_v22, %v18023_v63  ;;  %v7621_v39 = vrot.slane %v7613_v7, %v17584_v5  ;;  %v18205_v16 = vld [vmem:[#allocation103_spill] sm:$0xff]  ;;  %v18210_v36 = vld [vmem:[#allocation36_spill] sm:$0xff] }
 0x367   : > { %v7647_v21 = vcombine.low %v14552_v56, %v18202_v31  ;;  %v9090_v33 = vadd.f32 %v9089_v3, %v9088_v40  ;;  %v7612_v1 = vcombine.low %v7604_v57, %v7611_v48  ;;  %v7648_v26 = vcombine.low %v5791_v8, %v5799_v25  ;;  %v18212_v3 = vld [vmem:[#allocation121_spill] sm:$0xff] }
 0x368   : > { %v15451_v9 = vcombine.low %v18204_v30, %v18163_v11  ;;  %v9091_v29 = vsel %vm4300_vm1, %v7578_v27, 0.0  ;;  %v7247_v56 = vcombine.high %v15216_v54, %v15216_v54  ;;  %v5856_v38 = vcombine.high %v18205_v16, %v18205_v16 }
 0x369   : > { %v5880_v50 = vcombine.high %v15260_v4, %v15260_v4  ;;  %v7664_v62 = vcombine.low %v5807_v23, %v18206_v59  ;;  %v9092_v10 = vadd.f32 %v9091_v29, %v9090_v33  ;;  %v7629_v63 = vcombine.low %v7621_v39, %v7628_v24  ;;  %v18214_v29 = vld [vmem:[#allocation190_spill] sm:$0xff] }
 0x36a   : > { %v7655_v20 = vrot.slane %v7647_v21, %v17584_v5  ;;  %v7682_v7 = vcombine.low %v15144_v60, %v5832_v13  ;;  %v9093_v25 = vsel %vm4300_vm1, %v7595_v44, 0.0  ;;  %v18208_v55 = vcombine.high %v18207_v35, %v18207_v35  ;;  %v18211_v13 = vld [vmem:[#allocation47_spill] sm:$0xff] }
 0x36b   : > { %v18209_v8 = vcombine.high %v14566_v43, %v14566_v43  ;;  %v9094_v27 = vadd.f32 %v9093_v25, %v9092_v10  ;;  %v8939_v48 = vcombine.low %v7247_v56, %v18210_v36  ;;  %v5904_v46 = vcombine.high %v15282_v14, %v15282_v14 }
 0x36c   : > { %v7681_v54 = vcombine.low %v18207_v35, %v18208_v55  ;;  %v7662_v60 = vrot.slane %v7648_v26, %v17584_v5  ;;  %v9095_v23 = vsel %vm4300_vm1, %v7612_v1, 0.0  ;;  %v8954_v24 = vrot.slane %v18211_v13, %v17584_v5 }
 0x36d   : > { %v7699_v6 = vcombine.low %v18209_v8, %v18205_v16  ;;  %v5928_v40 = vcombine.high %v15299_v45, %v15299_v45  ;;  %v7672_v44 = vrot.slane %v7664_v62, %v17584_v5  ;;  %v9096_v43 = vadd.f32 %v9095_v23, %v9094_v27  ;;  %v18216_v62 = vld [vmem:[#allocation91_spill] sm:$0xff] }
 0x36e   : > { %v8947_v57 = vrot.slane %v8939_v48, %v17584_v5  ;;  %v7663_v31 = vcombine.low %v7655_v20, %v7662_v60  ;;  %v7696_v21 = vrot.slane %v7682_v7, %v17584_v5  ;;  %v18213_v0 = vrot.slane %v18212_v3, %v17584_v5 }
 0x36f   : > { %v9097_v22 = vsel %vm4300_vm1, %v7629_v63, 0.0  ;;  %v7689_v39 = vrot.slane %v7681_v54, %v17584_v5  ;;  %v7713_v33 = vrot.slane %v7699_v6, %v17584_v5  ;;  %v18215_v56 = vrot.slane %v18214_v29, %v17584_v5  ;;  %v18217_v63 = vld [vmem:[#allocation129_spill] sm:$0xff] }
 0x370   : > { %v7715_v30 = vcombine.low %v5856_v38, %v18213_v0  ;;  %v9098_v1 = vadd.f32 %v9097_v22, %v9096_v43  ;;  %v15493_v26 = vcombine.low %v8947_v57, %v8954_v24  ;;  %v7716_v59 = vcombine.low %v18158_v15, %v5879_v12  ;;  %v18219_v15 = vld [vmem:[#allocation123_spill] sm:$0xff]  ;;  %v18224_v29 = vld [vmem:[#allocation133_spill] sm:$0xff] }
 0x371   : > { %v7680_v16 = vcombine.low %v7672_v44, %v18215_v56  ;;  %v7732_v38 = vcombine.low %v15260_v4, %v5880_v50  ;;  %v9099_v10 = vsel %vm4300_vm1, %v18216_v62, 0.0  ;;  %v18218_v20 = vrot.slane %v18217_v63, %v17584_v5  ;;  %v18221_v44 = vld [vmem:[#allocation111_spill] sm:$0xff] }
 0x372   : > { %v4913_v25 = vmul.f32 %v4753_v51, %v14750_v37  ;;  %v7706_v35 = vrot.slane %v15432_v53, %v17584_v5  ;;  %v9100_v55 = vadd.f32 %v9099_v10, %v9098_v1  ;;  %v7697_v54 = vcombine.low %v7689_v39, %v7696_v21 }
 0x373   : > { %v7783_v7 = vcombine.low %v18218_v20, %v18169_v34  ;;  %v7723_v8 = vrot.slane %v7715_v30, %v17584_v5  ;;  %v18220_v4 = vrot.slane %v18219_v15, %v17584_v5  ;;  %v9101_v50 = vsel %vm4300_vm1, %v7663_v31, 0.0 }
 0x374   : > { %v5952_v6 = vcombine.high %v15311_v19, %v15311_v19  ;;  %v7714_v27 = vcombine.low %v7706_v35, %v7713_v33  ;;  %v7749_v37 = vcombine.low %v5903_v28, %v15282_v14  ;;  %v9102_v53 = vadd.f32 %v9101_v50, %v9100_v55 }
 0x375   : > { %v7750_v12 = vcombine.low %v5904_v46, %v18220_v4  ;;  %v7730_v51 = vrot.slane %v7716_v59, %v17584_v5  ;;  %v7740_v36 = vrot.slane %v7732_v38, %v17584_v5  ;;  %v7767_v48 = vcombine.low %v15299_v45, %v5928_v40  ;;  %v18226_v59 = vld [vmem:[#allocation84_spill] sm:$0xff] }
 0x376   : > { %v9103_v46 = vsel %vm4300_vm1, %v7680_v16, 0.0  ;;  %v5976_v60 = vcombine.high %v15325_v58, %v15325_v58  ;;  %v7766_v23 = vcombine.low %v18166_v42, %v5927_v2  ;;  %v7784_v14 = vcombine.low %v5951_v47, %v15311_v19  ;;  %v18222_v19 = vld [vmem:[#allocation124_spill] sm:$0xff] }
 0x377   : > { %v9104_v11 = vadd.f32 %v9103_v46, %v9102_v53  ;;  %v7731_v28 = vcombine.low %v7723_v8, %v7730_v51  ;;  %v7747_v45 = vrot.slane %v15451_v9, %v17584_v5  ;;  %v7764_v13 = vrot.slane %v7750_v12, %v17584_v5  ;;  %v18227_v38 = vld [vmem:[#allocation128_spill] sm:$0xff] }
 0x378   : > { %v9105_v24 = vsel %vm4300_vm1, %v7697_v54, 0.0  ;;  %v5073_v40 = vmul.f32 %v4913_v25, %v4913_v25  ;;  %v6039_v43 = vrot.slane %v18221_v44, %v17584_v5  ;;  %v7757_v42 = vrot.slane %v7749_v37, %v17584_v5 }
 0x379   : > { %v9106_v2 = vadd.f32 %v9105_v24, %v9104_v11  ;;  %v7748_v57 = vcombine.low %v7740_v36, %v7747_v45  ;;  %v7781_v34 = vrot.slane %v7767_v48, %v17584_v5  ;;  %v18223_v47 = vrot.slane %v18222_v19, %v17584_v5  ;;  %v18234_v11 = vld [vmem:[#allocation193_spill] sm:$0xff]  ;;  %v18235_v45 = vld [vmem:[#allocation70_spill] sm:$0xff] }
 0x37a   : > { %v9107_v9 = vsel %vm4300_vm1, %v7714_v27, 0.0  ;;  %v6024_v21 = vcombine.high %v15342_v18, %v15342_v18  ;;  %v7774_v3 = vrot.slane %v7766_v23, %v17584_v5  ;;  %v7798_v0 = vrot.slane %v7784_v14, %v17584_v5  ;;  %v18231_v27 = vld [vmem:[#allocation135_spill] sm:$0xff]  ;;  %v18233_v23 = vld [vmem:[#allocation184_spill] sm:$0xff] }
 0x37b   : > { %v7800_v31 = vcombine.low %v5952_v6, %v18223_v47  ;;  %v9108_v30 = vadd.f32 %v9107_v9, %v9106_v2  ;;  %v7765_v22 = vcombine.low %v7757_v42, %v7764_v13  ;;  %v7801_v39 = vcombine.low %v18176_v61, %v5975_v17  ;;  %v18229_v17 = vld [vmem:[#allocation130_spill] sm:$0xff] }
 0x37c   : > { %v7817_v33 = vcombine.low %v15325_v58, %v5976_v60  ;;  %v9109_v1 = vsel %vm4300_vm1, %v7731_v28, 0.0  ;;  %v18225_v56 = vcombine.high %v18224_v29, %v18224_v29  ;;  %v18228_v62 = vrot.slane %v18227_v38, %v17584_v5  ;;  %v18242_v29 = vld [vmem:[#allocation134_spill] sm:$0xff] }
 0x37d   : > { %v7791_v63 = vrot.slane %v7783_v7, %v17584_v5  ;;  %v9110_v20 = vadd.f32 %v9109_v1, %v9108_v30  ;;  %v6047_v25 = vcombine.high %v6039_v43, %v6039_v43  ;;  %v7782_v35 = vcombine.low %v7774_v3, %v7781_v34  ;;  %v18236_v34 = vld [vmem:[#allocation77_spill] sm:$0xff] }
 0x37e   : > { %v6070_v16 = vrot.slane %v18225_v56, %v17584_v5  ;;  %v7818_v10 = vcombine.low %v18228_v62, %v18226_v59  ;;  %v7808_v61 = vrot.slane %v7800_v31, %v17584_v5  ;;  %v9111_v58 = vsel %vm4300_vm1, %v7748_v57, 0.0 }
 0x37f   : > { %v18230_v55 = vcombine.high %v18229_v17, %v18229_v17  ;;  %v6031_v8 = vrot.slane %v5073_v40, %v17584_v5  ;;  %v7799_v15 = vcombine.low %v7791_v63, %v7798_v0  ;;  %v9112_v4 = vadd.f32 %v9111_v58, %v9110_v20  ;;  %v18247_v58 = vld [vmem:[#allocation144_spill] sm:$0xff] }
 0x380   : > { %v7815_v12 = vrot.slane %v7801_v39, %v17584_v5  ;;  %v7825_v7 = vrot.slane %v7817_v33, %v17584_v5  ;;  %v7852_v50 = vcombine.low %v15342_v18, %v6024_v21  ;;  %v9113_v6 = vsel %vm4300_vm1, %v7765_v22, 0.0  ;;  %v18240_v39 = vld [vmem:[#allocation137_spill] sm:$0xff] }
 0x381   : > { %v6094_v54 = vrot.slane %v18230_v55, %v17584_v5  ;;  %v18232_v37 = vcombine.high %v18231_v27, %v18231_v27  ;;  %v6072_v51 = vcombine.high %v6070_v16, %v6070_v16  ;;  %v7832_v36 = vrot.slane %v7818_v10, %v17584_v5  ;;  %v18244_v10 = vld [vmem:[#allocation136_spill] sm:$0xff] }
 0x382   : > { %v9114_v48 = vadd.f32 %v9113_v6, %v9112_v4  ;;  %v7816_v46 = vcombine.low %v7808_v61, %v7815_v12  ;;  %v7851_v60 = vcombine.low %v18188_v32, %v6023_v41  ;;  %v7869_v14 = vcombine.low %v6047_v25, %v18233_v23  ;;  %v18237_v41 = vld [vmem:[#allocation139_spill] sm:$0xff]  ;;  %v18249_v6 = vld [vmem:[#allocation142_spill] sm:$0xff] }
 0x383   : > { %v6118_v53 = vrot.slane %v18232_v37, %v17584_v5  ;;  %v9115_v18 = vsel %vm4300_vm1, %v7782_v35, 0.0  ;;  %v9129_v28 = vsel %vm4300_vm1, %v18234_v11, 0.0  ;;  %v6095_v13 = vcombine.high %v18235_v45, %v18235_v45  ;;  %v18246_v35 = vld [vmem:[#allocation75_spill] sm:$0xff] }
 0x384   : > { %v6096_v24 = vcombine.high %v6094_v54, %v6094_v54  ;;  %v9116_v40 = vadd.f32 %v9115_v18, %v9114_v48  ;;  %v7833_v44 = vcombine.low %v7825_v7, %v7832_v36  ;;  %v7866_v42 = vrot.slane %v7852_v50, %v17584_v5  ;;  %v18251_v48 = vld [vmem:[#allocation8_spill] sm:$0xff] }
 0x385   : > { %v7868_v2 = vcombine.low %v6031_v8, %v6039_v43  ;;  %v9117_v57 = vsel %vm4300_vm1, %v7799_v15, 0.0  ;;  %v6119_v32 = vcombine.high %v18236_v34, %v18236_v34  ;;  %v18238_v19 = vcombine.high %v18237_v41, %v18237_v41  ;;  %v18239_v43 = vld [vmem:[#allocation78_spill] sm:$0xff] }
 0x386   : > { %v7902_v31 = vcombine.low %v6070_v16, %v6072_v51  ;;  %v9118_v9 = vadd.f32 %v9117_v57, %v9116_v40  ;;  %v6120_v21 = vcombine.high %v6118_v53, %v6118_v53  ;;  %v7859_v3 = vrot.slane %v7851_v60, %v17584_v5 }
 0x387   : > { %v6142_v47 = vrot.slane %v18238_v19, %v17584_v5  ;;  %v7883_v0 = vrot.slane %v7869_v14, %v17584_v5  ;;  %v9119_v30 = vsel %vm4300_vm1, %v7816_v46, 0.0  ;;  %v6143_v22 = vcombine.high %v18239_v43, %v18239_v43 }
 0x388   : > { %v18241_v33 = vcombine.high %v18240_v39, %v18240_v39  ;;  %v18243_v56 = vrot.slane %v18242_v29, %v17584_v5  ;;  %v9120_v59 = vadd.f32 %v9119_v30, %v9118_v9  ;;  %v7867_v38 = vcombine.low %v7859_v3, %v7866_v42  ;;  %v18254_v42 = vld [vmem:[#allocation140_spill] sm:$0xff]  ;;  %v18257_v30 = vld [vmem:[#allocation81_spill] sm:$0xff] }
 0x389   : > { %v7876_v62 = vrot.slane %v7868_v2, %v17584_v5  ;;  %v18245_v63 = vrot.slane %v18244_v10, %v17584_v5  ;;  %v9121_v25 = vsel %vm4300_vm1, %v7833_v44, 0.0  ;;  %v6167_v61 = vcombine.high %v18246_v35, %v18246_v35 }
 0x38a   : > { %v6166_v1 = vrot.slane %v18241_v33, %v17584_v5  ;;  %v7903_v16 = vcombine.low %v18243_v56, %v18235_v45  ;;  %v18248_v17 = vcombine.high %v18247_v58, %v18247_v58  ;;  %v7910_v8 = vrot.slane %v7902_v31, %v17584_v5 }
 0x38b   : > { %v7920_v20 = vcombine.low %v6096_v24, %v18245_v63  ;;  %v9122_v15 = vadd.f32 %v9121_v25, %v9120_v59  ;;  %v6144_v4 = vcombine.high %v6142_v47, %v6142_v47  ;;  %v7884_v12 = vcombine.low %v7876_v62, %v7883_v0  ;;  %v18262_v63 = vld [vmem:[#allocation83_spill] sm:$0xff] }
 0x38c   : > { %v6190_v55 = vrot.slane %v18248_v17, %v17584_v5  ;;  %v7919_v7 = vcombine.low %v6095_v13, %v6094_v54  ;;  %v7937_v50 = vcombine.low %v6118_v53, %v6120_v21  ;;  %v18250_v27 = vcombine.high %v18249_v6, %v18249_v6  ;;  %v18252_v54 = vld [vmem:[#allocation138_spill] sm:$0xff] }
 0x38d   : > { %v7917_v51 = vrot.slane %v7903_v16, %v17584_v5  ;;  %v7954_v36 = vcombine.low %v6143_v22, %v6142_v47  ;;  %v9124_v46 = vadd.f32 %v18251_v48, %v9122_v15  ;;  %v6168_v60 = vcombine.high %v6166_v1, %v6166_v1  ;;  %v18258_v22 = vld [vmem:[#allocation141_spill] sm:$0xff]  ;;  %v18263_v15 = vld [vmem:[#allocation143_spill] sm:$0xff] }
 0x38e   : > { %v6214_v37 = vrot.slane %v18250_v27, %v17584_v5  ;;  %v7934_v23 = vrot.slane %v7920_v20, %v17584_v5  ;;  %v7936_v14 = vcombine.low %v18236_v34, %v6119_v32  ;;  %v9125_v18 = vsel %vm4300_vm1, %v7867_v38, 0.0  ;;  %v18256_v32 = vld [vmem:[#allocation79_spill] sm:$0xff]  ;;  %v18260_v38 = vld [vmem:[#allocation145_spill] sm:$0xff] }
 0x38f   : > { %v18253_v53 = vrot.slane %v18252_v54, %v17584_v5  ;;  %v6192_v45 = vcombine.high %v6190_v55, %v6190_v55  ;;  %v7918_v13 = vcombine.low %v7910_v8, %v7917_v51  ;;  %v9126_v24 = vadd.f32 %v9125_v18, %v9124_v46 }
 0x390   : > { %v7927_v40 = vrot.slane %v7919_v7, %v17584_v5  ;;  %v7951_v44 = vrot.slane %v7937_v50, %v17584_v5  ;;  %v18255_v2 = vrot.slane %v18254_v42, %v17584_v5  ;;  %v9127_v34 = vsel %vm4300_vm1, %v7884_v12, 0.0  ;;  %v18265_v7 = vld [vmem:[#allocation86_spill] sm:$0xff]  ;;  %v18266_v50 = vld [vmem:[#allocation63_spill] sm:$0xff] }
 0x391   : > { %v7953_v11 = vcombine.low %v18253_v53, %v18239_v43  ;;  %v6191_v41 = vcombine.high %v18256_v32, %v18256_v32  ;;  %v6216_v19 = vcombine.high %v6214_v37, %v6214_v37  ;;  %v7968_v47 = vrot.slane %v7954_v36, %v17584_v5  ;;  %v18271_v53 = vld [vmem:[#allocation147_spill] sm:$0xff] }
 0x392   : > { %v7970_v57 = vcombine.low %v6144_v4, %v18255_v2  ;;  %v9128_v31 = vadd.f32 %v9127_v34, %v9126_v24  ;;  %v7935_v9 = vcombine.low %v7927_v40, %v7934_v23  ;;  %v7944_v21 = vrot.slane %v7936_v14, %v17584_v5  ;;  %v18269_v14 = vld [vmem:[#allocation146_spill] sm:$0xff] }
 0x393   : > { %v7971_v3 = vcombine.low %v18246_v35, %v6167_v61  ;;  %v7987_v0 = vcombine.low %v6166_v1, %v6168_v60  ;;  %v6215_v43 = vcombine.high %v18257_v30, %v18257_v30  ;;  %v18259_v39 = vrot.slane %v18258_v22, %v17584_v5  ;;  %v18268_v60 = vld [vmem:[#allocation165_spill] sm:$0xff]  ;;  %v18273_v2 = vld [vmem:[#allocation166_spill] sm:$0xff] }
 0x394   : > { %v7961_v29 = vrot.slane %v7953_v11, %v17584_v5  ;;  %v9130_v56 = vadd.f32 %v9129_v28, %v9128_v31  ;;  %v7952_v16 = vcombine.low %v7944_v21, %v7951_v44  ;;  %v7978_v59 = vrot.slane %v7970_v57, %v17584_v5  ;;  %v18274_v21 = vld [vmem:[#allocation148_spill] sm:$0xff]  ;;  %v18277_v22 = vld [vmem:[#allocation150_spill] sm:$0xff] }
 0x395   : > { %v7988_v33 = vcombine.low %v18259_v39, %v18256_v32  ;;  %v18261_v62 = vrot.slane %v18260_v38, %v17584_v5  ;;  %v9131_v1 = vsel %vm4300_vm1, %v7918_v13, 0.0  ;;  %v6264_v20 = vcombine.high %v18262_v63, %v18262_v63 }
 0x396   : > { %v7969_v25 = vcombine.low %v7961_v29, %v7968_v47  ;;  %v8004_v35 = vcombine.low %v6191_v41, %v6190_v55  ;;  %v9132_v61 = vadd.f32 %v9131_v1, %v9130_v56  ;;  %v7985_v58 = vrot.slane %v7971_v3, %v17584_v5  ;;  %v18279_v56 = vld [vmem:[#allocation168_spill] sm:$0xff] }
 0x397   : > { %v8005_v10 = vcombine.low %v6192_v45, %v18261_v62  ;;  %v7995_v17 = vrot.slane %v7987_v0, %v17584_v5  ;;  %v8022_v28 = vcombine.low %v6214_v37, %v6216_v19  ;;  %v9133_v8 = vsel %vm4300_vm1, %v7935_v9, 0.0 }
 0x398   : > { %v18264_v4 = vcombine.high %v18263_v15, %v18263_v15  ;;  %v18267_v6 = vcombine.high %v18266_v50, %v18266_v50  ;;  %v8002_v55 = vrot.slane %v7988_v33, %v17584_v5  ;;  %v9134_v51 = vadd.f32 %v9133_v8, %v9132_v61  ;;  %v18283_v15 = vld [vmem:[#allocation157_spill] sm:$0xff] }
 0x399   : > { %v7986_v36 = vcombine.low %v7978_v59, %v7985_v58  ;;  %v8019_v48 = vrot.slane %v8005_v10, %v17584_v5  ;;  %v8021_v37 = vcombine.low %v18257_v30, %v6215_v43  ;;  %v9135_v46 = vsel %vm4300_vm1, %v7952_v16, 0.0  ;;  %v18276_v30 = vld [vmem:[#allocation167_spill] sm:$0xff] }
 0x39a   : > { %v6310_v12 = vrot.slane %v18264_v4, %v17584_v5  ;;  %v8039_v27 = vcombine.low %v18267_v6, %v18265_v7  ;;  %v6311_v23 = vcombine.high %v18268_v60, %v18268_v60  ;;  %v18270_v18 = vcombine.high %v18269_v14, %v18269_v14  ;;  %v18280_v10 = vld [vmem:[#allocation155_spill] sm:$0xff] }
 0x39b   : > { %v18272_v11 = vrot.slane %v18271_v53, %v17584_v5  ;;  %v9136_v13 = vadd.f32 %v9135_v46, %v9134_v51  ;;  %v8003_v24 = vcombine.low %v7995_v17, %v8002_v55  ;;  %v8012_v40 = vrot.slane %v8004_v35, %v17584_v5  ;;  %v18286_v51 = vld [vmem:[#allocation34_spill] sm:$0xff]  ;;  %v18287_v46 = vld [vmem:[#allocation160_spill] sm:$0xff]  ;;  %v18289_v53 = vld [vmem:[#allocation149_spill] sm:$0xff] }
 0x39c   : > { %v6334_v54 = vrot.slane %v18270_v18, %v17584_v5  ;;  %v8036_v44 = vrot.slane %v8022_v28, %v17584_v5  ;;  %v9137_v42 = vsel %vm4300_vm1, %v7969_v25, 0.0  ;;  %v6335_v57 = vcombine.high %v18273_v2, %v18273_v2 }
 0x39d   : > { %v8038_v45 = vcombine.low %v18272_v11, %v18266_v50  ;;  %v6312_v34 = vcombine.high %v6310_v12, %v6310_v12  ;;  %v8053_v32 = vrot.slane %v8039_v27, %v17584_v5  ;;  %v9138_v41 = vadd.f32 %v9137_v42, %v9136_v13  ;;  %v18285_v50 = vld [vmem:[#allocation170_spill] sm:$0xff]  ;;  %v18291_v42 = vld [vmem:[#allocation151_spill] sm:$0xff] }
 0x39e   : > { %v8020_v19 = vcombine.low %v8012_v40, %v8019_v48  ;;  %v8029_v47 = vrot.slane %v8021_v37, %v17584_v5  ;;  %v8072_v31 = vcombine.low %v18262_v63, %v6264_v20  ;;  %v9139_v9 = vsel %vm4300_vm1, %v7986_v36, 0.0  ;;  %v18282_v20 = vld [vmem:[#allocation169_spill] sm:$0xff] }
 0x39f   : > { %v18275_v3 = vcombine.high %v18274_v21, %v18274_v21  ;;  %v6359_v43 = vcombine.high %v18276_v30, %v18276_v30  ;;  %v18278_v39 = vcombine.high %v18277_v22, %v18277_v22  ;;  %v9140_v29 = vadd.f32 %v9139_v9, %v9138_v41  ;;  %v18294_v9 = vld [vmem:[#allocation92_spill] sm:$0xff] }
 0x3a0   : > { %v6383_v16 = vcombine.high %v18279_v56, %v18279_v56  ;;  %v8037_v59 = vcombine.low %v8029_v47, %v8036_v44  ;;  %v8046_v38 = vrot.slane %v8038_v45, %v17584_v5  ;;  %v9141_v62 = vsel %vm4300_vm1, %v8003_v24, 0.0 }
 0x3a1   : > { %v6358_v0 = vrot.slane %v18275_v3, %v17584_v5  ;;  %v6382_v33 = vrot.slane %v18278_v39, %v17584_v5  ;;  %v18281_v1 = vcombine.high %v18280_v10, %v18280_v10  ;;  %v6407_v25 = vcombine.high %v18282_v20, %v18282_v20  ;;  %v18295_v3 = vld [vmem:[#allocation161_spill] sm:$0xff] }
 0x3a2   : > { %v6336_v35 = vcombine.high %v6334_v54, %v6334_v54  ;;  %v9142_v61 = vadd.f32 %v9141_v62, %v9140_v29  ;;  %v8054_v58 = vcombine.low %v8046_v38, %v8053_v32  ;;  %v8080_v17 = vrot.slane %v8072_v31, %v17584_v5  ;;  %v18297_v29 = vld [vmem:[#allocation152_spill] sm:$0xff]  ;;  %v18299_v10 = vld [vmem:[#allocation153_spill] sm:$0xff] }
 0x3a3   : > { %v6406_v63 = vrot.slane %v18281_v1, %v17584_v5  ;;  %v8107_v28 = vcombine.low %v6310_v12, %v6312_v34  ;;  %v9143_v8 = vsel %vm4300_vm1, %v8020_v19, 0.0  ;;  %v18284_v4 = vcombine.high %v18283_v15, %v18283_v15 }
 0x3a4   : > { %v6431_v6 = vcombine.high %v18285_v50, %v18285_v50  ;;  %v6360_v27 = vcombine.high %v6358_v0, %v6358_v0  ;;  %v9144_v55 = vadd.f32 %v9143_v8, %v9142_v61  ;;  %v8087_v36 = vrot.slane %v18286_v51, %v17584_v5 }
 0x3a5   : > { %v6430_v7 = vrot.slane %v18284_v4, %v17584_v5  ;;  %v8106_v48 = vcombine.low %v18268_v60, %v6311_v23  ;;  %v8124_v37 = vcombine.low %v6335_v57, %v6334_v54  ;;  %v9145_v12 = vsel %vm4300_vm1, %v8037_v59, 0.0  ;;  %v18293_v57 = vld [vmem:[#allocation171_spill] sm:$0xff] }
 0x3a6   : > { %v18288_v14 = vcombine.high %v18287_v46, %v18287_v46  ;;  %v18290_v11 = vrot.slane %v18289_v53, %v17584_v5  ;;  %v6384_v13 = vcombine.high %v6382_v33, %v6382_v33  ;;  %v9146_v24 = vadd.f32 %v9145_v12, %v9144_v55 }
 0x3a7   : > { %v8088_v40 = vcombine.low %v8080_v17, %v8087_v36  ;;  %v8121_v44 = vrot.slane %v8107_v28, %v17584_v5  ;;  %v18292_v60 = vrot.slane %v18291_v42, %v17584_v5  ;;  %v9147_v54 = vsel %vm4300_vm1, %v8054_v58, 0.0 }
 0x3a8   : > { %v6454_v18 = vrot.slane %v18288_v14, %v17584_v5  ;;  %v8123_v45 = vcombine.low %v18290_v11, %v18273_v2  ;;  %v6455_v34 = vcombine.high %v18293_v57, %v18293_v57  ;;  %v8141_v32 = vcombine.low %v18276_v30, %v6359_v43  ;;  %v18302_v11 = vld [vmem:[#allocation186_spill] sm:$0xff] }
 0x3a9   : > { %v8140_v23 = vcombine.low %v6336_v35, %v18292_v60  ;;  %v8157_v41 = vcombine.low %v6358_v0, %v6360_v27  ;;  %v9148_v19 = vadd.f32 %v9147_v54, %v9146_v24  ;;  %v6408_v47 = vcombine.high %v6406_v63, %v6406_v63  ;;  %v18301_v27 = vld [vmem:[#allocation187_spill] sm:$0xff] }
 0x3aa   : > { %v8114_v2 = vrot.slane %v8106_v48, %v17584_v5  ;;  %v8138_v31 = vrot.slane %v8124_v37, %v17584_v5  ;;  %v9149_v21 = vsel %vm4300_vm1, %v18294_v9, 0.0  ;;  %v18296_v22 = vcombine.high %v18295_v3, %v18295_v3 }
 0x3ab   : > { %v18298_v59 = vrot.slane %v18297_v29, %v17584_v5  ;;  %v8131_v0 = vrot.slane %v8123_v45, %v17584_v5  ;;  %v9150_v43 = vadd.f32 %v9149_v21, %v9148_v19  ;;  %v8148_v62 = vrot.slane %v8140_v23, %v17584_v5  ;;  %v18310_v29 = vld [vmem:[#allocation85_spill] sm:$0xff] }
 0x3ac   : > { %v6502_v39 = vrot.slane %v18296_v22, %v17584_v5  ;;  %v8122_v38 = vcombine.low %v8114_v2, %v8121_v44  ;;  %v18300_v1 = vrot.slane %v18299_v10, %v17584_v5  ;;  %v9151_v61 = vsel %vm4300_vm1, %v8088_v40, 0.0  ;;  %v18315_v10 = vld [vmem:[#allocation164_spill] sm:$0xff] }
 0x3ad   : > { %v8158_v30 = vcombine.low %v18298_v59, %v18279_v56  ;;  %v6432_v58 = vcombine.high %v6430_v7, %v6430_v7  ;;  %v8155_v17 = vrot.slane %v8141_v32, %v17584_v5  ;;  %v8165_v28 = vrot.slane %v8157_v41, %v17584_v5  ;;  %v18311_v59 = vld [vmem:[#allocation156_spill] sm:$0xff] }
 0x3ae   : > { %v8175_v35 = vcombine.low %v6384_v13, %v18300_v1  ;;  %v9152_v8 = vadd.f32 %v9151_v61, %v9150_v43  ;;  %v8139_v15 = vcombine.low %v8131_v0, %v8138_v31  ;;  %v8174_v56 = vcombine.low %v6383_v16, %v6382_v33  ;;  %v18303_v33 = vld [vmem:[#allocation158_spill] sm:$0xff]  ;;  %v18308_v31 = vld [vmem:[#allocation159_spill] sm:$0xff]  ;;  %v18313_v43 = vld [vmem:[#allocation172_spill] sm:$0xff] }
 0x3af   : > { %v8192_v4 = vcombine.low %v6406_v63, %v6408_v47  ;;  %v9153_v55 = vsel %vm4300_vm1, %v18301_v27, 0.0  ;;  %v8172_v51 = vrot.slane %v8158_v30, %v17584_v5  ;;  %v8191_v36 = vcombine.low %v18282_v20, %v6407_v25  ;;  %v18307_v47 = vld [vmem:[#allocation15_spill] sm:$0xff]  ;;  %v18318_v27 = vld [vmem:[#allocation10_spill] sm:$0xff] }
 0x3b0   : > { %v8209_v48 = vcombine.low %v6431_v6, %v6430_v7  ;;  %v9154_v37 = vadd.f32 %v9153_v55, %v9152_v8  ;;  %v6456_v12 = vcombine.high %v6454_v18, %v6454_v18  ;;  %v8156_v46 = vcombine.low %v8148_v62, %v8155_v17  ;;  %v18305_v7 = vld [vmem:[#allocation154_spill] sm:$0xff] }
 0x3b1   : > { %v8189_v14 = vrot.slane %v8175_v35, %v17584_v5  ;;  %v9155_v53 = vsel %vm4300_vm1, %v8122_v38, 0.0  ;;  %v7031_v45 = vcombine.high %v18302_v11, %v18302_v11  ;;  %v18304_v16 = vrot.slane %v18303_v33, %v17584_v5 }
 0x3b2   : > { %v8173_v13 = vcombine.low %v8165_v28, %v8172_v51  ;;  %v9156_v24 = vadd.f32 %v9155_v53, %v9154_v37  ;;  %v8182_v20 = vrot.slane %v8174_v56, %v17584_v5  ;;  %v8206_v25 = vrot.slane %v8192_v4, %v17584_v5  ;;  %v18317_v56 = vld [vmem:[#allocation40_spill] sm:$0xff] }
 0x3b3   : > { %v8208_v63 = vcombine.low %v18304_v16, %v18285_v50  ;;  %v18306_v6 = vrot.slane %v18305_v7, %v17584_v5  ;;  %v9157_v44 = vsel %vm4300_vm1, %v8139_v15, 0.0  ;;  %v6504_v42 = vcombine.high %v6502_v39, %v6502_v39 }
 0x3b4   : > { %v8199_v60 = vrot.slane %v8191_v36, %v17584_v5  ;;  %v8223_v23 = vrot.slane %v8209_v48, %v17584_v5  ;;  %v9158_v54 = vadd.f32 %v9157_v44, %v9156_v24  ;;  %v8190_v32 = vcombine.low %v8182_v20, %v8189_v14 }
 0x3b5   : > { %v8225_v40 = vcombine.low %v6432_v58, %v18306_v6  ;;  %v8226_v50 = vcombine.low %v18293_v57, %v6455_v34  ;;  %v8242_v41 = vcombine.low %v6454_v18, %v6456_v12  ;;  %v9159_v19 = vsel %vm4300_vm1, %v8156_v46, 0.0  ;;  %v18321_v6 = vld [vmem:[#allocation173_spill] sm:$0xff] }
 0x3b6   : > { %v6503_v2 = vcombine.high %v18307_v47, %v18307_v47  ;;  %v18309_v9 = vcombine.high %v18308_v31, %v18308_v31  ;;  %v8216_v3 = vrot.slane %v8208_v63, %v17584_v5  ;;  %v9160_v22 = vadd.f32 %v9159_v19, %v9158_v54  ;;  %v18325_v19 = vld [vmem:[#allocation175_spill] sm:$0xff] }
 0x3b7   : > { %v18312_v30 = vrot.slane %v18311_v59, %v17584_v5  ;;  %v8207_v57 = vcombine.low %v8199_v60, %v8206_v25  ;;  %v8233_v18 = vrot.slane %v8225_v40, %v17584_v5  ;;  %v9161_v34 = vsel %vm4300_vm1, %v8173_v13, 0.0  ;;  %v18322_v60 = vld [vmem:[#allocation14_spill] sm:$0xff] }
 0x3b8   : > { %v6550_v21 = vrot.slane %v18309_v9, %v17584_v5  ;;  %v18314_v38 = vcombine.high %v18313_v43, %v18313_v43  ;;  %v18316_v1 = vcombine.high %v18315_v10, %v18315_v10  ;;  %v8224_v61 = vcombine.low %v8216_v3, %v8223_v23  ;;  %v18328_v3 = vld [vmem:[#allocation19_spill] sm:$0xff] }
 0x3b9   : > { %v8243_v0 = vcombine.low %v18312_v30, %v18310_v29  ;;  %v9162_v58 = vadd.f32 %v9161_v34, %v9160_v22  ;;  %v8240_v17 = vrot.slane %v8226_v50, %v17584_v5  ;;  %v8250_v28 = vrot.slane %v8242_v41, %v17584_v5  ;;  %v18324_v50 = vld [vmem:[#allocation174_spill] sm:$0xff]  ;;  %v18330_v30 = vld [vmem:[#allocation12_spill] sm:$0xff] }
 0x3ba   : > { %v8311_v62 = vcombine.low %v18313_v43, %v18314_v38  ;;  %v6574_v35 = vrot.slane %v18316_v1, %v17584_v5  ;;  %v8277_v8 = vcombine.low %v6502_v39, %v6504_v42  ;;  %v9163_v15 = vsel %vm4300_vm1, %v8190_v32, 0.0  ;;  %v18320_v39 = vld [vmem:[#allocation62_spill] sm:$0xff]  ;;  %v18332_v43 = vld [vmem:[#allocation17_spill] sm:$0xff] }
 0x3bb   : > { %v8318_v4 = vrot.slane %v18317_v56, %v17584_v5  ;;  %v18319_v55 = vcombine.high %v18318_v27, %v18318_v27  ;;  %v6552_v36 = vcombine.high %v6550_v21, %v6550_v21  ;;  %v9164_v48 = vadd.f32 %v9163_v15, %v9162_v58  ;;  %v18335_v15 = vld [vmem:[#allocation21_spill] sm:$0xff] }
 0x3bc   : > { %v8241_v37 = vcombine.low %v8233_v18, %v8240_v17  ;;  %v8257_v12 = vrot.slane %v8243_v0, %v17584_v5  ;;  %v8276_v46 = vcombine.low %v18307_v47, %v6503_v2  ;;  %v9165_v14 = vsel %vm4300_vm1, %v8207_v57, 0.0  ;;  %v18326_v2 = vld [vmem:[#allocation163_spill] sm:$0xff] }
 0x3bd   : > { %v6598_v51 = vrot.slane %v18319_v55, %v17584_v5  ;;  %v7183_v53 = vrot.slane %v18320_v39, %v17584_v5  ;;  %v8325_v33 = vrot.slane %v8311_v62, %v17584_v5  ;;  %v15826_v16 = vcombine.low %v18302_v11, %v7031_v45 }
 0x3be   : > { %v9166_v63 = vadd.f32 %v9165_v14, %v9164_v48  ;;  %v6576_v13 = vcombine.high %v6574_v35, %v6574_v35  ;;  %v8258_v24 = vcombine.low %v8250_v28, %v8257_v12  ;;  %v8291_v20 = vrot.slane %v8277_v8, %v17584_v5 }
 0x3bf   : > { %v9167_v25 = vsel %vm4300_vm1, %v8224_v61, 0.0  ;;  %v8326_v7 = vcombine.low %v8318_v4, %v8325_v33  ;;  %v6575_v40 = vcombine.high %v18321_v6, %v18321_v6  ;;  %v8327_v44 = vcombine.low %v6550_v21, %v6552_v36  ;;  %v18334_v61 = vld [vmem:[#allocation176_spill] sm:$0xff]  ;;  %v18337_v36 = vld [vmem:[#allocation93_spill] sm:$0xff] }
 0x3c0   : > { %v9168_v42 = vadd.f32 %v9167_v25, %v9166_v63  ;;  %v18323_v23 = vcombine.high %v18322_v60, %v18322_v60  ;;  %v6600_v11 = vcombine.high %v6598_v51, %v6598_v51  ;;  %v8284_v45 = vrot.slane %v8276_v46, %v17584_v5  ;;  %v18343_v60 = vld [vmem:[#allocation177_spill] sm:$0xff] }
 0x3c1   : > { %v9169_v32 = vsel %vm4300_vm1, %v8241_v37, 0.0  ;;  %v6599_v41 = vcombine.high %v18324_v50, %v18324_v50  ;;  %v6623_v47 = vcombine.high %v18325_v19, %v18325_v19  ;;  %v18327_v31 = vrot.slane %v18326_v2, %v17584_v5 }
 0x3c2   : > { %v6622_v54 = vrot.slane %v18323_v23, %v17584_v5  ;;  %v9170_v21 = vadd.f32 %v9169_v32, %v9168_v42  ;;  %v18329_v22 = vcombine.high %v18328_v3, %v18328_v3  ;;  %v8292_v59 = vcombine.low %v8284_v45, %v8291_v20 }
 0x3c3   : > { %v8328_v9 = vcombine.low %v18327_v31, %v18321_v6  ;;  %v18331_v0 = vrot.slane %v18330_v30, %v17584_v5  ;;  %v9171_v18 = vsel %vm4300_vm1, %v8258_v24, 0.0  ;;  %v9179_v34 = vsel %vm4300_vm1, %v8326_v7, 0.0  ;;  %v18340_v7 = vld [vmem:[#allocation18_spill] sm:$0xff]  ;;  %v18345_v31 = vld [vmem:[#allocation20_spill] sm:$0xff] }
 0x3c4   : > { %v6646_v29 = vrot.slane %v18329_v22, %v17584_v5  ;;  %v18333_v38 = vcombine.high %v18332_v43, %v18332_v43  ;;  %v8335_v10 = vrot.slane %v8327_v44, %v17584_v5  ;;  %v9172_v1 = vadd.f32 %v9171_v18, %v9170_v21  ;;  %v18342_v44 = vld [vmem:[#allocation42_spill] sm:$0xff]  ;;  %v18349_v43 = vld [vmem:[#allocation179_spill] sm:$0xff] }
 0x3c5   : > { %v8345_v57 = vcombine.low %v6576_v13, %v18331_v0  ;;  %v6647_v58 = vcombine.high %v18334_v61, %v18334_v61  ;;  %v6624_v17 = vcombine.high %v6622_v54, %v6622_v54  ;;  %v8344_v28 = vcombine.low %v6575_v40, %v6574_v35  ;;  %v18338_v35 = vld [vmem:[#allocation13_spill] sm:$0xff]  ;;  %v18347_v0 = vld [vmem:[#allocation23_spill] sm:$0xff] }
 0x3c6   : > { %v6670_v62 = vrot.slane %v18333_v38, %v17584_v5  ;;  %v8362_v8 = vcombine.low %v6598_v51, %v6600_v11  ;;  %v18336_v56 = vcombine.high %v18335_v15, %v18335_v15  ;;  %v8342_v27 = vrot.slane %v8328_v9, %v17584_v5 }
 0x3c7   : > { %v8379_v55 = vcombine.low %v6623_v47, %v6622_v54  ;;  %v9174_v48 = vadd.f32 %v18337_v36, %v9172_v1  ;;  %v6648_v37 = vcombine.high %v6646_v29, %v6646_v29  ;;  %v8359_v12 = vrot.slane %v8345_v57, %v17584_v5  ;;  %v18344_v47 = vld [vmem:[#allocation178_spill] sm:$0xff] }
 0x3c8   : > { %v6694_v4 = vrot.slane %v18336_v56, %v17584_v5  ;;  %v8361_v46 = vcombine.low %v18324_v50, %v6599_v41  ;;  %v9175_v14 = vsel %vm4300_vm1, %v8292_v59, 0.0  ;;  %v18339_v51 = vrot.slane %v18338_v35, %v17584_v5  ;;  %v18355_v35 = vld [vmem:[#allocation180_spill] sm:$0xff] }
 0x3c9   : > { %v6672_v63 = vcombine.high %v6670_v62, %v6670_v62  ;;  %v8343_v13 = vcombine.low %v8335_v10, %v8342_v27  ;;  %v9176_v24 = vadd.f32 %v9175_v14, %v9174_v48  ;;  %v8352_v20 = vrot.slane %v8344_v28, %v17584_v5  ;;  %v18352_v27 = vld [vmem:[#allocation82_spill] sm:$0xff] }
 0x3ca   : > { %v8378_v33 = vcombine.low %v18339_v51, %v18325_v19  ;;  %v8376_v25 = vrot.slane %v8362_v8, %v17584_v5  ;;  %v18341_v6 = vrot.slane %v18340_v7, %v17584_v5  ;;  %v9177_v42 = vsel %vm4300_vm1, %v18342_v44, 0.0  ;;  %v18350_v8 = vld [vmem:[#allocation25_spill] sm:$0xff] }
 0x3cb   : > { %v6671_v23 = vcombine.high %v18343_v60, %v18343_v60  ;;  %v6696_v54 = vcombine.high %v6694_v4, %v6694_v4  ;;  %v8393_v11 = vrot.slane %v8379_v55, %v17584_v5  ;;  %v9178_v45 = vadd.f32 %v9177_v42, %v9176_v24  ;;  %v18353_v55 = vld [vmem:[#allocation66_spill] sm:$0xff]  ;;  %v18358_v24 = vld [vmem:[#allocation24_spill] sm:$0xff] }
 0x3cc   : > { %v8395_v40 = vcombine.low %v6624_v17, %v18341_v6  ;;  %v8360_v32 = vcombine.low %v8352_v20, %v8359_v12  ;;  %v8369_v50 = vrot.slane %v8361_v46, %v17584_v5  ;;  %v8396_v41 = vcombine.low %v18334_v61, %v6647_v58 }
 0x3cd   : > { %v8412_v19 = vcombine.low %v6646_v29, %v6648_v37  ;;  %v6695_v2 = vcombine.high %v18344_v47, %v18344_v47  ;;  %v18346_v9 = vrot.slane %v18345_v31, %v17584_v5  ;;  %v8386_v3 = vrot.slane %v8378_v33, %v17584_v5  ;;  %v18356_v33 = vld [vmem:[#allocation29_spill] sm:$0xff] }
 0x3ce   : > { %v9180_v22 = vadd.f32 %v9179_v34, %v9178_v45  ;;  %v8377_v59 = vcombine.low %v8369_v50, %v8376_v25  ;;  %v8403_v30 = vrot.slane %v8395_v40, %v17584_v5  ;;  %v18348_v57 = vrot.slane %v18347_v0, %v17584_v5  ;;  %v18366_v0 = vld [vmem:[#allocation162_spill] sm:$0xff] }
 0x3cf   : > { %v8413_v21 = vcombine.low %v18346_v9, %v18343_v60  ;;  %v9181_v29 = vsel %vm4300_vm1, %v8343_v13, 0.0  ;;  %v6744_v38 = vcombine.high %v18349_v43, %v18349_v43  ;;  %v8394_v10 = vcombine.low %v8386_v3, %v8393_v11  ;;  %v18360_v60 = vld [vmem:[#allocation114_spill] sm:$0xff]  ;;  %v18363_v9 = vld [vmem:[#allocation181_spill] sm:$0xff]  ;;  %v18364_v3 = vld [vmem:[#allocation32_spill] sm:$0xff] }
 0x3d0   : > { %v8430_v18 = vcombine.low %v6672_v63, %v18348_v57  ;;  %v8429_v1 = vcombine.low %v6671_v23, %v6670_v62  ;;  %v9182_v61 = vadd.f32 %v9181_v29, %v9180_v22  ;;  %v8410_v58 = vrot.slane %v8396_v41, %v17584_v5 }
 0x3d1   : > { %v8420_v17 = vrot.slane %v8412_v19, %v17584_v5  ;;  %v8447_v34 = vcombine.low %v6694_v4, %v6696_v54  ;;  %v9183_v28 = vsel %vm4300_vm1, %v8360_v32, 0.0  ;;  %v18351_v15 = vcombine.high %v18350_v8, %v18350_v8 }
 0x3d2   : > { %v18354_v36 = vcombine.high %v18353_v55, %v18353_v55  ;;  %v8427_v62 = vrot.slane %v8413_v21, %v17584_v5  ;;  %v9184_v37 = vadd.f32 %v9183_v28, %v9182_v61  ;;  %v8411_v12 = vcombine.low %v8403_v30, %v8410_v58  ;;  %v18369_v61 = vld [vmem:[#allocation182_spill] sm:$0xff] }
 0x3d3   : > { %v6790_v56 = vrot.slane %v18351_v15, %v17584_v5  ;;  %v8444_v46 = vrot.slane %v8430_v18, %v17584_v5  ;;  %v8446_v4 = vcombine.low %v18344_v47, %v6695_v2  ;;  %v9185_v14 = vsel %vm4300_vm1, %v8377_v59, 0.0  ;;  %v18361_v47 = vld [vmem:[#allocation33_spill] sm:$0xff] }
 0x3d4   : > { %v8464_v48 = vcombine.low %v18354_v36, %v18352_v27  ;;  %v6791_v51 = vcombine.high %v18355_v35, %v18355_v35  ;;  %v18357_v63 = vcombine.high %v18356_v33, %v18356_v33  ;;  %v18359_v20 = vrot.slane %v18358_v24, %v17584_v5  ;;  %v18374_v24 = vld [vmem:[#allocation45_spill] sm:$0xff] }
 0x3d5   : > { %v9186_v7 = vadd.f32 %v9185_v14, %v9184_v37  ;;  %v8428_v6 = vcombine.low %v8420_v17, %v8427_v62  ;;  %v8437_v40 = vrot.slane %v8429_v1, %v17584_v5  ;;  %v8461_v44 = vrot.slane %v8447_v34, %v17584_v5  ;;  %v18372_v62 = vld [vmem:[#allocation183_spill] sm:$0xff] }
 0x3d6   : > { %v6814_v13 = vrot.slane %v18357_v63, %v17584_v5  ;;  %v8463_v25 = vcombine.low %v18359_v20, %v18353_v55  ;;  %v9187_v42 = vsel %vm4300_vm1, %v8394_v10, 0.0  ;;  %v6815_v23 = vcombine.high %v18360_v60, %v18360_v60  ;;  %v18370_v55 = vld [vmem:[#allocation44_spill] sm:$0xff] }
 0x3d7   : > { %v6792_v54 = vcombine.high %v6790_v56, %v6790_v56  ;;  %v8478_v11 = vrot.slane %v8464_v48, %v17584_v5  ;;  %v9188_v45 = vadd.f32 %v9187_v42, %v9186_v7  ;;  %v8445_v32 = vcombine.low %v8437_v40, %v8444_v46  ;;  %v18376_v7 = vld [vmem:[#allocation26_spill] sm:$0xff] }
 0x3d8   : > { %v8454_v50 = vrot.slane %v8446_v4, %v17584_v5  ;;  %v8497_v41 = vcombine.low %v18349_v43, %v6744_v38  ;;  %v9189_v19 = vsel %vm4300_vm1, %v8411_v12, 0.0  ;;  %v18362_v2 = vcombine.high %v18361_v47, %v18361_v47  ;;  %v18367_v38 = vld [vmem:[#allocation38_spill] sm:$0xff]  ;;  %v18373_v4 = vld [vmem:[#allocation116_spill] sm:$0xff] }
 0x3d9   : > { %v6839_v21 = vcombine.high %v18363_v9, %v18363_v9  ;;  %v18365_v22 = vcombine.high %v18364_v3, %v18364_v3  ;;  %v9190_v30 = vadd.f32 %v9189_v19, %v9188_v45  ;;  %v6863_v57 = vcombine.high %v18366_v0, %v18366_v0  ;;  %v18378_v45 = vld [vmem:[#allocation27_spill] sm:$0xff] }
 0x3da   : > { %v6838_v31 = vrot.slane %v18362_v2, %v17584_v5  ;;  %v8462_v18 = vcombine.low %v8454_v50, %v8461_v44  ;;  %v8471_v29 = vrot.slane %v8463_v25, %v17584_v5  ;;  %v9191_v43 = vsel %vm4300_vm1, %v8428_v6, 0.0  ;;  %v18381_v3 = vld [vmem:[#allocation95_spill] sm:$0xff] }
 0x3db   : > { %v6862_v59 = vrot.slane %v18365_v22, %v17584_v5  ;;  %v18368_v10 = vcombine.high %v18367_v38, %v18367_v38  ;;  %v6887_v58 = vcombine.high %v18369_v61, %v18369_v61  ;;  %v6816_v17 = vcombine.high %v6814_v13, %v6814_v13 }
 0x3dc   : > { %v9192_v34 = vadd.f32 %v9191_v43, %v9190_v30  ;;  %v8479_v28 = vcombine.low %v8471_v29, %v8478_v11  ;;  %v8505_v8 = vrot.slane %v8497_v41, %v17584_v5  ;;  %v8532_v15 = vcombine.low %v6790_v56, %v6792_v54  ;;  %v18382_v30 = vld [vmem:[#allocation49_spill] sm:$0xff]  ;;  %v18384_v43 = vld [vmem:[#allocation31_spill] sm:$0xff] }
 0x3dd   : > { %v6886_v1 = vrot.slane %v18368_v10, %v17584_v5  ;;  %v9193_v27 = vsel %vm4300_vm1, %v8445_v32, 0.0  ;;  %v18371_v36 = vcombine.high %v18370_v55, %v18370_v55  ;;  %v6911_v37 = vcombine.high %v18372_v62, %v18372_v62 }
 0x3de   : > { %v6840_v12 = vcombine.high %v6838_v31, %v6838_v31  ;;  %v9194_v46 = vadd.f32 %v9193_v27, %v9192_v34  ;;  %v8512_v14 = vrot.slane %v18373_v4, %v17584_v5  ;;  %v8531_v33 = vcombine.low %v18355_v35, %v6791_v51 }
 0x3df   : > { %v6910_v48 = vrot.slane %v18371_v36, %v17584_v5  ;;  %v8549_v63 = vcombine.low %v6815_v23, %v6814_v13  ;;  %v9195_v56 = vsel %vm4300_vm1, %v8462_v18, 0.0  ;;  %v18375_v20 = vcombine.high %v18374_v24, %v18374_v24  ;;  %v18380_v23 = vld [vmem:[#allocation22_spill] sm:$0xff] }
 0x3e0   : > { %v18377_v6 = vrot.slane %v18376_v7, %v17584_v5  ;;  %v6864_v44 = vcombine.high %v6862_v59, %v6862_v59  ;;  %v9196_v42 = vadd.f32 %v9195_v56, %v9194_v46  ;;  %v8513_v54 = vcombine.low %v8505_v8, %v8512_v14  ;;  %v18388_v14 = vld [vmem:[#allocation67_spill] sm:$0xff] }
 0x3e1   : > { %v6934_v25 = vrot.slane %v18375_v20, %v17584_v5  ;;  %v8546_v11 = vrot.slane %v8532_v15, %v17584_v5  ;;  %v18379_v35 = vrot.slane %v18378_v45, %v17584_v5  ;;  %v9197_v13 = vsel %vm4300_vm1, %v8479_v28, 0.0 }
 0x3e2   : > { %v8548_v40 = vcombine.low %v18377_v6, %v18360_v60  ;;  %v6935_v32 = vcombine.high %v18380_v23, %v18380_v23  ;;  %v6888_v50 = vcombine.high %v6886_v1, %v6886_v1  ;;  %v8566_v41 = vcombine.low %v18363_v9, %v6839_v21 }
 0x3e3   : > { %v8565_v51 = vcombine.low %v6816_v17, %v18379_v35  ;;  %v9198_v19 = vadd.f32 %v9197_v13, %v9196_v42  ;;  %v8539_v60 = vrot.slane %v8531_v33, %v17584_v5  ;;  %v8563_v47 = vrot.slane %v8549_v63, %v17584_v5 }
 0x3e4   : > { %v8582_v2 = vcombine.low %v6838_v31, %v6840_v12  ;;  %v9199_v22 = vsel %vm4300_vm1, %v18381_v3, 0.0  ;;  %v18383_v18 = vcombine.high %v18382_v30, %v18382_v30  ;;  %v18385_v38 = vrot.slane %v18384_v43, %v17584_v5  ;;  %v18386_v31 = vld [vmem:[#allocation37_spill] sm:$0xff]  ;;  %v18395_v30 = vld [vmem:[#allocation50_spill] sm:$0xff] }
 0x3e5   : > { %v8556_v9 = vrot.slane %v8548_v40, %v17584_v5  ;;  %v9200_v21 = vadd.f32 %v9199_v22, %v9198_v19  ;;  %v8547_v17 = vcombine.low %v8539_v60, %v8546_v11  ;;  %v8573_v34 = vrot.slane %v8565_v51, %v17584_v5  ;;  %v18394_v3 = vld [vmem:[#allocation185_spill] sm:$0xff] }
 0x3e6   : > { %v6982_v29 = vrot.slane %v18383_v18, %v17584_v5  ;;  %v8583_v10 = vcombine.low %v18385_v38, %v18366_v0  ;;  %v18387_v28 = vrot.slane %v18386_v31, %v17584_v5  ;;  %v9201_v15 = vsel %vm4300_vm1, %v8513_v54, 0.0 }
 0x3e7   : > { %v6912_v27 = vcombine.high %v6910_v48, %v6910_v48  ;;  %v8580_v55 = vrot.slane %v8566_v41, %v17584_v5  ;;  %v8599_v36 = vcombine.low %v6863_v57, %v6862_v59  ;;  %v9202_v12 = vadd.f32 %v9201_v15, %v9200_v21  ;;  %v18389_v57 = vld [vmem:[#allocation43_spill] sm:$0xff]  ;;  %v18398_v21 = vld [vmem:[#allocation48_spill] sm:$0xff] }
 0x3e8   : > { %v8600_v8 = vcombine.low %v6864_v44, %v18387_v28  ;;  %v8564_v46 = vcombine.low %v8556_v9, %v8563_v47  ;;  %v8590_v0 = vrot.slane %v8582_v2, %v17584_v5  ;;  %v8617_v4 = vcombine.low %v6886_v1, %v6888_v50  ;;  %v18390_v1 = vld [vmem:[#allocation39_spill] sm:$0xff]  ;;  %v18397_v9 = vld [vmem:[#allocation88_spill] sm:$0xff]  ;;  %v18400_v28 = vld [vmem:[#allocation53_spill] sm:$0xff] }
 0x3e9   : > { %v9203_v33 = vsel %vm4300_vm1, %v18388_v14, 0.0  ;;  %v6936_v63 = vcombine.high %v6934_v25, %v6934_v25  ;;  %v8616_v56 = vcombine.low %v18369_v61, %v6887_v58  ;;  %v8634_v24 = vcombine.low %v6911_v37, %v6910_v48  ;;  %v18392_v37 = vld [vmem:[#allocation41_spill] sm:$0xff]  ;;  %v18402_v14 = vld [vmem:[#allocation54_spill] sm:$0xff] }
 0x3ea   : > { %v9204_v20 = vadd.f32 %v9203_v33, %v9202_v12  ;;  %v8581_v7 = vcombine.low %v8573_v34, %v8580_v55  ;;  %v8597_v6 = vrot.slane %v8583_v10, %v17584_v5  ;;  %v8614_v40 = vrot.slane %v8600_v8, %v17584_v5 }
 0x3eb   : > { %v9205_v59 = vsel %vm4300_vm1, %v8547_v17, 0.0  ;;  %v8743_v44 = vrot.slane %v18389_v57, %v17584_v5  ;;  %v18391_v42 = vrot.slane %v18390_v1, %v17584_v5  ;;  %v8607_v11 = vrot.slane %v8599_v36, %v17584_v5 }
 0x3ec   : > { %v9206_v61 = vadd.f32 %v9205_v59, %v9204_v20  ;;  %v8598_v58 = vcombine.low %v8590_v0, %v8597_v6  ;;  %v8631_v48 = vrot.slane %v8617_v4, %v17584_v5  ;;  %v18393_v45 = vrot.slane %v18392_v37, %v17584_v5  ;;  %v18405_v59 = vld [vmem:[#allocation58_spill] sm:$0xff] }
 0x3ed   : > { %v8633_v54 = vcombine.low %v18391_v42, %v18372_v62  ;;  %v9207_v51 = vsel %vm4300_vm1, %v8564_v46, 0.0  ;;  %v6984_v13 = vcombine.high %v6982_v29, %v6982_v29  ;;  %v8624_v50 = vrot.slane %v8616_v56, %v17584_v5 }
 0x3ee   : > { %v8650_v35 = vcombine.low %v6912_v27, %v18393_v45  ;;  %v8648_v41 = vrot.slane %v8634_v24, %v17584_v5  ;;  %v9208_v19 = vadd.f32 %v9207_v51, %v9206_v61  ;;  %v8615_v60 = vcombine.low %v8607_v11, %v8614_v40  ;;  %v18404_v40 = vld [vmem:[#allocation9_spill] sm:$0xff]  ;;  %v18407_v51 = vld [vmem:[#allocation55_spill] sm:$0xff] }
 0x3ef   : > { %v8651_v62 = vcombine.low %v18380_v23, %v6935_v32  ;;  %v8667_v47 = vcombine.low %v6934_v25, %v6936_v63  ;;  %v9209_v2 = vsel %vm4300_vm1, %v8581_v7, 0.0  ;;  %v6983_v22 = vcombine.high %v18394_v3, %v18394_v3 }
 0x3f0   : > { %v18396_v18 = vcombine.high %v18395_v30, %v18395_v30  ;;  %v8641_v38 = vrot.slane %v8633_v54, %v17584_v5  ;;  %v9210_v10 = vadd.f32 %v9209_v2, %v9208_v19  ;;  %v18399_v17 = vrot.slane %v18398_v21, %v17584_v5  ;;  %v18410_v2 = vld [vmem:[#allocation46_spill] sm:$0xff]  ;;  %v18412_v30 = vld [vmem:[#allocation51_spill] sm:$0xff]  ;;  %v18415_v21 = vld [vmem:[#allocation52_spill] sm:$0xff] }
 0x3f1   : > { %v8632_v23 = vcombine.low %v8624_v50, %v8631_v48  ;;  %v8658_v25 = vrot.slane %v8650_v35, %v17584_v5  ;;  %v9211_v32 = vsel %vm4300_vm1, %v8598_v58, 0.0  ;;  %v8750_v31 = vrot.slane %v15826_v16, %v17584_v5  ;;  %v18406_v48 = vld [vmem:[#allocation115_spill] sm:$0xff] }
 0x3f2   : > { %v7030_v43 = vrot.slane %v18396_v18, %v17584_v5  ;;  %v8668_v34 = vcombine.low %v18399_v17, %v18397_v9  ;;  %v18401_v8 = vcombine.high %v18400_v28, %v18400_v28  ;;  %v8649_v27 = vcombine.low %v8641_v38, %v8648_v41 }
 0x3f3   : > { %v9212_v55 = vadd.f32 %v9211_v32, %v9210_v10  ;;  %v8665_v36 = vrot.slane %v8651_v62, %v17584_v5  ;;  %v8675_v12 = vrot.slane %v8667_v47, %v17584_v5  ;;  %v8702_v46 = vcombine.low %v6982_v29, %v6984_v13  ;;  %v18409_v62 = vld [vmem:[#allocation188_spill] sm:$0xff]  ;;  %v18414_v10 = vld [vmem:[#allocation189_spill] sm:$0xff]  ;;  %v18417_v32 = vld [vmem:[#allocation191_spill] sm:$0xff] }
 0x3f4   : > { %v7054_v15 = vrot.slane %v18401_v8, %v17584_v5  ;;  %v9213_v0 = vsel %vm4300_vm1, %v8615_v60, 0.0  ;;  %v8751_v4 = vcombine.low %v8743_v44, %v8750_v31  ;;  %v18403_v33 = vcombine.high %v18402_v14, %v18402_v14 }
 0x3f5   : > { %v7032_v63 = vcombine.high %v7030_v43, %v7030_v43  ;;  %v9214_v56 = vadd.f32 %v9213_v0, %v9212_v55  ;;  %v8666_v24 = vcombine.low %v8658_v25, %v8665_v36  ;;  %v8682_v20 = vrot.slane %v8668_v34, %v17584_v5  ;;  %v18418_v55 = vld [vmem:[#allocation56_spill] sm:$0xff] }
 0x3f6   : > { %v7078_v16 = vrot.slane %v18403_v33, %v17584_v5  ;;  %v8701_v7 = vcombine.low %v18394_v3, %v6983_v22  ;;  %v9215_v6 = vsel %vm4300_vm1, %v8632_v23, 0.0  ;;  %v7199_v29 = vcombine.high %v18404_v40, %v18404_v40  ;;  %v18421_v33 = vld [vmem:[#allocation61_spill] sm:$0xff] }
 0x3f7   : > { %v7208_v57 = vcombine.high %v18405_v59, %v18405_v59  ;;  %v7056_v44 = vcombine.high %v7054_v15, %v7054_v15  ;;  %v9216_v1 = vadd.f32 %v9215_v6, %v9214_v56  ;;  %v16060_v42 = vrot.slane %v18405_v59, %v17584_v5 }
 0x3f8   : > { %v8683_v54 = vcombine.low %v8675_v12, %v8682_v20  ;;  %v8716_v11 = vrot.slane %v8702_v46, %v17584_v5  ;;  %v9217_v61 = vsel %vm4300_vm1, %v8649_v27, 0.0  ;;  %v9229_v58 = vsel %vm4300_vm1, %v8751_v4, 0.0  ;;  %v18420_v46 = vld [vmem:[#allocation192_spill] sm:$0xff]  ;;  %v18423_v20 = vld [vmem:[#allocation94_spill] sm:$0xff] }
 0x3f9   : > { %v7055_v37 = vcombine.high %v18406_v48, %v18406_v48  ;;  %v8752_v45 = vcombine.low %v7030_v43, %v7032_v63  ;;  %v9218_v35 = vadd.f32 %v9217_v61, %v9216_v1  ;;  %v18408_v13 = vcombine.high %v18407_v51, %v18407_v51 }
 0x3fa   : > { %v8709_v41 = vrot.slane %v8701_v7, %v17584_v5  ;;  %v9219_v19 = vsel %vm4300_vm1, %v8666_v24, 0.0  ;;  %v7080_v60 = vcombine.high %v7078_v16, %v7078_v16  ;;  %v7079_v47 = vcombine.high %v18409_v62, %v18409_v62 }
 0x3fb   : > { %v7102_v50 = vrot.slane %v18408_v13, %v17584_v5  ;;  %v18411_v3 = vrot.slane %v18410_v2, %v17584_v5  ;;  %v18413_v18 = vrot.slane %v18412_v30, %v17584_v5  ;;  %v9220_v38 = vadd.f32 %v9219_v19, %v9218_v35  ;;  %v18426_v13 = vld [vmem:[#allocation11_spill] sm:$0xff] }
 0x3fc   : > { %v7103_v9 = vcombine.high %v18414_v10, %v18414_v10  ;;  %v18416_v17 = vcombine.high %v18415_v21, %v18415_v21  ;;  %v8717_v23 = vcombine.low %v8709_v41, %v8716_v11  ;;  %v9221_v25 = vsel %vm4300_vm1, %v8683_v54, 0.0  ;;  %v18424_v54 = vld [vmem:[#allocation57_spill] sm:$0xff] }
 0x3fd   : > { %v8753_v22 = vcombine.low %v18411_v3, %v18406_v48  ;;  %v8770_v43 = vcombine.low %v7056_v44, %v18413_v18  ;;  %v7127_v31 = vcombine.high %v18417_v32, %v18417_v32  ;;  %v8760_v28 = vrot.slane %v8752_v45, %v17584_v5 }
 0x3fe   : > { %v7126_v34 = vrot.slane %v18416_v17, %v17584_v5  ;;  %v8769_v8 = vcombine.low %v7055_v37, %v7054_v15  ;;  %v9222_v27 = vadd.f32 %v9221_v25, %v9220_v38  ;;  %v18419_v36 = vcombine.high %v18418_v55, %v18418_v55 }
 0x3ff   : > { %v7151_v0 = vcombine.high %v18420_v46, %v18420_v46  ;;  %v7104_v4 = vcombine.high %v7102_v50, %v7102_v50  ;;  %v8787_v14 = vcombine.low %v7078_v16, %v7080_v60  ;;  %v18422_v63 = vcombine.high %v18421_v33, %v18421_v33 }
 0x400   : > { %v7150_v12 = vrot.slane %v18419_v36, %v17584_v5  ;;  %v8767_v24 = vrot.slane %v8753_v22, %v17584_v5  ;;  %v8784_v15 = vrot.slane %v8770_v43, %v17584_v5  ;;  %v9224_v7 = vadd.f32 %v18423_v20, %v9222_v27  ;;  %v18429_v43 = vld [vmem:[#allocation59_spill] sm:$0xff] }
 0x401   : > { %v7174_v56 = vrot.slane %v18422_v63, %v17584_v5  ;;  %v9225_v6 = vsel %vm4300_vm1, %v8717_v23, 0.0  ;;  %v7128_v59 = vcombine.high %v7126_v34, %v7126_v34  ;;  %v8786_v44 = vcombine.low %v18409_v62, %v7079_v47 }
 0x402   : > { %v8804_v1 = vcombine.low %v7103_v9, %v7102_v50  ;;  %v18425_v16 = vrot.slane %v18424_v54, %v17584_v5  ;;  %v8768_v61 = vcombine.low %v8760_v28, %v8767_v24  ;;  %v8777_v48 = vrot.slane %v8769_v8, %v17584_v5  ;;  %v18428_v50 = vld [vmem:[#allocation30_spill] sm:$0xff] }
 0x403   : > { %v9226_v37 = vadd.f32 %v9225_v6, %v9224_v7  ;;  %v9227_v45 = vsel %vm4300_vm1, %v15251_v52, 0.0  ;;  %v7152_v35 = vcombine.high %v7150_v12, %v7150_v12  ;;  %v8801_v51 = vrot.slane %v8787_v14, %v17584_v5  ;;  %v18434_v7 = vld [vmem:[#allocation87_spill] sm:$0xff] }
 0x404   : > { %v8803_v11 = vcombine.low %v18425_v16, %v18414_v10  ;;  %v18427_v41 = vrot.slane %v18426_v13, %v17584_v5  ;;  %v7175_v60 = vcombine.high %v18428_v50, %v18428_v50  ;;  %v8785_v62 = vcombine.low %v8777_v48, %v8784_v15 }
 0x405   : > { %v9228_v47 = vadd.f32 %v9227_v45, %v9226_v37  ;;  %v7176_v2 = vcombine.high %v7174_v56, %v7174_v56  ;;  %v8821_v3 = vcombine.low %v18417_v32, %v7127_v31  ;;  %v8794_v22 = vrot.slane %v8786_v44, %v17584_v5  ;;  %v18431_v32 = vld [vmem:[#allocation60_spill] sm:$0xff] }
 0x406   : > { %v8820_v19 = vcombine.low %v7104_v4, %v18427_v41  ;;  %v8818_v30 = vrot.slane %v8804_v1, %v17584_v5  ;;  %v8837_v52 = vcombine.low %v7126_v34, %v7128_v59  ;;  %v7222_v18 = vrot.slane %v7208_v57, %v17584_v5  ;;  %v18433_v4 = vld [vmem:[#allocation90_spill] sm:$0xff] }
 0x407   : > { %v18430_v38 = vrot.slane %v18429_v43, %v17584_v5  ;;  %v9230_v9 = vadd.f32 %v9229_v58, %v9228_v47  ;;  %v9231_v21 = vsel %vm4300_vm1, %v8768_v61, 0.0  ;;  %v8811_v17 = vrot.slane %v8803_v11, %v17584_v5 }
 0x408   : > { %v8802_v23 = vcombine.low %v8794_v22, %v8801_v51  ;;  %v8828_v25 = vrot.slane %v8820_v19, %v17584_v5  ;;  %v18432_v31 = vrot.slane %v18431_v32, %v17584_v5  ;;  %v7223_v57 = vcombine.high %v16060_v42, %v16060_v42 }
 0x409   : > { %v8838_v10 = vcombine.low %v18430_v38, %v18420_v46  ;;  %v9232_v34 = vadd.f32 %v9231_v21, %v9230_v9  ;;  %v9233_v8 = vsel %vm4300_vm1, %v8785_v62, 0.0  ;;  %v8854_v27 = vcombine.low %v7151_v0, %v7150_v12 }
 0x40a   : > { %v8855_v28 = vcombine.low %v7152_v35, %v18432_v31  ;;  %v8819_v55 = vcombine.low %v8811_v17, %v8818_v30  ;;  %v8835_v58 = vrot.slane %v8821_v3, %v17584_v5  ;;  %v8845_v36 = vrot.slane %v8837_v52, %v17584_v5 }
 0x40b   : > { %v8872_v46 = vcombine.low %v7174_v56, %v7176_v2  ;;  %v8889_v14 = vcombine.low %v7199_v29, %v18433_v4  ;;  %v9234_v33 = vadd.f32 %v9233_v8, %v9232_v34  ;;  %v8852_v63 = vrot.slane %v8838_v10, %v17584_v5 }
 0x40c   : > { %v8871_v24 = vcombine.low %v18428_v50, %v7175_v60  ;;  %v8836_v15 = vcombine.low %v8828_v25, %v8835_v58  ;;  %v8869_v20 = vrot.slane %v8855_v28, %v17584_v5  ;;  %v9235_v12 = vsel %vm4300_vm1, %v8802_v23, 0.0 }
 0x40d   : > { %v7224_v0 = vcombine.high %v7222_v18, %v7222_v18  ;;  %v18435_v6 = vrot.slane %v18434_v7, %v17584_v5  ;;  %v18436_v56 = vcombine.high %v18433_v4, %v18433_v4  ;;  %v8888_v29 = vcombine.low %v7183_v53, %v18404_v40  ;;  %v18437_v4 = vld [vmem:[#allocation16_spill] sm:$0xff] }
 0x40e   : > { %v9236_v44 = vadd.f32 %v9235_v12, %v9234_v33  ;;  %v8853_v1 = vcombine.low %v8845_v36, %v8852_v63  ;;  %v8862_v54 = vrot.slane %v8854_v27, %v17584_v5  ;;  %v9237_v16 = vsel %vm4300_vm1, %v8819_v55, 0.0 }
 0x40f   : > { %v8905_v59 = vcombine.low %v18436_v56, %v18435_v6  ;;  %v8886_v11 = vrot.slane %v8872_v46, %v17584_v5  ;;  %v8906_v61 = vcombine.low %v16060_v42, %v7223_v57  ;;  %v8879_v48 = vrot.slane %v8871_v24, %v17584_v5  ;;  %v9341_v46 = vld [vmem:[%s16269_s3] sm:$0x1] }
 0x410   : > { %v9238_v37 = vadd.f32 %v9237_v16, %v9236_v44  ;;  %v8870_v45 = vcombine.low %v8862_v54, %v8869_v20  ;;  %v8903_v35 = vrot.slane %v8889_v14, %v17584_v5  ;;  %v8922_v51 = vcombine.low %v7222_v18, %v7224_v0 }
 0x411   : > { %v9239_v39 = vsel %vm4300_vm1, %v8836_v15, 0.0  ;;  %v8887_v40 = vcombine.low %v8879_v48, %v8886_v11  ;;  %v8896_v13 = vrot.slane %v8888_v29, %v17584_v5  ;;  %v8913_v41 = vrot.slane %v8905_v59, %v17584_v5 }
 0x412   : > { %v9240_v53 = vadd.f32 %v9239_v39, %v9238_v37  ;;  %v9241_v19 = vsel %vm4300_vm1, %v8853_v1, 0.0  ;;  %v8920_v42 = vrot.slane %v8906_v61, %v17584_v5  ;;  %v8930_v62 = vrot.slane %v8922_v51, %v17584_v5 }
 0x413   : > { %v8904_v60 = vcombine.low %v8896_v13, %v8903_v35  ;;  %v9243_v47 = vsel %vm4300_vm1, %v8870_v45, 0.0  ;;  %v8937_v22 = vrot.slane %v15238_v49, %v17584_v5  ;;  %v9245_v30 = vsel %vm4300_vm1, %v8887_v40, 0.0 }
 0x414   : > { %v9242_v50 = vadd.f32 %v9241_v19, %v9240_v53  ;;  %v8921_v3 = vcombine.low %v8913_v41, %v8920_v42  ;;  %v9253_v23 = vsel %vm4300_vm1, %v15493_v26, 0.0  ;;  %v9337_v26 = vld [vmem:[%s16268_s2] sm:$0x1] }
 0x415   : > { %v8938_v18 = vcombine.low %v8930_v62, %v8937_v22  ;;  %v9247_v43 = vsel %vm4300_vm1, %v8904_v60, 0.0 }
 0x416   : > { %v9244_v2 = vadd.f32 %v9243_v47, %v9242_v50  ;;  %v9249_v10 = vsel %vm4300_vm1, %v8921_v3, 0.0 }
 0x417   : > { %v9251_v21 = vsel %vm4300_vm1, %v8938_v18, 0.0 }
 0x418   : > { %v9246_v52 = vadd.f32 %v9245_v30, %v9244_v2 }
 0x41a   : > { %v9248_v38 = vadd.f32 %v9247_v43, %v9246_v52 }
 0x41c   : > { %v9250_v9 = vadd.f32 %v9249_v10, %v9248_v38 }
 0x41e   : > { %v9252_v17 = vadd.f32 %v9251_v21, %v9250_v9 }
 0x420   : > { %v9254_v25 = vadd.f32 %v9253_v23, %v9252_v17 }
 0x422   : > { %v9255_v5 = vrot.slane %v9254_v25, 4 }
 0x424   : > { %v9256_v49 = vadd.f32 %v9255_v5, %v9254_v25 }
 0x426   : > { %v9257_v32 = vrot.slane %v9256_v49, 2 }
 0x428   : > { %v9258_v31 = vadd.f32 %v9257_v32, %v9256_v49 }
 0x42a   : > { %v9259_v28 = vrot.slane %v9258_v31, 1 }
 0x42c   : > { %v9260_v57 = vadd.f32 %v9259_v28, %v9258_v31 }
 0x42e   : > { %9481 = vmatmul.mubr.msk.f32.vlgmr.msra.gmra.mxu1 %vm4300_vm1, %v9260_v57 }
 0x4ee   : > { %v9330_v34 = vpop.f32.mrf.mxu1 }
 0x4ef   : > { %v9334_v8 = vmul.f32 0.001953125, %v9330_v34 }
 0x4f0   : > { %v9482_v27 = vpop.f32.mrf.mxu1 }
 0x4f1   : > { %v9335_v55 = vadd.f32 1e-05, %v9334_v8 }
 0x4f3   : > { %9611 = vrsqrt.f32 %v9335_v55 }
 0x500   : > { %v9612_v58 = vpop.eup %9611 }
 0x501   : > { %v9338_v36 = vmul.f32 %v9612_v58, %v9337_v26 }
 0x503   : > { %9340 = vst.msk [vmem:[%s247_s9] sm:$0x1] %vm9339_vm2, %v9338_v36  ;;  %v9342_v14 = vmul.f32 %v9338_v36, %v18437_v4 }
 0x504   : > { %9856 = shalt.err (!%p9853_p3)
}
 0x505   : > { %s9857_s9 = scalar_lea.hbm %s16192_s13, 16  ;;  %s9861_s15 = scalar_lea.hbm %s16271_s5, 32 }
 0x506   : > { %p9858_p4 = scmp.ne.s32.totalorder %s16192_s13, %s9857_s9  ;;  %p9862_p9 = scmp.lt.s32.totalorder %s16192_s13, %s16271_s5 }
 0x507   : > { %p9863_p10 = scmp.lt.s32.totalorder %s9861_s15, %s9857_s9 }
 0x508   : > { %p9859_p7 = pnand %p9858_p4, %p10013_p5 }
 0x509   : > { %p9864_p11 = por %p9863_p10, %p9862_p9 }
 0x50a   : > { %p9860_p8 = pneg %p9859_p7 }
 0x50c   : > { %p9865_p12 = pnand %p9864_p11, %p9860_p8 }
 0x50e   : > { %9868 = shalt.err (!%p9865_p12)
}
 0x50f   : > { %9484 = dma.vmem_to_hbm [thread:$0]  (%p10013_p5), %s16194_s10, 16, %s16192_s13, %s9346_s18   ;;  %v9343_v33 = vsub.f32 %v9341_v46, %v9342_v14 }
 0x510   : > { %s9373_s16 = scalar_lea.hbm %s16272_s6, %s9465_s29  ;;  %s18438_s11 = scalar_lea.vmem [#allocation4], %s16180_s20 }
 0x511   : > { %9344 = vst.msk [vmem:[%s18438_s11] sm:$0x1] %vm9339_vm2, %v9343_v33  ;;  %s9350_s9 = scalar_lea.sflag [#allocation5], %s16180_s20  ;;  %s9869_s12 = scalar_lea.vmem %s9376_s17, 16 }
 0x512   : > { %p9870_p13 = scmp.ne.s32.totalorder %s9376_s17, %s9869_s12  ;;  %s9939_s14 = smov [#allocation4]  }
 0x513   : > { %s9873_s15 = sshll.u32 %s9939_s14, 4  ;;  %s9874_s15 = int_to_ptr.vmem [resolvable:$false] %s9873_s15 }
 0x514   : > { %p9871_p0 = pnand %p9870_p13, %p10013_p5  ;;  %s9875_s10 = scalar_lea.vmem %s9874_s15, 32 }
 0x515   : > { %p9876_p2 = scmp.lt.s32.totalorder %s9376_s17, %s9874_s15  ;;  %p9877_p3 = scmp.lt.s32.totalorder %s9875_s10, %s9869_s12 }
 0x516   : > { %p9872_p1 = pneg %p9871_p0 }
 0x517   : > { %p9878_p4 = por %p9877_p3, %p9876_p2 }
 0x519   : > { %p9879_p7 = pnand %p9878_p4, %p9872_p1 }
 0x51b   : > { %9882 = shalt.err (!%p9879_p7)
}
 0x51c   : > { %s9883_s25 = scalar_lea.hbm %s9373_s16, 16  ;;  %s9887_s13 = scalar_lea.hbm %s16272_s6, 32 }
 0x51d   : > { %p9884_p8 = scmp.ne.s32.totalorder %s9373_s16, %s9883_s25  ;;  %p9888_p11 = scmp.lt.s32.totalorder %s9373_s16, %s16272_s6 }
 0x51e   : > { %p9889_p12 = scmp.lt.s32.totalorder %s9887_s13, %s9883_s25 }
 0x51f   : > { %p9885_p9 = pnand %p9884_p8, %p10013_p5 }
 0x520   : > { %p9890_p13 = por %p9889_p12, %p9888_p11 }
 0x521   : > { %p9886_p10 = pneg %p9885_p9 }
 0x523   : > { %p9891_p0 = pnand %p9890_p13, %p9886_p10 }
 0x525   : > { %9894 = shalt.err (!%p9891_p0)
}
 0x526   : > { %9485 = dma.vmem_to_hbm [thread:$0]  (%p10013_p5), %s9376_s17, 16, %s9373_s16, %s9350_s9  }
 0x527 PF: > { %p9495_p1 = scmp.ge.s32.totalorder %s9933_s24, 2  ;;  %s9387_s19 = sand.u32 1, %s9921_s21  }
 0x528   : > { %s9388_s28 = scalar_lea.sflag [#allocation3], %s9387_s19 }
 0x529   : > { %p9489_p2 = pnand %p9495_p1, %p10017_p6 }
 0x52b   : > { %p9490_p3 = pneg %p9489_p2 }
 0x52d   : > { %9912 = dma.done.wait (%p9490_p3), %s9388_s28, 16  }
 0x52e   : > { %9914 = vsyncadd (%p9490_p3), %s9388_s28, 4294967280  ;;  %s9396_s11 = scalar_lea.sflag [#allocation5], %s9387_s19 }
 0x52f   : > { %9916 = dma.done.wait (%p9490_p3), %s9396_s11, 16  }
 0x530   : > { %9918 = vsyncadd (%p9490_p3), %s9396_s11, 4294967280  ;;  %p20_p5 = scmp.ge.s32.totalorder %s10000_s27, 4   ;;  %s18439_s21 = smov %s9925_s22 }
 0x531   : > { %s18440_s22 = smov %s9929_s23  ;;  %s18441_s23 = smov %s10011_s30 }
 0x532   : > { %s18442_s24 = smov %s10000_s27  ;;  %22 = sbr.rel (!%p20_p5) target bundleno = 5 (0x5), region = 92 }
 0x537   :  { %9400 = vsyncpa [#allocation3], 1 }
 0x538   :  { %9402 = vsyncpa [#allocation3 + $0x1], 1 }
 0x539   :  { %9403 = vsyncpa [#allocation5], 1 }
 0x53a   :  { %9405 = vsyncpa [#allocation5 + $0x1], 1 }

</bundles_post_ra>
